<compile_context>
chip_gen: v7x
topology: tpu7x:2x2x1
jax: 0.10.0
libtpu: 0.0.40
codegen_flags: <defaults>
</compile_context>

<pallas_src>
import functools

import numpy as np
import jax
import jax.numpy as jnp
from jax import lax
from jax.experimental import pallas as pl
from jax.experimental.pallas import tpu as pltpu

EPS = 1e-5


def _resnet_block_kernel(xpad_ref, w1_ref, w2_ref, o_ref, acc_ref, h1p_ref,
                         *, H, W, C, compute_dtype):
    """Fused conv1 -> IN -> ReLU -> reflect-pad -> conv2 -> IN -> +skip.

    xpad_ref: (1, H+2, W+2, C) f32   reflection-padded input tile
    w1_ref/w2_ref: (9, C, C)         tap-major weights (compute_dtype)
    o_ref:   (1, H, W, C) f32        output tile
    acc_ref: (H*W, C) f32            conv accumulator (VMEM scratch)
    h1p_ref: (H+2, W+2, C) f32       padded intermediate (VMEM scratch)
    """
    HW = H * W
    taps = [(dh, dw) for dh in range(3) for dw in range(3)]

    def conv3x3(load_patch, w_ref):
        # 3x3 conv as 9 accumulating (HW, C) @ (C, C) MXU dots.
        acc_ref[...] = jnp.zeros_like(acc_ref)
        for t, (dh, dw) in enumerate(taps):
            patch = load_patch(dh, dw).reshape(HW, C).astype(compute_dtype)
            acc_ref[...] += jnp.dot(patch, w_ref[t],
                                    preferred_element_type=jnp.float32)
        return acc_ref[...]

    def instance_norm(y):
        # One-pass statistics over the spatial axis, f32 accumulators.
        m = jnp.mean(y, axis=0, keepdims=True)
        v = jnp.mean(y * y, axis=0, keepdims=True) - m * m
        return (y - m) * lax.rsqrt(v + EPS)

    # ---- stage 1: conv1 + InstanceNorm + ReLU (no bias: cancelled by IN) ---
    y1 = conv3x3(lambda dh, dw: xpad_ref[0, dh:dh + H, dw:dw + W, :], w1_ref)
    h1 = jnp.maximum(instance_norm(y1), 0.0)
    h1_img = h1.reshape(H, W, C)

    # ---- reflection-pad h1 (pad=1) into VMEM; h1 never leaves the chip -----
    h1p_ref[1:H + 1, 1:W + 1, :] = h1_img
    h1p_ref[0:1, 1:W + 1, :] = h1_img[1:2, :, :]            # top    <- row 1
    h1p_ref[H + 1:H + 2, 1:W + 1, :] = h1_img[H - 2:H - 1, :, :]  # bottom
    h1p_ref[:, 0:1, :] = h1p_ref[:, 2:3, :]                  # left   <- col 1
    h1p_ref[:, W + 1:W + 2, :] = h1p_ref[:, W - 1:W, :]      # right  <- col W-2

    # ---- stage 2: conv2 + InstanceNorm + skip ------------------------------
    y2 = conv3x3(lambda dh, dw: h1p_ref[dh:dh + H, dw:dw + W, :], w2_ref)
    h2 = instance_norm(y2).reshape(H, W, C)

    skip = xpad_ref[0, 1:H + 1, 1:W + 1, :]                  # interior = x
    o_ref[0] = (skip + h2).astype(o_ref.dtype)


def resnet_block_forward(x_nchw, w1_hwio, b1, w2_hwio, b2,
                         *, compute_dtype=jnp.float32):
    """Pallas ResnetBlock forward.  x_nchw: (N, C, H, W) float32.

    b1/b2 are accepted for parity with nn.Conv2d(bias=True) but are unused:
    InstanceNorm2d(affine=False) subtracts the per-channel spatial mean,
    which cancels a per-channel bias exactly.
    """
    del b1, b2
    N, C, H, W = x_nchw.shape
    HW = H * W
    compute_dtype = np.dtype(compute_dtype)
    csz = compute_dtype.itemsize

    x_nhwc = jnp.transpose(x_nchw, (0, 2, 3, 1))              # NCHW -> NHWC
    xpad = jnp.pad(x_nhwc, ((0, 0), (1, 1), (1, 1), (0, 0)), mode="reflect")
    xpad = xpad.astype(jnp.float32)

    # HWIO -> (tap, Cin, Cout); tap order (dh, dw) matches the in-kernel loop.
    w1_t = w1_hwio.astype(compute_dtype).reshape(9, C, C)
    w2_t = w2_hwio.astype(compute_dtype).reshape(9, C, C)

    # Explicit scoped-VMEM budget: double-buffered input/output blocks,
    # double-buffered weights, plus the two scratches.
    need = (2 * (H + 2) * (W + 2) * C * 4        # padded input block x2
            + 2 * H * W * C * 4                  # output block x2
            + 2 * 2 * 9 * C * C * csz            # both weights x2
            + HW * C * 4                         # f32 accumulator scratch
            + (H + 2) * (W + 2) * C * 4)         # padded-h1 scratch
    vmem_limit = int(min(max(2 * need, 32 * 2**20), 96 * 2**20))

    kernel = functools.partial(_resnet_block_kernel, H=H, W=W, C=C,
                               compute_dtype=compute_dtype)

    cost = pl.CostEstimate(
        flops=int(2 * 2 * N * HW * 9 * C * C),               # two conv stages
        transcendentals=int(2 * N * C),                      # rsqrt per (n, c)
        bytes_accessed=int(N * (H + 2) * (W + 2) * C * 4     # padded input
                           + 2 * 9 * C * C * csz             # weights
                           + N * HW * C * 4),                # output
    )

    out_nhwc = pl.pallas_call(
        kernel,
        out_shape=jax.ShapeDtypeStruct((N, H, W, C), jnp.float32),
        grid_spec=pltpu.PrefetchScalarGridSpec(
            num_scalar_prefetch=0,
            grid=(N,),
            in_specs=[
                pl.BlockSpec((1, H + 2, W + 2, C), lambda n: (n, 0, 0, 0)),
                pl.BlockSpec((9, C, C), lambda n: (0, 0, 0)),
                pl.BlockSpec((9, C, C), lambda n: (0, 0, 0)),
            ],
            out_specs=pl.BlockSpec((1, H, W, C), lambda n: (n, 0, 0, 0)),
            scratch_shapes=[
                pltpu.VMEM((HW, C), jnp.float32),             # conv accumulator
                pltpu.VMEM((H + 2, W + 2, C), jnp.float32),   # padded h1
            ],
        ),
        compiler_params=pltpu.CompilerParams(
            dimension_semantics=("parallel",),
            vmem_limit_bytes=vmem_limit,
        ),
        cost_estimate=cost,
    )(xpad, w1_t, w2_t)

    return jnp.transpose(out_nhwc, (0, 3, 1, 2))              # back to NCHW


# --- pure-JAX reference (for correctness check only) -------------------------
def _instance_norm_ref(y_nhwc):
    m = jnp.mean(y_nhwc, axis=(1, 2), keepdims=True)
    v = jnp.mean((y_nhwc - m) ** 2, axis=(1, 2), keepdims=True)
    return (y_nhwc - m) * lax.rsqrt(v + EPS)


def _conv3_reflect_ref(x_nhwc, w_hwio, b):
    xp = jnp.pad(x_nhwc, ((0, 0), (1, 1), (1, 1), (0, 0)), mode="reflect")
    y = lax.conv_general_dilated(
        xp, w_hwio, window_strides=(1, 1), padding="VALID",
        dimension_numbers=("NHWC", "HWIO", "NHWC"))
    return y + b


def resnet_block_ref(x_nchw, w1_hwio, b1, w2_hwio, b2):
    x = jnp.transpose(x_nchw, (0, 2, 3, 1))
    h = jnp.maximum(_instance_norm_ref(_conv3_reflect_ref(x, w1_hwio, b1)), 0.0)
    h = _instance_norm_ref(_conv3_reflect_ref(h, w2_hwio, b2))
    return jnp.transpose(x + h, (0, 3, 1, 2))


if __name__ == "__main__":
    N, C, H, W = 2, 4, 16, 16   # small shapes consistent with the module
    key = jax.random.PRNGKey(0)
    kx, kw1, kb1, kw2, kb2 = jax.random.split(key, 5)

    x = jax.random.normal(kx, (N, C, H, W), dtype=jnp.float32)

    # Deterministic synthetic init (PyTorch-like uniform fan-in scale), HWIO.
    fan_in = C * 3 * 3
    bound = 1.0 / (fan_in ** 0.5)
    w1 = jax.random.uniform(kw1, (3, 3, C, C), jnp.float32, -bound, bound)
    b1 = jax.random.uniform(kb1, (C,), jnp.float32, -bound, bound)
    w2 = jax.random.uniform(kw2, (3, 3, C, C), jnp.float32, -bound, bound)
    b2 = jax.random.uniform(kb2, (C,), jnp.float32, -bound, bound)

    ref = resnet_block_ref(x, w1, b1, w2, b2)

    # f32 matmul path: tight check against the reference.
    fwd_f32 = jax.jit(
        functools.partial(resnet_block_forward, compute_dtype=jnp.float32))
    out_f32 = jax.block_until_ready(fwd_f32(x, w1, b1, w2, b2))
    assert out_f32.shape == (N, C, H, W)
    assert jnp.allclose(out_f32, ref, atol=1e-4, rtol=1e-4), "f32 mismatch"

    # bf16 matmul-operand path (f32 accumulation): loose check.
    fwd_bf16 = jax.jit(
        functools.partial(resnet_block_forward, compute_dtype=jnp.bfloat16))
    out_bf16 = jax.block_until_ready(fwd_bf16(x, w1, b1, w2, b2))
    assert out_bf16.shape == (N, C, H, W)
    assert jnp.allclose(out_bf16, ref, atol=1e-1, rtol=1e-1), "bf16 mismatch"

    print("KERNEL_OK")
</pallas_src>

<mosaic_0001>
module attributes {stable_mosaic.version = 11 : i64} {
  func.func @_resnet_block_kernel(%arg0: i32, %arg1: memref<1x18x18x4xf32, #tpu.memory_space<vmem>>, %arg2: memref<9x4x4xf32, #tpu.memory_space<vmem>>, %arg3: memref<9x4x4xf32, #tpu.memory_space<vmem>>, %arg4: memref<1x16x16x4xf32, #tpu.memory_space<vmem>>, %arg5: memref<256x4xf32, #tpu.memory_space<vmem>>, %arg6: memref<18x18x4xf32, #tpu.memory_space<vmem>>) attributes {dimension_semantics = [#tpu.dimension_semantics<parallel>], iteration_bounds = array<i64: 2>, scalar_prefetch = 0 : i64, scratch_operands = 2 : i64, tpu.core_type = #tpu.core_type<tc>, window_params = [{transform_indices = @transform_0, window_bounds = array<i64: 1, 18, 18, 4>}, {pipeline_mode = #tpu.pipeline_mode<synchronous>, transform_indices = @transform_1, window_bounds = array<i64: 9, 4, 4>}, {pipeline_mode = #tpu.pipeline_mode<synchronous>, transform_indices = @transform_2, window_bounds = array<i64: 9, 4, 4>}, {transform_indices = @transform_3, window_bounds = array<i64: 1, 16, 16, 4>}]} {
    %cst = arith.constant 0.000000e+00 : f32
    %0 = vector.broadcast %cst : f32 to vector<256x4xf32>
    %c0 = arith.constant 0 : index
    %c0_0 = arith.constant 0 : index
    %1 = vector.load %arg5[%c0, %c0_0] : memref<256x4xf32, #tpu.memory_space<vmem>>, vector<256x4xf32>
    tpu.vector_store %arg5[%c0, %c0_0], %0 {strides = array<i32>} : memref<256x4xf32, #tpu.memory_space<vmem>>, vector<256x4xf32>,
    %c0_1 = arith.constant 0 : index
    %c0_2 = arith.constant 0 : index
    %c0_3 = arith.constant 0 : index
    %c0_4 = arith.constant 0 : index
    %2 = vector.load %arg1[%c0_1, %c0_2, %c0_3, %c0_4] : memref<1x18x18x4xf32, #tpu.memory_space<vmem>>, vector<1x16x16x4xf32>
    %3 = vector.shape_cast %2 : vector<1x16x16x4xf32> to vector<16x16x4xf32>
    %4 = vector.shape_cast %3 : vector<16x16x4xf32> to vector<256x4xf32>
    %c0_5 = arith.constant 0 : index
    %c0_6 = arith.constant 0 : index
    %5 = vector.load %arg5[%c0_5, %c0_6] : memref<256x4xf32, #tpu.memory_space<vmem>>, vector<256x4xf32>
    %c0_7 = arith.constant 0 : index
    %c0_8 = arith.constant 0 : index
    %c0_9 = arith.constant 0 : index
    %6 = vector.load %arg2[%c0_7, %c0_8, %c0_9] : memref<9x4x4xf32, #tpu.memory_space<vmem>>, vector<1x4x4xf32>
    %7 = vector.shape_cast %6 : vector<1x4x4xf32> to vector<4x4xf32>
    %cst_10 = arith.constant dense<0.000000e+00> : vector<256x4xf32>
    %8 = tpu.matmul %4, %7, %cst_10 {dimension_numbers = #tpu.dot_dimension_numbers<[1], [0], [0], [1], [0, 0, 1, 1], [], []>} : vector<256x4xf32>, vector<4x4xf32>, vector<256x4xf32> -> vector<256x4xf32>
    %9 = arith.addf %5, %8 : vector<256x4xf32>
    %c0_11 = arith.constant 0 : index
    %c0_12 = arith.constant 0 : index
    %10 = vector.load %arg5[%c0_11, %c0_12] : memref<256x4xf32, #tpu.memory_space<vmem>>, vector<256x4xf32>
    tpu.vector_store %arg5[%c0_11, %c0_12], %9 {strides = array<i32>} : memref<256x4xf32, #tpu.memory_space<vmem>>, vector<256x4xf32>,
    %c0_13 = arith.constant 0 : index
    %c0_14 = arith.constant 0 : index
    %c1 = arith.constant 1 : index
    %c0_15 = arith.constant 0 : index
    %11 = vector.load %arg1[%c0_13, %c0_14, %c1, %c0_15] : memref<1x18x18x4xf32, #tpu.memory_space<vmem>>, vector<1x16x16x4xf32>
    %12 = vector.shape_cast %11 : vector<1x16x16x4xf32> to vector<16x16x4xf32>
    %13 = vector.shape_cast %12 : vector<16x16x4xf32> to vector<256x4xf32>
    %c0_16 = arith.constant 0 : index
    %c0_17 = arith.constant 0 : index
    %14 = vector.load %arg5[%c0_16, %c0_17] : memref<256x4xf32, #tpu.memory_space<vmem>>, vector<256x4xf32>
    %c1_18 = arith.constant 1 : index
    %c0_19 = arith.constant 0 : index
    %c0_20 = arith.constant 0 : index
    %15 = vector.load %arg2[%c1_18, %c0_19, %c0_20] : memref<9x4x4xf32, #tpu.memory_space<vmem>>, vector<1x4x4xf32>
    %16 = vector.shape_cast %15 : vector<1x4x4xf32> to vector<4x4xf32>
    %cst_21 = arith.constant dense<0.000000e+00> : vector<256x4xf32>
    %17 = tpu.matmul %13, %16, %cst_21 {dimension_numbers = #tpu.dot_dimension_numbers<[1], [0], [0], [1], [0, 0, 1, 1], [], []>} : vector<256x4xf32>, vector<4x4xf32>, vector<256x4xf32> -> vector<256x4xf32>
    %18 = arith.addf %14, %17 : vector<256x4xf32>
    %c0_22 = arith.constant 0 : index
    %c0_23 = arith.constant 0 : index
    %19 = vector.load %arg5[%c0_22, %c0_23] : memref<256x4xf32, #tpu.memory_space<vmem>>, vector<256x4xf32>
    tpu.vector_store %arg5[%c0_22, %c0_23], %18 {strides = array<i32>} : memref<256x4xf32, #tpu.memory_space<vmem>>, vector<256x4xf32>,
    %c0_24 = arith.constant 0 : index
    %c0_25 = arith.constant 0 : index
    %c2 = arith.constant 2 : index
    %c0_26 = arith.constant 0 : index
    %20 = vector.load %arg1[%c0_24, %c0_25, %c2, %c0_26] : memref<1x18x18x4xf32, #tpu.memory_space<vmem>>, vector<1x16x16x4xf32>
    %21 = vector.shape_cast %20 : vector<1x16x16x4xf32> to vector<16x16x4xf32>
    %22 = vector.shape_cast %21 : vector<16x16x4xf32> to vector<256x4xf32>
    %c0_27 = arith.constant 0 : index
    %c0_28 = arith.constant 0 : index
    %23 = vector.load %arg5[%c0_27, %c0_28] : memref<256x4xf32, #tpu.memory_space<vmem>>, vector<256x4xf32>
    %c2_29 = arith.constant 2 : index
    %c0_30 = arith.constant 0 : index
    %c0_31 = arith.constant 0 : index
    %24 = vector.load %arg2[%c2_29, %c0_30, %c0_31] : memref<9x4x4xf32, #tpu.memory_space<vmem>>, vector<1x4x4xf32>
    %25 = vector.shape_cast %24 : vector<1x4x4xf32> to vector<4x4xf32>
    %cst_32 = arith.constant dense<0.000000e+00> : vector<256x4xf32>
    %26 = tpu.matmul %22, %25, %cst_32 {dimension_numbers = #tpu.dot_dimension_numbers<[1], [0], [0], [1], [0, 0, 1, 1], [], []>} : vector<256x4xf32>, vector<4x4xf32>, vector<256x4xf32> -> vector<256x4xf32>
    %27 = arith.addf %23, %26 : vector<256x4xf32>
    %c0_33 = arith.constant 0 : index
    %c0_34 = arith.constant 0 : index
    %28 = vector.load %arg5[%c0_33, %c0_34] : memref<256x4xf32, #tpu.memory_space<vmem>>, vector<256x4xf32>
    tpu.vector_store %arg5[%c0_33, %c0_34], %27 {strides = array<i32>} : memref<256x4xf32, #tpu.memory_space<vmem>>, vector<256x4xf32>,
    %c0_35 = arith.constant 0 : index
    %c1_36 = arith.constant 1 : index
    %c0_37 = arith.constant 0 : index
    %c0_38 = arith.constant 0 : index
    %29 = vector.load %arg1[%c0_35, %c1_36, %c0_37, %c0_38] : memref<1x18x18x4xf32, #tpu.memory_space<vmem>>, vector<1x16x16x4xf32>
    %30 = vector.shape_cast %29 : vector<1x16x16x4xf32> to vector<16x16x4xf32>
    %31 = vector.shape_cast %30 : vector<16x16x4xf32> to vector<256x4xf32>
    %c0_39 = arith.constant 0 : index
    %c0_40 = arith.constant 0 : index
    %32 = vector.load %arg5[%c0_39, %c0_40] : memref<256x4xf32, #tpu.memory_space<vmem>>, vector<256x4xf32>
    %c3 = arith.constant 3 : index
    %c0_41 = arith.constant 0 : index
    %c0_42 = arith.constant 0 : index
    %33 = vector.load %arg2[%c3, %c0_41, %c0_42] : memref<9x4x4xf32, #tpu.memory_space<vmem>>, vector<1x4x4xf32>
    %34 = vector.shape_cast %33 : vector<1x4x4xf32> to vector<4x4xf32>
    %cst_43 = arith.constant dense<0.000000e+00> : vector<256x4xf32>
    %35 = tpu.matmul %31, %34, %cst_43 {dimension_numbers = #tpu.dot_dimension_numbers<[1], [0], [0], [1], [0, 0, 1, 1], [], []>} : vector<256x4xf32>, vector<4x4xf32>, vector<256x4xf32> -> vector<256x4xf32>
    %36 = arith.addf %32, %35 : vector<256x4xf32>
    %c0_44 = arith.constant 0 : index
    %c0_45 = arith.constant 0 : index
    %37 = vector.load %arg5[%c0_44, %c0_45] : memref<256x4xf32, #tpu.memory_space<vmem>>, vector<256x4xf32>
    tpu.vector_store %arg5[%c0_44, %c0_45], %36 {strides = array<i32>} : memref<256x4xf32, #tpu.memory_space<vmem>>, vector<256x4xf32>,
    %c0_46 = arith.constant 0 : index
    %c1_47 = arith.constant 1 : index
    %c1_48 = arith.constant 1 : index
    %c0_49 = arith.constant 0 : index
    %38 = vector.load %arg1[%c0_46, %c1_47, %c1_48, %c0_49] : memref<1x18x18x4xf32, #tpu.memory_space<vmem>>, vector<1x16x16x4xf32>
    %39 = vector.shape_cast %38 : vector<1x16x16x4xf32> to vector<16x16x4xf32>
    %40 = vector.shape_cast %39 : vector<16x16x4xf32> to vector<256x4xf32>
    %c0_50 = arith.constant 0 : index
    %c0_51 = arith.constant 0 : index
    %41 = vector.load %arg5[%c0_50, %c0_51] : memref<256x4xf32, #tpu.memory_space<vmem>>, vector<256x4xf32>
    %c4 = arith.constant 4 : index
    %c0_52 = arith.constant 0 : index
    %c0_53 = arith.constant 0 : index
    %42 = vector.load %arg2[%c4, %c0_52, %c0_53] : memref<9x4x4xf32, #tpu.memory_space<vmem>>, vector<1x4x4xf32>
    %43 = vector.shape_cast %42 : vector<1x4x4xf32> to vector<4x4xf32>
    %cst_54 = arith.constant dense<0.000000e+00> : vector<256x4xf32>
    %44 = tpu.matmul %40, %43, %cst_54 {dimension_numbers = #tpu.dot_dimension_numbers<[1], [0], [0], [1], [0, 0, 1, 1], [], []>} : vector<256x4xf32>, vector<4x4xf32>, vector<256x4xf32> -> vector<256x4xf32>
    %45 = arith.addf %41, %44 : vector<256x4xf32>
    %c0_55 = arith.constant 0 : index
    %c0_56 = arith.constant 0 : index
    %46 = vector.load %arg5[%c0_55, %c0_56] : memref<256x4xf32, #tpu.memory_space<vmem>>, vector<256x4xf32>
    tpu.vector_store %arg5[%c0_55, %c0_56], %45 {strides = array<i32>} : memref<256x4xf32, #tpu.memory_space<vmem>>, vector<256x4xf32>,
    %c0_57 = arith.constant 0 : index
    %c1_58 = arith.constant 1 : index
    %c2_59 = arith.constant 2 : index
    %c0_60 = arith.constant 0 : index
    %47 = vector.load %arg1[%c0_57, %c1_58, %c2_59, %c0_60] : memref<1x18x18x4xf32, #tpu.memory_space<vmem>>, vector<1x16x16x4xf32>
    %48 = vector.shape_cast %47 : vector<1x16x16x4xf32> to vector<16x16x4xf32>
    %49 = vector.shape_cast %48 : vector<16x16x4xf32> to vector<256x4xf32>
    %c0_61 = arith.constant 0 : index
    %c0_62 = arith.constant 0 : index
    %50 = vector.load %arg5[%c0_61, %c0_62] : memref<256x4xf32, #tpu.memory_space<vmem>>, vector<256x4xf32>
    %c5 = arith.constant 5 : index
    %c0_63 = arith.constant 0 : index
    %c0_64 = arith.constant 0 : index
    %51 = vector.load %arg2[%c5, %c0_63, %c0_64] : memref<9x4x4xf32, #tpu.memory_space<vmem>>, vector<1x4x4xf32>
    %52 = vector.shape_cast %51 : vector<1x4x4xf32> to vector<4x4xf32>
    %cst_65 = arith.constant dense<0.000000e+00> : vector<256x4xf32>
    %53 = tpu.matmul %49, %52, %cst_65 {dimension_numbers = #tpu.dot_dimension_numbers<[1], [0], [0], [1], [0, 0, 1, 1], [], []>} : vector<256x4xf32>, vector<4x4xf32>, vector<256x4xf32> -> vector<256x4xf32>
    %54 = arith.addf %50, %53 : vector<256x4xf32>
    %c0_66 = arith.constant 0 : index
    %c0_67 = arith.constant 0 : index
    %55 = vector.load %arg5[%c0_66, %c0_67] : memref<256x4xf32, #tpu.memory_space<vmem>>, vector<256x4xf32>
    tpu.vector_store %arg5[%c0_66, %c0_67], %54 {strides = array<i32>} : memref<256x4xf32, #tpu.memory_space<vmem>>, vector<256x4xf32>,
    %c0_68 = arith.constant 0 : index
    %c2_69 = arith.constant 2 : index
    %c0_70 = arith.constant 0 : index
    %c0_71 = arith.constant 0 : index
    %56 = vector.load %arg1[%c0_68, %c2_69, %c0_70, %c0_71] : memref<1x18x18x4xf32, #tpu.memory_space<vmem>>, vector<1x16x16x4xf32>
    %57 = vector.shape_cast %56 : vector<1x16x16x4xf32> to vector<16x16x4xf32>
    %58 = vector.shape_cast %57 : vector<16x16x4xf32> to vector<256x4xf32>
    %c0_72 = arith.constant 0 : index
    %c0_73 = arith.constant 0 : index
    %59 = vector.load %arg5[%c0_72, %c0_73] : memref<256x4xf32, #tpu.memory_space<vmem>>, vector<256x4xf32>
    %c6 = arith.constant 6 : index
    %c0_74 = arith.constant 0 : index
    %c0_75 = arith.constant 0 : index
    %60 = vector.load %arg2[%c6, %c0_74, %c0_75] : memref<9x4x4xf32, #tpu.memory_space<vmem>>, vector<1x4x4xf32>
    %61 = vector.shape_cast %60 : vector<1x4x4xf32> to vector<4x4xf32>
    %cst_76 = arith.constant dense<0.000000e+00> : vector<256x4xf32>
    %62 = tpu.matmul %58, %61, %cst_76 {dimension_numbers = #tpu.dot_dimension_numbers<[1], [0], [0], [1], [0, 0, 1, 1], [], []>} : vector<256x4xf32>, vector<4x4xf32>, vector<256x4xf32> -> vector<256x4xf32>
    %63 = arith.addf %59, %62 : vector<256x4xf32>
    %c0_77 = arith.constant 0 : index
    %c0_78 = arith.constant 0 : index
    %64 = vector.load %arg5[%c0_77, %c0_78] : memref<256x4xf32, #tpu.memory_space<vmem>>, vector<256x4xf32>
    tpu.vector_store %arg5[%c0_77, %c0_78], %63 {strides = array<i32>} : memref<256x4xf32, #tpu.memory_space<vmem>>, vector<256x4xf32>,
    %c0_79 = arith.constant 0 : index
    %c2_80 = arith.constant 2 : index
    %c1_81 = arith.constant 1 : index
    %c0_82 = arith.constant 0 : index
    %65 = vector.load %arg1[%c0_79, %c2_80, %c1_81, %c0_82] : memref<1x18x18x4xf32, #tpu.memory_space<vmem>>, vector<1x16x16x4xf32>
    %66 = vector.shape_cast %65 : vector<1x16x16x4xf32> to vector<16x16x4xf32>
    %67 = vector.shape_cast %66 : vector<16x16x4xf32> to vector<256x4xf32>
    %c0_83 = arith.constant 0 : index
    %c0_84 = arith.constant 0 : index
    %68 = vector.load %arg5[%c0_83, %c0_84] : memref<256x4xf32, #tpu.memory_space<vmem>>, vector<256x4xf32>
    %c7 = arith.constant 7 : index
    %c0_85 = arith.constant 0 : index
    %c0_86 = arith.constant 0 : index
    %69 = vector.load %arg2[%c7, %c0_85, %c0_86] : memref<9x4x4xf32, #tpu.memory_space<vmem>>, vector<1x4x4xf32>
    %70 = vector.shape_cast %69 : vector<1x4x4xf32> to vector<4x4xf32>
    %cst_87 = arith.constant dense<0.000000e+00> : vector<256x4xf32>
    %71 = tpu.matmul %67, %70, %cst_87 {dimension_numbers = #tpu.dot_dimension_numbers<[1], [0], [0], [1], [0, 0, 1, 1], [], []>} : vector<256x4xf32>, vector<4x4xf32>, vector<256x4xf32> -> vector<256x4xf32>
    %72 = arith.addf %68, %71 : vector<256x4xf32>
    %c0_88 = arith.constant 0 : index
    %c0_89 = arith.constant 0 : index
    %73 = vector.load %arg5[%c0_88, %c0_89] : memref<256x4xf32, #tpu.memory_space<vmem>>, vector<256x4xf32>
    tpu.vector_store %arg5[%c0_88, %c0_89], %72 {strides = array<i32>} : memref<256x4xf32, #tpu.memory_space<vmem>>, vector<256x4xf32>,
    %c0_90 = arith.constant 0 : index
    %c2_91 = arith.constant 2 : index
    %c2_92 = arith.constant 2 : index
    %c0_93 = arith.constant 0 : index
    %74 = vector.load %arg1[%c0_90, %c2_91, %c2_92, %c0_93] : memref<1x18x18x4xf32, #tpu.memory_space<vmem>>, vector<1x16x16x4xf32>
    %75 = vector.shape_cast %74 : vector<1x16x16x4xf32> to vector<16x16x4xf32>
    %76 = vector.shape_cast %75 : vector<16x16x4xf32> to vector<256x4xf32>
    %c0_94 = arith.constant 0 : index
    %c0_95 = arith.constant 0 : index
    %77 = vector.load %arg5[%c0_94, %c0_95] : memref<256x4xf32, #tpu.memory_space<vmem>>, vector<256x4xf32>
    %c8 = arith.constant 8 : index
    %c0_96 = arith.constant 0 : index
    %c0_97 = arith.constant 0 : index
    %78 = vector.load %arg2[%c8, %c0_96, %c0_97] : memref<9x4x4xf32, #tpu.memory_space<vmem>>, vector<1x4x4xf32>
    %79 = vector.shape_cast %78 : vector<1x4x4xf32> to vector<4x4xf32>
    %cst_98 = arith.constant dense<0.000000e+00> : vector<256x4xf32>
    %80 = tpu.matmul %76, %79, %cst_98 {dimension_numbers = #tpu.dot_dimension_numbers<[1], [0], [0], [1], [0, 0, 1, 1], [], []>} : vector<256x4xf32>, vector<4x4xf32>, vector<256x4xf32> -> vector<256x4xf32>
    %81 = arith.addf %77, %80 : vector<256x4xf32>
    %c0_99 = arith.constant 0 : index
    %c0_100 = arith.constant 0 : index
    %82 = vector.load %arg5[%c0_99, %c0_100] : memref<256x4xf32, #tpu.memory_space<vmem>>, vector<256x4xf32>
    tpu.vector_store %arg5[%c0_99, %c0_100], %81 {strides = array<i32>} : memref<256x4xf32, #tpu.memory_space<vmem>>, vector<256x4xf32>,
    %c0_101 = arith.constant 0 : index
    %c0_102 = arith.constant 0 : index
    %83 = vector.load %arg5[%c0_101, %c0_102] : memref<256x4xf32, #tpu.memory_space<vmem>>, vector<256x4xf32>
    %cst_103 = arith.constant dense<0.000000e+00> : vector<4xf32>
    %84 = vector.multi_reduction <add>, %83, %cst_103 [0] : vector<256x4xf32> to vector<4xf32>
    %85 = vector.shape_cast %84 : vector<4xf32> to vector<1x4xf32>
    %cst_104 = arith.constant 2.560000e+02 : f32
    %86 = vector.broadcast %cst_104 : f32 to vector<1x4xf32>
    %87 = arith.divf %85, %86 : vector<1x4xf32>
    %88 = arith.mulf %83, %83 : vector<256x4xf32>
    %cst_105 = arith.constant dense<0.000000e+00> : vector<4xf32>
    %89 = vector.multi_reduction <add>, %88, %cst_105 [0] : vector<256x4xf32> to vector<4xf32>
    %90 = vector.shape_cast %89 : vector<4xf32> to vector<1x4xf32>
    %cst_106 = arith.constant 2.560000e+02 : f32
    %91 = vector.broadcast %cst_106 : f32 to vector<1x4xf32>
    %92 = arith.divf %90, %91 : vector<1x4xf32>
    %93 = arith.mulf %87, %87 : vector<1x4xf32>
    %94 = arith.subf %92, %93 : vector<1x4xf32>
    %95 = vector.broadcast %87 : vector<1x4xf32> to vector<256x4xf32>
    %96 = arith.subf %83, %95 : vector<256x4xf32>
    %cst_107 = arith.constant 9.99999974E-6 : f32
    %97 = vector.broadcast %cst_107 : f32 to vector<1x4xf32>
    %98 = arith.addf %94, %97 : vector<1x4xf32>
    %99 = math.rsqrt %98 : vector<1x4xf32>
    %100 = vector.broadcast %99 : vector<1x4xf32> to vector<256x4xf32>
    %101 = arith.mulf %96, %100 : vector<256x4xf32>
    %cst_108 = arith.constant 0.000000e+00 : f32
    %102 = vector.broadcast %cst_108 : f32 to vector<256x4xf32>
    %103 = arith.maximumf %101, %102 : vector<256x4xf32>
    %104 = vector.shape_cast %103 : vector<256x4xf32> to vector<16x16x4xf32>
    %c1_109 = arith.constant 1 : index
    %c1_110 = arith.constant 1 : index
    %c0_111 = arith.constant 0 : index
    %105 = vector.load %arg6[%c1_109, %c1_110, %c0_111] : memref<18x18x4xf32, #tpu.memory_space<vmem>>, vector<16x16x4xf32>
    tpu.vector_store %arg6[%c1_109, %c1_110, %c0_111], %104 {strides = array<i32>} : memref<18x18x4xf32, #tpu.memory_space<vmem>>, vector<16x16x4xf32>,
    %106 = vector.extract_strided_slice %104 {offsets = [1, 0, 0], sizes = [1, 16, 4], strides = [1, 1, 1]} : vector<16x16x4xf32> to vector<1x16x4xf32>
    %c0_112 = arith.constant 0 : index
    %c1_113 = arith.constant 1 : index
    %c0_114 = arith.constant 0 : index
    %107 = vector.load %arg6[%c0_112, %c1_113, %c0_114] : memref<18x18x4xf32, #tpu.memory_space<vmem>>, vector<1x16x4xf32>
    tpu.vector_store %arg6[%c0_112, %c1_113, %c0_114], %106 {strides = array<i32>} : memref<18x18x4xf32, #tpu.memory_space<vmem>>, vector<1x16x4xf32>,
    %108 = vector.extract_strided_slice %104 {offsets = [14, 0, 0], sizes = [1, 16, 4], strides = [1, 1, 1]} : vector<16x16x4xf32> to vector<1x16x4xf32>
    %c17 = arith.constant 17 : index
    %c1_115 = arith.constant 1 : index
    %c0_116 = arith.constant 0 : index
    %109 = vector.load %arg6[%c17, %c1_115, %c0_116] : memref<18x18x4xf32, #tpu.memory_space<vmem>>, vector<1x16x4xf32>
    tpu.vector_store %arg6[%c17, %c1_115, %c0_116], %108 {strides = array<i32>} : memref<18x18x4xf32, #tpu.memory_space<vmem>>, vector<1x16x4xf32>,
    %c0_117 = arith.constant 0 : index
    %c2_118 = arith.constant 2 : index
    %c0_119 = arith.constant 0 : index
    %110 = vector.load %arg6[%c0_117, %c2_118, %c0_119] : memref<18x18x4xf32, #tpu.memory_space<vmem>>, vector<18x1x4xf32>
    %c0_120 = arith.constant 0 : index
    %c0_121 = arith.constant 0 : index
    %c0_122 = arith.constant 0 : index
    %111 = vector.load %arg6[%c0_120, %c0_121, %c0_122] : memref<18x18x4xf32, #tpu.memory_space<vmem>>, vector<18x1x4xf32>
    tpu.vector_store %arg6[%c0_120, %c0_121, %c0_122], %110 {strides = array<i32>} : memref<18x18x4xf32, #tpu.memory_space<vmem>>, vector<18x1x4xf32>,
    %c0_123 = arith.constant 0 : index
    %c15 = arith.constant 15 : index
    %c0_124 = arith.constant 0 : index
    %112 = vector.load %arg6[%c0_123, %c15, %c0_124] : memref<18x18x4xf32, #tpu.memory_space<vmem>>, vector<18x1x4xf32>
    %c0_125 = arith.constant 0 : index
    %c17_126 = arith.constant 17 : index
    %c0_127 = arith.constant 0 : index
    %113 = vector.load %arg6[%c0_125, %c17_126, %c0_127] : memref<18x18x4xf32, #tpu.memory_space<vmem>>, vector<18x1x4xf32>
    tpu.vector_store %arg6[%c0_125, %c17_126, %c0_127], %112 {strides = array<i32>} : memref<18x18x4xf32, #tpu.memory_space<vmem>>, vector<18x1x4xf32>,
    %cst_128 = arith.constant 0.000000e+00 : f32
    %114 = vector.broadcast %cst_128 : f32 to vector<256x4xf32>
    %c0_129 = arith.constant 0 : index
    %c0_130 = arith.constant 0 : index
    %115 = vector.load %arg5[%c0_129, %c0_130] : memref<256x4xf32, #tpu.memory_space<vmem>>, vector<256x4xf32>
    tpu.vector_store %arg5[%c0_129, %c0_130], %114 {strides = array<i32>} : memref<256x4xf32, #tpu.memory_space<vmem>>, vector<256x4xf32>,
    %c0_131 = arith.constant 0 : index
    %c0_132 = arith.constant 0 : index
    %c0_133 = arith.constant 0 : index
    %116 = vector.load %arg6[%c0_131, %c0_132, %c0_133] : memref<18x18x4xf32, #tpu.memory_space<vmem>>, vector<16x16x4xf32>
    %117 = vector.shape_cast %116 : vector<16x16x4xf32> to vector<256x4xf32>
    %c0_134 = arith.constant 0 : index
    %c0_135 = arith.constant 0 : index
    %118 = vector.load %arg5[%c0_134, %c0_135] : memref<256x4xf32, #tpu.memory_space<vmem>>, vector<256x4xf32>
    %c0_136 = arith.constant 0 : index
    %c0_137 = arith.constant 0 : index
    %c0_138 = arith.constant 0 : index
    %119 = vector.load %arg3[%c0_136, %c0_137, %c0_138] : memref<9x4x4xf32, #tpu.memory_space<vmem>>, vector<1x4x4xf32>
    %120 = vector.shape_cast %119 : vector<1x4x4xf32> to vector<4x4xf32>
    %cst_139 = arith.constant dense<0.000000e+00> : vector<256x4xf32>
    %121 = tpu.matmul %117, %120, %cst_139 {dimension_numbers = #tpu.dot_dimension_numbers<[1], [0], [0], [1], [0, 0, 1, 1], [], []>} : vector<256x4xf32>, vector<4x4xf32>, vector<256x4xf32> -> vector<256x4xf32>
    %122 = arith.addf %118, %121 : vector<256x4xf32>
    %c0_140 = arith.constant 0 : index
    %c0_141 = arith.constant 0 : index
    %123 = vector.load %arg5[%c0_140, %c0_141] : memref<256x4xf32, #tpu.memory_space<vmem>>, vector<256x4xf32>
    tpu.vector_store %arg5[%c0_140, %c0_141], %122 {strides = array<i32>} : memref<256x4xf32, #tpu.memory_space<vmem>>, vector<256x4xf32>,
    %c0_142 = arith.constant 0 : index
    %c1_143 = arith.constant 1 : index
    %c0_144 = arith.constant 0 : index
    %124 = vector.load %arg6[%c0_142, %c1_143, %c0_144] : memref<18x18x4xf32, #tpu.memory_space<vmem>>, vector<16x16x4xf32>
    %125 = vector.shape_cast %124 : vector<16x16x4xf32> to vector<256x4xf32>
    %c0_145 = arith.constant 0 : index
    %c0_146 = arith.constant 0 : index
    %126 = vector.load %arg5[%c0_145, %c0_146] : memref<256x4xf32, #tpu.memory_space<vmem>>, vector<256x4xf32>
    %c1_147 = arith.constant 1 : index
    %c0_148 = arith.constant 0 : index
    %c0_149 = arith.constant 0 : index
    %127 = vector.load %arg3[%c1_147, %c0_148, %c0_149] : memref<9x4x4xf32, #tpu.memory_space<vmem>>, vector<1x4x4xf32>
    %128 = vector.shape_cast %127 : vector<1x4x4xf32> to vector<4x4xf32>
    %cst_150 = arith.constant dense<0.000000e+00> : vector<256x4xf32>
    %129 = tpu.matmul %125, %128, %cst_150 {dimension_numbers = #tpu.dot_dimension_numbers<[1], [0], [0], [1], [0, 0, 1, 1], [], []>} : vector<256x4xf32>, vector<4x4xf32>, vector<256x4xf32> -> vector<256x4xf32>
    %130 = arith.addf %126, %129 : vector<256x4xf32>
    %c0_151 = arith.constant 0 : index
    %c0_152 = arith.constant 0 : index
    %131 = vector.load %arg5[%c0_151, %c0_152] : memref<256x4xf32, #tpu.memory_space<vmem>>, vector<256x4xf32>
    tpu.vector_store %arg5[%c0_151, %c0_152], %130 {strides = array<i32>} : memref<256x4xf32, #tpu.memory_space<vmem>>, vector<256x4xf32>,
    %c0_153 = arith.constant 0 : index
    %c2_154 = arith.constant 2 : index
    %c0_155 = arith.constant 0 : index
    %132 = vector.load %arg6[%c0_153, %c2_154, %c0_155] : memref<18x18x4xf32, #tpu.memory_space<vmem>>, vector<16x16x4xf32>
    %133 = vector.shape_cast %132 : vector<16x16x4xf32> to vector<256x4xf32>
    %c0_156 = arith.constant 0 : index
    %c0_157 = arith.constant 0 : index
    %134 = vector.load %arg5[%c0_156, %c0_157] : memref<256x4xf32, #tpu.memory_space<vmem>>, vector<256x4xf32>
    %c2_158 = arith.constant 2 : index
    %c0_159 = arith.constant 0 : index
    %c0_160 = arith.constant 0 : index
    %135 = vector.load %arg3[%c2_158, %c0_159, %c0_160] : memref<9x4x4xf32, #tpu.memory_space<vmem>>, vector<1x4x4xf32>
    %136 = vector.shape_cast %135 : vector<1x4x4xf32> to vector<4x4xf32>
    %cst_161 = arith.constant dense<0.000000e+00> : vector<256x4xf32>
    %137 = tpu.matmul %133, %136, %cst_161 {dimension_numbers = #tpu.dot_dimension_numbers<[1], [0], [0], [1], [0, 0, 1, 1], [], []>} : vector<256x4xf32>, vector<4x4xf32>, vector<256x4xf32> -> vector<256x4xf32>
    %138 = arith.addf %134, %137 : vector<256x4xf32>
    %c0_162 = arith.constant 0 : index
    %c0_163 = arith.constant 0 : index
    %139 = vector.load %arg5[%c0_162, %c0_163] : memref<256x4xf32, #tpu.memory_space<vmem>>, vector<256x4xf32>
    tpu.vector_store %arg5[%c0_162, %c0_163], %138 {strides = array<i32>} : memref<256x4xf32, #tpu.memory_space<vmem>>, vector<256x4xf32>,
    %c1_164 = arith.constant 1 : index
    %c0_165 = arith.constant 0 : index
    %c0_166 = arith.constant 0 : index
    %140 = vector.load %arg6[%c1_164, %c0_165, %c0_166] : memref<18x18x4xf32, #tpu.memory_space<vmem>>, vector<16x16x4xf32>
    %141 = vector.shape_cast %140 : vector<16x16x4xf32> to vector<256x4xf32>
    %c0_167 = arith.constant 0 : index
    %c0_168 = arith.constant 0 : index
    %142 = vector.load %arg5[%c0_167, %c0_168] : memref<256x4xf32, #tpu.memory_space<vmem>>, vector<256x4xf32>
    %c3_169 = arith.constant 3 : index
    %c0_170 = arith.constant 0 : index
    %c0_171 = arith.constant 0 : index
    %143 = vector.load %arg3[%c3_169, %c0_170, %c0_171] : memref<9x4x4xf32, #tpu.memory_space<vmem>>, vector<1x4x4xf32>
    %144 = vector.shape_cast %143 : vector<1x4x4xf32> to vector<4x4xf32>
    %cst_172 = arith.constant dense<0.000000e+00> : vector<256x4xf32>
    %145 = tpu.matmul %141, %144, %cst_172 {dimension_numbers = #tpu.dot_dimension_numbers<[1], [0], [0], [1], [0, 0, 1, 1], [], []>} : vector<256x4xf32>, vector<4x4xf32>, vector<256x4xf32> -> vector<256x4xf32>
    %146 = arith.addf %142, %145 : vector<256x4xf32>
    %c0_173 = arith.constant 0 : index
    %c0_174 = arith.constant 0 : index
    %147 = vector.load %arg5[%c0_173, %c0_174] : memref<256x4xf32, #tpu.memory_space<vmem>>, vector<256x4xf32>
    tpu.vector_store %arg5[%c0_173, %c0_174], %146 {strides = array<i32>} : memref<256x4xf32, #tpu.memory_space<vmem>>, vector<256x4xf32>,
    %c1_175 = arith.constant 1 : index
    %c1_176 = arith.constant 1 : index
    %c0_177 = arith.constant 0 : index
    %148 = vector.load %arg6[%c1_175, %c1_176, %c0_177] : memref<18x18x4xf32, #tpu.memory_space<vmem>>, vector<16x16x4xf32>
    %149 = vector.shape_cast %148 : vector<16x16x4xf32> to vector<256x4xf32>
    %c0_178 = arith.constant 0 : index
    %c0_179 = arith.constant 0 : index
    %150 = vector.load %arg5[%c0_178, %c0_179] : memref<256x4xf32, #tpu.memory_space<vmem>>, vector<256x4xf32>
    %c4_180 = arith.constant 4 : index
    %c0_181 = arith.constant 0 : index
    %c0_182 = arith.constant 0 : index
    %151 = vector.load %arg3[%c4_180, %c0_181, %c0_182] : memref<9x4x4xf32, #tpu.memory_space<vmem>>, vector<1x4x4xf32>
    %152 = vector.shape_cast %151 : vector<1x4x4xf32> to vector<4x4xf32>
    %cst_183 = arith.constant dense<0.000000e+00> : vector<256x4xf32>
    %153 = tpu.matmul %149, %152, %cst_183 {dimension_numbers = #tpu.dot_dimension_numbers<[1], [0], [0], [1], [0, 0, 1, 1], [], []>} : vector<256x4xf32>, vector<4x4xf32>, vector<256x4xf32> -> vector<256x4xf32>
    %154 = arith.addf %150, %153 : vector<256x4xf32>
    %c0_184 = arith.constant 0 : index
    %c0_185 = arith.constant 0 : index
    %155 = vector.load %arg5[%c0_184, %c0_185] : memref<256x4xf32, #tpu.memory_space<vmem>>, vector<256x4xf32>
    tpu.vector_store %arg5[%c0_184, %c0_185], %154 {strides = array<i32>} : memref<256x4xf32, #tpu.memory_space<vmem>>, vector<256x4xf32>,
    %c1_186 = arith.constant 1 : index
    %c2_187 = arith.constant 2 : index
    %c0_188 = arith.constant 0 : index
    %156 = vector.load %arg6[%c1_186, %c2_187, %c0_188] : memref<18x18x4xf32, #tpu.memory_space<vmem>>, vector<16x16x4xf32>
    %157 = vector.shape_cast %156 : vector<16x16x4xf32> to vector<256x4xf32>
    %c0_189 = arith.constant 0 : index
    %c0_190 = arith.constant 0 : index
    %158 = vector.load %arg5[%c0_189, %c0_190] : memref<256x4xf32, #tpu.memory_space<vmem>>, vector<256x4xf32>
    %c5_191 = arith.constant 5 : index
    %c0_192 = arith.constant 0 : index
    %c0_193 = arith.constant 0 : index
    %159 = vector.load %arg3[%c5_191, %c0_192, %c0_193] : memref<9x4x4xf32, #tpu.memory_space<vmem>>, vector<1x4x4xf32>
    %160 = vector.shape_cast %159 : vector<1x4x4xf32> to vector<4x4xf32>
    %cst_194 = arith.constant dense<0.000000e+00> : vector<256x4xf32>
    %161 = tpu.matmul %157, %160, %cst_194 {dimension_numbers = #tpu.dot_dimension_numbers<[1], [0], [0], [1], [0, 0, 1, 1], [], []>} : vector<256x4xf32>, vector<4x4xf32>, vector<256x4xf32> -> vector<256x4xf32>
    %162 = arith.addf %158, %161 : vector<256x4xf32>
    %c0_195 = arith.constant 0 : index
    %c0_196 = arith.constant 0 : index
    %163 = vector.load %arg5[%c0_195, %c0_196] : memref<256x4xf32, #tpu.memory_space<vmem>>, vector<256x4xf32>
    tpu.vector_store %arg5[%c0_195, %c0_196], %162 {strides = array<i32>} : memref<256x4xf32, #tpu.memory_space<vmem>>, vector<256x4xf32>,
    %c2_197 = arith.constant 2 : index
    %c0_198 = arith.constant 0 : index
    %c0_199 = arith.constant 0 : index
    %164 = vector.load %arg6[%c2_197, %c0_198, %c0_199] : memref<18x18x4xf32, #tpu.memory_space<vmem>>, vector<16x16x4xf32>
    %165 = vector.shape_cast %164 : vector<16x16x4xf32> to vector<256x4xf32>
    %c0_200 = arith.constant 0 : index
    %c0_201 = arith.constant 0 : index
    %166 = vector.load %arg5[%c0_200, %c0_201] : memref<256x4xf32, #tpu.memory_space<vmem>>, vector<256x4xf32>
    %c6_202 = arith.constant 6 : index
    %c0_203 = arith.constant 0 : index
    %c0_204 = arith.constant 0 : index
    %167 = vector.load %arg3[%c6_202, %c0_203, %c0_204] : memref<9x4x4xf32, #tpu.memory_space<vmem>>, vector<1x4x4xf32>
    %168 = vector.shape_cast %167 : vector<1x4x4xf32> to vector<4x4xf32>
    %cst_205 = arith.constant dense<0.000000e+00> : vector<256x4xf32>
    %169 = tpu.matmul %165, %168, %cst_205 {dimension_numbers = #tpu.dot_dimension_numbers<[1], [0], [0], [1], [0, 0, 1, 1], [], []>} : vector<256x4xf32>, vector<4x4xf32>, vector<256x4xf32> -> vector<256x4xf32>
    %170 = arith.addf %166, %169 : vector<256x4xf32>
    %c0_206 = arith.constant 0 : index
    %c0_207 = arith.constant 0 : index
    %171 = vector.load %arg5[%c0_206, %c0_207] : memref<256x4xf32, #tpu.memory_space<vmem>>, vector<256x4xf32>
    tpu.vector_store %arg5[%c0_206, %c0_207], %170 {strides = array<i32>} : memref<256x4xf32, #tpu.memory_space<vmem>>, vector<256x4xf32>,
    %c2_208 = arith.constant 2 : index
    %c1_209 = arith.constant 1 : index
    %c0_210 = arith.constant 0 : index
    %172 = vector.load %arg6[%c2_208, %c1_209, %c0_210] : memref<18x18x4xf32, #tpu.memory_space<vmem>>, vector<16x16x4xf32>
    %173 = vector.shape_cast %172 : vector<16x16x4xf32> to vector<256x4xf32>
    %c0_211 = arith.constant 0 : index
    %c0_212 = arith.constant 0 : index
    %174 = vector.load %arg5[%c0_211, %c0_212] : memref<256x4xf32, #tpu.memory_space<vmem>>, vector<256x4xf32>
    %c7_213 = arith.constant 7 : index
    %c0_214 = arith.constant 0 : index
    %c0_215 = arith.constant 0 : index
    %175 = vector.load %arg3[%c7_213, %c0_214, %c0_215] : memref<9x4x4xf32, #tpu.memory_space<vmem>>, vector<1x4x4xf32>
    %176 = vector.shape_cast %175 : vector<1x4x4xf32> to vector<4x4xf32>
    %cst_216 = arith.constant dense<0.000000e+00> : vector<256x4xf32>
    %177 = tpu.matmul %173, %176, %cst_216 {dimension_numbers = #tpu.dot_dimension_numbers<[1], [0], [0], [1], [0, 0, 1, 1], [], []>} : vector<256x4xf32>, vector<4x4xf32>, vector<256x4xf32> -> vector<256x4xf32>
    %178 = arith.addf %174, %177 : vector<256x4xf32>
    %c0_217 = arith.constant 0 : index
    %c0_218 = arith.constant 0 : index
    %179 = vector.load %arg5[%c0_217, %c0_218] : memref<256x4xf32, #tpu.memory_space<vmem>>, vector<256x4xf32>
    tpu.vector_store %arg5[%c0_217, %c0_218], %178 {strides = array<i32>} : memref<256x4xf32, #tpu.memory_space<vmem>>, vector<256x4xf32>,
    %c2_219 = arith.constant 2 : index
    %c2_220 = arith.constant 2 : index
    %c0_221 = arith.constant 0 : index
    %180 = vector.load %arg6[%c2_219, %c2_220, %c0_221] : memref<18x18x4xf32, #tpu.memory_space<vmem>>, vector<16x16x4xf32>
    %181 = vector.shape_cast %180 : vector<16x16x4xf32> to vector<256x4xf32>
    %c0_222 = arith.constant 0 : index
    %c0_223 = arith.constant 0 : index
    %182 = vector.load %arg5[%c0_222, %c0_223] : memref<256x4xf32, #tpu.memory_space<vmem>>, vector<256x4xf32>
    %c8_224 = arith.constant 8 : index
    %c0_225 = arith.constant 0 : index
    %c0_226 = arith.constant 0 : index
    %183 = vector.load %arg3[%c8_224, %c0_225, %c0_226] : memref<9x4x4xf32, #tpu.memory_space<vmem>>, vector<1x4x4xf32>
    %184 = vector.shape_cast %183 : vector<1x4x4xf32> to vector<4x4xf32>
    %cst_227 = arith.constant dense<0.000000e+00> : vector<256x4xf32>
    %185 = tpu.matmul %181, %184, %cst_227 {dimension_numbers = #tpu.dot_dimension_numbers<[1], [0], [0], [1], [0, 0, 1, 1], [], []>} : vector<256x4xf32>, vector<4x4xf32>, vector<256x4xf32> -> vector<256x4xf32>
    %186 = arith.addf %182, %185 : vector<256x4xf32>
    %c0_228 = arith.constant 0 : index
    %c0_229 = arith.constant 0 : index
    %187 = vector.load %arg5[%c0_228, %c0_229] : memref<256x4xf32, #tpu.memory_space<vmem>>, vector<256x4xf32>
    tpu.vector_store %arg5[%c0_228, %c0_229], %186 {strides = array<i32>} : memref<256x4xf32, #tpu.memory_space<vmem>>, vector<256x4xf32>,
    %c0_230 = arith.constant 0 : index
    %c0_231 = arith.constant 0 : index
    %188 = vector.load %arg5[%c0_230, %c0_231] : memref<256x4xf32, #tpu.memory_space<vmem>>, vector<256x4xf32>
    %cst_232 = arith.constant dense<0.000000e+00> : vector<4xf32>
    %189 = vector.multi_reduction <add>, %188, %cst_232 [0] : vector<256x4xf32> to vector<4xf32>
    %190 = vector.shape_cast %189 : vector<4xf32> to vector<1x4xf32>
    %cst_233 = arith.constant 2.560000e+02 : f32
    %191 = vector.broadcast %cst_233 : f32 to vector<1x4xf32>
    %192 = arith.divf %190, %191 : vector<1x4xf32>
    %193 = arith.mulf %188, %188 : vector<256x4xf32>
    %cst_234 = arith.constant dense<0.000000e+00> : vector<4xf32>
    %194 = vector.multi_reduction <add>, %193, %cst_234 [0] : vector<256x4xf32> to vector<4xf32>
    %195 = vector.shape_cast %194 : vector<4xf32> to vector<1x4xf32>
    %cst_235 = arith.constant 2.560000e+02 : f32
    %196 = vector.broadcast %cst_235 : f32 to vector<1x4xf32>
    %197 = arith.divf %195, %196 : vector<1x4xf32>
    %198 = arith.mulf %192, %192 : vector<1x4xf32>
    %199 = arith.subf %197, %198 : vector<1x4xf32>
    %200 = vector.broadcast %192 : vector<1x4xf32> to vector<256x4xf32>
    %201 = arith.subf %188, %200 : vector<256x4xf32>
    %cst_236 = arith.constant 9.99999974E-6 : f32
    %202 = vector.broadcast %cst_236 : f32 to vector<1x4xf32>
    %203 = arith.addf %199, %202 : vector<1x4xf32>
    %204 = math.rsqrt %203 : vector<1x4xf32>
    %205 = vector.broadcast %204 : vector<1x4xf32> to vector<256x4xf32>
    %206 = arith.mulf %201, %205 : vector<256x4xf32>
    %207 = vector.shape_cast %206 : vector<256x4xf32> to vector<16x16x4xf32>
    %c0_237 = arith.constant 0 : index
    %c1_238 = arith.constant 1 : index
    %c1_239 = arith.constant 1 : index
    %c0_240 = arith.constant 0 : index
    %208 = vector.load %arg1[%c0_237, %c1_238, %c1_239, %c0_240] : memref<1x18x18x4xf32, #tpu.memory_space<vmem>>, vector<1x16x16x4xf32>
    %209 = vector.shape_cast %208 : vector<1x16x16x4xf32> to vector<16x16x4xf32>
    %210 = arith.addf %209, %207 : vector<16x16x4xf32>
    %c0_241 = arith.constant 0 : index
    %c0_242 = arith.constant 0 : index
    %c0_243 = arith.constant 0 : index
    %c0_244 = arith.constant 0 : index
    %211 = vector.load %arg4[%c0_241, %c0_242, %c0_243, %c0_244] : memref<1x16x16x4xf32, #tpu.memory_space<vmem>>, vector<1x16x16x4xf32>
    %212 = vector.shape_cast %211 : vector<1x16x16x4xf32> to vector<16x16x4xf32>
    %213 = vector.shape_cast %210 : vector<16x16x4xf32> to vector<1x16x16x4xf32>
    tpu.vector_store %arg4[%c0_241, %c0_242, %c0_243, %c0_244], %213 {strides = array<i32>} : memref<1x16x16x4xf32, #tpu.memory_space<vmem>>, vector<1x16x16x4xf32>,
    return
  }
  func.func @transform_0(%arg0: i32) -> (i32, i32, i32, i32) {
    %c0_i32 = arith.constant 0 : i32
    %c0_i32_0 = arith.constant 0 : i32
    %c0_i32_1 = arith.constant 0 : i32
    %c0_i32_2 = arith.constant 0 : i32
    return %arg0, %c0_i32, %c0_i32_0, %c0_i32_1 : i32, i32, i32, i32
  }
  func.func @transform_1(%arg0: i32) -> (i32, i32, i32) {
    %c0_i32 = arith.constant 0 : i32
    %c0_i32_0 = arith.constant 0 : i32
    %c0_i32_1 = arith.constant 0 : i32
    %c0_i32_2 = arith.constant 0 : i32
    return %c0_i32, %c0_i32_0, %c0_i32_1 : i32, i32, i32
  }
  func.func @transform_2(%arg0: i32) -> (i32, i32, i32) {
    %c0_i32 = arith.constant 0 : i32
    %c0_i32_0 = arith.constant 0 : i32
    %c0_i32_1 = arith.constant 0 : i32
    %c0_i32_2 = arith.constant 0 : i32
    return %c0_i32, %c0_i32_0, %c0_i32_1 : i32, i32, i32
  }
  func.func @transform_3(%arg0: i32) -> (i32, i32, i32, i32) {
    %c0_i32 = arith.constant 0 : i32
    %c0_i32_0 = arith.constant 0 : i32
    %c0_i32_1 = arith.constant 0 : i32
    %c0_i32_2 = arith.constant 0 : i32
    return %arg0, %c0_i32, %c0_i32_0, %c0_i32_1 : i32, i32, i32, i32
  }
}

</mosaic_0001>

<bundles_post_ra>
// kernel: resnet_block_forward.1
= control target key start
LH: loop header
LB: loop body
LE: loop exit
PB: predicated region body
PF: predicated region fallthrough
CT: control target
= control target key end

     0   :  { %s11632_s12 = smov 0   ;;  %s15303_s0 = inlined_call_operand.vmem [shape: f32[2,18,18,4], index: 0, kind: input, shape index: {}]   ;;  %s15304_s1 = inlined_call_operand.vmem [shape: f32[9,4,4], index: 1, kind: input, shape index: {}]   ;;  %s15305_s2 = inlined_call_operand.vmem [shape: f32[9,4,4], index: 2, kind: input, shape index: {}]   ;;  %s15306_s3 = inlined_call_operand.vmem [shape: f32[2,16,16,4], index: 3, kind: output, shape index: {}]  }
   0x1 LB: > { %s9249_s13 = sadd.s32 4294967295, %s11609_s12   ;;  %p9253_p0 = scmp.ge.s32.totalorder %s11609_s12, 1  ;;  %s11609_s12 = sphi %s11632_s12, %s13_s12  }
   0x2   : > { %p137_p1 = scmp.lt.s32.totalorder %s11609_s12, 3 }
   0x4   : > { %p138_p2 = pnand %p9253_p0, %p137_p1 }
   0x6   : > { %141 = sbr.rel (%p138_p2) target bundleno = 1225 (0x4c9), region = 32 }
   0xd   : > { %v268_v0 = vld [vmem:[%s15304_s1] sm:$0xf]  ;;  %vm365_vm0 = vcmask 1043456   ;;  %p161_p3 = scmp.lt.s32.totalorder %s9249_s13, 1  ;;  %v9324_v1 = vld [vmem:[%s15304_s1 + $0x8] sm:$0xf] }
   0xe   : > { %10688 = vmatprep.subr.msk.mxu0 %vm365_vm0, %v268_v0  ;;  %v9290_v2 = vld [vmem:[%s15304_s1 + $0x4] sm:$0xf]  ;;  %v9390_v3 = vld [vmem:[%s15304_s1 + $0xc] sm:$0xf]  ;;  %vm171_vm1 = vcmask 31744   ;;  %vm4653_vm2 = vcmask 24576  }
   0xf   : > { %10689 = vmatpush3.msk.msra.mxu0 %vm365_vm0, %v268_v0  ;;  %s15419_s13 = smov (!%p161_p3, %s9249_s13), 1  ;;  %10738 = vmatprep.subr.msk.mxu1 %vm365_vm0, %v9290_v2  ;;  %v11675_v7 = vld [vmem:[%s15304_s1 + $0x10] sm:$0xf]  ;;  %v11699_v13 = vld [vmem:[%s15304_s1 + $0x14] sm:$0xf] }
  0x10   : > { %10788 = vmatprep.subr.msk.mxu0 %vm365_vm0, %v9324_v1  ;;  %10739 = vmatpush3.msk.msra.mxu1 %vm365_vm0, %v9290_v2  ;;  %s11588_s22 = smul.u32 432, %s15419_s13  ;;  %s10093_s5 = sshll.u32 %s15419_s13, 8 }
  0x11   : > { %10838 = vmatprep.subr.msk.mxu1 %vm365_vm0, %v9390_v3  ;;  %s15188_s7 = scalar_lea.vmem %s15306_s3, %s10093_s5 }
  0x12   : > { %s11664_s25 = scalar_lea.vmem %s15303_s0, %s11588_s22 }
  0x13   : > { %v204_v4 = vld [vmem:[%s11664_s25] sm:$0xff]  ;;  %v205_v5 = vld [vmem:[%s11664_s25 + $0x8] sm:$0xff]  ;;  %v11669_v6 = vld [vmem:[%s11664_s25 + $0x18] sm:$0xff] }
  0x14   : > { %10690 = vmatprep.mubr.msk.f32.mxu0 %vm171_vm1, %v204_v4  ;;  %v658_v8 = vld [vmem:[%s11664_s25 + $0x1] sm:$0xff]  ;;  %v659_v9 = vld [vmem:[%s11664_s25 + $0x9] sm:$0xff]  ;;  %v11687_v11 = vld [vmem:[%s11664_s25 + $0x19] sm:$0xff] }
  0x15   : > { %10691 = vmatmul.mubr.msk.f32.vlgmr.msra.gmra.mrb[0].mxu0 %vm171_vm1, %v205_v5  ;;  %v11684_v10 = vld [vmem:[%s11664_s25 + $0x20] sm:$0xff]  ;;  %v11690_v12 = vld [vmem:[%s11664_s25 + $0x30] sm:$0xff]  ;;  %10740 = vmatprep.mubr.msk.f32.mxu1 %vm171_vm1, %v658_v8  ;;  %v11711_v15 = vld [vmem:[%s11664_s25 + $0x38] sm:$0xff] }
  0x16   : > { %10789 = vmatpush3.msk.msra.mxu0 %vm365_vm0, %v9324_v1  ;;  %10693 = vmatprep.mubr.msk.f32.mxu0 %vm171_vm1, %v11669_v6  ;;  %v11706_v14 = vld [vmem:[%s11664_s25 + $0x21] sm:$0xff]  ;;  %15344 = vst [vmem:[#allocation4_spill] sm:$0xff] %v11711_v15  ;;  %v11714_v16 = vld [vmem:[%s11664_s25 + $0x31] sm:$0xff]  ;;  %v11729_v18 = vld [vmem:[%s11664_s25 + $0x39] sm:$0xff] }
  0x17   : > { %10888 = vmatprep.subr.msk.mxu0 %vm365_vm0, %v11675_v7  ;;  %10741 = vmatmul.mubr.msk.f32.vlgmr.msra.gmra.mrb[0].mxu1 %vm171_vm1, %v659_v9  ;;  %v11718_v17 = vld [vmem:[%s11664_s25 + $0x48] sm:$0xff]  ;;  %v11734_v19 = vld [vmem:[%s11664_s25 + $0x50] sm:$0xff]  ;;  %v11740_v21 = vld [vmem:[%s11664_s25 + $0x60] sm:$0xff] }
  0x18   : > { %10743 = vmatprep.mubr.msk.f32.mxu1 %vm171_vm1, %v11687_v11  ;;  %10839 = vmatpush3.msk.msra.mxu1 %vm365_vm0, %v9390_v3  ;;  %15345 = vst [vmem:[#allocation5_spill] sm:$0xff] %v11718_v17  ;;  %15346 = vst [vmem:[#allocation6_spill] sm:$0xff] %v11734_v19  ;;  %v11737_v20 = vld [vmem:[%s11664_s25 + $0x49] sm:$0xff]  ;;  %v11749_v22 = vld [vmem:[%s11664_s25 + $0x51] sm:$0xff] }
  0x19   : > { %10694 = vmatmul.mubr.msk.f32.gmra.mrb[2].mxu0 %vm171_vm1, %v11684_v10  ;;  %10938 = vmatprep.subr.msk.mxu1 %vm365_vm0, %v11699_v13  ;;  %15347 = vst [vmem:[#allocation7_spill] sm:$0xff] %v11740_v21  ;;  %v11754_v23 = vld [vmem:[%s11664_s25 + $0x68] sm:$0xff]  ;;  %v11760_v25 = vld [vmem:[%s11664_s25 + $0x78] sm:$0xff]  ;;  %v11774_v27 = vld [vmem:[%s11664_s25 + $0x80] sm:$0xff] }
  0x1a   : > { %10696 = vmatprep.mubr.msk.f32.mxu0 %vm171_vm1, %v11690_v12  ;;  %15348 = vst [vmem:[#allocation8_spill] sm:$0xff] %v11754_v23  ;;  %v11757_v24 = vld [vmem:[%s11664_s25 + $0x61] sm:$0xff]  ;;  %15349 = vst [vmem:[#allocation9_spill] sm:$0xff] %v11760_v25  ;;  %v11769_v26 = vld [vmem:[%s11664_s25 + $0x69] sm:$0xff] }
  0x1b   : > { %10744 = vmatmul.mubr.msk.f32.gmra.mrb[2].mxu1 %vm171_vm1, %v11706_v14  ;;  %15350 = vst [vmem:[#allocation10_spill] sm:$0xff] %v11774_v27  ;;  %v11777_v28 = vld [vmem:[%s11664_s25 + $0x79] sm:$0xff]  ;;  %v11780_v29 = vld [vmem:[%s11664_s25 + $0x90] sm:$0xff]  ;;  %v11789_v30 = vld [vmem:[%s11664_s25 + $0x81] sm:$0xff] }
  0x1c   : > { %10746 = vmatprep.mubr.msk.f32.mxu1 %vm171_vm1, %v11714_v16  ;;  %15351 = vst [vmem:[#allocation11_spill] sm:$0xff] %v11780_v29  ;;  %v11794_v31 = vld [vmem:[%s11664_s25 + $0x98] sm:$0xff]  ;;  %v11800_v33 = vld [vmem:[%s11664_s25 + $0xa8] sm:$0xff]  ;;  %v11814_v35 = vld [vmem:[%s11664_s25 + $0xb0] sm:$0xff] }
  0x1d   : > { %10697 = vmatmul.mubr.msk.f32.gmra.mrb[4].mxu0 %vm171_vm1, %v11711_v15  ;;  %15352 = vst [vmem:[#allocation12_spill] sm:$0xff] %v11794_v31  ;;  %v11797_v32 = vld [vmem:[%s11664_s25 + $0x91] sm:$0xff]  ;;  %15353 = vst [vmem:[#allocation13_spill] sm:$0xff] %v11800_v33  ;;  %v11809_v34 = vld [vmem:[%s11664_s25 + $0x99] sm:$0xff] }
  0x1e   : > { %10699 = vmatprep.mubr.msk.f32.mxu0 %vm171_vm1, %v11718_v17  ;;  %15354 = vst [vmem:[#allocation14_spill] sm:$0xff] %v11814_v35  ;;  %v11817_v36 = vld [vmem:[%s11664_s25 + $0xa9] sm:$0xff]  ;;  %v11820_v37 = vld [vmem:[%s11664_s25 + $0xc0] sm:$0xff]  ;;  %v11829_v38 = vld [vmem:[%s11664_s25 + $0xb1] sm:$0xff] }
  0x1f   : > { %10747 = vmatmul.mubr.msk.f32.gmra.mrb[4].mxu1 %vm171_vm1, %v11729_v18  ;;  %15355 = vst [vmem:[#allocation15_spill] sm:$0xff] %v11820_v37  ;;  %v11834_v39 = vld [vmem:[%s11664_s25 + $0xc8] sm:$0xff]  ;;  %v11840_v41 = vld [vmem:[%s11664_s25 + $0xd8] sm:$0xff]  ;;  %v11854_v43 = vld [vmem:[%s11664_s25 + $0xe0] sm:$0xff] }
  0x20   : > { %10749 = vmatprep.mubr.msk.f32.mxu1 %vm171_vm1, %v11737_v20  ;;  %15356 = vst [vmem:[#allocation16_spill] sm:$0xff] %v11834_v39  ;;  %v11837_v40 = vld [vmem:[%s11664_s25 + $0xc1] sm:$0xff]  ;;  %15357 = vst [vmem:[#allocation17_spill] sm:$0xff] %v11840_v41  ;;  %v11849_v42 = vld [vmem:[%s11664_s25 + $0xc9] sm:$0xff] }
  0x21   : > { %10700 = vmatmul.mubr.msk.f32.gmra.mrb[6].mxu0 %vm171_vm1, %v11734_v19  ;;  %15358 = vst [vmem:[#allocation18_spill] sm:$0xff] %v11854_v43  ;;  %v11857_v44 = vld [vmem:[%s11664_s25 + $0xd9] sm:$0xff]  ;;  %v11860_v45 = vld [vmem:[%s11664_s25 + $0xf0] sm:$0xff]  ;;  %v11869_v46 = vld [vmem:[%s11664_s25 + $0xe1] sm:$0xff] }
  0x22   : > { %10702 = vmatprep.mubr.msk.f32.mxu0 %vm171_vm1, %v11740_v21  ;;  %15359 = vst [vmem:[#allocation19_spill] sm:$0xff] %v11860_v45  ;;  %v11874_v47 = vld [vmem:[%s11664_s25 + $0xf8] sm:$0xff]  ;;  %v11880_v49 = vld [vmem:[%s11664_s25 + $0x108] sm:$0xff]  ;;  %v11894_v51 = vld [vmem:[%s11664_s25 + $0x110] sm:$0xff] }
  0x23   : > { %10750 = vmatmul.mubr.msk.f32.gmra.mrb[6].mxu1 %vm171_vm1, %v11749_v22  ;;  %15360 = vst [vmem:[#allocation20_spill] sm:$0xff] %v11874_v47  ;;  %v11877_v48 = vld [vmem:[%s11664_s25 + $0xf1] sm:$0xff]  ;;  %15361 = vst [vmem:[#allocation21_spill] sm:$0xff] %v11880_v49  ;;  %v11889_v50 = vld [vmem:[%s11664_s25 + $0xf9] sm:$0xff] }
  0x24   : > { %10752 = vmatprep.mubr.msk.f32.mxu1 %vm171_vm1, %v11757_v24  ;;  %15362 = vst [vmem:[#allocation22_spill] sm:$0xff] %v11894_v51  ;;  %v11897_v52 = vld [vmem:[%s11664_s25 + $0x109] sm:$0xff]  ;;  %v11900_v53 = vld [vmem:[%s11664_s25 + $0x120] sm:$0xff]  ;;  %v11909_v54 = vld [vmem:[%s11664_s25 + $0x111] sm:$0xff] }
  0x25   : > { %10703 = vmatmul.mubr.msk.f32.gmra.mrb[8].mxu0 %vm171_vm1, %v11754_v23  ;;  %15363 = vst [vmem:[#allocation23_spill] sm:$0xff] %v11900_v53  ;;  %v11914_v55 = vld [vmem:[%s11664_s25 + $0x128] sm:$0xff]  ;;  %v11920_v57 = vld [vmem:[%s11664_s25 + $0x138] sm:$0xff]  ;;  %v11934_v59 = vld [vmem:[%s11664_s25 + $0x140] sm:$0xff] }
  0x26   : > { %10705 = vmatprep.mubr.msk.f32.mxu0 %vm171_vm1, %v11760_v25  ;;  %15364 = vst [vmem:[#allocation24_spill] sm:$0xff] %v11914_v55  ;;  %v11917_v56 = vld [vmem:[%s11664_s25 + $0x121] sm:$0xff]  ;;  %15365 = vst [vmem:[#allocation25_spill] sm:$0xff] %v11920_v57  ;;  %v11929_v58 = vld [vmem:[%s11664_s25 + $0x129] sm:$0xff] }
  0x27   : > { %10753 = vmatmul.mubr.msk.f32.gmra.mrb[8].mxu1 %vm171_vm1, %v11769_v26  ;;  %15366 = vst [vmem:[#allocation26_spill] sm:$0xff] %v11934_v59  ;;  %v11937_v60 = vld [vmem:[%s11664_s25 + $0x139] sm:$0xff]  ;;  %v11940_v61 = vld [vmem:[%s11664_s25 + $0x150] sm:$0xff]  ;;  %v11949_v62 = vld [vmem:[%s11664_s25 + $0x141] sm:$0xff] }
  0x28   : > { %10755 = vmatprep.mubr.msk.f32.mxu1 %vm171_vm1, %v11777_v28  ;;  %v11954_v63 = vld [vmem:[%s11664_s25 + $0x158] sm:$0xff]  ;;  %v11960_v1 = vld [vmem:[%s11664_s25 + $0x168] sm:$0xff]  ;;  %v11974_v3 = vld [vmem:[%s11664_s25 + $0x170] sm:$0xff] }
  0x29   : > { %10706 = vmatmul.mubr.msk.f32.gmra.mrb[10].mxu0 %vm171_vm1, %v11774_v27  ;;  %v11957_v0 = vld [vmem:[%s11664_s25 + $0x151] sm:$0xff]  ;;  %v11969_v2 = vld [vmem:[%s11664_s25 + $0x159] sm:$0xff]  ;;  %v11977_v4 = vld [vmem:[%s11664_s25 + $0x169] sm:$0xff] }
  0x2a   : > { %10708 = vmatprep.mubr.msk.f32.mxu0 %vm171_vm1, %v11780_v29  ;;  %15367 = vst [vmem:[#allocation27_spill] sm:$0xff] %v11957_v0  ;;  %15368 = vst [vmem:[#allocation28_spill] sm:$0xff] %v11969_v2  ;;  %v1112_v5 = vld [vmem:[%s11664_s25 + $0x2] sm:$0xff]  ;;  %v11987_v8 = vld [vmem:[%s11664_s25 + $0x171] sm:$0xff] }
  0x2b   : > { %10756 = vmatmul.mubr.msk.f32.gmra.mrb[10].mxu1 %vm171_vm1, %v11789_v30  ;;  %15369 = vst [vmem:[#allocation29_spill] sm:$0xff] %v11987_v8  ;;  %v1113_v9 = vld [vmem:[%s11664_s25 + $0xa] sm:$0xff] }
  0x2c   : > { %10758 = vmatprep.mubr.msk.f32.mxu1 %vm171_vm1, %v11797_v32 }
  0x2d   : > { %10709 = vmatmul.mubr.msk.f32.gmra.mrb[12].mxu0 %vm171_vm1, %v11794_v31 }
  0x2e   : > { %10711 = vmatprep.mubr.msk.f32.mxu0 %vm171_vm1, %v11800_v33 }
  0x2f   : > { %10759 = vmatmul.mubr.msk.f32.gmra.mrb[12].mxu1 %vm171_vm1, %v11809_v34 }
  0x30   : > { %10761 = vmatprep.mubr.msk.f32.mxu1 %vm171_vm1, %v11817_v36 }
  0x31   : > { %10712 = vmatmul.mubr.msk.f32.gmra.mrb[14].mxu0 %vm171_vm1, %v11814_v35 }
  0x32   : > { %10714 = vmatprep.mubr.msk.f32.mxu0 %vm171_vm1, %v11820_v37 }
  0x33   : > { %10762 = vmatmul.mubr.msk.f32.gmra.mrb[14].mxu1 %vm171_vm1, %v11829_v38 }
  0x34   : > { %10764 = vmatprep.mubr.msk.f32.mxu1 %vm171_vm1, %v11837_v40 }
  0x35   : > { %10715 = vmatmul.mubr.msk.f32.gmra.mrb[16].mxu0 %vm171_vm1, %v11834_v39 }
  0x36   : > { %10717 = vmatprep.mubr.msk.f32.mxu0 %vm171_vm1, %v11840_v41 }
  0x37   : > { %10765 = vmatmul.mubr.msk.f32.gmra.mrb[16].mxu1 %vm171_vm1, %v11849_v42 }
  0x38   : > { %10767 = vmatprep.mubr.msk.f32.mxu1 %vm171_vm1, %v11857_v44 }
  0x39   : > { %10718 = vmatmul.mubr.msk.f32.gmra.mrb[18].mxu0 %vm171_vm1, %v11854_v43 }
  0x3a   : > { %10720 = vmatprep.mubr.msk.f32.mxu0 %vm171_vm1, %v11860_v45 }
  0x3b   : > { %10768 = vmatmul.mubr.msk.f32.gmra.mrb[18].mxu1 %vm171_vm1, %v11869_v46 }
  0x3c   : > { %10770 = vmatprep.mubr.msk.f32.mxu1 %vm171_vm1, %v11877_v48 }
  0x3d   : > { %10721 = vmatmul.mubr.msk.f32.gmra.mrb[20].mxu0 %vm171_vm1, %v11874_v47 }
  0x3e   : > { %10723 = vmatprep.mubr.msk.f32.mxu0 %vm171_vm1, %v11880_v49 }
  0x3f   : > { %10771 = vmatmul.mubr.msk.f32.gmra.mrb[20].mxu1 %vm171_vm1, %v11889_v50 }
  0x40   : > { %10773 = vmatprep.mubr.msk.f32.mxu1 %vm171_vm1, %v11897_v52 }
  0x41   : > { %10724 = vmatmul.mubr.msk.f32.gmra.mrb[22].mxu0 %vm171_vm1, %v11894_v51 }
  0x42   : > { %10726 = vmatprep.mubr.msk.f32.mxu0 %vm171_vm1, %v11900_v53 }
  0x43   : > { %10774 = vmatmul.mubr.msk.f32.gmra.mrb[22].mxu1 %vm171_vm1, %v11909_v54 }
  0x44   : > { %10776 = vmatprep.mubr.msk.f32.mxu1 %vm171_vm1, %v11917_v56 }
  0x45   : > { %10727 = vmatmul.mubr.msk.f32.gmra.mrb[24].mxu0 %vm171_vm1, %v11914_v55 }
  0x46   : > { %10729 = vmatprep.mubr.msk.f32.mxu0 %vm171_vm1, %v11920_v57 }
  0x47   : > { %10777 = vmatmul.mubr.msk.f32.gmra.mrb[24].mxu1 %vm171_vm1, %v11929_v58 }
  0x48   : > { %10779 = vmatprep.mubr.msk.f32.mxu1 %vm171_vm1, %v11937_v60 }
  0x49   : > { %10730 = vmatmul.mubr.msk.f32.gmra.mrb[26].mxu0 %vm171_vm1, %v11934_v59 }
  0x4a   : > { %10732 = vmatprep.mubr.msk.f32.mxu0 %vm171_vm1, %v11940_v61 }
  0x4b   : > { %10780 = vmatmul.mubr.msk.f32.gmra.mrb[26].mxu1 %vm171_vm1, %v11949_v62 }
  0x4c   : > { %10782 = vmatprep.mubr.msk.f32.mxu1 %vm171_vm1, %v11957_v0  ;;  %v11992_v0 = vld [vmem:[%s11664_s25 + $0x1a] sm:$0xff] }
  0x4d   : > { %10733 = vmatmul.mubr.msk.f32.gmra.mrb[28].mxu0 %vm171_vm1, %v11954_v63 }
  0x4e   : > { %10735 = vmatprep.mubr.msk.f32.mxu0 %vm171_vm1, %v11960_v1 }
  0x4f   : > { %10783 = vmatmul.mubr.msk.f32.gmra.mrb[28].mxu1 %vm171_vm1, %v11969_v2  ;;  %v11999_v2 = vld [vmem:[%s15304_s1 + $0x18] sm:$0xf] }
  0x50   : > { %10785 = vmatprep.mubr.msk.f32.mxu1 %vm171_vm1, %v11977_v4 }
  0x51   : > { %10736 = vmatmul.mubr.msk.f32.gmra.mrb[30].mxu0 %vm171_vm1, %v11974_v3 }
  0x52   : > { %10790 = vmatprep.mubr.msk.f32.mxu0 %vm171_vm1, %v1112_v5  ;;  %v12009_v5 = vld [vmem:[%s11664_s25 + $0x22] sm:$0xff] }
  0x53   : > { %10786 = vmatmul.mubr.msk.f32.gmra.mrb[30].mxu1 %vm171_vm1, %v11987_v8  ;;  %v12012_v8 = vld [vmem:[%s11664_s25 + $0x32] sm:$0xff] }
  0x54   : > { %10840 = vmatprep.mubr.msk.f32.mxu1 %vm171_vm1, %v11669_v6  ;;  %v12021_v6 = vld [vmem:[%s15304_s1 + $0x1c] sm:$0xf] }
  0x55   : > { %10791 = vmatmul.mubr.msk.f32.vlgmr.msra.gmra.mrb[32].mxu0 %vm171_vm1, %v1113_v9  ;;  %v12048_v9 = vld [vmem:[%s11664_s25 + $0x52] sm:$0xff] }
  0x56   : > { %10889 = vmatpush3.msk.msra.mxu0 %vm365_vm0, %v11675_v7  ;;  %10793 = vmatprep.mubr.msk.f32.mxu0 %vm171_vm1, %v11992_v0  ;;  %v12030_v7 = vld [vmem:[%s11664_s25 + $0x3a] sm:$0xff] }
  0x57   : > { %10988 = vmatprep.subr.msk.mxu0 %vm365_vm0, %v11999_v2  ;;  %10841 = vmatmul.mubr.msk.f32.vlgmr.msra.gmra.mrb[32].mxu1 %vm171_vm1, %v11684_v10  ;;  %v12035_v10 = vld [vmem:[%s11664_s25 + $0x4a] sm:$0xff] }
  0x58   : > { %10843 = vmatprep.mubr.msk.f32.mxu1 %vm171_vm1, %v11690_v12  ;;  %10939 = vmatpush3.msk.msra.mxu1 %vm365_vm0, %v11699_v13  ;;  %v12051_v13 = vld [vmem:[%s11664_s25 + $0x62] sm:$0xff] }
  0x59   : > { %10794 = vmatmul.mubr.msk.f32.gmra.mrb[34].mxu0 %vm171_vm1, %v12009_v5  ;;  %11038 = vmatprep.subr.msk.mxu1 %vm365_vm0, %v12021_v6 }
  0x5a   : > { %10796 = vmatprep.mubr.msk.f32.mxu0 %vm171_vm1, %v12012_v8 }
  0x5b   : > { %10844 = vmatmul.mubr.msk.f32.gmra.mrb[34].mxu1 %vm171_vm1, %v11711_v15  ;;  %v15313_v15 = vmov 0.0  }
  0x5c   : > { %10846 = vmatprep.mubr.msk.f32.mxu1 %vm171_vm1, %v11718_v17  ;;  %173 = vst.msk [vmem:[#allocation2 + $0x8] sm:$0xff] %vm171_vm1, %v15313_v15  ;;  %172 = vst.msk [vmem:[#allocation2] sm:$0xff] %vm171_vm1, %v15313_v15  ;;  %v12143_v17 = vld [vmem:[%s11664_s25 + $0x92] sm:$0xff] }
  0x5d   : > { %10797 = vmatmul.mubr.msk.f32.gmra.mrb[36].mxu0 %vm171_vm1, %v12030_v7  ;;  %174 = vst.msk [vmem:[#allocation2 + $0x10] sm:$0xff] %vm171_vm1, %v15313_v15  ;;  %175 = vst.msk [vmem:[#allocation2 + $0x18] sm:$0xff] %vm171_vm1, %v15313_v15 }
  0x5e   : > { %10799 = vmatprep.mubr.msk.f32.mxu0 %vm171_vm1, %v12035_v10  ;;  %176 = vst.msk [vmem:[#allocation2 + $0x20] sm:$0xff] %vm171_vm1, %v15313_v15  ;;  %177 = vst.msk [vmem:[#allocation2 + $0x28] sm:$0xff] %vm171_vm1, %v15313_v15 }
  0x5f   : > { %10847 = vmatmul.mubr.msk.f32.gmra.mrb[36].mxu1 %vm171_vm1, %v11734_v19  ;;  %178 = vst.msk [vmem:[#allocation2 + $0x30] sm:$0xff] %vm171_vm1, %v15313_v15  ;;  %179 = vst.msk [vmem:[#allocation2 + $0x38] sm:$0xff] %vm171_vm1, %v15313_v15  ;;  %v12129_v19 = vld [vmem:[%s11664_s25 + $0x7a] sm:$0xff] }
  0x60   : > { %10849 = vmatprep.mubr.msk.f32.mxu1 %vm171_vm1, %v11740_v21  ;;  %180 = vst.msk [vmem:[#allocation2 + $0x40] sm:$0xff] %vm171_vm1, %v15313_v15  ;;  %181 = vst.msk [vmem:[#allocation2 + $0x48] sm:$0xff] %vm171_vm1, %v15313_v15  ;;  %v12126_v21 = vld [vmem:[%s11664_s25 + $0x6a] sm:$0xff] }
  0x61   : > { %10800 = vmatmul.mubr.msk.f32.gmra.mrb[38].mxu0 %vm171_vm1, %v12048_v9  ;;  %182 = vst.msk [vmem:[#allocation2 + $0x50] sm:$0xff] %vm171_vm1, %v15313_v15  ;;  %183 = vst.msk [vmem:[#allocation2 + $0x58] sm:$0xff] %vm171_vm1, %v15313_v15 }
  0x62   : > { %184 = vst.msk [vmem:[#allocation2 + $0x60] sm:$0xff] %vm171_vm1, %v15313_v15  ;;  %185 = vst.msk [vmem:[#allocation2 + $0x68] sm:$0xff] %vm171_vm1, %v15313_v15  ;;  %10802 = vmatprep.mubr.msk.f32.mxu0 %vm171_vm1, %v12051_v13 }
  0x63   : > { %186 = vst.msk [vmem:[#allocation2 + $0x70] sm:$0xff] %vm171_vm1, %v15313_v15  ;;  %187 = vst.msk [vmem:[#allocation2 + $0x78] sm:$0xff] %vm171_vm1, %v15313_v15  ;;  %10850 = vmatmul.mubr.msk.f32.gmra.mrb[38].mxu1 %vm171_vm1, %v11754_v23  ;;  %v12157_v23 = vld [vmem:[%s11664_s25 + $0xaa] sm:$0xff] }
  0x64   : > { %188 = vst.msk [vmem:[#allocation2 + $0x80] sm:$0xff] %vm171_vm1, %v15313_v15  ;;  %189 = vst.msk [vmem:[#allocation2 + $0x88] sm:$0xff] %vm171_vm1, %v15313_v15  ;;  %10852 = vmatprep.mubr.msk.f32.mxu1 %vm171_vm1, %v11760_v25  ;;  %v12154_v25 = vld [vmem:[%s11664_s25 + $0x9a] sm:$0xff] }
  0x65   : > { %190 = vst.msk [vmem:[#allocation2 + $0x90] sm:$0xff] %vm171_vm1, %v15313_v15  ;;  %191 = vst.msk [vmem:[#allocation2 + $0x98] sm:$0xff] %vm171_vm1, %v15313_v15  ;;  %10803 = vmatmul.mubr.msk.f32.gmra.mrb[40].mxu0 %vm171_vm1, %v12126_v21 }
  0x66   : > { %192 = vst.msk [vmem:[#allocation2 + $0xa0] sm:$0xff] %vm171_vm1, %v15313_v15  ;;  %193 = vst.msk [vmem:[#allocation2 + $0xa8] sm:$0xff] %vm171_vm1, %v15313_v15  ;;  %10805 = vmatprep.mubr.msk.f32.mxu0 %vm171_vm1, %v12129_v19 }
  0x67   : > { %194 = vst.msk [vmem:[#allocation2 + $0xb0] sm:$0xff] %vm171_vm1, %v15313_v15  ;;  %195 = vst.msk [vmem:[#allocation2 + $0xb8] sm:$0xff] %vm171_vm1, %v15313_v15  ;;  %10853 = vmatmul.mubr.msk.f32.gmra.mrb[40].mxu1 %vm171_vm1, %v11774_v27  ;;  %v12171_v27 = vld [vmem:[%s11664_s25 + $0xc2] sm:$0xff] }
  0x68   : > { %196 = vst.msk [vmem:[#allocation2 + $0xc0] sm:$0xff] %vm171_vm1, %v15313_v15  ;;  %197 = vst.msk [vmem:[#allocation2 + $0xc8] sm:$0xff] %vm171_vm1, %v15313_v15  ;;  %10855 = vmatprep.mubr.msk.f32.mxu1 %vm171_vm1, %v11780_v29  ;;  %v12168_v29 = vld [vmem:[%s11664_s25 + $0xb2] sm:$0xff] }
  0x69   : > { %198 = vst.msk [vmem:[#allocation2 + $0xd0] sm:$0xff] %vm171_vm1, %v15313_v15  ;;  %199 = vst.msk [vmem:[#allocation2 + $0xd8] sm:$0xff] %vm171_vm1, %v15313_v15 }
  0x6a   : > { %200 = vst.msk [vmem:[#allocation2 + $0xe0] sm:$0xff] %vm171_vm1, %v15313_v15  ;;  %201 = vst.msk [vmem:[#allocation2 + $0xe8] sm:$0xff] %vm171_vm1, %v15313_v15 }
  0x6b   : > { %202 = vst.msk [vmem:[#allocation2 + $0xf0] sm:$0xff] %vm171_vm1, %v15313_v15  ;;  %203 = vst.msk [vmem:[#allocation2 + $0xf8] sm:$0xff] %vm171_vm1, %v15313_v15  ;;  %v12140_v15 = vld [vmem:[%s11664_s25 + $0x82] sm:$0xff]  ;;  %10856 = vmatmul.mubr.msk.f32.gmra.mrb[42].mxu1 %vm171_vm1, %v11794_v31  ;;  %v12185_v31 = vld [vmem:[%s11664_s25 + $0xda] sm:$0xff] }
  0x6c   : > { %10806 = vmatmul.mubr.msk.f32.gmra.mrb[42].mxu0 %vm171_vm1, %v12140_v15  ;;  %10858 = vmatprep.mubr.msk.f32.mxu1 %vm171_vm1, %v11800_v33  ;;  %v12182_v33 = vld [vmem:[%s11664_s25 + $0xca] sm:$0xff] }
  0x6d   : > { %10808 = vmatprep.mubr.msk.f32.mxu0 %vm171_vm1, %v12143_v17 }
  0x6f   : > { %10859 = vmatmul.mubr.msk.f32.gmra.mrb[44].mxu1 %vm171_vm1, %v11814_v35  ;;  %v12199_v35 = vld [vmem:[%s11664_s25 + $0xf2] sm:$0xff] }
  0x70   : > { %10809 = vmatmul.mubr.msk.f32.gmra.mrb[44].mxu0 %vm171_vm1, %v12154_v25  ;;  %10861 = vmatprep.mubr.msk.f32.mxu1 %vm171_vm1, %v11820_v37  ;;  %v12196_v37 = vld [vmem:[%s11664_s25 + $0xe2] sm:$0xff] }
  0x71   : > { %10811 = vmatprep.mubr.msk.f32.mxu0 %vm171_vm1, %v12157_v23 }
  0x73   : > { %10862 = vmatmul.mubr.msk.f32.gmra.mrb[46].mxu1 %vm171_vm1, %v11834_v39  ;;  %v12213_v39 = vld [vmem:[%s11664_s25 + $0x10a] sm:$0xff] }
  0x74   : > { %10812 = vmatmul.mubr.msk.f32.gmra.mrb[46].mxu0 %vm171_vm1, %v12168_v29  ;;  %10864 = vmatprep.mubr.msk.f32.mxu1 %vm171_vm1, %v11840_v41  ;;  %v12210_v41 = vld [vmem:[%s11664_s25 + $0xfa] sm:$0xff] }
  0x75   : > { %10814 = vmatprep.mubr.msk.f32.mxu0 %vm171_vm1, %v12171_v27 }
  0x77   : > { %10865 = vmatmul.mubr.msk.f32.gmra.mrb[48].mxu1 %vm171_vm1, %v11854_v43  ;;  %v12227_v43 = vld [vmem:[%s11664_s25 + $0x122] sm:$0xff] }
  0x78   : > { %10815 = vmatmul.mubr.msk.f32.gmra.mrb[48].mxu0 %vm171_vm1, %v12182_v33  ;;  %10867 = vmatprep.mubr.msk.f32.mxu1 %vm171_vm1, %v11860_v45  ;;  %v12224_v45 = vld [vmem:[%s11664_s25 + $0x112] sm:$0xff] }
  0x79   : > { %10817 = vmatprep.mubr.msk.f32.mxu0 %vm171_vm1, %v12185_v31 }
  0x7b   : > { %10868 = vmatmul.mubr.msk.f32.gmra.mrb[50].mxu1 %vm171_vm1, %v11874_v47  ;;  %v12241_v47 = vld [vmem:[%s11664_s25 + $0x13a] sm:$0xff] }
  0x7c   : > { %10818 = vmatmul.mubr.msk.f32.gmra.mrb[50].mxu0 %vm171_vm1, %v12196_v37  ;;  %10870 = vmatprep.mubr.msk.f32.mxu1 %vm171_vm1, %v11880_v49  ;;  %v12238_v49 = vld [vmem:[%s11664_s25 + $0x12a] sm:$0xff] }
  0x7d   : > { %10820 = vmatprep.mubr.msk.f32.mxu0 %vm171_vm1, %v12199_v35 }
  0x7f   : > { %10871 = vmatmul.mubr.msk.f32.gmra.mrb[52].mxu1 %vm171_vm1, %v11894_v51  ;;  %v12255_v51 = vld [vmem:[%s11664_s25 + $0x152] sm:$0xff] }
  0x80   : > { %10821 = vmatmul.mubr.msk.f32.gmra.mrb[52].mxu0 %vm171_vm1, %v12210_v41  ;;  %10873 = vmatprep.mubr.msk.f32.mxu1 %vm171_vm1, %v11900_v53  ;;  %v12252_v53 = vld [vmem:[%s11664_s25 + $0x142] sm:$0xff] }
  0x81   : > { %10823 = vmatprep.mubr.msk.f32.mxu0 %vm171_vm1, %v12213_v39 }
  0x83   : > { %10874 = vmatmul.mubr.msk.f32.gmra.mrb[54].mxu1 %vm171_vm1, %v11914_v55  ;;  %v12269_v55 = vld [vmem:[%s11664_s25 + $0x16a] sm:$0xff] }
  0x84   : > { %10824 = vmatmul.mubr.msk.f32.gmra.mrb[54].mxu0 %vm171_vm1, %v12224_v45  ;;  %10876 = vmatprep.mubr.msk.f32.mxu1 %vm171_vm1, %v11920_v57  ;;  %v12266_v57 = vld [vmem:[%s11664_s25 + $0x15a] sm:$0xff] }
  0x85   : > { %10826 = vmatprep.mubr.msk.f32.mxu0 %vm171_vm1, %v12227_v43 }
  0x87   : > { %10877 = vmatmul.mubr.msk.f32.gmra.mrb[56].mxu1 %vm171_vm1, %v11934_v59  ;;  %v12283_v59 = vld [vmem:[%s11664_s25 + $0x180] sm:$0xff] }
  0x88   : > { %10827 = vmatmul.mubr.msk.f32.gmra.mrb[56].mxu0 %vm171_vm1, %v12238_v49  ;;  %10879 = vmatprep.mubr.msk.f32.mxu1 %vm171_vm1, %v11940_v61  ;;  %v12280_v61 = vld [vmem:[%s11664_s25 + $0x172] sm:$0xff] }
  0x89   : > { %10829 = vmatprep.mubr.msk.f32.mxu0 %vm171_vm1, %v12241_v47 }
  0x8b   : > { %10880 = vmatmul.mubr.msk.f32.gmra.mrb[58].mxu1 %vm171_vm1, %v11954_v63  ;;  %v12292_v63 = vld [vmem:[%s11664_s25 + $0x188] sm:$0xff] }
  0x8c   : > { %10830 = vmatmul.mubr.msk.f32.gmra.mrb[58].mxu0 %vm171_vm1, %v12252_v53  ;;  %10882 = vmatprep.mubr.msk.f32.mxu1 %vm171_vm1, %v11960_v1  ;;  %v12301_v1 = vld [vmem:[%s15304_s1 + $0x20] sm:$0xf] }
  0x8d   : > { %10832 = vmatprep.mubr.msk.f32.mxu0 %vm171_vm1, %v12255_v51 }
  0x8f   : > { %10883 = vmatmul.mubr.msk.f32.gmra.mrb[60].mxu1 %vm171_vm1, %v11974_v3  ;;  %v243_v3 = vld [vmem:[#allocation2 + $0x38] sm:$0xff] }
  0x90   : > { %10833 = vmatmul.mubr.msk.f32.gmra.mrb[60].mxu0 %vm171_vm1, %v12266_v57  ;;  %10885 = vmatprep.mubr.msk.f32.mxu1 %vm171_vm1, %v12283_v59 }
  0x91   : > { %10835 = vmatprep.mubr.msk.f32.mxu0 %vm171_vm1, %v12269_v55 }
  0x93   : > { %10886 = vmatmul.mubr.msk.f32.gmra.mrb[62].mxu1 %vm171_vm1, %v12292_v63 }
  0x94   : > { %10836 = vmatmul.mubr.msk.f32.gmra.mrb[62].mxu0 %vm171_vm1, %v12280_v61  ;;  %10940 = vmatprep.mubr.msk.f32.mxu1 %vm171_vm1, %v11992_v0  ;;  %v15387_v0 = vld [vmem:[#allocation18_spill] sm:$0xff] }
  0x95   : > { %10890 = vmatprep.mubr.msk.f32.mxu0 %vm171_vm1, %v11687_v11  ;;  %v15370_v11 = vld [vmem:[#allocation27_spill] sm:$0xff] }
  0x97   : > { %10941 = vmatmul.mubr.msk.f32.vlgmr.msra.gmra.mrb[64].mxu1 %vm171_vm1, %v12009_v5 }
  0x98   : > { %10891 = vmatmul.mubr.msk.f32.vlgmr.msra.gmra.mrb[64].mxu0 %vm171_vm1, %v11706_v14  ;;  %10943 = vmatprep.mubr.msk.f32.mxu1 %vm171_vm1, %v12012_v8  ;;  %v15371_v14 = vld [vmem:[#allocation28_spill] sm:$0xff] }
  0x99   : > { %10989 = vmatpush3.msk.msra.mxu0 %vm365_vm0, %v11999_v2  ;;  %10893 = vmatprep.mubr.msk.f32.mxu0 %vm171_vm1, %v11714_v16 }
  0x9a   : > { %11088 = vmatprep.subr.msk.mxu0 %vm365_vm0, %v12301_v1  ;;  %11039 = vmatpush3.msk.msra.mxu1 %vm365_vm0, %v12021_v6  ;;  %v242_v6 = vld [vmem:[#allocation2 + $0x30] sm:$0xff] }
  0x9b   : > { %10944 = vmatmul.mubr.msk.f32.gmra.mrb[66].mxu1 %vm171_vm1, %v12030_v7 }
  0x9c   : > { %10894 = vmatmul.mubr.msk.f32.gmra.mrb[66].mxu0 %vm171_vm1, %v11729_v18  ;;  %10946 = vmatprep.mubr.msk.f32.mxu1 %vm171_vm1, %v12035_v10 }
  0x9d   : > { %10896 = vmatprep.mubr.msk.f32.mxu0 %vm171_vm1, %v11737_v20 }
  0x9f   : > { %10947 = vmatmul.mubr.msk.f32.gmra.mrb[68].mxu1 %vm171_vm1, %v12048_v9 }
  0xa0   : > { %10897 = vmatmul.mubr.msk.f32.gmra.mrb[68].mxu0 %vm171_vm1, %v11749_v22  ;;  %10949 = vmatprep.mubr.msk.f32.mxu1 %vm171_vm1, %v12051_v13 }
  0xa1   : > { %10899 = vmatprep.mubr.msk.f32.mxu0 %vm171_vm1, %v11757_v24 }
  0xa3   : > { %10950 = vmatmul.mubr.msk.f32.gmra.mrb[70].mxu1 %vm171_vm1, %v12126_v21  ;;  %v9520_v21 = vld [vmem:[%s11664_s25 + $0x182] sm:$0xff] }
  0xa4   : > { %10900 = vmatmul.mubr.msk.f32.gmra.mrb[70].mxu0 %vm171_vm1, %v11769_v26  ;;  %10952 = vmatprep.mubr.msk.f32.mxu1 %vm171_vm1, %v12129_v19  ;;  %v12431_v19 = vld [vmem:[%s11664_s25 + $0x189] sm:$0xff] }
  0xa5   : > { %10902 = vmatprep.mubr.msk.f32.mxu0 %vm171_vm1, %v11777_v28 }
  0xa7   : > { %10953 = vmatmul.mubr.msk.f32.gmra.mrb[72].mxu1 %vm171_vm1, %v12140_v15  ;;  %v12420_v15 = vld [vmem:[%s11664_s25 + $0x181] sm:$0xff] }
  0xa8   : > { %10903 = vmatmul.mubr.msk.f32.gmra.mrb[72].mxu0 %vm171_vm1, %v11789_v30  ;;  %10955 = vmatprep.mubr.msk.f32.mxu1 %vm171_vm1, %v12143_v17  ;;  %v15372_v17 = vld [vmem:[#allocation29_spill] sm:$0xff] }
  0xa9   : > { %10905 = vmatprep.mubr.msk.f32.mxu0 %vm171_vm1, %v11797_v32 }
  0xab   : > { %10956 = vmatmul.mubr.msk.f32.gmra.mrb[74].mxu1 %vm171_vm1, %v12154_v25  ;;  %v15373_v25 = vld [vmem:[#allocation4_spill] sm:$0xff] }
  0xac   : > { %10906 = vmatmul.mubr.msk.f32.gmra.mrb[74].mxu0 %vm171_vm1, %v11809_v34  ;;  %10958 = vmatprep.mubr.msk.f32.mxu1 %vm171_vm1, %v12157_v23  ;;  %v9521_v23 = vld [vmem:[%s11664_s25 + $0x18a] sm:$0xff] }
  0xad   : > { %10908 = vmatprep.mubr.msk.f32.mxu0 %vm171_vm1, %v11817_v36 }
  0xaf   : > { %10959 = vmatmul.mubr.msk.f32.gmra.mrb[76].mxu1 %vm171_vm1, %v12168_v29  ;;  %v15375_v29 = vld [vmem:[#allocation6_spill] sm:$0xff] }
  0xb0   : > { %10909 = vmatmul.mubr.msk.f32.gmra.mrb[76].mxu0 %vm171_vm1, %v11829_v38  ;;  %10961 = vmatprep.mubr.msk.f32.mxu1 %vm171_vm1, %v12171_v27  ;;  %v15374_v27 = vld [vmem:[#allocation5_spill] sm:$0xff] }
  0xb1   : > { %10911 = vmatprep.mubr.msk.f32.mxu0 %vm171_vm1, %v11837_v40 }
  0xb3   : > { %10962 = vmatmul.mubr.msk.f32.gmra.mrb[78].mxu1 %vm171_vm1, %v12182_v33  ;;  %v236_v33 = vld [vmem:[#allocation2] sm:$0xff] }
  0xb4   : > { %10912 = vmatmul.mubr.msk.f32.gmra.mrb[78].mxu0 %vm171_vm1, %v11849_v42  ;;  %10964 = vmatprep.mubr.msk.f32.mxu1 %vm171_vm1, %v12185_v31  ;;  %v15378_v31 = vld [vmem:[#allocation9_spill] sm:$0xff] }
  0xb5   : > { %10914 = vmatprep.mubr.msk.f32.mxu0 %vm171_vm1, %v11857_v44 }
  0xb7   : > { %10965 = vmatmul.mubr.msk.f32.gmra.mrb[80].mxu1 %vm171_vm1, %v12196_v37 }
  0xb8   : > { %10915 = vmatmul.mubr.msk.f32.gmra.mrb[80].mxu0 %vm171_vm1, %v11869_v46  ;;  %10967 = vmatprep.mubr.msk.f32.mxu1 %vm171_vm1, %v12199_v35 }
  0xb9   : > { %10917 = vmatprep.mubr.msk.f32.mxu0 %vm171_vm1, %v11877_v48 }
  0xbb   : > { %10968 = vmatmul.mubr.msk.f32.gmra.mrb[82].mxu1 %vm171_vm1, %v12210_v41  ;;  %v239_v41 = vld [vmem:[#allocation2 + $0x18] sm:$0xff] }
  0xbc   : > { %10918 = vmatmul.mubr.msk.f32.gmra.mrb[82].mxu0 %vm171_vm1, %v11889_v50  ;;  %10970 = vmatprep.mubr.msk.f32.mxu1 %vm171_vm1, %v12213_v39  ;;  %v15383_v39 = vld [vmem:[#allocation14_spill] sm:$0xff] }
  0xbd   : > { %10920 = vmatprep.mubr.msk.f32.mxu0 %vm171_vm1, %v11897_v52 }
  0xbf   : > { %10971 = vmatmul.mubr.msk.f32.gmra.mrb[84].mxu1 %vm171_vm1, %v12224_v45 }
  0xc0   : > { %10921 = vmatmul.mubr.msk.f32.gmra.mrb[84].mxu0 %vm171_vm1, %v11909_v54  ;;  %10973 = vmatprep.mubr.msk.f32.mxu1 %vm171_vm1, %v12227_v43  ;;  %v238_v43 = vld [vmem:[#allocation2 + $0x10] sm:$0xff]  ;;  %v241_v54 = vld [vmem:[#allocation2 + $0x28] sm:$0xff] }
  0xc1   : > { %10923 = vmatprep.mubr.msk.f32.mxu0 %vm171_vm1, %v11917_v56  ;;  %v240_v56 = vld [vmem:[#allocation2 + $0x20] sm:$0xff] }
  0xc3   : > { %10974 = vmatmul.mubr.msk.f32.gmra.mrb[86].mxu1 %vm171_vm1, %v12238_v49 }
  0xc4   : > { %10924 = vmatmul.mubr.msk.f32.gmra.mrb[86].mxu0 %vm171_vm1, %v11929_v58  ;;  %10976 = vmatprep.mubr.msk.f32.mxu1 %vm171_vm1, %v12241_v47 }
  0xc5   : > { %10926 = vmatprep.mubr.msk.f32.mxu0 %vm171_vm1, %v11937_v60 }
  0xc7   : > { %10977 = vmatmul.mubr.msk.f32.gmra.mrb[88].mxu1 %vm171_vm1, %v12252_v53  ;;  %v15385_v53 = vld [vmem:[#allocation16_spill] sm:$0xff] }
  0xc8   : > { %10927 = vmatmul.mubr.msk.f32.gmra.mrb[88].mxu0 %vm171_vm1, %v11949_v62  ;;  %10979 = vmatprep.mubr.msk.f32.mxu1 %vm171_vm1, %v12255_v51 }
  0xc9   : > { %10929 = vmatprep.mubr.msk.f32.mxu0 %vm171_vm1, %v15370_v11 }
  0xcb   : > { %10980 = vmatmul.mubr.msk.f32.gmra.mrb[90].mxu1 %vm171_vm1, %v12266_v57 }
  0xcc   : > { %10930 = vmatmul.mubr.msk.f32.gmra.mrb[90].mxu0 %vm171_vm1, %v15371_v14  ;;  %10982 = vmatprep.mubr.msk.f32.mxu1 %vm171_vm1, %v12269_v55  ;;  %v15386_v55 = vld [vmem:[#allocation17_spill] sm:$0xff]  ;;  %v245_v14 = vld [vmem:[#allocation2 + $0x48] sm:$0xff] }
  0xcd   : > { %10932 = vmatprep.mubr.msk.f32.mxu0 %vm171_vm1, %v11977_v4  ;;  %v15388_v4 = vld [vmem:[#allocation19_spill] sm:$0xff] }
  0xcf   : > { %10983 = vmatmul.mubr.msk.f32.gmra.mrb[92].mxu1 %vm171_vm1, %v12280_v61  ;;  %v15389_v61 = vld [vmem:[#allocation20_spill] sm:$0xff] }
  0xd0   : > { %10933 = vmatmul.mubr.msk.f32.gmra.mrb[92].mxu0 %vm171_vm1, %v15372_v17  ;;  %10985 = vmatprep.mubr.msk.f32.mxu1 %vm171_vm1, %v9520_v21  ;;  %v15390_v17 = vld [vmem:[#allocation21_spill] sm:$0xff] }
  0xd1   : > { %10935 = vmatprep.mubr.msk.f32.mxu0 %vm171_vm1, %v12420_v15 }
  0xd3   : > { %10986 = vmatmul.mubr.msk.f32.gmra.mrb[94].mxu1 %vm171_vm1, %v9521_v23  ;;  %v244_v23 = vld [vmem:[#allocation2 + $0x40] sm:$0xff] }
  0xd4   : > { %10936 = vmatmul.mubr.msk.f32.gmra.mrb[94].mxu0 %vm171_vm1, %v12431_v19  ;;  %11040 = vmatprep.mubr.msk.f32.mxu1 %vm171_vm1, %v11714_v16  ;;  %v15377_v16 = vld [vmem:[#allocation8_spill] sm:$0xff] }
  0xd5   : > { %10990 = vmatprep.mubr.msk.f32.mxu0 %vm171_vm1, %v11690_v12  ;;  %v15376_v12 = vld [vmem:[#allocation7_spill] sm:$0xff] }
  0xd7   : > { %11041 = vmatmul.mubr.msk.f32.vlgmr.msra.gmra.mrb[96].mxu1 %vm171_vm1, %v11729_v18  ;;  %v15379_v18 = vld [vmem:[#allocation10_spill] sm:$0xff] }
  0xd8   : > { %10991 = vmatmul.mubr.msk.f32.vlgmr.msra.gmra.mrb[96].mxu0 %vm171_vm1, %v15373_v25  ;;  %11043 = vmatprep.mubr.msk.f32.mxu1 %vm171_vm1, %v11737_v20  ;;  %v15380_v20 = vld [vmem:[#allocation11_spill] sm:$0xff] }
  0xd9   : > { %11089 = vmatpush3.msk.msra.mxu0 %vm365_vm0, %v12301_v1  ;;  %10993 = vmatprep.mubr.msk.f32.mxu0 %vm171_vm1, %v15374_v27 }
  0xdb   : > { %11044 = vmatmul.mubr.msk.f32.gmra.mrb[98].mxu1 %vm171_vm1, %v11749_v22  ;;  %v15381_v22 = vld [vmem:[#allocation12_spill] sm:$0xff] }
  0xdc   : > { %10994 = vmatmul.mubr.msk.f32.gmra.mrb[98].mxu0 %vm171_vm1, %v15375_v29  ;;  %11046 = vmatprep.mubr.msk.f32.mxu1 %vm171_vm1, %v11757_v24  ;;  %v237_v24 = vld [vmem:[#allocation2 + $0x8] sm:$0xff] }
  0xdd   : > { %10996 = vmatprep.mubr.msk.f32.mxu0 %vm171_vm1, %v15376_v12 }
  0xdf   : > { %11047 = vmatmul.mubr.msk.f32.gmra.mrb[100].mxu1 %vm171_vm1, %v11769_v26  ;;  %v15382_v26 = vld [vmem:[#allocation13_spill] sm:$0xff] }
  0xe0   : > { %10997 = vmatmul.mubr.msk.f32.gmra.mrb[100].mxu0 %vm171_vm1, %v15377_v16  ;;  %11049 = vmatprep.mubr.msk.f32.mxu1 %vm171_vm1, %v11777_v28 }
  0xe1   : > { %10999 = vmatprep.mubr.msk.f32.mxu0 %vm171_vm1, %v15378_v31  ;;  %v15391_v31 = vld [vmem:[#allocation22_spill] sm:$0xff] }
  0xe3   : > { %11050 = vmatmul.mubr.msk.f32.gmra.mrb[102].mxu1 %vm171_vm1, %v11789_v30 }
  0xe4   : > { %11000 = vmatmul.mubr.msk.f32.gmra.mrb[102].mxu0 %vm171_vm1, %v15379_v18  ;;  %11052 = vmatprep.mubr.msk.f32.mxu1 %vm171_vm1, %v11797_v32  ;;  %v15384_v32 = vld [vmem:[#allocation15_spill] sm:$0xff]  ;;  %v9641_v18 = vld [vmem:[%s11664_s25 + $0x111] sm:$0xff] }
  0xe5   : > { %11002 = vmatprep.mubr.msk.f32.mxu0 %vm171_vm1, %v15380_v20 }
  0xe7   : > { %11053 = vmatmul.mubr.msk.f32.gmra.mrb[104].mxu1 %vm171_vm1, %v11809_v34 }
  0xe8   : > { %11003 = vmatmul.mubr.msk.f32.gmra.mrb[104].mxu0 %vm171_vm1, %v15381_v22  ;;  %v10692_v35 = vpop.f32.mrb[0].mxu0  ;;  %11055 = vmatprep.mubr.msk.f32.mxu1 %vm171_vm1, %v11817_v36 }
  0xe9   : > { %11005 = vmatprep.mubr.msk.f32.mxu0 %vm171_vm1, %v15382_v26  ;;  %v595_v28 = vadd.f32 %v10692_v35, %v237_v24  ;;  %v435_v37 = vpop.f32.mrb[1].mxu0  ;;  %v247_v24 = vld [vmem:[#allocation2 + $0x58] sm:$0xff]  ;;  %v15392_v26 = vld [vmem:[#allocation23_spill] sm:$0xff] }
  0xea   : > { %v594_v30 = vadd.f32 %v435_v37, %v236_v33  ;;  %v10742_v45 = vpop.f32.mrb[0].mxu1 }
  0xeb   : > { %627 = vst.msk [vmem:[#allocation2 + $0x8] sm:$0xff] %vm171_vm1, %v595_v28  ;;  %v889_v47 = vpop.f32.mrb[1].mxu1  ;;  %11056 = vmatmul.mubr.msk.f32.gmra.mrb[106].mxu1 %vm171_vm1, %v11829_v38  ;;  %v246_v28 = vld [vmem:[#allocation2 + $0x50] sm:$0xff] }
  0xec   : > { %11006 = vmatmul.mubr.msk.f32.gmra.mrb[106].mxu0 %vm171_vm1, %v15383_v39  ;;  %626 = vst.msk [vmem:[#allocation2] sm:$0xff] %vm171_vm1, %v594_v30  ;;  %v10695_v34 = vpop.f32.mrb[2].mxu0  ;;  %11058 = vmatprep.mubr.msk.f32.mxu1 %vm171_vm1, %v11837_v40 }
  0xed   : > { %11008 = vmatprep.mubr.msk.f32.mxu0 %vm171_vm1, %v15384_v32  ;;  %v597_v49 = vadd.f32 %v10695_v34, %v239_v41  ;;  %v445_v51 = vpop.f32.mrb[3].mxu0 }
  0xee   : > { %v596_v36 = vadd.f32 %v445_v51, %v238_v43  ;;  %v10745_v57 = vpop.f32.mrb[2].mxu1  ;;  %v15393_v43 = vld [vmem:[#allocation24_spill] sm:$0xff]  ;;  %v15394_v51 = vld [vmem:[#allocation25_spill] sm:$0xff] }
  0xef   : > { %629 = vst.msk [vmem:[#allocation2 + $0x18] sm:$0xff] %vm171_vm1, %v597_v49  ;;  %v899_v58 = vpop.f32.mrb[3].mxu1  ;;  %11059 = vmatmul.mubr.msk.f32.gmra.mrb[108].mxu1 %vm171_vm1, %v11849_v42  ;;  %v249_v49 = vld [vmem:[#allocation2 + $0x68] sm:$0xff] }
  0xf0   : > { %11009 = vmatmul.mubr.msk.f32.gmra.mrb[108].mxu0 %vm171_vm1, %v15385_v53  ;;  %628 = vst.msk [vmem:[#allocation2 + $0x10] sm:$0xff] %vm171_vm1, %v596_v36  ;;  %v10698_v38 = vpop.f32.mrb[4].mxu0  ;;  %11061 = vmatprep.mubr.msk.f32.mxu1 %vm171_vm1, %v11857_v44  ;;  %v9644_v53 = vld [vmem:[%s11664_s25 + $0x139] sm:$0xff] }
  0xf1   : > { %11011 = vmatprep.mubr.msk.f32.mxu0 %vm171_vm1, %v15386_v55  ;;  %v599_v60 = vadd.f32 %v10698_v38, %v241_v54  ;;  %v455_v62 = vpop.f32.mrb[5].mxu0  ;;  %v248_v55 = vld [vmem:[#allocation2 + $0x60] sm:$0xff] }
  0xf2   : > { %v598_v40 = vadd.f32 %v455_v62, %v240_v56  ;;  %v691_v2 = vld [vmem:[#allocation2 + $0x8] sm:$0xff]  ;;  %v10748_v42 = vpop.f32.mrb[4].mxu1  ;;  %v9580_v56 = vld [vmem:[%s11664_s25 + $0x150] sm:$0xff] }
  0xf3   : > { %631 = vst.msk [vmem:[#allocation2 + $0x28] sm:$0xff] %vm171_vm1, %v599_v60  ;;  %v1049_v8 = vadd.f32 %v10742_v45, %v691_v2  ;;  %v690_v5 = vld [vmem:[#allocation2] sm:$0xff]  ;;  %v909_v9 = vpop.f32.mrb[5].mxu1  ;;  %11062 = vmatmul.mubr.msk.f32.gmra.mrb[110].mxu1 %vm171_vm1, %v11869_v46  ;;  %v9643_v45 = vld [vmem:[%s11664_s25 + $0x129] sm:$0xff]  ;;  %v251_v2 = vld [vmem:[#allocation2 + $0x78] sm:$0xff] }
  0xf4   : > { %11012 = vmatmul.mubr.msk.f32.gmra.mrb[110].mxu0 %vm171_vm1, %v15387_v0  ;;  %630 = vst.msk [vmem:[#allocation2 + $0x20] sm:$0xff] %vm171_vm1, %v598_v40  ;;  %v1048_v7 = vadd.f32 %v889_v47, %v690_v5  ;;  %v10701_v10 = vpop.f32.mrb[6].mxu0  ;;  %11064 = vmatprep.mubr.msk.f32.mxu1 %vm171_vm1, %v11877_v48  ;;  %v15395_v40 = vld [vmem:[#allocation26_spill] sm:$0xff]  ;;  %v9581_v5 = vld [vmem:[%s11664_s25 + $0x158] sm:$0xff] }
  0xf5   : > { %11014 = vmatprep.mubr.msk.f32.mxu0 %vm171_vm1, %v15388_v4  ;;  %1081 = vst.msk [vmem:[#allocation2 + $0x8] sm:$0xff] %vm171_vm1, %v1049_v8  ;;  %v601_v44 = vadd.f32 %v10701_v10, %v243_v3  ;;  %v465_v13 = vpop.f32.mrb[7].mxu0  ;;  %v9645_v3 = vld [vmem:[%s11664_s25 + $0x141] sm:$0xff]  ;;  %v250_v10 = vld [vmem:[#allocation2 + $0x70] sm:$0xff] }
  0xf6   : > { %1080 = vst.msk [vmem:[#allocation2] sm:$0xff] %vm171_vm1, %v1048_v7  ;;  %v600_v1 = vadd.f32 %v465_v13, %v242_v6  ;;  %v693_v11 = vld [vmem:[#allocation2 + $0x18] sm:$0xff]  ;;  %v10751_v25 = vpop.f32.mrb[6].mxu1 }
  0xf7   : > { %633 = vst.msk [vmem:[#allocation2 + $0x38] sm:$0xff] %vm171_vm1, %v601_v44  ;;  %v1051_v46 = vadd.f32 %v10745_v57, %v693_v11  ;;  %v692_v21 = vld [vmem:[#allocation2 + $0x10] sm:$0xff]  ;;  %v919_v29 = vpop.f32.mrb[7].mxu1  ;;  %11065 = vmatmul.mubr.msk.f32.gmra.mrb[112].mxu1 %vm171_vm1, %v11889_v50  ;;  %v9642_v50 = vld [vmem:[%s11664_s25 + $0x121] sm:$0xff] }
  0xf8   : > { %11015 = vmatmul.mubr.msk.f32.gmra.mrb[112].mxu0 %vm171_vm1, %v15389_v61  ;;  %632 = vst.msk [vmem:[#allocation2 + $0x30] sm:$0xff] %vm171_vm1, %v600_v1  ;;  %v1050_v27 = vadd.f32 %v899_v58, %v692_v21  ;;  %v10704_v48 = vpop.f32.mrb[8].mxu0  ;;  %11067 = vmatprep.mubr.msk.f32.mxu1 %vm171_vm1, %v11897_v52  ;;  %v9646_v6 = vld [vmem:[%s11664_s25 + $0x151] sm:$0xff] }
  0xf9   : > { %11017 = vmatprep.mubr.msk.f32.mxu0 %vm171_vm1, %v15390_v17  ;;  %1083 = vst.msk [vmem:[#allocation2 + $0x18] sm:$0xff] %vm171_vm1, %v1051_v46  ;;  %v603_v12 = vadd.f32 %v10704_v48, %v245_v14  ;;  %v475_v16 = vpop.f32.mrb[9].mxu0  ;;  %v253_v17 = vld [vmem:[#allocation2 + $0x88] sm:$0xff]  ;;  %v9647_v46 = vld [vmem:[%s11664_s25 + $0x159] sm:$0xff] }
  0xfa   : > { %1082 = vst.msk [vmem:[#allocation2 + $0x10] sm:$0xff] %vm171_vm1, %v1050_v27  ;;  %v602_v20 = vadd.f32 %v475_v16, %v244_v23  ;;  %v695_v22 = vld [vmem:[#allocation2 + $0x28] sm:$0xff]  ;;  %v10754_v37 = vpop.f32.mrb[8].mxu1 }
  0xfb   : > { %635 = vst.msk [vmem:[#allocation2 + $0x48] sm:$0xff] %vm171_vm1, %v603_v12  ;;  %v1053_v33 = vadd.f32 %v10748_v42, %v695_v22  ;;  %v694_v35 = vld [vmem:[#allocation2 + $0x20] sm:$0xff]  ;;  %v929_v30 = vpop.f32.mrb[9].mxu1  ;;  %11068 = vmatmul.mubr.msk.f32.gmra.mrb[114].mxu1 %vm171_vm1, %v9641_v18  ;;  %v9648_v27 = vld [vmem:[%s11664_s25 + $0x169] sm:$0xff] }
  0xfc   : > { %11018 = vmatmul.mubr.msk.f32.gmra.mrb[114].mxu0 %vm171_vm1, %v15391_v31  ;;  %634 = vst.msk [vmem:[#allocation2 + $0x40] sm:$0xff] %vm171_vm1, %v602_v20  ;;  %v1052_v52 = vadd.f32 %v909_v9, %v694_v35  ;;  %v10707_v39 = vpop.f32.mrb[10].mxu0  ;;  %11070 = vmatprep.mubr.msk.f32.mxu1 %vm171_vm1, %v9642_v50  ;;  %v9582_v9 = vld [vmem:[%s11664_s25 + $0x168] sm:$0xff]  ;;  %v252_v12 = vld [vmem:[#allocation2 + $0x80] sm:$0xff]  ;;  %v255_v35 = vld [vmem:[#allocation2 + $0x98] sm:$0xff] }
  0xfd   : > { %11020 = vmatprep.mubr.msk.f32.mxu0 %vm171_vm1, %v15392_v26  ;;  %1085 = vst.msk [vmem:[#allocation2 + $0x28] sm:$0xff] %vm171_vm1, %v1053_v33  ;;  %v605_v41 = vadd.f32 %v10707_v39, %v247_v24  ;;  %v485_v32 = vpop.f32.mrb[11].mxu0  ;;  %v9649_v26 = vld [vmem:[%s11664_s25 + $0x171] sm:$0xff] }
  0xfe   : > { %1084 = vst.msk [vmem:[#allocation2 + $0x20] sm:$0xff] %vm171_vm1, %v1052_v52  ;;  %v604_v34 = vadd.f32 %v485_v32, %v246_v28  ;;  %v697_v47 = vld [vmem:[#allocation2 + $0x38] sm:$0xff]  ;;  %v10757_v57 = vpop.f32.mrb[10].mxu1  ;;  %v254_v52 = vld [vmem:[#allocation2 + $0x90] sm:$0xff] }
  0xff   : > { %637 = vst.msk [vmem:[#allocation2 + $0x58] sm:$0xff] %vm171_vm1, %v605_v41  ;;  %v1055_v36 = vadd.f32 %v10751_v25, %v697_v47  ;;  %v696_v54 = vld [vmem:[#allocation2 + $0x30] sm:$0xff]  ;;  %v939_v60 = vpop.f32.mrb[11].mxu1  ;;  %11071 = vmatmul.mubr.msk.f32.gmra.mrb[116].mxu1 %vm171_vm1, %v9643_v45  ;;  %v9586_v39 = vld [vmem:[%s11664_s25 + $0x198] sm:$0xff] }
 0x100   : > { %11021 = vmatmul.mubr.msk.f32.gmra.mrb[116].mxu0 %vm171_vm1, %v15393_v43  ;;  %636 = vst.msk [vmem:[#allocation2 + $0x50] sm:$0xff] %vm171_vm1, %v604_v34  ;;  %v1054_v38 = vadd.f32 %v919_v29, %v696_v54  ;;  %v10710_v58 = vpop.f32.mrb[12].mxu0  ;;  %11073 = vmatprep.mubr.msk.f32.mxu1 %vm171_vm1, %v9644_v53  ;;  %v9583_v25 = vld [vmem:[%s11664_s25 + $0x170] sm:$0xff]  ;;  %v257_v34 = vld [vmem:[#allocation2 + $0xa8] sm:$0xff]  ;;  %v9652_v53 = vld [vmem:[%s11664_s25 + $0x199] sm:$0xff] }
 0x101   : > { %11023 = vmatprep.mubr.msk.f32.mxu0 %vm171_vm1, %v15394_v51  ;;  %1087 = vst.msk [vmem:[#allocation2 + $0x38] sm:$0xff] %vm171_vm1, %v1055_v36  ;;  %v607_v62 = vadd.f32 %v10710_v58, %v249_v49  ;;  %v495_v0 = vpop.f32.mrb[13].mxu0  ;;  %v9587_v51 = vld [vmem:[%s11664_s25 + $0x1a0] sm:$0xff] }
 0x102   : > { %1086 = vst.msk [vmem:[#allocation2 + $0x30] sm:$0xff] %vm171_vm1, %v1054_v38  ;;  %v606_v4 = vadd.f32 %v495_v0, %v248_v55  ;;  %v699_v8 = vld [vmem:[#allocation2 + $0x48] sm:$0xff]  ;;  %v10760_v44 = vpop.f32.mrb[12].mxu1  ;;  %v256_v55 = vld [vmem:[#allocation2 + $0xa0] sm:$0xff] }
 0x103   : > { %639 = vst.msk [vmem:[#allocation2 + $0x68] sm:$0xff] %vm171_vm1, %v607_v62  ;;  %v1057_v42 = vadd.f32 %v10754_v37, %v699_v8  ;;  %v698_v7 = vld [vmem:[#allocation2 + $0x40] sm:$0xff]  ;;  %v949_v1 = vpop.f32.mrb[13].mxu1  ;;  %11074 = vmatmul.mubr.msk.f32.gmra.mrb[118].mxu1 %vm171_vm1, %v9645_v3  ;;  %v258_v8 = vld [vmem:[#allocation2 + $0xb0] sm:$0xff] }
 0x104   : > { %11024 = vmatmul.mubr.msk.f32.gmra.mrb[118].mxu0 %vm171_vm1, %v15395_v40  ;;  %638 = vst.msk [vmem:[#allocation2 + $0x60] sm:$0xff] %vm171_vm1, %v606_v4  ;;  %v1056_v13 = vadd.f32 %v929_v30, %v698_v7  ;;  %v10713_v61 = vpop.f32.mrb[14].mxu0  ;;  %11076 = vmatprep.mubr.msk.f32.mxu1 %vm171_vm1, %v9646_v6  ;;  %v9653_v62 = vld [vmem:[%s11664_s25 + $0x1a1] sm:$0xff] }
 0x105   : > { %11026 = vmatprep.mubr.msk.f32.mxu0 %vm171_vm1, %v9580_v56  ;;  %1089 = vst.msk [vmem:[#allocation2 + $0x48] sm:$0xff] %vm171_vm1, %v1057_v42  ;;  %v609_v11 = vadd.f32 %v10713_v61, %v251_v2  ;;  %v505_v14 = vpop.f32.mrb[15].mxu0  ;;  %v9688_v56 = vld [vmem:[%s11664_s25 + $0x32] sm:$0xff]  ;;  %v9689_v3 = vld [vmem:[%s11664_s25 + $0x3a] sm:$0xff] }
 0x106   : > { %1088 = vst.msk [vmem:[#allocation2 + $0x40] sm:$0xff] %vm171_vm1, %v1056_v13  ;;  %v608_v21 = vadd.f32 %v505_v14, %v250_v10  ;;  %v701_v23 = vld [vmem:[#allocation2 + $0x58] sm:$0xff]  ;;  %v10763_v16 = vpop.f32.mrb[14].mxu1 }
 0x107   : > { %641 = vst.msk [vmem:[#allocation2 + $0x78] sm:$0xff] %vm171_vm1, %v609_v11  ;;  %v1059_v48 = vadd.f32 %v10757_v57, %v701_v23  ;;  %v700_v29 = vld [vmem:[#allocation2 + $0x50] sm:$0xff]  ;;  %v959_v20 = vpop.f32.mrb[15].mxu1  ;;  %11077 = vmatmul.mubr.msk.f32.gmra.mrb[120].mxu1 %vm171_vm1, %v9647_v46  ;;  %v259_v2 = vld [vmem:[#allocation2 + $0xb8] sm:$0xff]  ;;  %v260_v46 = vld [vmem:[#allocation2 + $0xc0] sm:$0xff] }
 0x108   : > { %11027 = vmatmul.mubr.msk.f32.gmra.mrb[120].mxu0 %vm171_vm1, %v9581_v5  ;;  %640 = vst.msk [vmem:[#allocation2 + $0x70] sm:$0xff] %vm171_vm1, %v608_v21  ;;  %v1058_v31 = vadd.f32 %v939_v60, %v700_v29  ;;  %v10716_v18 = vpop.f32.mrb[16].mxu0  ;;  %11079 = vmatprep.mubr.msk.f32.mxu1 %vm171_vm1, %v9648_v27  ;;  %v9690_v5 = vld [vmem:[%s11664_s25 + $0x4a] sm:$0xff]  ;;  %v9691_v11 = vld [vmem:[%s11664_s25 + $0x52] sm:$0xff]  ;;  %v9692_v21 = vld [vmem:[%s11664_s25 + $0x62] sm:$0xff] }
 0x109   : > { %11029 = vmatprep.mubr.msk.f32.mxu0 %vm171_vm1, %v9582_v9  ;;  %1091 = vst.msk [vmem:[#allocation2 + $0x58] sm:$0xff] %vm171_vm1, %v1059_v48  ;;  %v611_v22 = vadd.f32 %v10716_v18, %v253_v17  ;;  %v515_v24 = vpop.f32.mrb[17].mxu0  ;;  %v263_v18 = vld [vmem:[#allocation2 + $0xd8] sm:$0xff] }
 0x10a   : > { %1090 = vst.msk [vmem:[#allocation2 + $0x50] sm:$0xff] %vm171_vm1, %v1058_v31  ;;  %v610_v50 = vadd.f32 %v515_v24, %v252_v12  ;;  %v703_v33 = vld [vmem:[#allocation2 + $0x68] sm:$0xff]  ;;  %v10766_v30 = vpop.f32.mrb[16].mxu1 }
 0x10b   : > { %643 = vst.msk [vmem:[#allocation2 + $0x88] sm:$0xff] %vm171_vm1, %v611_v22  ;;  %v1061_v28 = vadd.f32 %v10760_v44, %v703_v33  ;;  %v702_v37 = vld [vmem:[#allocation2 + $0x60] sm:$0xff]  ;;  %v969_v43 = vpop.f32.mrb[17].mxu1  ;;  %11080 = vmatmul.mubr.msk.f32.gmra.mrb[122].mxu1 %vm171_vm1, %v9649_v26  ;;  %v262_v26 = vld [vmem:[#allocation2 + $0xd0] sm:$0xff] }
 0x10c   : > { %11030 = vmatmul.mubr.msk.f32.gmra.mrb[122].mxu0 %vm171_vm1, %v9583_v25  ;;  %642 = vst.msk [vmem:[#allocation2 + $0x80] sm:$0xff] %vm171_vm1, %v610_v50  ;;  %v1060_v41 = vadd.f32 %v949_v1, %v702_v37  ;;  %v10719_v32 = vpop.f32.mrb[18].mxu0  ;;  %11082 = vmatprep.mubr.msk.f32.mxu1 %vm171_vm1, %v12420_v15  ;;  %v261_v1 = vld [vmem:[#allocation2 + $0xc8] sm:$0xff]  ;;  %v9694_v50 = vld [vmem:[%s11664_s25 + $0x7a] sm:$0xff] }
 0x10d   : > { %11032 = vmatprep.mubr.msk.f32.mxu0 %vm171_vm1, %v12283_v59  ;;  %1093 = vst.msk [vmem:[#allocation2 + $0x68] sm:$0xff] %vm171_vm1, %v1061_v28  ;;  %v613_v59 = vadd.f32 %v10719_v32, %v255_v35  ;;  %v525_v45 = vpop.f32.mrb[19].mxu0  ;;  %v265_v32 = vld [vmem:[#allocation2 + $0xe8] sm:$0xff] }
 0x10e   : > { %1092 = vst.msk [vmem:[#allocation2 + $0x60] sm:$0xff] %vm171_vm1, %v1060_v41  ;;  %v612_v47 = vadd.f32 %v525_v45, %v254_v52  ;;  %v705_v49 = vld [vmem:[#allocation2 + $0x78] sm:$0xff] }
 0x10f   : > { %645 = vst.msk [vmem:[#allocation2 + $0x98] sm:$0xff] %vm171_vm1, %v613_v59  ;;  %v1063_v36 = vadd.f32 %v10763_v16, %v705_v49  ;;  %v704_v54 = vld [vmem:[#allocation2 + $0x70] sm:$0xff]  ;;  %11083 = vmatmul.mubr.msk.f32.gmra.mrb[124].mxu1 %vm171_vm1, %v12431_v19 }
 0x110   : > { %11033 = vmatmul.mubr.msk.f32.gmra.mrb[124].mxu0 %vm171_vm1, %v12292_v63  ;;  %v10769_v63 = vpop.f32.mrb[18].mxu1  ;;  %644 = vst.msk [vmem:[#allocation2 + $0x90] sm:$0xff] %vm171_vm1, %v612_v47  ;;  %v1062_v15 = vadd.f32 %v959_v20, %v704_v54  ;;  %v10722_v57 = vpop.f32.mrb[20].mxu0  ;;  %11085 = vmatprep.mubr.msk.f32.mxu1 %vm171_vm1, %v9652_v53  ;;  %v9693_v20 = vld [vmem:[%s11664_s25 + $0x6a] sm:$0xff]  ;;  %v9696_v47 = vld [vmem:[%s11664_s25 + $0x92] sm:$0xff] }
 0x111   : > { %11035 = vmatprep.mubr.msk.f32.mxu0 %vm171_vm1, %v9586_v39  ;;  %v979_v38 = vpop.f32.mrb[19].mxu1  ;;  %1095 = vst.msk [vmem:[#allocation2 + $0x78] sm:$0xff] %vm171_vm1, %v1063_v36  ;;  %v615_v58 = vadd.f32 %v10722_v57, %v257_v34  ;;  %v535_v60 = vpop.f32.mrb[21].mxu0  ;;  %v264_v34 = vld [vmem:[#allocation2 + $0xe0] sm:$0xff] }
 0x112   : > { %1094 = vst.msk [vmem:[#allocation2 + $0x70] sm:$0xff] %vm171_vm1, %v1062_v15  ;;  %v614_v0 = vadd.f32 %v535_v60, %v256_v55  ;;  %v707_v40 = vld [vmem:[#allocation2 + $0x88] sm:$0xff]  ;;  %v10772_v6 = vpop.f32.mrb[20].mxu1  ;;  %v267_v15 = vld [vmem:[#allocation2 + $0xf8] sm:$0xff]  ;;  %v266_v60 = vld [vmem:[#allocation2 + $0xf0] sm:$0xff] }
 0x113   : > { %647 = vst.msk [vmem:[#allocation2 + $0xa8] sm:$0xff] %vm171_vm1, %v615_v58  ;;  %v1065_v19 = vadd.f32 %v10766_v30, %v707_v40  ;;  %v706_v4 = vld [vmem:[#allocation2 + $0x80] sm:$0xff]  ;;  %v989_v10 = vpop.f32.mrb[21].mxu1  ;;  %11086 = vmatmul.mubr.msk.f32.gmra.mrb[126].mxu1 %vm171_vm1, %v9653_v62  ;;  %v9698_v62 = vld [vmem:[%s11664_s25 + $0xaa] sm:$0xff] }
 0x114   : > { %11036 = vmatmul.mubr.msk.f32.gmra.mrb[126].mxu0 %vm171_vm1, %v9587_v51  ;;  %646 = vst.msk [vmem:[#allocation2 + $0xa0] sm:$0xff] %vm171_vm1, %v614_v0  ;;  %v1064_v42 = vadd.f32 %v969_v43, %v706_v4  ;;  %v10725_v7 = vpop.f32.mrb[22].mxu0  ;;  %v9695_v43 = vld [vmem:[%s11664_s25 + $0x82] sm:$0xff]  ;;  %v9697_v57 = vld [vmem:[%s11664_s25 + $0x9a] sm:$0xff] }
 0x115   : > { %11090 = vmatprep.mubr.msk.f32.mxu0 %vm171_vm1, %v9688_v56  ;;  %1097 = vst.msk [vmem:[#allocation2 + $0x88] sm:$0xff] %vm171_vm1, %v1065_v19  ;;  %v617_v9 = vadd.f32 %v10725_v7, %v259_v2  ;;  %v545_v44 = vpop.f32.mrb[23].mxu0 }
 0x116   : > { %1096 = vst.msk [vmem:[#allocation2 + $0x80] sm:$0xff] %vm171_vm1, %v1064_v42  ;;  %v616_v13 = vadd.f32 %v545_v44, %v258_v8  ;;  %v709_v61 = vld [vmem:[#allocation2 + $0x98] sm:$0xff]  ;;  %v10775_v23 = vpop.f32.mrb[22].mxu1 }
 0x117   : > { %649 = vst.msk [vmem:[#allocation2 + $0xb8] sm:$0xff] %vm171_vm1, %v617_v9  ;;  %v1067_v14 = vadd.f32 %v10769_v63, %v709_v61  ;;  %v708_v17 = vld [vmem:[#allocation2 + $0x90] sm:$0xff]  ;;  %v999_v48 = vpop.f32.mrb[23].mxu1 }
 0x118   : > { %11091 = vmatmul.mubr.msk.f32.vlgmr.msra.gmra.mrb[128].mxu0 %vm171_vm1, %v9689_v3  ;;  %648 = vst.msk [vmem:[#allocation2 + $0xb0] sm:$0xff] %vm171_vm1, %v616_v13  ;;  %v1066_v25 = vadd.f32 %v979_v38, %v708_v17  ;;  %v10728_v27 = vpop.f32.mrb[24].mxu0  ;;  %v1145_v13 = vld [vmem:[#allocation2 + $0x8] sm:$0xff] }
 0x119   : > { %11093 = vmatprep.mubr.msk.f32.mxu0 %vm171_vm1, %v9690_v5  ;;  %1099 = vst.msk [vmem:[#allocation2 + $0x98] sm:$0xff] %vm171_vm1, %v1067_v14  ;;  %v619_v29 = vadd.f32 %v10728_v27, %v261_v1  ;;  %v555_v12 = vpop.f32.mrb[25].mxu0  ;;  %v1144_v14 = vld [vmem:[#allocation2] sm:$0xff] }
 0x11a   : > { %1098 = vst.msk [vmem:[#allocation2 + $0x90] sm:$0xff] %vm171_vm1, %v1066_v25  ;;  %v618_v16 = vadd.f32 %v555_v12, %v260_v46  ;;  %v711_v31 = vld [vmem:[#allocation2 + $0xa8] sm:$0xff]  ;;  %v10778_v33 = vpop.f32.mrb[24].mxu1 }
 0x11b   : > { %651 = vst.msk [vmem:[#allocation2 + $0xc8] sm:$0xff] %vm171_vm1, %v619_v29  ;;  %v1069_v22 = vadd.f32 %v10772_v6, %v711_v31  ;;  %v710_v24 = vld [vmem:[#allocation2 + $0xa0] sm:$0xff]  ;;  %v1009_v37 = vpop.f32.mrb[25].mxu1  ;;  %v9699_v6 = vld [vmem:[%s11664_s25 + $0xb2] sm:$0xff] }
 0x11c   : > { %11094 = vmatmul.mubr.msk.f32.gmra.mrb[130].mxu0 %vm171_vm1, %v9691_v11  ;;  %650 = vst.msk [vmem:[#allocation2 + $0xc0] sm:$0xff] %vm171_vm1, %v618_v16  ;;  %v1068_v35 = vadd.f32 %v989_v10, %v710_v24  ;;  %v10731_v28 = vpop.f32.mrb[26].mxu0  ;;  %v9700_v10 = vld [vmem:[%s11664_s25 + $0xc2] sm:$0xff]  ;;  %v1147_v16 = vld [vmem:[#allocation2 + $0x18] sm:$0xff] }
 0x11d   : > { %11096 = vmatprep.mubr.msk.f32.mxu0 %vm171_vm1, %v9692_v21  ;;  %1101 = vst.msk [vmem:[#allocation2 + $0xa8] sm:$0xff] %vm171_vm1, %v1069_v22  ;;  %v621_v52 = vadd.f32 %v10731_v28, %v263_v18  ;;  %v565_v39 = vpop.f32.mrb[27].mxu0  ;;  %v1146_v22 = vld [vmem:[#allocation2 + $0x10] sm:$0xff] }
 0x11e   : > { %1100 = vst.msk [vmem:[#allocation2 + $0xa0] sm:$0xff] %vm171_vm1, %v1068_v35  ;;  %v620_v30 = vadd.f32 %v565_v39, %v262_v26  ;;  %v713_v41 = vld [vmem:[#allocation2 + $0xb8] sm:$0xff]  ;;  %v10781_v49 = vpop.f32.mrb[26].mxu1 }
 0x11f   : > { %653 = vst.msk [vmem:[#allocation2 + $0xd8] sm:$0xff] %vm171_vm1, %v621_v52  ;;  %v1071_v59 = vadd.f32 %v10775_v23, %v713_v41  ;;  %v712_v45 = vld [vmem:[#allocation2 + $0xb0] sm:$0xff]  ;;  %v1019_v36 = vpop.f32.mrb[27].mxu1 }
 0x120   : > { %11097 = vmatmul.mubr.msk.f32.gmra.mrb[132].mxu0 %vm171_vm1, %v9693_v20  ;;  %652 = vst.msk [vmem:[#allocation2 + $0xd0] sm:$0xff] %vm171_vm1, %v620_v30  ;;  %v1070_v51 = vadd.f32 %v999_v48, %v712_v45  ;;  %v10734_v53 = vpop.f32.mrb[28].mxu0  ;;  %v9701_v23 = vld [vmem:[%s11664_s25 + $0xca] sm:$0xff]  ;;  %v9702_v48 = vld [vmem:[%s11664_s25 + $0xda] sm:$0xff] }
 0x121   : > { %11099 = vmatprep.mubr.msk.f32.mxu0 %vm171_vm1, %v9694_v50  ;;  %1103 = vst.msk [vmem:[#allocation2 + $0xb8] sm:$0xff] %vm171_vm1, %v1071_v59  ;;  %v623_v54 = vadd.f32 %v10734_v53, %v265_v32  ;;  %v575_v55 = vpop.f32.mrb[29].mxu0  ;;  %v1149_v30 = vld [vmem:[#allocation2 + $0x28] sm:$0xff]  ;;  %v1148_v59 = vld [vmem:[#allocation2 + $0x20] sm:$0xff] }
 0x122   : > { %1102 = vst.msk [vmem:[#allocation2 + $0xb0] sm:$0xff] %vm171_vm1, %v1070_v51  ;;  %v622_v56 = vadd.f32 %v575_v55, %v264_v34  ;;  %v715_v63 = vld [vmem:[#allocation2 + $0xc8] sm:$0xff]  ;;  %v10784_v0 = vpop.f32.mrb[28].mxu1 }
 0x123   : > { %655 = vst.msk [vmem:[#allocation2 + $0xe8] sm:$0xff] %vm171_vm1, %v623_v54  ;;  %v1073_v38 = vadd.f32 %v10778_v33, %v715_v63  ;;  %v714_v58 = vld [vmem:[#allocation2 + $0xc0] sm:$0xff]  ;;  %v1029_v3 = vpop.f32.mrb[29].mxu1 }
 0x124   : > { %11100 = vmatmul.mubr.msk.f32.gmra.mrb[134].mxu0 %vm171_vm1, %v9695_v43  ;;  %654 = vst.msk [vmem:[#allocation2 + $0xe0] sm:$0xff] %vm171_vm1, %v622_v56  ;;  %v1072_v40 = vadd.f32 %v1009_v37, %v714_v58  ;;  %v10737_v2 = vpop.f32.mrb[30].mxu0  ;;  %v9703_v33 = vld [vmem:[%s11664_s25 + $0xe2] sm:$0xff]  ;;  %v9704_v37 = vld [vmem:[%s11664_s25 + $0xf2] sm:$0xff] }
 0x125   : > { %11102 = vmatprep.mubr.msk.f32.mxu0 %vm171_vm1, %v9696_v47  ;;  %1105 = vst.msk [vmem:[#allocation2 + $0xc8] sm:$0xff] %vm171_vm1, %v1073_v38  ;;  %v625_v19 = vadd.f32 %v10737_v2, %v267_v15  ;;  %v585_v4 = vpop.f32.mrb[31].mxu0  ;;  %v1151_v56 = vld [vmem:[#allocation2 + $0x38] sm:$0xff]  ;;  %v1150_v38 = vld [vmem:[#allocation2 + $0x30] sm:$0xff] }
 0x126   : > { %1104 = vst.msk [vmem:[#allocation2 + $0xc0] sm:$0xff] %vm171_vm1, %v1072_v40  ;;  %v624_v8 = vadd.f32 %v585_v4, %v266_v60  ;;  %v717_v5 = vld [vmem:[#allocation2 + $0xd8] sm:$0xff]  ;;  %v10787_v9 = vpop.f32.mrb[30].mxu1 }
 0x127   : > { %657 = vst.msk [vmem:[#allocation2 + $0xf8] sm:$0xff] %vm171_vm1, %v625_v19  ;;  %v1075_v42 = vadd.f32 %v10781_v49, %v717_v5  ;;  %v716_v7 = vld [vmem:[#allocation2 + $0xd0] sm:$0xff]  ;;  %v1039_v1 = vpop.f32.mrb[31].mxu1  ;;  %v9705_v49 = vld [vmem:[%s11664_s25 + $0xfa] sm:$0xff] }
 0x128   : > { %11103 = vmatmul.mubr.msk.f32.gmra.mrb[136].mxu0 %vm171_vm1, %v9697_v57  ;;  %656 = vst.msk [vmem:[#allocation2 + $0xf0] sm:$0xff] %vm171_vm1, %v624_v8  ;;  %v1074_v44 = vadd.f32 %v1019_v36, %v716_v7  ;;  %v10792_v61 = vpop.f32.mrb[32].mxu0  ;;  %v9706_v36 = vld [vmem:[%s11664_s25 + $0x10a] sm:$0xff]  ;;  %v1152_v7 = vld [vmem:[#allocation2 + $0x40] sm:$0xff] }
 0x129   : > { %11105 = vmatprep.mubr.msk.f32.mxu0 %vm171_vm1, %v9698_v62  ;;  %1107 = vst.msk [vmem:[#allocation2 + $0xd8] sm:$0xff] %vm171_vm1, %v1075_v42  ;;  %v1503_v11 = vadd.f32 %v10792_v61, %v1145_v13  ;;  %v1343_v17 = vpop.f32.mrb[33].mxu0  ;;  %v1153_v8 = vld [vmem:[#allocation2 + $0x48] sm:$0xff] }
 0x12a   : > { %1106 = vst.msk [vmem:[#allocation2 + $0xd0] sm:$0xff] %vm171_vm1, %v1074_v44  ;;  %v1502_v46 = vadd.f32 %v1343_v17, %v1144_v14  ;;  %v719_v21 = vld [vmem:[#allocation2 + $0xe8] sm:$0xff]  ;;  %v10842_v29 = vpop.f32.mrb[32].mxu1 }
 0x12b   : > { %1535 = vst.msk [vmem:[#allocation2 + $0x8] sm:$0xff] %vm171_vm1, %v1503_v11  ;;  %v1077_v25 = vadd.f32 %v10784_v0, %v719_v21  ;;  %v718_v27 = vld [vmem:[#allocation2 + $0xe0] sm:$0xff]  ;;  %v1798_v18 = vpop.f32.mrb[33].mxu1  ;;  %v9707_v0 = vld [vmem:[%s11664_s25 + $0x112] sm:$0xff]  ;;  %v9709_v13 = vld [vmem:[%s11664_s25 + $0x12a] sm:$0xff] }
 0x12c   : > { %11106 = vmatmul.mubr.msk.f32.gmra.mrb[138].mxu0 %vm171_vm1, %v9699_v6  ;;  %1534 = vst.msk [vmem:[#allocation2] sm:$0xff] %vm171_vm1, %v1502_v46  ;;  %v1076_v12 = vadd.f32 %v1029_v3, %v718_v27  ;;  %v10795_v31 = vpop.f32.mrb[34].mxu0  ;;  %v9708_v3 = vld [vmem:[%s11664_s25 + $0x122] sm:$0xff]  ;;  %v9710_v11 = vld [vmem:[%s11664_s25 + $0x13a] sm:$0xff]  ;;  %v1154_v27 = vld [vmem:[#allocation2 + $0x50] sm:$0xff] }
 0x12d   : > { %11108 = vmatprep.mubr.msk.f32.mxu0 %vm171_vm1, %v9700_v10  ;;  %1109 = vst.msk [vmem:[#allocation2 + $0xe8] sm:$0xff] %vm171_vm1, %v1077_v25  ;;  %v1505_v20 = vadd.f32 %v10795_v31, %v1147_v16  ;;  %v1353_v24 = vpop.f32.mrb[35].mxu0  ;;  %v1155_v46 = vld [vmem:[#allocation2 + $0x58] sm:$0xff]  ;;  %v9711_v16 = vld [vmem:[%s11664_s25 + $0x142] sm:$0xff] }
 0x12e   : > { %1108 = vst.msk [vmem:[#allocation2 + $0xe0] sm:$0xff] %vm171_vm1, %v1076_v12  ;;  %v1504_v26 = vadd.f32 %v1353_v24, %v1146_v22  ;;  %v721_v50 = vld [vmem:[#allocation2 + $0xf8] sm:$0xff]  ;;  %v10845_v52 = vpop.f32.mrb[34].mxu1 }
 0x12f   : > { %1537 = vst.msk [vmem:[#allocation2 + $0x18] sm:$0xff] %vm171_vm1, %v1505_v20  ;;  %v1079_v35 = vadd.f32 %v10787_v9, %v721_v50  ;;  %v720_v28 = vld [vmem:[#allocation2 + $0xf0] sm:$0xff]  ;;  %v1808_v32 = vpop.f32.mrb[35].mxu1 }
 0x130   : > { %11109 = vmatmul.mubr.msk.f32.gmra.mrb[140].mxu0 %vm171_vm1, %v9701_v23  ;;  %1536 = vst.msk [vmem:[#allocation2 + $0x10] sm:$0xff] %vm171_vm1, %v1504_v26  ;;  %v1078_v39 = vadd.f32 %v1039_v1, %v720_v28  ;;  %v10798_v41 = vpop.f32.mrb[36].mxu0  ;;  %v9712_v20 = vld [vmem:[%s11664_s25 + $0x152] sm:$0xff]  ;;  %v1157_v26 = vld [vmem:[#allocation2 + $0x68] sm:$0xff]  ;;  %v1156_v28 = vld [vmem:[#allocation2 + $0x60] sm:$0xff] }
 0x131   : > { %11111 = vmatprep.mubr.msk.f32.mxu0 %vm171_vm1, %v9702_v48  ;;  %1111 = vst.msk [vmem:[#allocation2 + $0xf8] sm:$0xff] %vm171_vm1, %v1079_v35  ;;  %v1507_v43 = vadd.f32 %v10798_v41, %v1149_v30  ;;  %v1363_v45 = vpop.f32.mrb[37].mxu0  ;;  %v9713_v30 = vld [vmem:[%s11664_s25 + $0x15a] sm:$0xff] }
 0x132   : > { %1110 = vst.msk [vmem:[#allocation2 + $0xf0] sm:$0xff] %vm171_vm1, %v1078_v39  ;;  %v1506_v34 = vadd.f32 %v1363_v45, %v1148_v59  ;;  %v1600_v47 = vld [vmem:[#allocation2 + $0x8] sm:$0xff]  ;;  %v10848_v54 = vpop.f32.mrb[36].mxu1 }
 0x133   : > { %1539 = vst.msk [vmem:[#allocation2 + $0x28] sm:$0xff] %vm171_vm1, %v1507_v43  ;;  %v1958_v51 = vadd.f32 %v10842_v29, %v1600_v47  ;;  %v1599_v53 = vld [vmem:[#allocation2] sm:$0xff]  ;;  %v1818_v15 = vpop.f32.mrb[37].mxu1  ;;  %v9714_v43 = vld [vmem:[%s11664_s25 + $0x16a] sm:$0xff] }
 0x134   : > { %11112 = vmatmul.mubr.msk.f32.gmra.mrb[142].mxu0 %vm171_vm1, %v9703_v33  ;;  %1538 = vst.msk [vmem:[#allocation2 + $0x20] sm:$0xff] %vm171_vm1, %v1506_v34  ;;  %v1957_v55 = vadd.f32 %v1798_v18, %v1599_v53  ;;  %v10801_v63 = vpop.f32.mrb[38].mxu0  ;;  %v1159_v34 = vld [vmem:[#allocation2 + $0x78] sm:$0xff]  ;;  %v1158_v53 = vld [vmem:[#allocation2 + $0x70] sm:$0xff] }
 0x135   : > { %11114 = vmatprep.mubr.msk.f32.mxu0 %vm171_vm1, %v9704_v37  ;;  %1990 = vst.msk [vmem:[#allocation2 + $0x8] sm:$0xff] %vm171_vm1, %v1958_v51  ;;  %v1509_v57 = vadd.f32 %v10801_v63, %v1151_v56  ;;  %v1373_v58 = vpop.f32.mrb[39].mxu0  ;;  %v9715_v56 = vld [vmem:[%s11664_s25 + $0x172] sm:$0xff] }
 0x136   : > { %1989 = vst.msk [vmem:[#allocation2] sm:$0xff] %vm171_vm1, %v1957_v55  ;;  %v1508_v60 = vadd.f32 %v1373_v58, %v1150_v38  ;;  %v1602_v62 = vld [vmem:[#allocation2 + $0x18] sm:$0xff]  ;;  %v10851_v19 = vpop.f32.mrb[38].mxu1 }
 0x137   : > { %1541 = vst.msk [vmem:[#allocation2 + $0x38] sm:$0xff] %vm171_vm1, %v1509_v57  ;;  %v1960_v40 = vadd.f32 %v10845_v52, %v1602_v62  ;;  %v1601_v2 = vld [vmem:[#allocation2 + $0x10] sm:$0xff]  ;;  %v1828_v6 = vpop.f32.mrb[39].mxu1  ;;  %v9716_v57 = vld [vmem:[%s11664_s25 + $0x182] sm:$0xff] }
 0x138   : > { %11115 = vmatmul.mubr.msk.f32.gmra.mrb[144].mxu0 %vm171_vm1, %v9705_v49  ;;  %1540 = vst.msk [vmem:[#allocation2 + $0x30] sm:$0xff] %vm171_vm1, %v1508_v60  ;;  %v1959_v4 = vadd.f32 %v1808_v32, %v1601_v2  ;;  %v10804_v5 = vpop.f32.mrb[40].mxu0  ;;  %v1161_v60 = vld [vmem:[#allocation2 + $0x88] sm:$0xff]  ;;  %v1160_v2 = vld [vmem:[#allocation2 + $0x80] sm:$0xff] }
 0x139   : > { %11117 = vmatprep.mubr.msk.f32.mxu0 %vm171_vm1, %v9706_v36  ;;  %1992 = vst.msk [vmem:[#allocation2 + $0x18] sm:$0xff] %vm171_vm1, %v1960_v40  ;;  %v1511_v42 = vadd.f32 %v10804_v5, %v1153_v8  ;;  %v1383_v10 = vpop.f32.mrb[41].mxu0  ;;  %v9717_v8 = vld [vmem:[%s11664_s25 + $0x18a] sm:$0xff] }
 0x13a   : > { %1991 = vst.msk [vmem:[#allocation2 + $0x10] sm:$0xff] %vm171_vm1, %v1959_v4  ;;  %v1510_v9 = vadd.f32 %v1383_v10, %v1152_v7  ;;  %v1604_v44 = vld [vmem:[#allocation2 + $0x28] sm:$0xff]  ;;  %v10854_v14 = vpop.f32.mrb[40].mxu1 }
 0x13b   : > { %1543 = vst.msk [vmem:[#allocation2 + $0x48] sm:$0xff] %vm171_vm1, %v1511_v42  ;;  %v1962_v61 = vadd.f32 %v10848_v54, %v1604_v44  ;;  %v1603_v1 = vld [vmem:[#allocation2 + $0x20] sm:$0xff]  ;;  %v1838_v23 = vpop.f32.mrb[41].mxu1 }
 0x13c   : > { %11118 = vmatmul.mubr.msk.f32.gmra.mrb[146].mxu0 %vm171_vm1, %v9707_v0  ;;  %1542 = vst.msk [vmem:[#allocation2 + $0x40] sm:$0xff] %vm171_vm1, %v1510_v9  ;;  %v1961_v17 = vadd.f32 %v1818_v15, %v1603_v1  ;;  %v9718_v42 = vld [vmem:[%s11664_s25 + $0x19a] sm:$0xff]  ;;  %v1162_v1 = vld [vmem:[#allocation2 + $0x90] sm:$0xff] }
 0x13d   : > { %11120 = vmatprep.mubr.msk.f32.mxu0 %vm171_vm1, %v9708_v3  ;;  %1994 = vst.msk [vmem:[#allocation2 + $0x28] sm:$0xff] %vm171_vm1, %v1962_v61  ;;  %v1163_v9 = vld [vmem:[#allocation2 + $0x98] sm:$0xff] }
 0x13e   : > { %1993 = vst.msk [vmem:[#allocation2 + $0x20] sm:$0xff] %vm171_vm1, %v1961_v17  ;;  %v1606_v12 = vld [vmem:[#allocation2 + $0x38] sm:$0xff]  ;;  %v10857_v22 = vpop.f32.mrb[42].mxu1 }
 0x13f   : > { %v10807_v21 = vpop.f32.mrb[42].mxu0  ;;  %v1964_v31 = vadd.f32 %v10851_v19, %v1606_v12  ;;  %v1605_v18 = vld [vmem:[#allocation2 + $0x30] sm:$0xff]  ;;  %v1848_v33 = vpop.f32.mrb[43].mxu1 }
 0x140   : > { %v1513_v25 = vadd.f32 %v10807_v21, %v1155_v46  ;;  %v1393_v48 = vpop.f32.mrb[43].mxu0  ;;  %11121 = vmatmul.mubr.msk.f32.gmra.mrb[148].mxu0 %vm171_vm1, %v9709_v13  ;;  %v1963_v24 = vadd.f32 %v1828_v6, %v1605_v18  ;;  %v9719_v46 = vld [vmem:[%s11664_s25 + $0x1a2] sm:$0xff] }
 0x141   : > { %v1512_v29 = vadd.f32 %v1393_v48, %v1154_v27  ;;  %11123 = vmatprep.mubr.msk.f32.mxu0 %vm171_vm1, %v9710_v11  ;;  %1996 = vst.msk [vmem:[#allocation2 + $0x38] sm:$0xff] %vm171_vm1, %v1964_v31  ;;  %v1165_v48 = vld [vmem:[#allocation2 + $0xa8] sm:$0xff]  ;;  %v1164_v31 = vld [vmem:[#allocation2 + $0xa0] sm:$0xff] }
 0x142   : > { %1545 = vst.msk [vmem:[#allocation2 + $0x58] sm:$0xff] %vm171_vm1, %v1513_v25  ;;  %1995 = vst.msk [vmem:[#allocation2 + $0x30] sm:$0xff] %vm171_vm1, %v1963_v24  ;;  %v1608_v39 = vld [vmem:[#allocation2 + $0x48] sm:$0xff]  ;;  %v10860_v59 = vpop.f32.mrb[44].mxu1 }
 0x143   : > { %1544 = vst.msk [vmem:[#allocation2 + $0x50] sm:$0xff] %vm171_vm1, %v1512_v29  ;;  %v10810_v50 = vpop.f32.mrb[44].mxu0  ;;  %v1966_v41 = vadd.f32 %v10854_v14, %v1608_v39  ;;  %v1607_v32 = vld [vmem:[#allocation2 + $0x40] sm:$0xff]  ;;  %v1858_v49 = vpop.f32.mrb[45].mxu1  ;;  %v1166_v39 = vld [vmem:[#allocation2 + $0xb0] sm:$0xff] }
 0x144   : > { %v1515_v35 = vadd.f32 %v10810_v50, %v1157_v26  ;;  %v1403_v37 = vpop.f32.mrb[45].mxu0  ;;  %11124 = vmatmul.mubr.msk.f32.gmra.mrb[150].mxu0 %vm171_vm1, %v9711_v16  ;;  %v1965_v45 = vadd.f32 %v1838_v23, %v1607_v32 }
 0x145   : > { %v1514_v52 = vadd.f32 %v1403_v37, %v1156_v28  ;;  %11126 = vmatprep.mubr.msk.f32.mxu0 %vm171_vm1, %v9712_v20  ;;  %1998 = vst.msk [vmem:[#allocation2 + $0x48] sm:$0xff] %vm171_vm1, %v1966_v41 }
 0x146   : > { %1547 = vst.msk [vmem:[#allocation2 + $0x68] sm:$0xff] %vm171_vm1, %v1515_v35  ;;  %1997 = vst.msk [vmem:[#allocation2 + $0x40] sm:$0xff] %vm171_vm1, %v1965_v45  ;;  %v10863_v38 = vpop.f32.mrb[46].mxu1  ;;  %v1167_v35 = vld [vmem:[#allocation2 + $0xb8] sm:$0xff] }
 0x147   : > { %1546 = vst.msk [vmem:[#allocation2 + $0x60] sm:$0xff] %vm171_vm1, %v1514_v52  ;;  %v10813_v47 = vpop.f32.mrb[46].mxu0  ;;  %v1868_v0 = vpop.f32.mrb[47].mxu1 }
 0x148   : > { %v1517_v51 = vadd.f32 %v10813_v47, %v1159_v34  ;;  %v1413_v36 = vpop.f32.mrb[47].mxu0  ;;  %11127 = vmatmul.mubr.msk.f32.gmra.mrb[152].mxu0 %vm171_vm1, %v9713_v30  ;;  %v1169_v47 = vld [vmem:[#allocation2 + $0xc8] sm:$0xff] }
 0x149   : > { %v1516_v54 = vadd.f32 %v1413_v36, %v1158_v53  ;;  %v1610_v55 = vld [vmem:[#allocation2 + $0x58] sm:$0xff]  ;;  %11129 = vmatprep.mubr.msk.f32.mxu0 %vm171_vm1, %v9714_v43  ;;  %v1168_v36 = vld [vmem:[#allocation2 + $0xc0] sm:$0xff] }
 0x14a   : > { %1549 = vst.msk [vmem:[#allocation2 + $0x78] sm:$0xff] %vm171_vm1, %v1517_v51  ;;  %v1968_v63 = vadd.f32 %v10857_v22, %v1610_v55  ;;  %v1609_v15 = vld [vmem:[#allocation2 + $0x50] sm:$0xff]  ;;  %v10866_v7 = vpop.f32.mrb[48].mxu1 }
 0x14b   : > { %1548 = vst.msk [vmem:[#allocation2 + $0x70] sm:$0xff] %vm171_vm1, %v1516_v54  ;;  %v1967_v58 = vadd.f32 %v1848_v33, %v1609_v15  ;;  %v10816_v62 = vpop.f32.mrb[48].mxu0  ;;  %v1878_v13 = vpop.f32.mrb[49].mxu1 }
 0x14c   : > { %2000 = vst.msk [vmem:[#allocation2 + $0x58] sm:$0xff] %vm171_vm1, %v1968_v63  ;;  %v1519_v40 = vadd.f32 %v10816_v62, %v1161_v60  ;;  %v1423_v3 = vpop.f32.mrb[49].mxu0  ;;  %11130 = vmatmul.mubr.msk.f32.gmra.mrb[154].mxu0 %vm171_vm1, %v9715_v56 }
 0x14d   : > { %1999 = vst.msk [vmem:[#allocation2 + $0x50] sm:$0xff] %vm171_vm1, %v1967_v58  ;;  %v1518_v19 = vadd.f32 %v1423_v3, %v1160_v2  ;;  %v1612_v4 = vld [vmem:[#allocation2 + $0x68] sm:$0xff]  ;;  %11132 = vmatprep.mubr.msk.f32.mxu0 %vm171_vm1, %v9716_v57  ;;  %v1171_v58 = vld [vmem:[#allocation2 + $0xd8] sm:$0xff] }
 0x14e   : > { %1551 = vst.msk [vmem:[#allocation2 + $0x88] sm:$0xff] %vm171_vm1, %v1519_v40  ;;  %v1970_v5 = vadd.f32 %v10860_v59, %v1612_v4  ;;  %v1611_v6 = vld [vmem:[#allocation2 + $0x60] sm:$0xff]  ;;  %v10869_v25 = vpop.f32.mrb[50].mxu1  ;;  %v1170_v40 = vld [vmem:[#allocation2 + $0xd0] sm:$0xff] }
 0x14f   : > { %1550 = vst.msk [vmem:[#allocation2 + $0x80] sm:$0xff] %vm171_vm1, %v1518_v19  ;;  %v1969_v10 = vadd.f32 %v1858_v49, %v1611_v6  ;;  %v10819_v44 = vpop.f32.mrb[50].mxu0  ;;  %v1888_v12 = vpop.f32.mrb[51].mxu1 }
 0x150   : > { %2002 = vst.msk [vmem:[#allocation2 + $0x68] sm:$0xff] %vm171_vm1, %v1970_v5  ;;  %v1521_v61 = vadd.f32 %v10819_v44, %v1163_v9  ;;  %v1433_v11 = vpop.f32.mrb[51].mxu0  ;;  %11133 = vmatmul.mubr.msk.f32.gmra.mrb[156].mxu0 %vm171_vm1, %v9717_v8  ;;  %v1172_v44 = vld [vmem:[#allocation2 + $0xe0] sm:$0xff] }
 0x151   : > { %2001 = vst.msk [vmem:[#allocation2 + $0x60] sm:$0xff] %vm171_vm1, %v1969_v10  ;;  %v1520_v14 = vadd.f32 %v1433_v11, %v1162_v1  ;;  %v1614_v17 = vld [vmem:[#allocation2 + $0x78] sm:$0xff]  ;;  %11135 = vmatprep.mubr.msk.f32.mxu0 %vm171_vm1, %v9718_v42  ;;  %v1173_v42 = vld [vmem:[#allocation2 + $0xe8] sm:$0xff] }
 0x152   : > { %1553 = vst.msk [vmem:[#allocation2 + $0x98] sm:$0xff] %vm171_vm1, %v1521_v61  ;;  %v1972_v21 = vadd.f32 %v10863_v38, %v1614_v17  ;;  %v1613_v23 = vld [vmem:[#allocation2 + $0x70] sm:$0xff]  ;;  %v10872_v50 = vpop.f32.mrb[52].mxu1 }
 0x153   : > { %1552 = vst.msk [vmem:[#allocation2 + $0x90] sm:$0xff] %vm171_vm1, %v1520_v14  ;;  %v1971_v27 = vadd.f32 %v1868_v0, %v1613_v23  ;;  %v10822_v29 = vpop.f32.mrb[52].mxu0  ;;  %v1898_v37 = vpop.f32.mrb[53].mxu1 }
 0x154   : > { %2004 = vst.msk [vmem:[#allocation2 + $0x78] sm:$0xff] %vm171_vm1, %v1972_v21  ;;  %v1523_v16 = vadd.f32 %v10822_v29, %v1165_v48  ;;  %v1443_v18 = vpop.f32.mrb[53].mxu0  ;;  %11136 = vmatmul.mubr.msk.f32.gmra.mrb[158].mxu0 %vm171_vm1, %v9719_v46  ;;  %v1175_v21 = vld [vmem:[#allocation2 + $0xf8] sm:$0xff]  ;;  %v1174_v48 = vld [vmem:[#allocation2 + $0xf0] sm:$0xff] }
 0x155   : > { %2003 = vst.msk [vmem:[#allocation2 + $0x70] sm:$0xff] %vm171_vm1, %v1971_v27  ;;  %v1522_v20 = vadd.f32 %v1443_v18, %v1164_v31  ;;  %v1616_v22 = vld [vmem:[#allocation2 + $0x88] sm:$0xff] }
 0x156   : > { %1555 = vst.msk [vmem:[#allocation2 + $0xa8] sm:$0xff] %vm171_vm1, %v1523_v16  ;;  %v1974_v24 = vadd.f32 %v10866_v7, %v1616_v22  ;;  %v1615_v26 = vld [vmem:[#allocation2 + $0x80] sm:$0xff]  ;;  %v10875_v45 = vpop.f32.mrb[54].mxu1 }
 0x157   : > { %1554 = vst.msk [vmem:[#allocation2 + $0xa0] sm:$0xff] %vm171_vm1, %v1522_v20  ;;  %v1973_v33 = vadd.f32 %v1878_v13, %v1615_v26  ;;  %v10825_v28 = vpop.f32.mrb[54].mxu0  ;;  %v1908_v51 = vpop.f32.mrb[55].mxu1 }
 0x158   : > { %2006 = vst.msk [vmem:[#allocation2 + $0x88] sm:$0xff] %vm171_vm1, %v1974_v24  ;;  %v1525_v52 = vadd.f32 %v10825_v28, %v1167_v35  ;;  %v1453_v30 = vpop.f32.mrb[55].mxu0  ;;  %v2054_v24 = vld [vmem:[#allocation2 + $0x8] sm:$0xff]  ;;  %v2053_v35 = vld [vmem:[#allocation2] sm:$0xff] }
 0x159   : > { %2005 = vst.msk [vmem:[#allocation2 + $0x80] sm:$0xff] %vm171_vm1, %v1973_v33  ;;  %v1524_v41 = vadd.f32 %v1453_v30, %v1166_v39  ;;  %v1618_v32 = vld [vmem:[#allocation2 + $0x98] sm:$0xff] }
 0x15a   : > { %1557 = vst.msk [vmem:[#allocation2 + $0xb8] sm:$0xff] %vm171_vm1, %v1525_v52  ;;  %v1976_v43 = vadd.f32 %v10869_v25, %v1618_v32  ;;  %v1617_v59 = vld [vmem:[#allocation2 + $0x90] sm:$0xff]  ;;  %v10878_v57 = vpop.f32.mrb[56].mxu1 }
 0x15b   : > { %1556 = vst.msk [vmem:[#allocation2 + $0xb0] sm:$0xff] %vm171_vm1, %v1524_v41  ;;  %v1975_v34 = vadd.f32 %v1888_v12, %v1617_v59  ;;  %v10828_v49 = vpop.f32.mrb[56].mxu0  ;;  %v1918_v62 = vpop.f32.mrb[57].mxu1 }
 0x15c   : > { %2008 = vst.msk [vmem:[#allocation2 + $0x98] sm:$0xff] %vm171_vm1, %v1976_v43  ;;  %v1527_v53 = vadd.f32 %v10828_v49, %v1169_v47  ;;  %v1463_v54 = vpop.f32.mrb[57].mxu0  ;;  %v2056_v43 = vld [vmem:[#allocation2 + $0x18] sm:$0xff]  ;;  %v2055_v47 = vld [vmem:[#allocation2 + $0x10] sm:$0xff] }
 0x15d   : > { %2007 = vst.msk [vmem:[#allocation2 + $0x90] sm:$0xff] %vm171_vm1, %v1975_v34  ;;  %v1526_v55 = vadd.f32 %v1463_v54, %v1168_v36  ;;  %v1620_v56 = vld [vmem:[#allocation2 + $0xa8] sm:$0xff] }
 0x15e   : > { %1559 = vst.msk [vmem:[#allocation2 + $0xc8] sm:$0xff] %vm171_vm1, %v1527_v53  ;;  %v1978_v63 = vadd.f32 %v10872_v50, %v1620_v56  ;;  %v1619_v15 = vld [vmem:[#allocation2 + $0xa0] sm:$0xff]  ;;  %v10881_v5 = vpop.f32.mrb[58].mxu1 }
 0x15f   : > { %1558 = vst.msk [vmem:[#allocation2 + $0xc0] sm:$0xff] %vm171_vm1, %v1526_v55  ;;  %v1977_v38 = vadd.f32 %v1898_v37, %v1619_v15  ;;  %v10831_v60 = vpop.f32.mrb[58].mxu0  ;;  %v1928_v10 = vpop.f32.mrb[59].mxu1 }
 0x160   : > { %2010 = vst.msk [vmem:[#allocation2 + $0xa8] sm:$0xff] %vm171_vm1, %v1978_v63  ;;  %v1529_v0 = vadd.f32 %v10831_v60, %v1171_v58  ;;  %v1473_v2 = vpop.f32.mrb[59].mxu0  ;;  %v2058_v63 = vld [vmem:[#allocation2 + $0x28] sm:$0xff]  ;;  %v2057_v58 = vld [vmem:[#allocation2 + $0x20] sm:$0xff] }
 0x161   : > { %2009 = vst.msk [vmem:[#allocation2 + $0xa0] sm:$0xff] %vm171_vm1, %v1977_v38  ;;  %v1528_v3 = vadd.f32 %v1473_v2, %v1170_v40  ;;  %v1622_v19 = vld [vmem:[#allocation2 + $0xb8] sm:$0xff] }
 0x162   : > { %1561 = vst.msk [vmem:[#allocation2 + $0xd8] sm:$0xff] %vm171_vm1, %v1529_v0  ;;  %v1980_v4 = vadd.f32 %v10875_v45, %v1622_v19  ;;  %v1621_v8 = vld [vmem:[#allocation2 + $0xb0] sm:$0xff]  ;;  %v10884_v17 = vpop.f32.mrb[60].mxu1 }
 0x163   : > { %1560 = vst.msk [vmem:[#allocation2 + $0xd0] sm:$0xff] %vm171_vm1, %v1528_v3  ;;  %v1979_v6 = vadd.f32 %v1908_v51, %v1621_v8  ;;  %v10834_v7 = vpop.f32.mrb[60].mxu0  ;;  %v1938_v25 = vpop.f32.mrb[61].mxu1 }
 0x164   : > { %2012 = vst.msk [vmem:[#allocation2 + $0xb8] sm:$0xff] %vm171_vm1, %v1980_v4  ;;  %v1531_v9 = vadd.f32 %v10834_v7, %v1173_v42  ;;  %v1483_v13 = vpop.f32.mrb[61].mxu0  ;;  %v2060_v4 = vld [vmem:[#allocation2 + $0x38] sm:$0xff]  ;;  %v2059_v42 = vld [vmem:[#allocation2 + $0x30] sm:$0xff] }
 0x165   : > { %2011 = vst.msk [vmem:[#allocation2 + $0xb0] sm:$0xff] %vm171_vm1, %v1979_v6  ;;  %v1530_v61 = vadd.f32 %v1483_v13, %v1172_v44  ;;  %v1624_v1 = vld [vmem:[#allocation2 + $0xc8] sm:$0xff] }
 0x166   : > { %1563 = vst.msk [vmem:[#allocation2 + $0xe8] sm:$0xff] %vm171_vm1, %v1531_v9  ;;  %v1982_v11 = vadd.f32 %v10878_v57, %v1624_v1  ;;  %v1623_v14 = vld [vmem:[#allocation2 + $0xc0] sm:$0xff]  ;;  %v10887_v20 = vpop.f32.mrb[62].mxu1 }
 0x167   : > { %1562 = vst.msk [vmem:[#allocation2 + $0xe0] sm:$0xff] %vm171_vm1, %v1530_v61  ;;  %v1981_v46 = vadd.f32 %v1918_v62, %v1623_v14  ;;  %v10837_v23 = vpop.f32.mrb[62].mxu0  ;;  %v1948_v50 = vpop.f32.mrb[63].mxu1 }
 0x168   : > { %2014 = vst.msk [vmem:[#allocation2 + $0xc8] sm:$0xff] %vm171_vm1, %v1982_v11  ;;  %v1533_v27 = vadd.f32 %v10837_v23, %v1175_v21  ;;  %v1493_v29 = vpop.f32.mrb[63].mxu0  ;;  %v2062_v11 = vld [vmem:[#allocation2 + $0x48] sm:$0xff]  ;;  %v2061_v21 = vld [vmem:[#allocation2 + $0x40] sm:$0xff] }
 0x169   : > { %2013 = vst.msk [vmem:[#allocation2 + $0xc0] sm:$0xff] %vm171_vm1, %v1981_v46  ;;  %v1532_v12 = vadd.f32 %v1493_v29, %v1174_v48  ;;  %v1626_v16 = vld [vmem:[#allocation2 + $0xd8] sm:$0xff] }
 0x16a   : > { %1565 = vst.msk [vmem:[#allocation2 + $0xf8] sm:$0xff] %vm171_vm1, %v1533_v27  ;;  %v1984_v31 = vadd.f32 %v10881_v5, %v1626_v16  ;;  %v1625_v18 = vld [vmem:[#allocation2 + $0xd0] sm:$0xff]  ;;  %v10942_v41 = vpop.f32.mrb[64].mxu1 }
 0x16b   : > { %1564 = vst.msk [vmem:[#allocation2 + $0xf0] sm:$0xff] %vm171_vm1, %v1532_v12  ;;  %v1983_v22 = vadd.f32 %v1928_v10, %v1625_v18  ;;  %v10892_v26 = vpop.f32.mrb[64].mxu0  ;;  %v2706_v45 = vpop.f32.mrb[65].mxu1 }
 0x16c   : > { %2016 = vst.msk [vmem:[#allocation2 + $0xd8] sm:$0xff] %vm171_vm1, %v1984_v31  ;;  %v2412_v33 = vadd.f32 %v10892_v26, %v2054_v24  ;;  %v2252_v28 = vpop.f32.mrb[65].mxu0  ;;  %v2064_v31 = vld [vmem:[#allocation2 + $0x58] sm:$0xff]  ;;  %v2063_v24 = vld [vmem:[#allocation2 + $0x50] sm:$0xff] }
 0x16d   : > { %2015 = vst.msk [vmem:[#allocation2 + $0xd0] sm:$0xff] %vm171_vm1, %v1983_v22  ;;  %v2411_v37 = vadd.f32 %v2252_v28, %v2053_v35  ;;  %v1628_v52 = vld [vmem:[#allocation2 + $0xe8] sm:$0xff] }
 0x16e   : > { %2444 = vst.msk [vmem:[#allocation2 + $0x8] sm:$0xff] %vm171_vm1, %v2412_v33  ;;  %v1986_v39 = vadd.f32 %v10884_v17, %v1628_v52  ;;  %v1627_v30 = vld [vmem:[#allocation2 + $0xe0] sm:$0xff]  ;;  %v10945_v55 = vpop.f32.mrb[66].mxu1 }
 0x16f   : > { %2443 = vst.msk [vmem:[#allocation2] sm:$0xff] %vm171_vm1, %v2411_v37  ;;  %v1985_v32 = vadd.f32 %v1938_v25, %v1627_v30  ;;  %v10895_v59 = vpop.f32.mrb[66].mxu0  ;;  %v2716_v57 = vpop.f32.mrb[67].mxu1 }
 0x170   : > { %2018 = vst.msk [vmem:[#allocation2 + $0xe8] sm:$0xff] %vm171_vm1, %v1986_v39  ;;  %v2414_v34 = vadd.f32 %v10895_v59, %v2056_v43  ;;  %v2262_v49 = vpop.f32.mrb[67].mxu0  ;;  %v2066_v39 = vld [vmem:[#allocation2 + $0x68] sm:$0xff]  ;;  %v2065_v43 = vld [vmem:[#allocation2 + $0x60] sm:$0xff] }
 0x171   : > { %2017 = vst.msk [vmem:[#allocation2 + $0xe0] sm:$0xff] %vm171_vm1, %v1985_v32  ;;  %v2413_v51 = vadd.f32 %v2262_v49, %v2055_v47  ;;  %v1630_v53 = vld [vmem:[#allocation2 + $0xf8] sm:$0xff] }
 0x172   : > { %2446 = vst.msk [vmem:[#allocation2 + $0x18] sm:$0xff] %vm171_vm1, %v2414_v34  ;;  %v1988_v36 = vadd.f32 %v10887_v20, %v1630_v53  ;;  %v1629_v54 = vld [vmem:[#allocation2 + $0xf0] sm:$0xff]  ;;  %v10948_v3 = vpop.f32.mrb[68].mxu1 }
 0x173   : > { %2445 = vst.msk [vmem:[#allocation2 + $0x10] sm:$0xff] %vm171_vm1, %v2413_v51  ;;  %v1987_v56 = vadd.f32 %v1948_v50, %v1629_v54  ;;  %v10898_v15 = vpop.f32.mrb[68].mxu0  ;;  %v2726_v5 = vpop.f32.mrb[69].mxu1 }
 0x174   : > { %2020 = vst.msk [vmem:[#allocation2 + $0xf8] sm:$0xff] %vm171_vm1, %v1988_v36  ;;  %v2416_v38 = vadd.f32 %v10898_v15, %v2058_v63  ;;  %v2272_v60 = vpop.f32.mrb[69].mxu0  ;;  %v2068_v36 = vld [vmem:[#allocation2 + $0x78] sm:$0xff]  ;;  %v2067_v63 = vld [vmem:[#allocation2 + $0x70] sm:$0xff] }
 0x175   : > { %2019 = vst.msk [vmem:[#allocation2 + $0xf0] sm:$0xff] %vm171_vm1, %v1987_v56  ;;  %v2415_v62 = vadd.f32 %v2272_v60, %v2057_v58  ;;  %v2508_v0 = vld [vmem:[#allocation2 + $0x8] sm:$0xff] }
 0x176   : > { %2448 = vst.msk [vmem:[#allocation2 + $0x28] sm:$0xff] %vm171_vm1, %v2416_v38  ;;  %v2866_v40 = vadd.f32 %v10942_v41, %v2508_v0  ;;  %v2507_v2 = vld [vmem:[#allocation2] sm:$0xff]  ;;  %v10951_v61 = vpop.f32.mrb[70].mxu1 }
 0x177   : > { %2447 = vst.msk [vmem:[#allocation2 + $0x20] sm:$0xff] %vm171_vm1, %v2415_v62  ;;  %v2865_v19 = vadd.f32 %v2706_v45, %v2507_v2  ;;  %v10901_v8 = vpop.f32.mrb[70].mxu0  ;;  %v2736_v17 = vpop.f32.mrb[71].mxu1 }
 0x178   : > { %2898 = vst.msk [vmem:[#allocation2 + $0x8] sm:$0xff] %vm171_vm1, %v2866_v40  ;;  %v2418_v6 = vadd.f32 %v10901_v8, %v2060_v4  ;;  %v2282_v7 = vpop.f32.mrb[71].mxu0  ;;  %v2070_v40 = vld [vmem:[#allocation2 + $0x88] sm:$0xff]  ;;  %v2069_v4 = vld [vmem:[#allocation2 + $0x80] sm:$0xff] }
 0x179   : > { %2897 = vst.msk [vmem:[#allocation2] sm:$0xff] %vm171_vm1, %v2865_v19  ;;  %v2417_v10 = vadd.f32 %v2282_v7, %v2059_v42  ;;  %v2510_v9 = vld [vmem:[#allocation2 + $0x18] sm:$0xff] }
 0x17a   : > { %2450 = vst.msk [vmem:[#allocation2 + $0x38] sm:$0xff] %vm171_vm1, %v2418_v6  ;;  %v2868_v44 = vadd.f32 %v10945_v55, %v2510_v9  ;;  %v2509_v13 = vld [vmem:[#allocation2 + $0x10] sm:$0xff]  ;;  %v10954_v12 = vpop.f32.mrb[72].mxu1 }
 0x17b   : > { %2449 = vst.msk [vmem:[#allocation2 + $0x30] sm:$0xff] %vm171_vm1, %v2417_v10  ;;  %v2867_v1 = vadd.f32 %v2716_v57, %v2509_v13  ;;  %v10904_v14 = vpop.f32.mrb[72].mxu0  ;;  %v2746_v20 = vpop.f32.mrb[73].mxu1 }
 0x17c   : > { %2900 = vst.msk [vmem:[#allocation2 + $0x18] sm:$0xff] %vm171_vm1, %v2868_v44  ;;  %v2420_v46 = vadd.f32 %v10904_v14, %v2062_v11  ;;  %v2292_v23 = vpop.f32.mrb[73].mxu0  ;;  %v2072_v44 = vld [vmem:[#allocation2 + $0x98] sm:$0xff]  ;;  %v2071_v11 = vld [vmem:[#allocation2 + $0x90] sm:$0xff] }
 0x17d   : > { %2899 = vst.msk [vmem:[#allocation2 + $0x10] sm:$0xff] %vm171_vm1, %v2867_v1  ;;  %v2419_v25 = vadd.f32 %v2292_v23, %v2061_v21  ;;  %v2512_v27 = vld [vmem:[#allocation2 + $0x28] sm:$0xff] }
 0x17e   : > { %2452 = vst.msk [vmem:[#allocation2 + $0x48] sm:$0xff] %vm171_vm1, %v2420_v46  ;;  %v2870_v48 = vadd.f32 %v10948_v3, %v2512_v27  ;;  %v2511_v29 = vld [vmem:[#allocation2 + $0x20] sm:$0xff]  ;;  %v10957_v37 = vpop.f32.mrb[74].mxu1 }
 0x17f   : > { %2451 = vst.msk [vmem:[#allocation2 + $0x40] sm:$0xff] %vm171_vm1, %v2419_v25  ;;  %v2869_v16 = vadd.f32 %v2726_v5, %v2511_v29  ;;  %v10907_v18 = vpop.f32.mrb[74].mxu0  ;;  %v2756_v41 = vpop.f32.mrb[75].mxu1 }
 0x180   : > { %2902 = vst.msk [vmem:[#allocation2 + $0x28] sm:$0xff] %vm171_vm1, %v2870_v48  ;;  %v2422_v22 = vadd.f32 %v10907_v18, %v2064_v31  ;;  %v2302_v26 = vpop.f32.mrb[75].mxu0  ;;  %v2074_v48 = vld [vmem:[#allocation2 + $0xa8] sm:$0xff]  ;;  %v2073_v31 = vld [vmem:[#allocation2 + $0xa0] sm:$0xff] }
 0x181   : > { %2901 = vst.msk [vmem:[#allocation2 + $0x20] sm:$0xff] %vm171_vm1, %v2869_v16  ;;  %v2421_v50 = vadd.f32 %v2302_v26, %v2063_v24  ;;  %v2514_v33 = vld [vmem:[#allocation2 + $0x38] sm:$0xff] }
 0x182   : > { %2454 = vst.msk [vmem:[#allocation2 + $0x58] sm:$0xff] %vm171_vm1, %v2422_v22  ;;  %v2872_v35 = vadd.f32 %v10951_v61, %v2514_v33  ;;  %v2513_v28 = vld [vmem:[#allocation2 + $0x30] sm:$0xff]  ;;  %v10960_v51 = vpop.f32.mrb[76].mxu1 }
 0x183   : > { %2453 = vst.msk [vmem:[#allocation2 + $0x50] sm:$0xff] %vm171_vm1, %v2421_v50  ;;  %v2871_v52 = vadd.f32 %v2736_v17, %v2513_v28  ;;  %v10910_v30 = vpop.f32.mrb[76].mxu0  ;;  %v2766_v55 = vpop.f32.mrb[77].mxu1 }
 0x184   : > { %2904 = vst.msk [vmem:[#allocation2 + $0x38] sm:$0xff] %vm171_vm1, %v2872_v35  ;;  %v2424_v32 = vadd.f32 %v10910_v30, %v2066_v39  ;;  %v2312_v59 = vpop.f32.mrb[77].mxu0  ;;  %v2076_v35 = vld [vmem:[#allocation2 + $0xb8] sm:$0xff]  ;;  %v2075_v39 = vld [vmem:[#allocation2 + $0xb0] sm:$0xff] }
 0x185   : > { %2903 = vst.msk [vmem:[#allocation2 + $0x30] sm:$0xff] %vm171_vm1, %v2871_v52  ;;  %v2423_v45 = vadd.f32 %v2312_v59, %v2065_v43  ;;  %v2516_v34 = vld [vmem:[#allocation2 + $0x48] sm:$0xff] }
 0x186   : > { %2456 = vst.msk [vmem:[#allocation2 + $0x68] sm:$0xff] %vm171_vm1, %v2424_v32  ;;  %v2874_v47 = vadd.f32 %v10954_v12, %v2516_v34  ;;  %v2515_v49 = vld [vmem:[#allocation2 + $0x40] sm:$0xff]  ;;  %v10963_v62 = vpop.f32.mrb[78].mxu1 }
 0x187   : > { %2455 = vst.msk [vmem:[#allocation2 + $0x60] sm:$0xff] %vm171_vm1, %v2423_v45  ;;  %v2873_v53 = vadd.f32 %v2746_v20, %v2515_v49  ;;  %v10913_v54 = vpop.f32.mrb[78].mxu0  ;;  %v2776_v3 = vpop.f32.mrb[79].mxu1 }
 0x188   : > { %2906 = vst.msk [vmem:[#allocation2 + $0x48] sm:$0xff] %vm171_vm1, %v2874_v47  ;;  %v2426_v56 = vadd.f32 %v10913_v54, %v2068_v36  ;;  %v2322_v15 = vpop.f32.mrb[79].mxu0  ;;  %v2078_v47 = vld [vmem:[#allocation2 + $0xc8] sm:$0xff]  ;;  %v2077_v36 = vld [vmem:[#allocation2 + $0xc0] sm:$0xff] }
 0x189   : > { %2905 = vst.msk [vmem:[#allocation2 + $0x40] sm:$0xff] %vm171_vm1, %v2873_v53  ;;  %v2425_v57 = vadd.f32 %v2322_v15, %v2067_v63  ;;  %v2518_v38 = vld [vmem:[#allocation2 + $0x58] sm:$0xff] }
 0x18a   : > { %2458 = vst.msk [vmem:[#allocation2 + $0x78] sm:$0xff] %vm171_vm1, %v2426_v56  ;;  %v2876_v58 = vadd.f32 %v10957_v37, %v2518_v38  ;;  %v2517_v60 = vld [vmem:[#allocation2 + $0x50] sm:$0xff]  ;;  %v10966_v10 = vpop.f32.mrb[80].mxu1 }
 0x18b   : > { %2457 = vst.msk [vmem:[#allocation2 + $0x70] sm:$0xff] %vm171_vm1, %v2425_v57  ;;  %v2875_v0 = vadd.f32 %v2756_v41, %v2517_v60  ;;  %v10916_v2 = vpop.f32.mrb[80].mxu0  ;;  %v2786_v61 = vpop.f32.mrb[81].mxu1 }
 0x18c   : > { %2908 = vst.msk [vmem:[#allocation2 + $0x58] sm:$0xff] %vm171_vm1, %v2876_v58  ;;  %v2428_v19 = vadd.f32 %v10916_v2, %v2070_v40  ;;  %v2332_v8 = vpop.f32.mrb[81].mxu0  ;;  %v2080_v58 = vld [vmem:[#allocation2 + $0xd8] sm:$0xff]  ;;  %v2079_v40 = vld [vmem:[#allocation2 + $0xd0] sm:$0xff] }
 0x18d   : > { %2907 = vst.msk [vmem:[#allocation2 + $0x50] sm:$0xff] %vm171_vm1, %v2875_v0  ;;  %v2427_v5 = vadd.f32 %v2332_v8, %v2069_v4  ;;  %v2520_v6 = vld [vmem:[#allocation2 + $0x68] sm:$0xff] }
 0x18e   : > { %2460 = vst.msk [vmem:[#allocation2 + $0x88] sm:$0xff] %vm171_vm1, %v2428_v19  ;;  %v2878_v42 = vadd.f32 %v10960_v51, %v2520_v6  ;;  %v2519_v7 = vld [vmem:[#allocation2 + $0x60] sm:$0xff]  ;;  %v10969_v25 = vpop.f32.mrb[82].mxu1 }
 0x18f   : > { %2459 = vst.msk [vmem:[#allocation2 + $0x80] sm:$0xff] %vm171_vm1, %v2427_v5  ;;  %v2877_v9 = vadd.f32 %v2766_v55, %v2519_v7  ;;  %v10919_v13 = vpop.f32.mrb[82].mxu0  ;;  %v2796_v12 = vpop.f32.mrb[83].mxu1 }
 0x190   : > { %2910 = vst.msk [vmem:[#allocation2 + $0x68] sm:$0xff] %vm171_vm1, %v2878_v42  ;;  %v2430_v1 = vadd.f32 %v10919_v13, %v2072_v44  ;;  %v2342_v14 = vpop.f32.mrb[83].mxu0  ;;  %v2082_v42 = vld [vmem:[#allocation2 + $0xe8] sm:$0xff]  ;;  %v2081_v44 = vld [vmem:[#allocation2 + $0xe0] sm:$0xff] }
 0x191   : > { %2909 = vst.msk [vmem:[#allocation2 + $0x60] sm:$0xff] %vm171_vm1, %v2877_v9  ;;  %v2429_v17 = vadd.f32 %v2342_v14, %v2071_v11  ;;  %v2522_v46 = vld [vmem:[#allocation2 + $0x78] sm:$0xff] }
 0x192   : > { %2462 = vst.msk [vmem:[#allocation2 + $0x98] sm:$0xff] %vm171_vm1, %v2430_v1  ;;  %v2880_v21 = vadd.f32 %v10963_v62, %v2522_v46  ;;  %v2521_v23 = vld [vmem:[#allocation2 + $0x70] sm:$0xff]  ;;  %v10972_v50 = vpop.f32.mrb[84].mxu1 }
 0x193   : > { %2461 = vst.msk [vmem:[#allocation2 + $0x90] sm:$0xff] %vm171_vm1, %v2429_v17  ;;  %v2879_v27 = vadd.f32 %v2776_v3, %v2521_v23  ;;  %v10922_v29 = vpop.f32.mrb[84].mxu0  ;;  %v2806_v37 = vpop.f32.mrb[85].mxu1 }
 0x194   : > { %2912 = vst.msk [vmem:[#allocation2 + $0x78] sm:$0xff] %vm171_vm1, %v2880_v21  ;;  %v2432_v16 = vadd.f32 %v10922_v29, %v2074_v48  ;;  %v2352_v18 = vpop.f32.mrb[85].mxu0  ;;  %v2084_v21 = vld [vmem:[#allocation2 + $0xf8] sm:$0xff]  ;;  %v2083_v48 = vld [vmem:[#allocation2 + $0xf0] sm:$0xff] }
 0x195   : > { %2911 = vst.msk [vmem:[#allocation2 + $0x70] sm:$0xff] %vm171_vm1, %v2879_v27  ;;  %v2431_v20 = vadd.f32 %v2352_v18, %v2073_v31  ;;  %v2524_v22 = vld [vmem:[#allocation2 + $0x88] sm:$0xff] }
 0x196   : > { %2464 = vst.msk [vmem:[#allocation2 + $0xa8] sm:$0xff] %vm171_vm1, %v2432_v16  ;;  %v2882_v24 = vadd.f32 %v10966_v10, %v2524_v22  ;;  %v2523_v26 = vld [vmem:[#allocation2 + $0x80] sm:$0xff]  ;;  %v10975_v45 = vpop.f32.mrb[86].mxu1 }
 0x197   : > { %2463 = vst.msk [vmem:[#allocation2 + $0xa0] sm:$0xff] %vm171_vm1, %v2431_v20  ;;  %v2881_v33 = vadd.f32 %v2786_v61, %v2523_v26  ;;  %v10925_v28 = vpop.f32.mrb[86].mxu0  ;;  %v2816_v51 = vpop.f32.mrb[87].mxu1 }
 0x198   : > { %2914 = vst.msk [vmem:[#allocation2 + $0x88] sm:$0xff] %vm171_vm1, %v2882_v24  ;;  %v2434_v52 = vadd.f32 %v10925_v28, %v2076_v35  ;;  %v2362_v30 = vpop.f32.mrb[87].mxu0  ;;  %v2963_v24 = vld [vmem:[#allocation2 + $0x8] sm:$0xff]  ;;  %v2962_v35 = vld [vmem:[#allocation2] sm:$0xff] }
 0x199   : > { %2913 = vst.msk [vmem:[#allocation2 + $0x80] sm:$0xff] %vm171_vm1, %v2881_v33  ;;  %v2433_v41 = vadd.f32 %v2362_v30, %v2075_v39  ;;  %v2526_v32 = vld [vmem:[#allocation2 + $0x98] sm:$0xff] }
 0x19a   : > { %2466 = vst.msk [vmem:[#allocation2 + $0xb8] sm:$0xff] %vm171_vm1, %v2434_v52  ;;  %v2884_v43 = vadd.f32 %v10969_v25, %v2526_v32  ;;  %v2525_v59 = vld [vmem:[#allocation2 + $0x90] sm:$0xff]  ;;  %v10978_v57 = vpop.f32.mrb[88].mxu1 }
 0x19b   : > { %2465 = vst.msk [vmem:[#allocation2 + $0xb0] sm:$0xff] %vm171_vm1, %v2433_v41  ;;  %v2883_v34 = vadd.f32 %v2796_v12, %v2525_v59  ;;  %v10928_v49 = vpop.f32.mrb[88].mxu0  ;;  %v2826_v62 = vpop.f32.mrb[89].mxu1 }
 0x19c   : > { %2916 = vst.msk [vmem:[#allocation2 + $0x98] sm:$0xff] %vm171_vm1, %v2884_v43  ;;  %v2436_v53 = vadd.f32 %v10928_v49, %v2078_v47  ;;  %v2372_v54 = vpop.f32.mrb[89].mxu0  ;;  %v2965_v43 = vld [vmem:[#allocation2 + $0x18] sm:$0xff]  ;;  %v2964_v47 = vld [vmem:[#allocation2 + $0x10] sm:$0xff] }
 0x19d   : > { %2915 = vst.msk [vmem:[#allocation2 + $0x90] sm:$0xff] %vm171_vm1, %v2883_v34  ;;  %v2435_v55 = vadd.f32 %v2372_v54, %v2077_v36  ;;  %v2528_v56 = vld [vmem:[#allocation2 + $0xa8] sm:$0xff] }
 0x19e   : > { %2468 = vst.msk [vmem:[#allocation2 + $0xc8] sm:$0xff] %vm171_vm1, %v2436_v53  ;;  %v2886_v63 = vadd.f32 %v10972_v50, %v2528_v56  ;;  %v2527_v15 = vld [vmem:[#allocation2 + $0xa0] sm:$0xff]  ;;  %v10981_v5 = vpop.f32.mrb[90].mxu1 }
 0x19f   : > { %2467 = vst.msk [vmem:[#allocation2 + $0xc0] sm:$0xff] %vm171_vm1, %v2435_v55  ;;  %v2885_v38 = vadd.f32 %v2806_v37, %v2527_v15  ;;  %v10931_v60 = vpop.f32.mrb[90].mxu0  ;;  %v2836_v10 = vpop.f32.mrb[91].mxu1 }
 0x1a0   : > { %2918 = vst.msk [vmem:[#allocation2 + $0xa8] sm:$0xff] %vm171_vm1, %v2886_v63  ;;  %v2438_v0 = vadd.f32 %v10931_v60, %v2080_v58  ;;  %v2382_v2 = vpop.f32.mrb[91].mxu0  ;;  %v2967_v63 = vld [vmem:[#allocation2 + $0x28] sm:$0xff]  ;;  %v2966_v58 = vld [vmem:[#allocation2 + $0x20] sm:$0xff] }
 0x1a1   : > { %2917 = vst.msk [vmem:[#allocation2 + $0xa0] sm:$0xff] %vm171_vm1, %v2885_v38  ;;  %v2437_v3 = vadd.f32 %v2382_v2, %v2079_v40  ;;  %v2530_v19 = vld [vmem:[#allocation2 + $0xb8] sm:$0xff] }
 0x1a2   : > { %2470 = vst.msk [vmem:[#allocation2 + $0xd8] sm:$0xff] %vm171_vm1, %v2438_v0  ;;  %v2888_v4 = vadd.f32 %v10975_v45, %v2530_v19  ;;  %v2529_v8 = vld [vmem:[#allocation2 + $0xb0] sm:$0xff]  ;;  %v10984_v17 = vpop.f32.mrb[92].mxu1 }
 0x1a3   : > { %2469 = vst.msk [vmem:[#allocation2 + $0xd0] sm:$0xff] %vm171_vm1, %v2437_v3  ;;  %v2887_v6 = vadd.f32 %v2816_v51, %v2529_v8  ;;  %v10934_v7 = vpop.f32.mrb[92].mxu0  ;;  %v2846_v25 = vpop.f32.mrb[93].mxu1 }
 0x1a4   : > { %2920 = vst.msk [vmem:[#allocation2 + $0xb8] sm:$0xff] %vm171_vm1, %v2888_v4  ;;  %v2440_v9 = vadd.f32 %v10934_v7, %v2082_v42  ;;  %v2392_v13 = vpop.f32.mrb[93].mxu0  ;;  %v2969_v4 = vld [vmem:[#allocation2 + $0x38] sm:$0xff]  ;;  %v2968_v42 = vld [vmem:[#allocation2 + $0x30] sm:$0xff] }
 0x1a5   : > { %2919 = vst.msk [vmem:[#allocation2 + $0xb0] sm:$0xff] %vm171_vm1, %v2887_v6  ;;  %v2439_v61 = vadd.f32 %v2392_v13, %v2081_v44  ;;  %v2532_v1 = vld [vmem:[#allocation2 + $0xc8] sm:$0xff] }
 0x1a6   : > { %2472 = vst.msk [vmem:[#allocation2 + $0xe8] sm:$0xff] %vm171_vm1, %v2440_v9  ;;  %v2890_v11 = vadd.f32 %v10978_v57, %v2532_v1  ;;  %v2531_v14 = vld [vmem:[#allocation2 + $0xc0] sm:$0xff]  ;;  %v10987_v20 = vpop.f32.mrb[94].mxu1 }
 0x1a7   : > { %2471 = vst.msk [vmem:[#allocation2 + $0xe0] sm:$0xff] %vm171_vm1, %v2439_v61  ;;  %v2889_v46 = vadd.f32 %v2826_v62, %v2531_v14  ;;  %v10937_v23 = vpop.f32.mrb[94].mxu0  ;;  %v2856_v50 = vpop.f32.mrb[95].mxu1 }
 0x1a8   : > { %2922 = vst.msk [vmem:[#allocation2 + $0xc8] sm:$0xff] %vm171_vm1, %v2890_v11  ;;  %v2442_v27 = vadd.f32 %v10937_v23, %v2084_v21  ;;  %v2402_v29 = vpop.f32.mrb[95].mxu0  ;;  %v2971_v11 = vld [vmem:[#allocation2 + $0x48] sm:$0xff]  ;;  %v2970_v21 = vld [vmem:[#allocation2 + $0x40] sm:$0xff] }
 0x1a9   : > { %2921 = vst.msk [vmem:[#allocation2 + $0xc0] sm:$0xff] %vm171_vm1, %v2889_v46  ;;  %v2441_v12 = vadd.f32 %v2402_v29, %v2083_v48  ;;  %v2534_v16 = vld [vmem:[#allocation2 + $0xd8] sm:$0xff] }
 0x1aa   : > { %2474 = vst.msk [vmem:[#allocation2 + $0xf8] sm:$0xff] %vm171_vm1, %v2442_v27  ;;  %v2892_v31 = vadd.f32 %v10981_v5, %v2534_v16  ;;  %v2533_v18 = vld [vmem:[#allocation2 + $0xd0] sm:$0xff]  ;;  %v11042_v41 = vpop.f32.mrb[96].mxu1 }
 0x1ab   : > { %2473 = vst.msk [vmem:[#allocation2 + $0xf0] sm:$0xff] %vm171_vm1, %v2441_v12  ;;  %v2891_v22 = vadd.f32 %v2836_v10, %v2533_v18  ;;  %v10992_v26 = vpop.f32.mrb[96].mxu0  ;;  %v3615_v45 = vpop.f32.mrb[97].mxu1 }
 0x1ac   : > { %2924 = vst.msk [vmem:[#allocation2 + $0xd8] sm:$0xff] %vm171_vm1, %v2892_v31  ;;  %v3321_v33 = vadd.f32 %v10992_v26, %v2963_v24  ;;  %v3161_v28 = vpop.f32.mrb[97].mxu0  ;;  %v2973_v31 = vld [vmem:[#allocation2 + $0x58] sm:$0xff]  ;;  %v2972_v24 = vld [vmem:[#allocation2 + $0x50] sm:$0xff] }
 0x1ad   : > { %2923 = vst.msk [vmem:[#allocation2 + $0xd0] sm:$0xff] %vm171_vm1, %v2891_v22  ;;  %v3320_v37 = vadd.f32 %v3161_v28, %v2962_v35  ;;  %v2536_v52 = vld [vmem:[#allocation2 + $0xe8] sm:$0xff] }
 0x1ae   : > { %3353 = vst.msk [vmem:[#allocation2 + $0x8] sm:$0xff] %vm171_vm1, %v3321_v33  ;;  %v2894_v39 = vadd.f32 %v10984_v17, %v2536_v52  ;;  %v2535_v30 = vld [vmem:[#allocation2 + $0xe0] sm:$0xff]  ;;  %v11045_v55 = vpop.f32.mrb[98].mxu1 }
 0x1af   : > { %3352 = vst.msk [vmem:[#allocation2] sm:$0xff] %vm171_vm1, %v3320_v37  ;;  %v2893_v32 = vadd.f32 %v2846_v25, %v2535_v30  ;;  %v10995_v59 = vpop.f32.mrb[98].mxu0  ;;  %v3625_v57 = vpop.f32.mrb[99].mxu1 }
 0x1b0   : > { %2926 = vst.msk [vmem:[#allocation2 + $0xe8] sm:$0xff] %vm171_vm1, %v2894_v39  ;;  %v3323_v34 = vadd.f32 %v10995_v59, %v2965_v43  ;;  %v3171_v49 = vpop.f32.mrb[99].mxu0  ;;  %v2975_v39 = vld [vmem:[#allocation2 + $0x68] sm:$0xff]  ;;  %v2974_v43 = vld [vmem:[#allocation2 + $0x60] sm:$0xff] }
 0x1b1   : > { %2925 = vst.msk [vmem:[#allocation2 + $0xe0] sm:$0xff] %vm171_vm1, %v2893_v32  ;;  %v3322_v51 = vadd.f32 %v3171_v49, %v2964_v47  ;;  %v2538_v53 = vld [vmem:[#allocation2 + $0xf8] sm:$0xff] }
 0x1b2   : > { %3355 = vst.msk [vmem:[#allocation2 + $0x18] sm:$0xff] %vm171_vm1, %v3323_v34  ;;  %v2896_v36 = vadd.f32 %v10987_v20, %v2538_v53  ;;  %v2537_v54 = vld [vmem:[#allocation2 + $0xf0] sm:$0xff]  ;;  %v11048_v3 = vpop.f32.mrb[100].mxu1 }
 0x1b3   : > { %3354 = vst.msk [vmem:[#allocation2 + $0x10] sm:$0xff] %vm171_vm1, %v3322_v51  ;;  %v2895_v56 = vadd.f32 %v2856_v50, %v2537_v54  ;;  %v10998_v15 = vpop.f32.mrb[100].mxu0  ;;  %v3635_v5 = vpop.f32.mrb[101].mxu1 }
 0x1b4   : > { %2928 = vst.msk [vmem:[#allocation2 + $0xf8] sm:$0xff] %vm171_vm1, %v2896_v36  ;;  %v3325_v38 = vadd.f32 %v10998_v15, %v2967_v63  ;;  %v3181_v60 = vpop.f32.mrb[101].mxu0  ;;  %v2977_v36 = vld [vmem:[#allocation2 + $0x78] sm:$0xff]  ;;  %v2976_v63 = vld [vmem:[#allocation2 + $0x70] sm:$0xff] }
 0x1b5   : > { %2927 = vst.msk [vmem:[#allocation2 + $0xf0] sm:$0xff] %vm171_vm1, %v2895_v56  ;;  %v3324_v62 = vadd.f32 %v3181_v60, %v2966_v58  ;;  %v3417_v0 = vld [vmem:[#allocation2 + $0x8] sm:$0xff] }
 0x1b6   : > { %3357 = vst.msk [vmem:[#allocation2 + $0x28] sm:$0xff] %vm171_vm1, %v3325_v38  ;;  %v3775_v40 = vadd.f32 %v11042_v41, %v3417_v0  ;;  %v3416_v2 = vld [vmem:[#allocation2] sm:$0xff]  ;;  %v11051_v61 = vpop.f32.mrb[102].mxu1 }
 0x1b7   : > { %3356 = vst.msk [vmem:[#allocation2 + $0x20] sm:$0xff] %vm171_vm1, %v3324_v62  ;;  %v3774_v19 = vadd.f32 %v3615_v45, %v3416_v2  ;;  %v11001_v8 = vpop.f32.mrb[102].mxu0  ;;  %v3645_v17 = vpop.f32.mrb[103].mxu1 }
 0x1b8   : > { %3807 = vst.msk [vmem:[#allocation2 + $0x8] sm:$0xff] %vm171_vm1, %v3775_v40  ;;  %v3327_v6 = vadd.f32 %v11001_v8, %v2969_v4  ;;  %v3191_v7 = vpop.f32.mrb[103].mxu0  ;;  %v2979_v40 = vld [vmem:[#allocation2 + $0x88] sm:$0xff]  ;;  %v2978_v4 = vld [vmem:[#allocation2 + $0x80] sm:$0xff] }
 0x1b9   : > { %3806 = vst.msk [vmem:[#allocation2] sm:$0xff] %vm171_vm1, %v3774_v19  ;;  %v3326_v10 = vadd.f32 %v3191_v7, %v2968_v42  ;;  %v3419_v9 = vld [vmem:[#allocation2 + $0x18] sm:$0xff] }
 0x1ba   : > { %3359 = vst.msk [vmem:[#allocation2 + $0x38] sm:$0xff] %vm171_vm1, %v3327_v6  ;;  %v3777_v44 = vadd.f32 %v11045_v55, %v3419_v9  ;;  %v3418_v13 = vld [vmem:[#allocation2 + $0x10] sm:$0xff]  ;;  %v11054_v12 = vpop.f32.mrb[104].mxu1  ;;  %v9787_v6 = vld [vmem:[%s15305_s2 + $0x4] sm:$0xf] }
 0x1bb   : > { %3358 = vst.msk [vmem:[#allocation2 + $0x30] sm:$0xff] %vm171_vm1, %v3326_v10  ;;  %v3776_v1 = vadd.f32 %v3625_v57, %v3418_v13  ;;  %v11004_v14 = vpop.f32.mrb[104].mxu0  ;;  %v3655_v20 = vpop.f32.mrb[105].mxu1  ;;  %11188 = vmatprep.subr.msk.mxu0 %vm365_vm0, %v9787_v6 }
 0x1bc   : > { %3809 = vst.msk [vmem:[#allocation2 + $0x18] sm:$0xff] %vm171_vm1, %v3777_v44  ;;  %v3329_v46 = vadd.f32 %v11004_v14, %v2971_v11  ;;  %v3201_v23 = vpop.f32.mrb[105].mxu0  ;;  %11189 = vmatpush3.msk.msra.mxu0 %vm365_vm0, %v9787_v6 }
 0x1bd   : > { %3808 = vst.msk [vmem:[#allocation2 + $0x10] sm:$0xff] %vm171_vm1, %v3776_v1  ;;  %v3328_v25 = vadd.f32 %v3201_v23, %v2970_v21  ;;  %v3421_v27 = vld [vmem:[#allocation2 + $0x28] sm:$0xff] }
 0x1be   : > { %3361 = vst.msk [vmem:[#allocation2 + $0x48] sm:$0xff] %vm171_vm1, %v3329_v46  ;;  %v3779_v48 = vadd.f32 %v11048_v3, %v3421_v27  ;;  %v3420_v29 = vld [vmem:[#allocation2 + $0x20] sm:$0xff]  ;;  %v11057_v37 = vpop.f32.mrb[106].mxu1 }
 0x1bf   : > { %3360 = vst.msk [vmem:[#allocation2 + $0x40] sm:$0xff] %vm171_vm1, %v3328_v25  ;;  %v3778_v16 = vadd.f32 %v3635_v5, %v3420_v29  ;;  %v11007_v18 = vpop.f32.mrb[106].mxu0  ;;  %v3665_v41 = vpop.f32.mrb[107].mxu1  ;;  %v4804_v5 = vld [vmem:[%s15305_s2] sm:$0xf] }
 0x1c0   : > { %3811 = vst.msk [vmem:[#allocation2 + $0x28] sm:$0xff] %vm171_vm1, %v3779_v48  ;;  %v3331_v22 = vadd.f32 %v11007_v18, %v2973_v31  ;;  %v3211_v26 = vpop.f32.mrb[107].mxu0  ;;  %11138 = vmatprep.subr.msk.mxu1 %vm365_vm0, %v4804_v5 }
 0x1c1   : > { %3810 = vst.msk [vmem:[#allocation2 + $0x20] sm:$0xff] %vm171_vm1, %v3778_v16  ;;  %v3330_v50 = vadd.f32 %v3211_v26, %v2972_v24  ;;  %v3423_v33 = vld [vmem:[#allocation2 + $0x38] sm:$0xff]  ;;  %11139 = vmatpush3.msk.msra.mxu1 %vm365_vm0, %v4804_v5 }
 0x1c2   : > { %3363 = vst.msk [vmem:[#allocation2 + $0x58] sm:$0xff] %vm171_vm1, %v3331_v22  ;;  %v3781_v35 = vadd.f32 %v11051_v61, %v3423_v33  ;;  %v3422_v28 = vld [vmem:[#allocation2 + $0x30] sm:$0xff]  ;;  %v11060_v51 = vpop.f32.mrb[108].mxu1  ;;  %v2981_v61 = vld [vmem:[#allocation2 + $0x98] sm:$0xff] }
 0x1c3   : > { %3362 = vst.msk [vmem:[#allocation2 + $0x50] sm:$0xff] %vm171_vm1, %v3330_v50  ;;  %v3780_v52 = vadd.f32 %v3645_v17, %v3422_v28  ;;  %v11010_v30 = vpop.f32.mrb[108].mxu0  ;;  %v3675_v55 = vpop.f32.mrb[109].mxu1  ;;  %v2980_v17 = vld [vmem:[#allocation2 + $0x90] sm:$0xff] }
 0x1c4   : > { %3813 = vst.msk [vmem:[#allocation2 + $0x38] sm:$0xff] %vm171_vm1, %v3781_v35  ;;  %v3333_v32 = vadd.f32 %v11010_v30, %v2975_v39  ;;  %v3221_v59 = vpop.f32.mrb[109].mxu0 }
 0x1c5   : > { %3812 = vst.msk [vmem:[#allocation2 + $0x30] sm:$0xff] %vm171_vm1, %v3780_v52  ;;  %v3332_v45 = vadd.f32 %v3221_v59, %v2974_v43  ;;  %v3425_v34 = vld [vmem:[#allocation2 + $0x48] sm:$0xff] }
 0x1c6   : > { %3365 = vst.msk [vmem:[#allocation2 + $0x68] sm:$0xff] %vm171_vm1, %v3333_v32  ;;  %v3783_v47 = vadd.f32 %v11054_v12, %v3425_v34  ;;  %v3424_v49 = vld [vmem:[#allocation2 + $0x40] sm:$0xff]  ;;  %v11063_v62 = vpop.f32.mrb[110].mxu1  ;;  %v2983_v12 = vld [vmem:[#allocation2 + $0xa8] sm:$0xff] }
 0x1c7   : > { %3364 = vst.msk [vmem:[#allocation2 + $0x60] sm:$0xff] %vm171_vm1, %v3332_v45  ;;  %v3782_v53 = vadd.f32 %v3655_v20, %v3424_v49  ;;  %v11013_v54 = vpop.f32.mrb[110].mxu0  ;;  %v3685_v3 = vpop.f32.mrb[111].mxu1  ;;  %v2982_v20 = vld [vmem:[#allocation2 + $0xa0] sm:$0xff] }
 0x1c8   : > { %3815 = vst.msk [vmem:[#allocation2 + $0x48] sm:$0xff] %vm171_vm1, %v3783_v47  ;;  %v3335_v56 = vadd.f32 %v11013_v54, %v2977_v36  ;;  %v3231_v15 = vpop.f32.mrb[111].mxu0 }
 0x1c9   : > { %3814 = vst.msk [vmem:[#allocation2 + $0x40] sm:$0xff] %vm171_vm1, %v3782_v53  ;;  %v3334_v57 = vadd.f32 %v3231_v15, %v2976_v63  ;;  %v3427_v38 = vld [vmem:[#allocation2 + $0x58] sm:$0xff] }
 0x1ca   : > { %3367 = vst.msk [vmem:[#allocation2 + $0x78] sm:$0xff] %vm171_vm1, %v3335_v56  ;;  %v3785_v58 = vadd.f32 %v11057_v37, %v3427_v38  ;;  %v3426_v60 = vld [vmem:[#allocation2 + $0x50] sm:$0xff]  ;;  %v11066_v44 = vpop.f32.mrb[112].mxu1  ;;  %v2985_v37 = vld [vmem:[#allocation2 + $0xb8] sm:$0xff] }
 0x1cb   : > { %3366 = vst.msk [vmem:[#allocation2 + $0x70] sm:$0xff] %vm171_vm1, %v3334_v57  ;;  %v3784_v0 = vadd.f32 %v3665_v41, %v3426_v60  ;;  %v11016_v2 = vpop.f32.mrb[112].mxu0  ;;  %v3695_v11 = vpop.f32.mrb[113].mxu1  ;;  %v2984_v41 = vld [vmem:[#allocation2 + $0xb0] sm:$0xff] }
 0x1cc   : > { %3817 = vst.msk [vmem:[#allocation2 + $0x58] sm:$0xff] %vm171_vm1, %v3785_v58  ;;  %v3337_v19 = vadd.f32 %v11016_v2, %v2979_v40  ;;  %v3241_v8 = vpop.f32.mrb[113].mxu0 }
 0x1cd   : > { %3816 = vst.msk [vmem:[#allocation2 + $0x50] sm:$0xff] %vm171_vm1, %v3784_v0  ;;  %v3336_v42 = vadd.f32 %v3241_v8, %v2978_v4  ;;  %v3429_v7 = vld [vmem:[#allocation2 + $0x68] sm:$0xff] }
 0x1ce   : > { %3369 = vst.msk [vmem:[#allocation2 + $0x88] sm:$0xff] %vm171_vm1, %v3337_v19  ;;  %v3787_v10 = vadd.f32 %v11060_v51, %v3429_v7  ;;  %v3428_v9 = vld [vmem:[#allocation2 + $0x60] sm:$0xff]  ;;  %v11069_v48 = vpop.f32.mrb[114].mxu1  ;;  %v2987_v51 = vld [vmem:[#allocation2 + $0xc8] sm:$0xff] }
 0x1cf   : > { %3368 = vst.msk [vmem:[#allocation2 + $0x80] sm:$0xff] %vm171_vm1, %v3336_v42  ;;  %v3786_v13 = vadd.f32 %v3675_v55, %v3428_v9  ;;  %v11019_v1 = vpop.f32.mrb[114].mxu0  ;;  %v3705_v31 = vpop.f32.mrb[115].mxu1  ;;  %v2986_v55 = vld [vmem:[#allocation2 + $0xc0] sm:$0xff] }
 0x1d0   : > { %3819 = vst.msk [vmem:[#allocation2 + $0x68] sm:$0xff] %vm171_vm1, %v3787_v10  ;;  %v3339_v14 = vadd.f32 %v11019_v1, %v2981_v61  ;;  %v3251_v46 = vpop.f32.mrb[115].mxu0  ;;  %v2991_v10 = vld [vmem:[#allocation2 + $0xe8] sm:$0xff]  ;;  %v2990_v61 = vld [vmem:[#allocation2 + $0xe0] sm:$0xff] }
 0x1d1   : > { %3818 = vst.msk [vmem:[#allocation2 + $0x60] sm:$0xff] %vm171_vm1, %v3786_v13  ;;  %v3338_v21 = vadd.f32 %v3251_v46, %v2980_v17  ;;  %v3431_v23 = vld [vmem:[#allocation2 + $0x78] sm:$0xff] }
 0x1d2   : > { %3371 = vst.msk [vmem:[#allocation2 + $0x98] sm:$0xff] %vm171_vm1, %v3339_v14  ;;  %v3789_v25 = vadd.f32 %v11063_v62, %v3431_v23  ;;  %v3430_v27 = vld [vmem:[#allocation2 + $0x70] sm:$0xff]  ;;  %v11072_v35 = vpop.f32.mrb[116].mxu1  ;;  %v2989_v62 = vld [vmem:[#allocation2 + $0xd8] sm:$0xff] }
 0x1d3   : > { %3370 = vst.msk [vmem:[#allocation2 + $0x90] sm:$0xff] %vm171_vm1, %v3338_v21  ;;  %v3788_v29 = vadd.f32 %v3685_v3, %v3430_v27  ;;  %v11022_v16 = vpop.f32.mrb[116].mxu0  ;;  %v3715_v39 = vpop.f32.mrb[117].mxu1  ;;  %v2988_v3 = vld [vmem:[#allocation2 + $0xd0] sm:$0xff] }
 0x1d4   : > { %3821 = vst.msk [vmem:[#allocation2 + $0x78] sm:$0xff] %vm171_vm1, %v3789_v25  ;;  %v3341_v18 = vadd.f32 %v11022_v16, %v2983_v12  ;;  %v3261_v22 = vpop.f32.mrb[117].mxu0  ;;  %v2993_v25 = vld [vmem:[#allocation2 + $0xf8] sm:$0xff]  ;;  %v2992_v12 = vld [vmem:[#allocation2 + $0xf0] sm:$0xff] }
 0x1d5   : > { %3820 = vst.msk [vmem:[#allocation2 + $0x70] sm:$0xff] %vm171_vm1, %v3788_v29  ;;  %v3340_v24 = vadd.f32 %v3261_v22, %v2982_v20  ;;  %v3433_v26 = vld [vmem:[#allocation2 + $0x88] sm:$0xff] }
 0x1d6   : > { %3373 = vst.msk [vmem:[#allocation2 + $0xa8] sm:$0xff] %vm171_vm1, %v3341_v18  ;;  %v3791_v50 = vadd.f32 %v11066_v44, %v3433_v26  ;;  %v3432_v33 = vld [vmem:[#allocation2 + $0x80] sm:$0xff]  ;;  %v11075_v47 = vpop.f32.mrb[118].mxu1 }
 0x1d7   : > { %3372 = vst.msk [vmem:[#allocation2 + $0xa0] sm:$0xff] %vm171_vm1, %v3340_v24  ;;  %v3790_v28 = vadd.f32 %v3695_v11, %v3432_v33  ;;  %v11025_v52 = vpop.f32.mrb[118].mxu0  ;;  %v3725_v36 = vpop.f32.mrb[119].mxu1 }
 0x1d8   : > { %3823 = vst.msk [vmem:[#allocation2 + $0x88] sm:$0xff] %vm171_vm1, %v3791_v50  ;;  %v3343_v30 = vadd.f32 %v11025_v52, %v2985_v37  ;;  %v3271_v32 = vpop.f32.mrb[119].mxu0  ;;  %v3871_v50 = vld [vmem:[#allocation2 + $0x8] sm:$0xff]  ;;  %v3870_v37 = vld [vmem:[#allocation2] sm:$0xff] }
 0x1d9   : > { %3822 = vst.msk [vmem:[#allocation2 + $0x80] sm:$0xff] %vm171_vm1, %v3790_v28  ;;  %v3342_v43 = vadd.f32 %v3271_v32, %v2984_v41  ;;  %v3435_v59 = vld [vmem:[#allocation2 + $0x98] sm:$0xff] }
 0x1da   : > { %3375 = vst.msk [vmem:[#allocation2 + $0xb8] sm:$0xff] %vm171_vm1, %v3343_v30  ;;  %v3793_v45 = vadd.f32 %v11069_v48, %v3435_v59  ;;  %v3434_v34 = vld [vmem:[#allocation2 + $0x90] sm:$0xff]  ;;  %v11078_v58 = vpop.f32.mrb[120].mxu1 }
 0x1db   : > { %3374 = vst.msk [vmem:[#allocation2 + $0xb0] sm:$0xff] %vm171_vm1, %v3342_v43  ;;  %v3792_v49 = vadd.f32 %v3705_v31, %v3434_v34  ;;  %v11028_v53 = vpop.f32.mrb[120].mxu0  ;;  %v3735_v40 = vpop.f32.mrb[121].mxu1 }
 0x1dc   : > { %3825 = vst.msk [vmem:[#allocation2 + $0x98] sm:$0xff] %vm171_vm1, %v3793_v45  ;;  %v3345_v54 = vadd.f32 %v11028_v53, %v2987_v51  ;;  %v3281_v56 = vpop.f32.mrb[121].mxu0  ;;  %v3873_v45 = vld [vmem:[#allocation2 + $0x18] sm:$0xff] }
 0x1dd   : > { %3824 = vst.msk [vmem:[#allocation2 + $0x90] sm:$0xff] %vm171_vm1, %v3792_v49  ;;  %v3344_v63 = vadd.f32 %v3281_v56, %v2986_v55  ;;  %v3437_v15 = vld [vmem:[#allocation2 + $0xa8] sm:$0xff]  ;;  %v3872_v49 = vld [vmem:[#allocation2 + $0x10] sm:$0xff] }
 0x1de   : > { %3377 = vst.msk [vmem:[#allocation2 + $0xc8] sm:$0xff] %vm171_vm1, %v3345_v54  ;;  %v3795_v57 = vadd.f32 %v11072_v35, %v3437_v15  ;;  %v3436_v38 = vld [vmem:[#allocation2 + $0xa0] sm:$0xff]  ;;  %v11081_v42 = vpop.f32.mrb[122].mxu1 }
 0x1df   : > { %3376 = vst.msk [vmem:[#allocation2 + $0xc0] sm:$0xff] %vm171_vm1, %v3344_v63  ;;  %v3794_v60 = vadd.f32 %v3715_v39, %v3436_v38  ;;  %v11031_v0 = vpop.f32.mrb[122].mxu0  ;;  %v3745_v44 = vpop.f32.mrb[123].mxu1  ;;  %v9821_v39 = vld [vmem:[%s15305_s2 + $0x8] sm:$0xf]  ;;  %v3874_v38 = vld [vmem:[#allocation2 + $0x20] sm:$0xff] }
 0x1e0   : > { %3827 = vst.msk [vmem:[#allocation2 + $0xa8] sm:$0xff] %vm171_vm1, %v3795_v57  ;;  %v3347_v2 = vadd.f32 %v11031_v0, %v2989_v62  ;;  %v3291_v19 = vpop.f32.mrb[123].mxu0  ;;  %11238 = vmatprep.subr.msk.mxu1 %vm365_vm0, %v9821_v39  ;;  %v3875_v63 = vld [vmem:[#allocation2 + $0x28] sm:$0xff] }
 0x1e1   : > { %3826 = vst.msk [vmem:[#allocation2 + $0xa0] sm:$0xff] %vm171_vm1, %v3794_v60  ;;  %v3346_v4 = vadd.f32 %v3291_v19, %v2988_v3  ;;  %v3439_v8 = vld [vmem:[#allocation2 + $0xb8] sm:$0xff] }
 0x1e2   : > { %3379 = vst.msk [vmem:[#allocation2 + $0xd8] sm:$0xff] %vm171_vm1, %v3347_v2  ;;  %v3797_v5 = vadd.f32 %v11075_v47, %v3439_v8  ;;  %v3438_v6 = vld [vmem:[#allocation2 + $0xb0] sm:$0xff]  ;;  %v11084_v21 = vpop.f32.mrb[124].mxu1  ;;  %v3877_v8 = vld [vmem:[#allocation2 + $0x38] sm:$0xff] }
 0x1e3   : > { %3378 = vst.msk [vmem:[#allocation2 + $0xd0] sm:$0xff] %vm171_vm1, %v3346_v4  ;;  %v3796_v7 = vadd.f32 %v3725_v36, %v3438_v6  ;;  %v11034_v9 = vpop.f32.mrb[124].mxu0  ;;  %v3755_v48 = vpop.f32.mrb[125].mxu1 }
 0x1e4   : > { %3829 = vst.msk [vmem:[#allocation2 + $0xb8] sm:$0xff] %vm171_vm1, %v3797_v5  ;;  %v3349_v13 = vadd.f32 %v11034_v9, %v2991_v10  ;;  %v3301_v1 = vpop.f32.mrb[125].mxu0 }
 0x1e5   : > { %3828 = vst.msk [vmem:[#allocation2 + $0xb0] sm:$0xff] %vm171_vm1, %v3796_v7  ;;  %v3348_v11 = vadd.f32 %v3301_v1, %v2990_v61  ;;  %v3441_v14 = vld [vmem:[#allocation2 + $0xc8] sm:$0xff] }
 0x1e6   : > { %3381 = vst.msk [vmem:[#allocation2 + $0xe8] sm:$0xff] %vm171_vm1, %v3349_v13  ;;  %v3799_v17 = vadd.f32 %v11078_v58, %v3441_v14  ;;  %v3440_v46 = vld [vmem:[#allocation2 + $0xc0] sm:$0xff]  ;;  %v11087_v24 = vpop.f32.mrb[126].mxu1 }
 0x1e7   : > { %3380 = vst.msk [vmem:[#allocation2 + $0xe0] sm:$0xff] %vm171_vm1, %v3348_v11  ;;  %v3798_v23 = vadd.f32 %v3735_v40, %v3440_v46  ;;  %v11037_v27 = vpop.f32.mrb[126].mxu0  ;;  %v3765_v35 = vpop.f32.mrb[127].mxu1  ;;  %v15396_v40 = vmov 0.0   ;;  %v3879_v46 = vld [vmem:[#allocation2 + $0x48] sm:$0xff] }
 0x1e8   : > { %3831 = vst.msk [vmem:[#allocation2 + $0xc8] sm:$0xff] %vm171_vm1, %v3799_v17  ;;  %v3351_v29 = vadd.f32 %v11037_v27, %v2993_v25  ;;  %v3311_v16 = vpop.f32.mrb[127].mxu0 }
 0x1e9   : > { %3830 = vst.msk [vmem:[#allocation2 + $0xc0] sm:$0xff] %vm171_vm1, %v3798_v23  ;;  %v3350_v31 = vadd.f32 %v3311_v16, %v2992_v12  ;;  %v3443_v18 = vld [vmem:[#allocation2 + $0xd8] sm:$0xff] }
 0x1ea   : > { %3383 = vst.msk [vmem:[#allocation2 + $0xf8] sm:$0xff] %vm171_vm1, %v3351_v29  ;;  %v3801_v20 = vadd.f32 %v11081_v42, %v3443_v18  ;;  %v3442_v22 = vld [vmem:[#allocation2 + $0xd0] sm:$0xff] }
 0x1eb   : > { %3382 = vst.msk [vmem:[#allocation2 + $0xf0] sm:$0xff] %vm171_vm1, %v3350_v31  ;;  %v3800_v26 = vadd.f32 %v3745_v44, %v3442_v22  ;;  %v11092_v33 = vpop.f32.mrb[128].mxu0  ;;  %v3876_v42 = vld [vmem:[#allocation2 + $0x30] sm:$0xff] }
 0x1ec   : > { %3833 = vst.msk [vmem:[#allocation2 + $0xd8] sm:$0xff] %vm171_vm1, %v3801_v20  ;;  %v4229_v28 = vadd.f32 %v11092_v33, %v3871_v50  ;;  %v4069_v52 = vpop.f32.mrb[129].mxu0 }
 0x1ed   : > { %3832 = vst.msk [vmem:[#allocation2 + $0xd0] sm:$0xff] %vm171_vm1, %v3800_v26  ;;  %v4228_v30 = vadd.f32 %v4069_v52, %v3870_v37  ;;  %v3445_v41 = vld [vmem:[#allocation2 + $0xe8] sm:$0xff] }
 0x1ee   : > { %4261 = vst.msk [vmem:[#allocation2 + $0x8] sm:$0xff] %vm171_vm1, %v4229_v28  ;;  %v3803_v32 = vadd.f32 %v11084_v21, %v3445_v41  ;;  %v3444_v43 = vld [vmem:[#allocation2 + $0xe0] sm:$0xff]  ;;  %v3881_v28 = vld [vmem:[#allocation2 + $0x58] sm:$0xff]  ;;  %v3880_v41 = vld [vmem:[#allocation2 + $0x50] sm:$0xff] }
 0x1ef   : > { %4260 = vst.msk [vmem:[#allocation2] sm:$0xff] %vm171_vm1, %v4228_v30  ;;  %v3802_v59 = vadd.f32 %v3755_v48, %v3444_v43  ;;  %v11095_v34 = vpop.f32.mrb[130].mxu0  ;;  %v3878_v48 = vld [vmem:[#allocation2 + $0x40] sm:$0xff] }
 0x1f0   : > { %3835 = vst.msk [vmem:[#allocation2 + $0xe8] sm:$0xff] %vm171_vm1, %v3803_v32  ;;  %v4231_v47 = vadd.f32 %v11095_v34, %v3873_v45  ;;  %v4079_v51 = vpop.f32.mrb[131].mxu0 }
 0x1f1   : > { %3834 = vst.msk [vmem:[#allocation2 + $0xe0] sm:$0xff] %vm171_vm1, %v3802_v59  ;;  %v4230_v53 = vadd.f32 %v4079_v51, %v3872_v49  ;;  %v3447_v36 = vld [vmem:[#allocation2 + $0xf8] sm:$0xff] }
 0x1f2   : > { %4263 = vst.msk [vmem:[#allocation2 + $0x18] sm:$0xff] %vm171_vm1, %v4231_v47  ;;  %v3805_v54 = vadd.f32 %v11087_v24, %v3447_v36  ;;  %v3446_v55 = vld [vmem:[#allocation2 + $0xf0] sm:$0xff] }
 0x1f3   : > { %4262 = vst.msk [vmem:[#allocation2 + $0x10] sm:$0xff] %vm171_vm1, %v4230_v53  ;;  %v3804_v56 = vadd.f32 %v3765_v35, %v3446_v55  ;;  %v11098_v15 = vpop.f32.mrb[132].mxu0 }
 0x1f4   : > { %3837 = vst.msk [vmem:[#allocation2 + $0xf8] sm:$0xff] %vm171_vm1, %v3805_v54  ;;  %v4233_v57 = vadd.f32 %v11098_v15, %v3875_v63  ;;  %v4089_v58 = vpop.f32.mrb[133].mxu0 }
 0x1f5   : > { %v12908_v60 = vld [vmem:[#allocation2 + $0x8] sm:$0xff]  ;;  %3836 = vst.msk [vmem:[#allocation2 + $0xf0] sm:$0xff] %vm171_vm1, %v3804_v56  ;;  %v4232_v62 = vadd.f32 %v4089_v58, %v3874_v38  ;;  %v3882_v58 = vld [vmem:[#allocation2 + $0x60] sm:$0xff] }
 0x1f6   : > { %v4396_v0 = vmul.f32 %v12908_v60, %v12908_v60  ;;  %4709 = vst.msk [vmem:[#allocation2 + $0x8] sm:$0xff] %vm171_vm1, %v15396_v40  ;;  %v12915_v2 = vld [vmem:[#allocation2] sm:$0xff]  ;;  %4265 = vst.msk [vmem:[#allocation2 + $0x28] sm:$0xff] %vm171_vm1, %v4233_v57  ;;  %v4325_v3 = vsel %vm171_vm1, %v12908_v60, 0.0  ;;  %v3883_v56 = vld [vmem:[#allocation2 + $0x68] sm:$0xff] }
 0x1f7   : > { %v4324_v19 = vsel %vm171_vm1, %v12915_v2, 0.0  ;;  %v4395_v4 = vmul.f32 %v12915_v2, %v12915_v2  ;;  %4708 = vst.msk [vmem:[#allocation2] sm:$0xff] %vm171_vm1, %v15396_v40  ;;  %4264 = vst.msk [vmem:[#allocation2 + $0x20] sm:$0xff] %vm171_vm1, %v4232_v62  ;;  %v11101_v5 = vpop.f32.mrb[134].mxu0 }
 0x1f8   : > { %v4235_v6 = vadd.f32 %v11101_v5, %v3877_v8  ;;  %v4099_v7 = vpop.f32.mrb[135].mxu0  ;;  %v4428_v10 = vsel %vm171_vm1, %v4396_v0, 0.0  ;;  %v4326_v61 = vadd.f32 %v4325_v3, %v4324_v19 }
 0x1f9   : > { %v4427_v9 = vsel %vm171_vm1, %v4395_v4, 0.0  ;;  %v12929_v44 = vld [vmem:[#allocation2 + $0x18] sm:$0xff]  ;;  %v4234_v13 = vadd.f32 %v4099_v7, %v3876_v42 }
 0x1fa   : > { %4711 = vst.msk [vmem:[#allocation2 + $0x18] sm:$0xff] %vm171_vm1, %v15396_v40  ;;  %v12933_v1 = vld [vmem:[#allocation2 + $0x10] sm:$0xff]  ;;  %4267 = vst.msk [vmem:[#allocation2 + $0x38] sm:$0xff] %vm171_vm1, %v4235_v6  ;;  %v4398_v11 = vmul.f32 %v12929_v44, %v12929_v44  ;;  %v4429_v23 = vadd.f32 %v4428_v10, %v4427_v9  ;;  %v4329_v12 = vsel %vm171_vm1, %v12929_v44, 0.0 }
 0x1fb   : > { %v4327_v14 = vsel %vm171_vm1, %v12933_v1, 0.0  ;;  %v4397_v17 = vmul.f32 %v12933_v1, %v12933_v1  ;;  %4710 = vst.msk [vmem:[#allocation2 + $0x10] sm:$0xff] %vm171_vm1, %v15396_v40  ;;  %4266 = vst.msk [vmem:[#allocation2 + $0x30] sm:$0xff] %vm171_vm1, %v4234_v13  ;;  %v11104_v21 = vpop.f32.mrb[136].mxu0  ;;  %v3885_v13 = vld [vmem:[#allocation2 + $0x78] sm:$0xff] }
 0x1fc   : > { %v4328_v25 = vadd.f32 %v4327_v14, %v4326_v61  ;;  %v4237_v27 = vadd.f32 %v11104_v21, %v3879_v46  ;;  %v4109_v29 = vpop.f32.mrb[137].mxu0  ;;  %v4432_v26 = vsel %vm171_vm1, %v4398_v11, 0.0  ;;  %v3884_v46 = vld [vmem:[#allocation2 + $0x70] sm:$0xff] }
 0x1fd   : > { %v4430_v16 = vsel %vm171_vm1, %v4397_v17, 0.0  ;;  %v12948_v31 = vld [vmem:[#allocation2 + $0x28] sm:$0xff]  ;;  %v4236_v18 = vadd.f32 %v4109_v29, %v3878_v48 }
 0x1fe   : > { %v4431_v20 = vadd.f32 %v4430_v16, %v4429_v23  ;;  %4713 = vst.msk [vmem:[#allocation2 + $0x28] sm:$0xff] %vm171_vm1, %v15396_v40  ;;  %v12952_v22 = vld [vmem:[#allocation2 + $0x20] sm:$0xff]  ;;  %v4330_v24 = vadd.f32 %v4329_v12, %v4328_v25  ;;  %4269 = vst.msk [vmem:[#allocation2 + $0x48] sm:$0xff] %vm171_vm1, %v4237_v27  ;;  %v4400_v50 = vmul.f32 %v12948_v31, %v12948_v31  ;;  %v4333_v43 = vsel %vm171_vm1, %v12948_v31, 0.0 }
 0x1ff   : > { %v4331_v33 = vsel %vm171_vm1, %v12952_v22, 0.0  ;;  %v4399_v35 = vmul.f32 %v12952_v22, %v12952_v22  ;;  %4712 = vst.msk [vmem:[#allocation2 + $0x20] sm:$0xff] %vm171_vm1, %v15396_v40  ;;  %4268 = vst.msk [vmem:[#allocation2 + $0x40] sm:$0xff] %vm171_vm1, %v4236_v18  ;;  %v11107_v37 = vpop.f32.mrb[138].mxu0 }
 0x200   : > { %v4332_v52 = vadd.f32 %v4331_v33, %v4330_v24  ;;  %v4433_v39 = vadd.f32 %v4432_v26, %v4431_v20  ;;  %v4239_v30 = vadd.f32 %v11107_v37, %v3881_v28  ;;  %v4119_v32 = vpop.f32.mrb[139].mxu0  ;;  %v4436_v53 = vsel %vm171_vm1, %v4400_v50, 0.0  ;;  %v3887_v50 = vld [vmem:[#allocation2 + $0x88] sm:$0xff] }
 0x201   : > { %v4434_v59 = vsel %vm171_vm1, %v4399_v35, 0.0  ;;  %v12968_v45 = vld [vmem:[#allocation2 + $0x38] sm:$0xff]  ;;  %v4238_v34 = vadd.f32 %v4119_v32, %v3880_v41 }
 0x202   : > { %v4435_v47 = vadd.f32 %v4434_v59, %v4433_v39  ;;  %4715 = vst.msk [vmem:[#allocation2 + $0x38] sm:$0xff] %vm171_vm1, %v15396_v40  ;;  %v12972_v49 = vld [vmem:[#allocation2 + $0x30] sm:$0xff]  ;;  %v4334_v51 = vadd.f32 %v4333_v43, %v4332_v52  ;;  %4271 = vst.msk [vmem:[#allocation2 + $0x58] sm:$0xff] %vm171_vm1, %v4239_v30  ;;  %v4402_v36 = vmul.f32 %v12968_v45, %v12968_v45  ;;  %v4337_v0 = vsel %vm171_vm1, %v12968_v45, 0.0  ;;  %v3886_v52 = vld [vmem:[#allocation2 + $0x80] sm:$0xff] }
 0x203   : > { %v4335_v54 = vsel %vm171_vm1, %v12972_v49, 0.0  ;;  %v4401_v55 = vmul.f32 %v12972_v49, %v12972_v49  ;;  %4714 = vst.msk [vmem:[#allocation2 + $0x30] sm:$0xff] %vm171_vm1, %v15396_v40  ;;  %4270 = vst.msk [vmem:[#allocation2 + $0x50] sm:$0xff] %vm171_vm1, %v4238_v34  ;;  %v11110_v63 = vpop.f32.mrb[140].mxu0 }
 0x204   : > { %v4336_v15 = vadd.f32 %v4335_v54, %v4334_v51  ;;  %v4437_v57 = vadd.f32 %v4436_v53, %v4435_v47  ;;  %v4241_v38 = vadd.f32 %v11110_v63, %v3883_v56  ;;  %v4129_v62 = vpop.f32.mrb[141].mxu0  ;;  %v4440_v42 = vsel %vm171_vm1, %v4402_v36, 0.0 }
 0x205   : > { %v4438_v3 = vsel %vm171_vm1, %v4401_v55, 0.0  ;;  %v12988_v19 = vld [vmem:[#allocation2 + $0x48] sm:$0xff]  ;;  %v4240_v4 = vadd.f32 %v4129_v62, %v3882_v58  ;;  %v3889_v55 = vld [vmem:[#allocation2 + $0x98] sm:$0xff] }
 0x206   : > { %v4439_v8 = vadd.f32 %v4438_v3, %v4437_v57  ;;  %4717 = vst.msk [vmem:[#allocation2 + $0x48] sm:$0xff] %vm171_vm1, %v15396_v40  ;;  %v12992_v5 = vld [vmem:[#allocation2 + $0x40] sm:$0xff]  ;;  %v4338_v6 = vadd.f32 %v4337_v0, %v4336_v15  ;;  %4273 = vst.msk [vmem:[#allocation2 + $0x68] sm:$0xff] %vm171_vm1, %v4241_v38  ;;  %v4404_v7 = vmul.f32 %v12988_v19, %v12988_v19  ;;  %v4341_v23 = vsel %vm171_vm1, %v12988_v19, 0.0  ;;  %v3888_v38 = vld [vmem:[#allocation2 + $0x90] sm:$0xff] }
 0x207   : > { %v4339_v10 = vsel %vm171_vm1, %v12992_v5, 0.0  ;;  %v4403_v9 = vmul.f32 %v12992_v5, %v12992_v5  ;;  %4716 = vst.msk [vmem:[#allocation2 + $0x40] sm:$0xff] %vm171_vm1, %v15396_v40  ;;  %4272 = vst.msk [vmem:[#allocation2 + $0x60] sm:$0xff] %vm171_vm1, %v4240_v4  ;;  %v11113_v61 = vpop.f32.mrb[142].mxu0 }
 0x208   : > { %v4340_v11 = vadd.f32 %v4339_v10, %v4338_v6  ;;  %v4441_v14 = vadd.f32 %v4440_v42, %v4439_v8  ;;  %v4243_v17 = vadd.f32 %v11113_v61, %v3885_v13  ;;  %v4139_v21 = vpop.f32.mrb[143].mxu0  ;;  %v4444_v18 = vsel %vm171_vm1, %v4404_v7, 0.0  ;;  %v3891_v61 = vld [vmem:[#allocation2 + $0xa8] sm:$0xff] }
 0x209   : > { %v4442_v25 = vsel %vm171_vm1, %v4403_v9, 0.0  ;;  %v13008_v27 = vld [vmem:[#allocation2 + $0x58] sm:$0xff]  ;;  %v4242_v48 = vadd.f32 %v4139_v21, %v3884_v46  ;;  %v3890_v21 = vld [vmem:[#allocation2 + $0xa0] sm:$0xff] }
 0x20a   : > { %v4443_v29 = vadd.f32 %v4442_v25, %v4441_v14  ;;  %4719 = vst.msk [vmem:[#allocation2 + $0x58] sm:$0xff] %vm171_vm1, %v15396_v40  ;;  %v13012_v12 = vld [vmem:[#allocation2 + $0x50] sm:$0xff]  ;;  %v4342_v16 = vadd.f32 %v4341_v23, %v4340_v11  ;;  %4275 = vst.msk [vmem:[#allocation2 + $0x78] sm:$0xff] %vm171_vm1, %v4243_v17  ;;  %v4406_v20 = vmul.f32 %v13008_v27, %v13008_v27  ;;  %v4345_v30 = vsel %vm171_vm1, %v13008_v27, 0.0 }
 0x20b   : > { %v4343_v24 = vsel %vm171_vm1, %v13012_v12, 0.0  ;;  %v4405_v26 = vmul.f32 %v13012_v12, %v13012_v12  ;;  %4718 = vst.msk [vmem:[#allocation2 + $0x50] sm:$0xff] %vm171_vm1, %v15396_v40  ;;  %4274 = vst.msk [vmem:[#allocation2 + $0x70] sm:$0xff] %vm171_vm1, %v4242_v48  ;;  %v11116_v33 = vpop.f32.mrb[144].mxu0 }
 0x20c   : > { %v4344_v35 = vadd.f32 %v4343_v24, %v4342_v16  ;;  %v4445_v28 = vadd.f32 %v4444_v18, %v4443_v29  ;;  %v4245_v37 = vadd.f32 %v11116_v33, %v3887_v50  ;;  %v4149_v39 = vpop.f32.mrb[145].mxu0  ;;  %v4448_v51 = vsel %vm171_vm1, %v4406_v20, 0.0 }
 0x20d   : > { %v4446_v41 = vsel %vm171_vm1, %v4405_v26, 0.0  ;;  %v13028_v32 = vld [vmem:[#allocation2 + $0x68] sm:$0xff]  ;;  %v4244_v43 = vadd.f32 %v4149_v39, %v3886_v52 }
 0x20e   : > { %v4447_v59 = vadd.f32 %v4446_v41, %v4445_v28  ;;  %4721 = vst.msk [vmem:[#allocation2 + $0x68] sm:$0xff] %vm171_vm1, %v15396_v40  ;;  %v13032_v34 = vld [vmem:[#allocation2 + $0x60] sm:$0xff]  ;;  %v4346_v47 = vadd.f32 %v4345_v30, %v4344_v35  ;;  %4277 = vst.msk [vmem:[#allocation2 + $0x88] sm:$0xff] %vm171_vm1, %v4245_v37  ;;  %v4408_v53 = vmul.f32 %v13028_v32, %v13028_v32  ;;  %v4349_v62 = vsel %vm171_vm1, %v13028_v32, 0.0  ;;  %v3893_v28 = vld [vmem:[#allocation2 + $0xb8] sm:$0xff] }
 0x20f   : > { %v4347_v36 = vsel %vm171_vm1, %v13032_v34, 0.0  ;;  %v4407_v54 = vmul.f32 %v13032_v34, %v13032_v34  ;;  %4720 = vst.msk [vmem:[#allocation2 + $0x60] sm:$0xff] %vm171_vm1, %v15396_v40  ;;  %4276 = vst.msk [vmem:[#allocation2 + $0x80] sm:$0xff] %vm171_vm1, %v4244_v43  ;;  %v11119_v56 = vpop.f32.mrb[146].mxu0  ;;  %v3892_v41 = vld [vmem:[#allocation2 + $0xb0] sm:$0xff] }
 0x210   : > { %v4348_v63 = vadd.f32 %v4347_v36, %v4346_v47  ;;  %v4449_v15 = vadd.f32 %v4448_v51, %v4447_v59  ;;  %v4247_v57 = vadd.f32 %v11119_v56, %v3889_v55  ;;  %v4159_v58 = vpop.f32.mrb[147].mxu0  ;;  %v4452_v7 = vsel %vm171_vm1, %v4408_v53, 0.0 }
 0x211   : > { %v4450_v0 = vsel %vm171_vm1, %v4407_v54, 0.0  ;;  %v13048_v3 = vld [vmem:[#allocation2 + $0x78] sm:$0xff]  ;;  %v4246_v4 = vadd.f32 %v4159_v58, %v3888_v38  ;;  %v3895_v38 = vld [vmem:[#allocation2 + $0xc8] sm:$0xff] }
 0x212   : > { %v4451_v8 = vadd.f32 %v4450_v0, %v4449_v15  ;;  %4723 = vst.msk [vmem:[#allocation2 + $0x78] sm:$0xff] %vm171_vm1, %v15396_v40  ;;  %v13052_v6 = vld [vmem:[#allocation2 + $0x70] sm:$0xff]  ;;  %v4350_v42 = vadd.f32 %v4349_v62, %v4348_v63  ;;  %4279 = vst.msk [vmem:[#allocation2 + $0x98] sm:$0xff] %vm171_vm1, %v4247_v57  ;;  %v4410_v10 = vmul.f32 %v13048_v3, %v13048_v3  ;;  %v4353_v25 = vsel %vm171_vm1, %v13048_v3, 0.0 }
 0x213   : > { %v4351_v9 = vsel %vm171_vm1, %v13052_v6, 0.0  ;;  %v4409_v13 = vmul.f32 %v13052_v6, %v13052_v6  ;;  %4722 = vst.msk [vmem:[#allocation2 + $0x70] sm:$0xff] %vm171_vm1, %v15396_v40  ;;  %4278 = vst.msk [vmem:[#allocation2 + $0x90] sm:$0xff] %vm171_vm1, %v4246_v4  ;;  %v11122_v11 = vpop.f32.mrb[148].mxu0 }
 0x214   : > { %v4352_v14 = vadd.f32 %v4351_v9, %v4350_v42  ;;  %v4453_v17 = vadd.f32 %v4452_v7, %v4451_v8  ;;  %v4249_v46 = vadd.f32 %v11122_v11, %v3891_v61  ;;  %v4169_v23 = vpop.f32.mrb[149].mxu0  ;;  %v4456_v26 = vsel %vm171_vm1, %v4410_v10, 0.0  ;;  %v3894_v8 = vld [vmem:[#allocation2 + $0xc0] sm:$0xff] }
 0x215   : > { %v4454_v48 = vsel %vm171_vm1, %v4409_v13, 0.0  ;;  %v13068_v29 = vld [vmem:[#allocation2 + $0x88] sm:$0xff]  ;;  %v4248_v16 = vadd.f32 %v4169_v23, %v3890_v21 }
 0x216   : > { %v4455_v18 = vadd.f32 %v4454_v48, %v4453_v17  ;;  %4725 = vst.msk [vmem:[#allocation2 + $0x88] sm:$0xff] %vm171_vm1, %v15396_v40  ;;  %v13072_v20 = vld [vmem:[#allocation2 + $0x80] sm:$0xff]  ;;  %v4354_v24 = vadd.f32 %v4353_v25, %v4352_v14  ;;  %4281 = vst.msk [vmem:[#allocation2 + $0xa8] sm:$0xff] %vm171_vm1, %v4249_v46  ;;  %v4412_v50 = vmul.f32 %v13068_v29, %v13068_v29  ;;  %v4357_v59 = vsel %vm171_vm1, %v13068_v29, 0.0  ;;  %v3897_v25 = vld [vmem:[#allocation2 + $0xd8] sm:$0xff] }
 0x217   : > { %v4355_v33 = vsel %vm171_vm1, %v13072_v20, 0.0  ;;  %v4411_v35 = vmul.f32 %v13072_v20, %v13072_v20  ;;  %4724 = vst.msk [vmem:[#allocation2 + $0x80] sm:$0xff] %vm171_vm1, %v15396_v40  ;;  %4280 = vst.msk [vmem:[#allocation2 + $0xa0] sm:$0xff] %vm171_vm1, %v4248_v16  ;;  %v11125_v37 = vpop.f32.mrb[150].mxu0 }
 0x218   : > { %v4356_v52 = vadd.f32 %v4355_v33, %v4354_v24  ;;  %v4457_v39 = vadd.f32 %v4456_v26, %v4455_v18  ;;  %v4251_v30 = vadd.f32 %v11125_v37, %v3893_v28  ;;  %v4179_v43 = vpop.f32.mrb[151].mxu0  ;;  %v4460_v56 = vsel %vm171_vm1, %v4412_v50, 0.0  ;;  %v3896_v26 = vld [vmem:[#allocation2 + $0xd0] sm:$0xff] }
 0x219   : > { %v4458_v47 = vsel %vm171_vm1, %v4411_v35, 0.0  ;;  %v13088_v51 = vld [vmem:[#allocation2 + $0x98] sm:$0xff]  ;;  %v4250_v53 = vadd.f32 %v4179_v43, %v3892_v41  ;;  %v13138_v41 = vld [vmem:[%s15305_s2 + $0xc] sm:$0xf] }
 0x21a   : > { %v4459_v36 = vadd.f32 %v4458_v47, %v4457_v39  ;;  %4727 = vst.msk [vmem:[#allocation2 + $0x98] sm:$0xff] %vm171_vm1, %v15396_v40  ;;  %v13092_v54 = vld [vmem:[#allocation2 + $0x90] sm:$0xff]  ;;  %v4358_v55 = vadd.f32 %v4357_v59, %v4356_v52  ;;  %4283 = vst.msk [vmem:[#allocation2 + $0xb8] sm:$0xff] %vm171_vm1, %v4251_v30  ;;  %v4414_v63 = vmul.f32 %v13088_v51, %v13088_v51  ;;  %v4361_v7 = vsel %vm171_vm1, %v13088_v51, 0.0 }
 0x21b   : > { %v4359_v15 = vsel %vm171_vm1, %v13092_v54, 0.0  ;;  %v4413_v57 = vmul.f32 %v13092_v54, %v13092_v54  ;;  %4726 = vst.msk [vmem:[#allocation2 + $0x90] sm:$0xff] %vm171_vm1, %v15396_v40  ;;  %4282 = vst.msk [vmem:[#allocation2 + $0xb0] sm:$0xff] %vm171_vm1, %v4250_v53  ;;  %v11128_v58 = vpop.f32.mrb[152].mxu0  ;;  %11288 = vmatprep.subr.msk.mxu0 %vm365_vm0, %v13138_v41 }
 0x21c   : > { %v4360_v62 = vadd.f32 %v4359_v15, %v4358_v55  ;;  %v4461_v0 = vadd.f32 %v4460_v56, %v4459_v36  ;;  %v4253_v4 = vadd.f32 %v11128_v58, %v3895_v38  ;;  %v4189_v42 = vpop.f32.mrb[153].mxu0  ;;  %v4464_v17 = vsel %vm171_vm1, %v4414_v63, 0.0  ;;  %v3899_v36 = vld [vmem:[#allocation2 + $0xe8] sm:$0xff] }
 0x21d   : > { %v4462_v10 = vsel %vm171_vm1, %v4413_v57, 0.0  ;;  %v13108_v9 = vld [vmem:[#allocation2 + $0xa8] sm:$0xff]  ;;  %v4252_v13 = vadd.f32 %v4189_v42, %v3894_v8  ;;  %v3898_v57 = vld [vmem:[#allocation2 + $0xe0] sm:$0xff] }
 0x21e   : > { %v4463_v61 = vadd.f32 %v4462_v10, %v4461_v0  ;;  %4729 = vst.msk [vmem:[#allocation2 + $0xa8] sm:$0xff] %vm171_vm1, %v15396_v40  ;;  %v13112_v11 = vld [vmem:[#allocation2 + $0xa0] sm:$0xff]  ;;  %v4362_v14 = vadd.f32 %v4361_v7, %v4360_v62  ;;  %4285 = vst.msk [vmem:[#allocation2 + $0xc8] sm:$0xff] %vm171_vm1, %v4253_v4  ;;  %v4416_v46 = vmul.f32 %v13108_v9, %v13108_v9  ;;  %v4365_v33 = vsel %vm171_vm1, %v13108_v9, 0.0 }
 0x21f   : > { %v4363_v21 = vsel %vm171_vm1, %v13112_v11, 0.0  ;;  %v4415_v23 = vmul.f32 %v13112_v11, %v13112_v11  ;;  %4728 = vst.msk [vmem:[#allocation2 + $0xa0] sm:$0xff] %vm171_vm1, %v15396_v40  ;;  %4284 = vst.msk [vmem:[#allocation2 + $0xc0] sm:$0xff] %vm171_vm1, %v4252_v13  ;;  %v11131_v48 = vpop.f32.mrb[154].mxu0 }
 0x220   : > { %v4364_v16 = vadd.f32 %v4363_v21, %v4362_v14  ;;  %v4465_v18 = vadd.f32 %v4464_v17, %v4463_v61  ;;  %v4255_v24 = vadd.f32 %v11131_v48, %v3897_v25  ;;  %v4199_v50 = vpop.f32.mrb[155].mxu0  ;;  %v4468_v43 = vsel %vm171_vm1, %v4416_v46, 0.0  ;;  %v3901_v17 = vld [vmem:[#allocation2 + $0xf8] sm:$0xff]  ;;  %v3900_v48 = vld [vmem:[#allocation2 + $0xf0] sm:$0xff] }
 0x221   : > { %v4466_v35 = vsel %vm171_vm1, %v4415_v23, 0.0  ;;  %v13128_v28 = vld [vmem:[#allocation2 + $0xb8] sm:$0xff]  ;;  %v4254_v37 = vadd.f32 %v4199_v50, %v3896_v26 }
 0x222   : > { %v4467_v52 = vadd.f32 %v4466_v35, %v4465_v18  ;;  %4731 = vst.msk [vmem:[#allocation2 + $0xb8] sm:$0xff] %vm171_vm1, %v15396_v40  ;;  %v13132_v39 = vld [vmem:[#allocation2 + $0xb0] sm:$0xff]  ;;  %v4366_v30 = vadd.f32 %v4365_v33, %v4364_v16  ;;  %4287 = vst.msk [vmem:[#allocation2 + $0xd8] sm:$0xff] %vm171_vm1, %v4255_v24  ;;  %v4418_v59 = vmul.f32 %v13128_v28, %v13128_v28  ;;  %v4369_v58 = vsel %vm171_vm1, %v13128_v28, 0.0 }
 0x223   : > { %v4367_v47 = vsel %vm171_vm1, %v13132_v39, 0.0  ;;  %v4417_v53 = vmul.f32 %v13132_v39, %v13132_v39  ;;  %4730 = vst.msk [vmem:[#allocation2 + $0xb0] sm:$0xff] %vm171_vm1, %v15396_v40  ;;  %4286 = vst.msk [vmem:[#allocation2 + $0xd0] sm:$0xff] %vm171_vm1, %v4254_v37  ;;  %v11134_v55 = vpop.f32.mrb[156].mxu0 }
 0x224   : > { %v4368_v56 = vadd.f32 %v4367_v47, %v4366_v30  ;;  %v4469_v63 = vadd.f32 %v4468_v43, %v4467_v52  ;;  %v4257_v15 = vadd.f32 %v11134_v55, %v3899_v36  ;;  %v4209_v38 = vpop.f32.mrb[157].mxu0  ;;  %v4472_v10 = vsel %vm171_vm1, %v4418_v59, 0.0 }
 0x225   : > { %v4470_v62 = vsel %vm171_vm1, %v4417_v53, 0.0  ;;  %v13155_v0 = vld [vmem:[#allocation2 + $0xc8] sm:$0xff]  ;;  %v4256_v4 = vadd.f32 %v4209_v38, %v3898_v57 }
 0x226   : > { %v4471_v8 = vadd.f32 %v4470_v62, %v4469_v63  ;;  %4733 = vst.msk [vmem:[#allocation2 + $0xc8] sm:$0xff] %vm171_vm1, %v15396_v40  ;;  %v13159_v42 = vld [vmem:[#allocation2 + $0xc0] sm:$0xff]  ;;  %v4370_v7 = vadd.f32 %v4369_v58, %v4368_v56  ;;  %4289 = vst.msk [vmem:[#allocation2 + $0xe8] sm:$0xff] %vm171_vm1, %v4257_v15  ;;  %v4420_v13 = vmul.f32 %v13155_v0, %v13155_v0  ;;  %v4373_v18 = vsel %vm171_vm1, %v13155_v0, 0.0 }
 0x227   : > { %v4371_v61 = vsel %vm171_vm1, %v13159_v42, 0.0  ;;  %v4419_v14 = vmul.f32 %v13159_v42, %v13159_v42  ;;  %4732 = vst.msk [vmem:[#allocation2 + $0xc0] sm:$0xff] %vm171_vm1, %v15396_v40  ;;  %4288 = vst.msk [vmem:[#allocation2 + $0xe0] sm:$0xff] %vm171_vm1, %v4256_v4  ;;  %v11137_v46 = vpop.f32.mrb[158].mxu0 }
 0x228   : > { %v4372_v21 = vadd.f32 %v4371_v61, %v4370_v7  ;;  %v4473_v23 = vadd.f32 %v4472_v10, %v4471_v8  ;;  %v4259_v25 = vadd.f32 %v11137_v46, %v3901_v17  ;;  %v4219_v16 = vpop.f32.mrb[159].mxu0  ;;  %v4476_v52 = vsel %vm171_vm1, %v4420_v13, 0.0 }
 0x229   : > { %v4474_v24 = vsel %vm171_vm1, %v4419_v14, 0.0  ;;  %v13175_v26 = vld [vmem:[#allocation2 + $0xd8] sm:$0xff]  ;;  %v4258_v50 = vadd.f32 %v4219_v16, %v3900_v48 }
 0x22a   : > { %v4475_v33 = vadd.f32 %v4474_v24, %v4473_v23  ;;  %4735 = vst.msk [vmem:[#allocation2 + $0xd8] sm:$0xff] %vm171_vm1, %v15396_v40  ;;  %v13179_v35 = vld [vmem:[#allocation2 + $0xd0] sm:$0xff]  ;;  %v4374_v37 = vadd.f32 %v4373_v18, %v4372_v21  ;;  %4291 = vst.msk [vmem:[#allocation2 + $0xf8] sm:$0xff] %vm171_vm1, %v4259_v25  ;;  %v4422_v30 = vmul.f32 %v13175_v26, %v13175_v26  ;;  %v4377_v36 = vsel %vm171_vm1, %v13175_v26, 0.0 }
 0x22b   : > { %v4375_v43 = vsel %vm171_vm1, %v13179_v35, 0.0  ;;  %v4421_v59 = vmul.f32 %v13179_v35, %v13179_v35  ;;  %4734 = vst.msk [vmem:[#allocation2 + $0xd0] sm:$0xff] %vm171_vm1, %v15396_v40  ;;  %4290 = vst.msk [vmem:[#allocation2 + $0xf0] sm:$0xff] %vm171_vm1, %v4258_v50 }
 0x22c   : > { %v4376_v47 = vadd.f32 %v4375_v43, %v4374_v37  ;;  %v4477_v53 = vadd.f32 %v4476_v52, %v4475_v33  ;;  %v4480_v38 = vsel %vm171_vm1, %v4422_v30, 0.0 }
 0x22d   : > { %v4478_v55 = vsel %vm171_vm1, %v4421_v59, 0.0  ;;  %v13195_v56 = vld [vmem:[#allocation2 + $0xe8] sm:$0xff] }
 0x22e   : > { %v4479_v63 = vadd.f32 %v4478_v55, %v4477_v53  ;;  %4737 = vst.msk [vmem:[#allocation2 + $0xe8] sm:$0xff] %vm171_vm1, %v15396_v40  ;;  %v13199_v15 = vld [vmem:[#allocation2 + $0xe0] sm:$0xff]  ;;  %v4378_v57 = vadd.f32 %v4377_v36, %v4376_v47  ;;  %v4424_v58 = vmul.f32 %v13195_v56, %v13195_v56  ;;  %v4381_v10 = vsel %vm171_vm1, %v13195_v56, 0.0 }
 0x22f   : > { %v4379_v62 = vsel %vm171_vm1, %v13199_v15, 0.0  ;;  %v4423_v4 = vmul.f32 %v13199_v15, %v13199_v15  ;;  %4736 = vst.msk [vmem:[#allocation2 + $0xe0] sm:$0xff] %vm171_vm1, %v15396_v40 }
 0x230   : > { %v4380_v8 = vadd.f32 %v4379_v62, %v4378_v57  ;;  %v4481_v7 = vadd.f32 %v4480_v38, %v4479_v63  ;;  %v4484_v21 = vsel %vm171_vm1, %v4424_v58, 0.0 }
 0x231   : > { %v4482_v13 = vsel %vm171_vm1, %v4423_v4, 0.0  ;;  %v13213_v61 = vld [vmem:[#allocation2 + $0xf8] sm:$0xff] }
 0x232   : > { %v4483_v14 = vadd.f32 %v4482_v13, %v4481_v7  ;;  %4739 = vst.msk [vmem:[#allocation2 + $0xf8] sm:$0xff] %vm171_vm1, %v15396_v40  ;;  %v13217_v17 = vld [vmem:[#allocation2 + $0xf0] sm:$0xff]  ;;  %v4382_v46 = vadd.f32 %v4381_v10, %v4380_v8  ;;  %v4426_v23 = vmul.f32 %v13213_v61, %v13213_v61  ;;  %v4385_v24 = vsel %vm171_vm1, %v13213_v61, 0.0 }
 0x233   : > { %v4383_v25 = vsel %vm171_vm1, %v13217_v17, 0.0  ;;  %v4425_v48 = vmul.f32 %v13217_v17, %v13217_v17  ;;  %4738 = vst.msk [vmem:[#allocation2 + $0xf0] sm:$0xff] %vm171_vm1, %v15396_v40 }
 0x234   : > { %v4384_v16 = vadd.f32 %v4383_v25, %v4382_v46  ;;  %v4485_v18 = vadd.f32 %v4484_v21, %v4483_v14  ;;  %v4488_v52 = vsel %vm171_vm1, %v4426_v23, 0.0 }
 0x235   : > { %v4486_v50 = vsel %vm171_vm1, %v4425_v48, 0.0 }
 0x236   : > { %v4386_v33 = vadd.f32 %v4385_v24, %v4384_v16  ;;  %v4487_v37 = vadd.f32 %v4486_v50, %v4485_v18 }
 0x238   : > { %v4387_v30 = vrot.slane %v4386_v33, 4  ;;  %v4489_v43 = vadd.f32 %v4488_v52, %v4487_v37 }
 0x23a   : > { %v4388_v59 = vadd.f32 %v4387_v30, %v4386_v33  ;;  %v4490_v47 = vrot.slane %v4489_v43, 4 }
 0x23c   : > { %v4389_v53 = vrot.slane %v4388_v59, 2  ;;  %v4491_v36 = vadd.f32 %v4490_v47, %v4489_v43 }
 0x23e   : > { %v4390_v55 = vadd.f32 %v4389_v53, %v4388_v59  ;;  %v4492_v63 = vrot.slane %v4491_v36, 2 }
 0x240   : > { %v4391_v40 = vrot.slane %v4390_v55, 1  ;;  %v4493_v57 = vadd.f32 %v4492_v63, %v4491_v36 }
 0x242   : > { %v4392_v38 = vadd.f32 %v4391_v40, %v4390_v55  ;;  %v4494_v58 = vrot.slane %v4493_v57, 1 }
 0x244   : > { %v13232_v62 = vmul.f32 0.00390625, %v4392_v38  ;;  %v4495_v4 = vadd.f32 %v4494_v58, %v4493_v57 }
 0x246   : > { %v4496_v8 = vmul.f32 0.00390625, %v4495_v4  ;;  %v4497_v7 = vmul.f32 %v13232_v62, %v13232_v62  ;;  %v4502_v14 = vsub.f32 %v12929_v44, %v13232_v62  ;;  %v4501_v46 = vsub.f32 %v12933_v1, %v13232_v62 }
 0x247   : > { %v4499_v21 = vsub.f32 %v12915_v2, %v13232_v62  ;;  %v4500_v23 = vsub.f32 %v12908_v60, %v13232_v62  ;;  %v4503_v25 = vsub.f32 %v12952_v22, %v13232_v62  ;;  %v4504_v48 = vsub.f32 %v12948_v31, %v13232_v62 }
 0x248   : > { %v4498_v10 = vsub.f32 %v4496_v8, %v4497_v7  ;;  %v4505_v16 = vsub.f32 %v12972_v49, %v13232_v62  ;;  %v4506_v44 = vsub.f32 %v12968_v45, %v13232_v62  ;;  %v4507_v1 = vsub.f32 %v12992_v5, %v13232_v62 }
 0x249   : > { %v4508_v2 = vsub.f32 %v12988_v19, %v13232_v62  ;;  %v4509_v60 = vsub.f32 %v13012_v12, %v13232_v62  ;;  %v4510_v22 = vsub.f32 %v13008_v27, %v13232_v62  ;;  %v4511_v31 = vsub.f32 %v13032_v34, %v13232_v62 }
 0x24a   : > { %v4531_v13 = vadd.f32 1e-05, %v4498_v10  ;;  %v4512_v49 = vsub.f32 %v13028_v32, %v13232_v62  ;;  %v4513_v45 = vsub.f32 %v13052_v6, %v13232_v62  ;;  %v4514_v5 = vsub.f32 %v13048_v3, %v13232_v62 }
 0x24b   : > { %v4515_v19 = vsub.f32 %v13072_v20, %v13232_v62  ;;  %v4516_v12 = vsub.f32 %v13068_v29, %v13232_v62  ;;  %v4517_v27 = vsub.f32 %v13092_v54, %v13232_v62  ;;  %v4518_v34 = vsub.f32 %v13088_v51, %v13232_v62 }
 0x24c   : > { %11598 = vrsqrt.f32 %v4531_v13  ;;  %v4519_v32 = vsub.f32 %v13112_v11, %v13232_v62  ;;  %v4520_v6 = vsub.f32 %v13108_v9, %v13232_v62  ;;  %v4521_v3 = vsub.f32 %v13132_v39, %v13232_v62 }
 0x24d   : > { %v4522_v18 = vsub.f32 %v13128_v28, %v13232_v62  ;;  %v4523_v24 = vsub.f32 %v13159_v42, %v13232_v62  ;;  %v4524_v50 = vsub.f32 %v13155_v0, %v13232_v62  ;;  %v4525_v33 = vsub.f32 %v13179_v35, %v13232_v62 }
 0x24e   : > { %v4526_v37 = vsub.f32 %v13175_v26, %v13232_v62  ;;  %v4527_v30 = vsub.f32 %v13199_v15, %v13232_v62  ;;  %v4528_v43 = vsub.f32 %v13195_v56, %v13232_v62  ;;  %v4529_v59 = vsub.f32 %v13217_v17, %v13232_v62 }
 0x24f   : > { %v15397_v56 = vsub.f32 %v13213_v61, %v13232_v62 }
 0x256   : > { %v13292_v52 = vpop.eup %11598 }
 0x257   : > { %v4535_v53 = vmul.f32 %v13292_v52, %v4501_v46  ;;  %v4536_v36 = vmul.f32 %v13292_v52, %v4502_v14  ;;  %v4533_v55 = vmul.f32 %v13292_v52, %v4499_v21  ;;  %v4534_v63 = vmul.f32 %v13292_v52, %v4500_v23 }
 0x258   : > { %v4537_v40 = vmul.f32 %v13292_v52, %v4503_v25  ;;  %v4538_v57 = vmul.f32 %v13292_v52, %v4504_v48  ;;  %v4539_v38 = vmul.f32 %v13292_v52, %v4505_v16  ;;  %v4540_v58 = vmul.f32 %v13292_v52, %v4506_v44 }
 0x259   : > { %v4567_v4 = vmax.f32 %v4535_v53, 0.0  ;;  %v4568_v8 = vmax.f32 %v4536_v36, 0.0  ;;  %v4565_v7 = vmax.f32 %v4533_v55, 0.0  ;;  %v4566_v10 = vmax.f32 %v4534_v63, 0.0 }
 0x25a   : > { %v4569_v13 = vmax.f32 %v4537_v40, 0.0  ;;  %v4570_v46 = vmax.f32 %v4538_v57, 0.0  ;;  %v4571_v14 = vmax.f32 %v4539_v38, 0.0  ;;  %v4572_v47 = vmax.f32 %v4540_v58, 0.0 }
 0x25b   : > { %4630 = vst.msk [vmem:[#allocation3 + $0x1] sm:$0xff] %vm171_vm1, %v4567_v4  ;;  %4600 = vst.msk [vmem:[#allocation3 + $0x31] sm:$0xff] %vm171_vm1, %v4567_v4  ;;  %v4541_v21 = vmul.f32 %v13292_v52, %v4507_v1  ;;  %v4542_v23 = vmul.f32 %v13292_v52, %v4508_v2  ;;  %v4543_v25 = vmul.f32 %v13292_v52, %v4509_v60 }
 0x25c   : > { %4631 = vst.msk [vmem:[#allocation3 + $0x9] sm:$0xff] %vm171_vm1, %v4568_v8  ;;  %4601 = vst.msk [vmem:[#allocation3 + $0x39] sm:$0xff] %vm171_vm1, %v4568_v8  ;;  %v4544_v48 = vmul.f32 %v13292_v52, %v4510_v22  ;;  %v4545_v16 = vmul.f32 %v13292_v52, %v4511_v31  ;;  %v4546_v44 = vmul.f32 %v13292_v52, %v4512_v49 }
 0x25d   : > { %4598 = vst.msk [vmem:[#allocation3 + $0x19] sm:$0xff] %vm171_vm1, %v4565_v7  ;;  %4599 = vst.msk [vmem:[#allocation3 + $0x21] sm:$0xff] %vm171_vm1, %v4566_v10  ;;  %v4547_v1 = vmul.f32 %v13292_v52, %v4513_v45  ;;  %v4548_v2 = vmul.f32 %v13292_v52, %v4514_v5  ;;  %v4573_v53 = vmax.f32 %v4541_v21, 0.0  ;;  %v4574_v60 = vmax.f32 %v4542_v23, 0.0  ;;  %v13451_v23 = vld [vmem:[%s15305_s2 + $0x10] sm:$0xf] }
 0x25e   : > { %4602 = vst.msk [vmem:[#allocation3 + $0x49] sm:$0xff] %vm171_vm1, %v4569_v13  ;;  %4603 = vst.msk [vmem:[#allocation3 + $0x51] sm:$0xff] %vm171_vm1, %v4570_v46  ;;  %v4575_v36 = vmax.f32 %v4543_v25, 0.0  ;;  %v4576_v22 = vmax.f32 %v4544_v48, 0.0  ;;  %v4577_v55 = vmax.f32 %v4545_v16, 0.0  ;;  %v4578_v63 = vmax.f32 %v4546_v44, 0.0 }
 0x25f   : > { %4604 = vst.msk [vmem:[#allocation3 + $0x61] sm:$0xff] %vm171_vm1, %v4571_v14  ;;  %4605 = vst.msk [vmem:[#allocation3 + $0x69] sm:$0xff] %vm171_vm1, %v4572_v47  ;;  %v4579_v40 = vmax.f32 %v4547_v1, 0.0  ;;  %v4580_v57 = vmax.f32 %v4548_v2, 0.0  ;;  %v4549_v31 = vmul.f32 %v13292_v52, %v4515_v19  ;;  %v4550_v49 = vmul.f32 %v13292_v52, %v4516_v12  ;;  %v11602_v16 = vld [vmem:[%s15305_s2 + $0x8] sm:$0xf] }
 0x260   : > { %4606 = vst.msk [vmem:[#allocation3 + $0x79] sm:$0xff] %vm171_vm1, %v4573_v53  ;;  %4607 = vst.msk [vmem:[#allocation3 + $0x81] sm:$0xff] %vm171_vm1, %v4574_v60  ;;  %v4551_v45 = vmul.f32 %v13292_v52, %v4517_v27  ;;  %v4552_v5 = vmul.f32 %v13292_v52, %v4518_v34  ;;  %v4553_v29 = vmul.f32 %v13292_v52, %v4519_v32 }
 0x261   : > { %4608 = vst.msk [vmem:[#allocation3 + $0x91] sm:$0xff] %vm171_vm1, %v4575_v36  ;;  %4609 = vst.msk [vmem:[#allocation3 + $0x99] sm:$0xff] %vm171_vm1, %v4576_v22  ;;  %v4554_v20 = vmul.f32 %v13292_v52, %v4520_v6  ;;  %v4555_v51 = vmul.f32 %v13292_v52, %v4521_v3  ;;  %v4556_v54 = vmul.f32 %v13292_v52, %v4522_v18  ;;  %v4581_v19 = vmax.f32 %v4549_v31, 0.0 }
 0x262   : > { %4610 = vst.msk [vmem:[#allocation3 + $0xa9] sm:$0xff] %vm171_vm1, %v4577_v55  ;;  %4611 = vst.msk [vmem:[#allocation3 + $0xb1] sm:$0xff] %vm171_vm1, %v4578_v63  ;;  %v4582_v12 = vmax.f32 %v4550_v49, 0.0  ;;  %v4583_v11 = vmax.f32 %v4551_v45, 0.0  ;;  %v4584_v27 = vmax.f32 %v4552_v5, 0.0  ;;  %v5193_v34 = vld [vmem:[#allocation3 + $0x1] sm:$0xff]  ;;  %v4557_v39 = vmul.f32 %v13292_v52, %v4523_v24 }
 0x263   : > { %4612 = vst.msk [vmem:[#allocation3 + $0xc1] sm:$0xff] %vm171_vm1, %v4579_v40  ;;  %4613 = vst.msk [vmem:[#allocation3 + $0xc9] sm:$0xff] %vm171_vm1, %v4580_v57  ;;  %v5194_v32 = vld [vmem:[#allocation3 + $0x9] sm:$0xff]  ;;  %v4585_v47 = vmax.f32 %v4553_v29, 0.0  ;;  %v4586_v9 = vmax.f32 %v4554_v20, 0.0  ;;  %v4587_v38 = vmax.f32 %v4555_v51, 0.0  ;;  %11190 = vmatprep.mubr.msk.f32.mxu0 %vm171_vm1, %v5193_v34  ;;  %v4558_v3 = vmul.f32 %v13292_v52, %v4524_v50 }
 0x264   : > { %v4635_v6 = vld [vmem:[#allocation3 + $0x2] sm:$0x1]  ;;  %4614 = vst.msk [vmem:[#allocation3 + $0xd9] sm:$0xff] %vm171_vm1, %v4581_v19  ;;  %4615 = vst.msk [vmem:[#allocation3 + $0xe1] sm:$0xff] %vm171_vm1, %v4582_v12  ;;  %v4588_v28 = vmax.f32 %v4556_v54, 0.0  ;;  %v4559_v42 = vmul.f32 %v13292_v52, %v4525_v33  ;;  %v4560_v18 = vmul.f32 %v13292_v52, %v4526_v37  ;;  %11191 = vmatmul.mubr.msk.f32.vlgmr.msra.gmra.mrb[160].mxu0 %vm171_vm1, %v5194_v32  ;;  %v13390_v24 = vld [vmem:[#allocation3 + $0x19] sm:$0xff] }
 0x265   : > { %4616 = vst.msk [vmem:[#allocation3 + $0xf1] sm:$0xff] %vm171_vm1, %v4583_v11  ;;  %4617 = vst.msk [vmem:[#allocation3 + $0xf9] sm:$0xff] %vm171_vm1, %v4584_v27  ;;  %v4636_v58 = vld [vmem:[#allocation3 + $0x1a] sm:$0x1]  ;;  %v4589_v0 = vmax.f32 %v4557_v39, 0.0  ;;  %v4561_v26 = vmul.f32 %v13292_v52, %v4527_v30  ;;  %v4562_v35 = vmul.f32 %v13292_v52, %v4528_v43  ;;  %v4563_v50 = vmul.f32 %v13292_v52, %v4529_v59  ;;  %v13419_v4 = vld [vmem:[#allocation3 + $0x21] sm:$0xff] }
 0x266   : > { %4654 = vst.msk [vmem:[#allocation3] sm:$0x1] %vm4653_vm2, %v4635_v6  ;;  %11193 = vmatprep.mubr.msk.f32.mxu0 %vm171_vm1, %v13390_v24  ;;  %4655 = vst.msk [vmem:[#allocation3 + $0x18] sm:$0x1] %vm4653_vm2, %v4636_v58  ;;  %v4590_v15 = vmax.f32 %v4558_v3, 0.0  ;;  %v4591_v33 = vmax.f32 %v4559_v42, 0.0  ;;  %11289 = vmatpush3.msk.msra.mxu0 %vm365_vm0, %v13138_v41  ;;  %v4564_v17 = vmul.f32 %v13292_v52, %v15397_v56 }
 0x267   : > { %4618 = vst.msk [vmem:[#allocation3 + $0x109] sm:$0xff] %vm171_vm1, %v4585_v47  ;;  %4619 = vst.msk [vmem:[#allocation3 + $0x111] sm:$0xff] %vm171_vm1, %v4586_v9  ;;  %v4592_v37 = vmax.f32 %v4560_v18, 0.0  ;;  %v4637_v30 = vld [vmem:[#allocation3 + $0x32] sm:$0x1]  ;;  %v4593_v43 = vmax.f32 %v4561_v26, 0.0 }
 0x268   : > { %4620 = vst.msk [vmem:[#allocation3 + $0x121] sm:$0xff] %vm171_vm1, %v4587_v38  ;;  %4621 = vst.msk [vmem:[#allocation3 + $0x129] sm:$0xff] %vm171_vm1, %v4588_v28  ;;  %v4594_v59 = vmax.f32 %v4562_v35, 0.0  ;;  %v4638_v8 = vld [vmem:[#allocation3 + $0x4a] sm:$0x1]  ;;  %v4595_v41 = vmax.f32 %v4563_v50, 0.0  ;;  %11194 = vmatmul.mubr.msk.f32.gmra.mrb[162].mxu0 %vm171_vm1, %v13419_v4 }
 0x269   : > { %4622 = vst.msk [vmem:[#allocation3 + $0x139] sm:$0xff] %vm171_vm1, %v4589_v0  ;;  %4623 = vst.msk [vmem:[#allocation3 + $0x141] sm:$0xff] %vm171_vm1, %v4590_v15  ;;  %v4596_v61 = vmax.f32 %v4564_v17, 0.0  ;;  %v13427_v62 = vld [vmem:[#allocation3 + $0x31] sm:$0xff]  ;;  %v4639_v52 = vld [vmem:[#allocation3 + $0x62] sm:$0x1] }
 0x26a   : > { %4656 = vst.msk [vmem:[#allocation3 + $0x30] sm:$0x1] %vm4653_vm2, %v4637_v30  ;;  %4657 = vst.msk [vmem:[#allocation3 + $0x48] sm:$0x1] %vm4653_vm2, %v4638_v8  ;;  %11196 = vmatprep.mubr.msk.f32.mxu0 %vm171_vm1, %v13427_v62  ;;  %v4640_v7 = vld [vmem:[#allocation3 + $0x7a] sm:$0x1] }
 0x26b   : > { %4624 = vst.msk [vmem:[#allocation3 + $0x151] sm:$0xff] %vm171_vm1, %v4591_v33  ;;  %4625 = vst.msk [vmem:[#allocation3 + $0x159] sm:$0xff] %vm171_vm1, %v4592_v37  ;;  %v13439_v13 = vld [vmem:[#allocation3 + $0x39] sm:$0xff]  ;;  %v4641_v46 = vld [vmem:[#allocation3 + $0x92] sm:$0x1] }
 0x26c   : > { %4626 = vst.msk [vmem:[#allocation3 + $0x169] sm:$0xff] %vm171_vm1, %v4593_v43  ;;  %4633 = vst.msk [vmem:[#allocation3 + $0x199] sm:$0xff] %vm171_vm1, %v4593_v43  ;;  %v4741_v14 = vld [vmem:[#allocation3 + $0x8] sm:$0xff]  ;;  %11197 = vmatmul.mubr.msk.f32.gmra.mrb[164].mxu0 %vm171_vm1, %v13439_v13  ;;  %v13465_v44 = vld [vmem:[#allocation3 + $0x51] sm:$0xff] }
 0x26d   : > { %4627 = vst.msk [vmem:[#allocation3 + $0x171] sm:$0xff] %vm171_vm1, %v4594_v59  ;;  %4634 = vst.msk [vmem:[#allocation3 + $0x1a1] sm:$0xff] %vm171_vm1, %v4594_v59  ;;  %v4740_v10 = vld [vmem:[#allocation3] sm:$0xff]  ;;  %v13445_v21 = vld [vmem:[#allocation3 + $0x49] sm:$0xff] }
 0x26e   : > { %4658 = vst.msk [vmem:[#allocation3 + $0x60] sm:$0x1] %vm4653_vm2, %v4639_v52  ;;  %4659 = vst.msk [vmem:[#allocation3 + $0x78] sm:$0x1] %vm4653_vm2, %v4640_v7  ;;  %11140 = vmatprep.mubr.msk.f32.mxu1 %vm171_vm1, %v4740_v10  ;;  %v13454_v25 = vld [vmem:[#allocation3 + $0x18] sm:$0xff]  ;;  %11199 = vmatprep.mubr.msk.f32.mxu0 %vm171_vm1, %v13445_v21  ;;  %v13469_v2 = vld [vmem:[#allocation3 + $0x20] sm:$0xff] }
 0x26f   : > { %4628 = vst.msk [vmem:[#allocation3 + $0x181] sm:$0xff] %vm171_vm1, %v4595_v41  ;;  %4629 = vst.msk [vmem:[#allocation3 + $0x189] sm:$0xff] %vm171_vm1, %v4596_v61  ;;  %11141 = vmatmul.mubr.msk.f32.vlgmr.msra.gmra.mrb[128].mxu1 %vm171_vm1, %v4741_v14  ;;  %v4642_v48 = vld [vmem:[#allocation3 + $0xaa] sm:$0x1]  ;;  %v4643_v1 = vld [vmem:[#allocation3 + $0xc2] sm:$0x1] }
 0x270   : > { %4660 = vst.msk [vmem:[#allocation3 + $0x90] sm:$0x1] %vm4653_vm2, %v4641_v46  ;;  %11239 = vmatpush3.msk.msra.mxu1 %vm365_vm0, %v11602_v16  ;;  %11143 = vmatprep.mubr.msk.f32.mxu1 %vm171_vm1, %v13454_v25  ;;  %4661 = vst.msk [vmem:[#allocation3 + $0xa8] sm:$0x1] %vm4653_vm2, %v4642_v48  ;;  %v13473_v53 = vld [vmem:[#allocation3 + $0x61] sm:$0xff]  ;;  %v13485_v55 = vld [vmem:[#allocation3 + $0x69] sm:$0xff] }
 0x271   : > { %11338 = vmatprep.subr.msk.mxu1 %vm365_vm0, %v13451_v23  ;;  %11200 = vmatmul.mubr.msk.f32.gmra.mrb[166].mxu0 %vm171_vm1, %v13465_v44  ;;  %4662 = vst.msk [vmem:[#allocation3 + $0xc0] sm:$0x1] %vm4653_vm2, %v4643_v1  ;;  %v13478_v60 = vld [vmem:[#allocation3 + $0x30] sm:$0xff]  ;;  %v4644_v36 = vld [vmem:[#allocation3 + $0xda] sm:$0x1]  ;;  %v13496_v31 = vld [vmem:[#allocation3 + $0x48] sm:$0xff] }
 0x272   : > { %11202 = vmatprep.mubr.msk.f32.mxu0 %vm171_vm1, %v13473_v53  ;;  %4663 = vst.msk [vmem:[#allocation3 + $0xd8] sm:$0x1] %vm4653_vm2, %v4644_v36  ;;  %v4645_v22 = vld [vmem:[#allocation3 + $0xf2] sm:$0x1]  ;;  %v13488_v63 = vld [vmem:[#allocation3 + $0x38] sm:$0xff]  ;;  %v13503_v45 = vld [vmem:[#allocation3 + $0x81] sm:$0xff] }
 0x273   : > { %11144 = vmatmul.mubr.msk.f32.gmra.mrb[130].mxu1 %vm171_vm1, %v13469_v2  ;;  %4664 = vst.msk [vmem:[#allocation3 + $0xf0] sm:$0x1] %vm4653_vm2, %v4645_v22  ;;  %v13492_v40 = vld [vmem:[#allocation3 + $0x79] sm:$0xff]  ;;  %v4646_v57 = vld [vmem:[#allocation3 + $0x10a] sm:$0x1]  ;;  %v13506_v29 = vld [vmem:[#allocation3 + $0x50] sm:$0xff] }
 0x274   : > { %11146 = vmatprep.mubr.msk.f32.mxu1 %vm171_vm1, %v13478_v60  ;;  %4665 = vst.msk [vmem:[#allocation3 + $0x108] sm:$0x1] %vm4653_vm2, %v4646_v57  ;;  %v4647_v49 = vld [vmem:[#allocation3 + $0x122] sm:$0x1]  ;;  %v4648_v5 = vld [vmem:[#allocation3 + $0x13a] sm:$0x1] }
 0x275   : > { %11203 = vmatmul.mubr.msk.f32.gmra.mrb[168].mxu0 %vm171_vm1, %v13485_v55  ;;  %4666 = vst.msk [vmem:[#allocation3 + $0x120] sm:$0x1] %vm4653_vm2, %v4647_v49  ;;  %v13510_v20 = vld [vmem:[#allocation3 + $0x91] sm:$0xff]  ;;  %4667 = vst.msk [vmem:[#allocation3 + $0x138] sm:$0x1] %vm4653_vm2, %v4648_v5  ;;  %v13515_v51 = vld [vmem:[#allocation3 + $0x60] sm:$0xff] }
 0x276   : > { %11205 = vmatprep.mubr.msk.f32.mxu0 %vm171_vm1, %v13492_v40  ;;  %v4649_v54 = vld [vmem:[#allocation3 + $0x152] sm:$0x1]  ;;  %v4650_v19 = vld [vmem:[#allocation3 + $0x16a] sm:$0x1]  ;;  %v13522_v12 = vld [vmem:[#allocation3 + $0x99] sm:$0xff] }
 0x277   : > { %11147 = vmatmul.mubr.msk.f32.gmra.mrb[132].mxu1 %vm171_vm1, %v13488_v63  ;;  %4668 = vst.msk [vmem:[#allocation3 + $0x150] sm:$0x1] %vm4653_vm2, %v4649_v54  ;;  %4669 = vst.msk [vmem:[#allocation3 + $0x168] sm:$0x1] %vm4653_vm2, %v4650_v19  ;;  %v4672_v11 = vld [vmem:[#allocation3 + $0xf] sm:$0x1] }
 0x278   : > { %11149 = vmatprep.mubr.msk.f32.mxu1 %vm171_vm1, %v13496_v31  ;;  %v13525_v27 = vld [vmem:[#allocation3 + $0x68] sm:$0xff]  ;;  %4690 = vst.msk [vmem:[#allocation3 + $0x11] sm:$0x1] %vm4653_vm2, %v4672_v11  ;;  %v4673_v32 = vld [vmem:[#allocation3 + $0x27] sm:$0x1]  ;;  %v13534_v47 = vld [vmem:[#allocation3 + $0x78] sm:$0xff] }
 0x279   : > { %11206 = vmatmul.mubr.msk.f32.gmra.mrb[170].mxu0 %vm171_vm1, %v13503_v45  ;;  %v13529_v34 = vld [vmem:[#allocation3 + $0xa9] sm:$0xff]  ;;  %4691 = vst.msk [vmem:[#allocation3 + $0x29] sm:$0x1] %vm4653_vm2, %v4673_v32  ;;  %v4674_v9 = vld [vmem:[#allocation3 + $0x3f] sm:$0x1]  ;;  %v13543_v6 = vld [vmem:[#allocation3 + $0xb1] sm:$0xff] }
 0x27a   : > { %11208 = vmatprep.mubr.msk.f32.mxu0 %vm171_vm1, %v13510_v20  ;;  %v4675_v38 = vld [vmem:[#allocation3 + $0x57] sm:$0x1]  ;;  %4692 = vst.msk [vmem:[#allocation3 + $0x41] sm:$0x1] %vm4653_vm2, %v4674_v9  ;;  %v4676_v39 = vld [vmem:[#allocation3 + $0x6f] sm:$0x1] }
 0x27b   : > { %11150 = vmatmul.mubr.msk.f32.gmra.mrb[134].mxu1 %vm171_vm1, %v13506_v29  ;;  %4693 = vst.msk [vmem:[#allocation3 + $0x59] sm:$0x1] %vm4653_vm2, %v4675_v38  ;;  %4694 = vst.msk [vmem:[#allocation3 + $0x71] sm:$0x1] %vm4653_vm2, %v4676_v39  ;;  %v4677_v28 = vld [vmem:[#allocation3 + $0x87] sm:$0x1] }
 0x27c   : > { %11152 = vmatprep.mubr.msk.f32.mxu1 %vm171_vm1, %v13515_v51  ;;  %v13546_v3 = vld [vmem:[#allocation3 + $0x80] sm:$0xff]  ;;  %4695 = vst.msk [vmem:[#allocation3 + $0x89] sm:$0x1] %vm4653_vm2, %v4677_v28  ;;  %v4678_v18 = vld [vmem:[#allocation3 + $0x9f] sm:$0x1]  ;;  %v13555_v58 = vld [vmem:[#allocation3 + $0x90] sm:$0xff] }
 0x27d   : > { %11209 = vmatmul.mubr.msk.f32.gmra.mrb[172].mxu0 %vm171_vm1, %v13522_v12  ;;  %v13550_v42 = vld [vmem:[#allocation3 + $0xc1] sm:$0xff]  ;;  %4696 = vst.msk [vmem:[#allocation3 + $0xa1] sm:$0x1] %vm4653_vm2, %v4678_v18  ;;  %v4679_v0 = vld [vmem:[#allocation3 + $0xb7] sm:$0x1]  ;;  %v13563_v35 = vld [vmem:[#allocation3 + $0xc9] sm:$0xff] }
 0x27e   : > { %11211 = vmatprep.mubr.msk.f32.mxu0 %vm171_vm1, %v13529_v34  ;;  %4697 = vst.msk [vmem:[#allocation3 + $0xb9] sm:$0x1] %vm4653_vm2, %v4679_v0  ;;  %v4680_v26 = vld [vmem:[#allocation3 + $0xcf] sm:$0x1]  ;;  %v4681_v50 = vld [vmem:[#allocation3 + $0xe7] sm:$0x1] }
 0x27f   : > { %11153 = vmatmul.mubr.msk.f32.gmra.mrb[136].mxu1 %vm171_vm1, %v13525_v27  ;;  %4698 = vst.msk [vmem:[#allocation3 + $0xd1] sm:$0x1] %vm4653_vm2, %v4680_v26  ;;  %v13566_v15 = vld [vmem:[#allocation3 + $0x98] sm:$0xff]  ;;  %4699 = vst.msk [vmem:[#allocation3 + $0xe9] sm:$0x1] %vm4653_vm2, %v4681_v50  ;;  %v13575_v56 = vld [vmem:[#allocation3 + $0xa8] sm:$0xff] }
 0x280   : > { %11155 = vmatprep.mubr.msk.f32.mxu1 %vm171_vm1, %v13534_v47  ;;  %v13570_v33 = vld [vmem:[#allocation3 + $0xd9] sm:$0xff]  ;;  %v4683_v17 = vld [vmem:[#allocation3 + $0x117] sm:$0x1]  ;;  %v4684_v30 = vld [vmem:[#allocation3 + $0x12f] sm:$0x1] }
 0x281   : > { %11212 = vmatmul.mubr.msk.f32.gmra.mrb[174].mxu0 %vm171_vm1, %v13543_v6  ;;  %v4682_v37 = vld [vmem:[#allocation3 + $0xff] sm:$0x1]  ;;  %4701 = vst.msk [vmem:[#allocation3 + $0x119] sm:$0x1] %vm4653_vm2, %v4683_v17  ;;  %v13583_v43 = vld [vmem:[#allocation3 + $0xe1] sm:$0xff]  ;;  %v13586_v8 = vld [vmem:[#allocation3 + $0xb0] sm:$0xff] }
 0x282   : > { %11214 = vmatprep.mubr.msk.f32.mxu0 %vm171_vm1, %v13550_v42  ;;  %4700 = vst.msk [vmem:[#allocation3 + $0x101] sm:$0x1] %vm4653_vm2, %v4682_v37  ;;  %4702 = vst.msk [vmem:[#allocation3 + $0x131] sm:$0x1] %vm4653_vm2, %v4684_v30  ;;  %v4651_v59 = vld [vmem:[#allocation3 + $0x182] sm:$0x1] }
 0x283   : > { %11156 = vmatmul.mubr.msk.f32.gmra.mrb[138].mxu1 %vm171_vm1, %v13546_v3  ;;  %v13590_v41 = vld [vmem:[#allocation3 + $0xf1] sm:$0xff]  ;;  %4670 = vst.msk [vmem:[#allocation3 + $0x180] sm:$0x1] %vm4653_vm2, %v4651_v59  ;;  %v4685_v61 = vld [vmem:[#allocation3 + $0x147] sm:$0x1]  ;;  %v13609_v46 = vld [vmem:[#allocation3 + $0xf9] sm:$0xff] }
 0x284   : > { %11158 = vmatprep.mubr.msk.f32.mxu1 %vm171_vm1, %v13555_v58  ;;  %v13595_v52 = vld [vmem:[#allocation3 + $0xc0] sm:$0xff]  ;;  %4703 = vst.msk [vmem:[#allocation3 + $0x149] sm:$0x1] %vm4653_vm2, %v4685_v61  ;;  %v13603_v7 = vld [vmem:[%s15305_s2 + $0x14] sm:$0xf]  ;;  %v13612_v48 = vld [vmem:[#allocation3 + $0xc8] sm:$0xff] }
 0x285   : > { %11215 = vmatmul.mubr.msk.f32.gmra.mrb[176].mxu0 %vm171_vm1, %v13563_v35  ;;  %11388 = vmatprep.subr.msk.mxu0 %vm365_vm0, %v13603_v7  ;;  %v4686_v10 = vld [vmem:[#allocation3 + $0x15f] sm:$0x1]  ;;  %v4687_v14 = vld [vmem:[#allocation3 + $0x177] sm:$0x1]  ;;  %v13616_v16 = vld [vmem:[#allocation3 + $0x109] sm:$0xff] }
 0x286   : > { %11217 = vmatprep.mubr.msk.f32.mxu0 %vm171_vm1, %v13570_v33  ;;  %4704 = vst.msk [vmem:[#allocation3 + $0x161] sm:$0x1] %vm4653_vm2, %v4686_v10  ;;  %4705 = vst.msk [vmem:[#allocation3 + $0x179] sm:$0x1] %vm4653_vm2, %v4687_v14  ;;  %v4688_v1 = vld [vmem:[#allocation3 + $0x18f] sm:$0x1] }
 0x287   : > { %11159 = vmatmul.mubr.msk.f32.gmra.mrb[140].mxu1 %vm171_vm1, %v13566_v15  ;;  %v13621_v36 = vld [vmem:[#allocation3 + $0xd8] sm:$0xff]  ;;  %4706 = vst.msk [vmem:[#allocation3 + $0x191] sm:$0x1] %vm4653_vm2, %v4688_v1  ;;  %v13630_v57 = vld [vmem:[#allocation3 + $0xe0] sm:$0xff]  ;;  %v13638_v5 = vld [vmem:[#allocation3 + $0xf0] sm:$0xff] }
 0x288   : > { %11161 = vmatprep.mubr.msk.f32.mxu1 %vm171_vm1, %v13575_v56  ;;  %15398 = vst [vmem:[#allocation27_spill] sm:$0xff] %v13621_v36  ;;  %v13628_v22 = vld [vmem:[#allocation3 + $0x111] sm:$0xff]  ;;  %v13634_v49 = vld [vmem:[#allocation3 + $0x121] sm:$0xff]  ;;  %15399 = vst [vmem:[#allocation28_spill] sm:$0xff] %v13638_v5 }
 0x289   : > { %11218 = vmatmul.mubr.msk.f32.gmra.mrb[178].mxu0 %vm171_vm1, %v13583_v43  ;;  %v13644_v54 = vld [vmem:[#allocation3 + $0x129] sm:$0xff]  ;;  %v13646_v19 = vld [vmem:[#allocation3 + $0xf8] sm:$0xff]  ;;  %v13660_v9 = vld [vmem:[#allocation3 + $0x141] sm:$0xff] }
 0x28a   : > { %11220 = vmatprep.mubr.msk.f32.mxu0 %vm171_vm1, %v13590_v41  ;;  %v13650_v11 = vld [vmem:[#allocation3 + $0x139] sm:$0xff]  ;;  %v13654_v32 = vld [vmem:[#allocation3 + $0x108] sm:$0xff]  ;;  %v13662_v38 = vld [vmem:[#allocation3 + $0x110] sm:$0xff] }
 0x28b   : > { %11162 = vmatmul.mubr.msk.f32.gmra.mrb[142].mxu1 %vm171_vm1, %v13586_v8  ;;  %15400 = vst [vmem:[#allocation29_spill] sm:$0xff] %v13654_v32  ;;  %v13666_v39 = vld [vmem:[#allocation3 + $0x151] sm:$0xff]  ;;  %v13670_v28 = vld [vmem:[#allocation3 + $0x120] sm:$0xff]  ;;  %v4652_v0 = vld [vmem:[#allocation3 + $0x19a] sm:$0x1] }
 0x28c   : > { %11164 = vmatprep.mubr.msk.f32.mxu1 %vm171_vm1, %v13595_v52  ;;  %15401 = vst [vmem:[#allocation4_spill] sm:$0xff] %v13670_v28  ;;  %v13676_v18 = vld [vmem:[#allocation3 + $0x159] sm:$0xff]  ;;  %v13678_v26 = vld [vmem:[#allocation3 + $0x128] sm:$0xff]  ;;  %4671 = vst.msk [vmem:[#allocation3 + $0x198] sm:$0x1] %vm4653_vm2, %v4652_v0 }
 0x28d   : > { %11221 = vmatmul.mubr.msk.f32.gmra.mrb[180].mxu0 %vm171_vm1, %v13609_v46  ;;  %v13682_v50 = vld [vmem:[#allocation3 + $0x169] sm:$0xff]  ;;  %v13687_v37 = vld [vmem:[#allocation3 + $0x138] sm:$0xff]  ;;  %v13695_v30 = vld [vmem:[#allocation3 + $0x140] sm:$0xff] }
 0x28e   : > { %11223 = vmatprep.mubr.msk.f32.mxu0 %vm171_vm1, %v13616_v16  ;;  %15402 = vst [vmem:[#allocation5_spill] sm:$0xff] %v13687_v37  ;;  %v13693_v17 = vld [vmem:[#allocation3 + $0x171] sm:$0xff]  ;;  %v13714_v10 = vld [vmem:[%s15305_s2 + $0x1c] sm:$0xf]  ;;  %v13718_v14 = vld [vmem:[#allocation3 + $0x168] sm:$0xff] }
 0x28f   : > { %11165 = vmatmul.mubr.msk.f32.gmra.mrb[144].mxu1 %vm171_vm1, %v13612_v48  ;;  %v13701_v59 = vld [vmem:[#allocation3 + $0x150] sm:$0xff]  ;;  %v13707_v61 = vld [vmem:[#allocation3 + $0x158] sm:$0xff]  ;;  %15404 = vst [vmem:[#allocation7_spill] sm:$0xff] %v13718_v14 }
 0x290   : > { %11167 = vmatprep.mubr.msk.f32.mxu1 %vm171_vm1, %v13621_v36  ;;  %15403 = vst [vmem:[#allocation6_spill] sm:$0xff] %v13701_v59  ;;  %v13743_v1 = vld [vmem:[%s15305_s2 + $0x18] sm:$0xf] }
 0x291   : > { %11224 = vmatmul.mubr.msk.f32.gmra.mrb[182].mxu0 %vm171_vm1, %v13628_v22  ;;  %v13816_v0 = vld [vmem:[#allocation3 + $0x9a] sm:$0xff] }
 0x292   : > { %11226 = vmatprep.mubr.msk.f32.mxu0 %vm171_vm1, %v13634_v49 }
 0x293   : > { %11168 = vmatmul.mubr.msk.f32.gmra.mrb[146].mxu1 %vm171_vm1, %v13630_v57 }
 0x294   : > { %11170 = vmatprep.mubr.msk.f32.mxu1 %vm171_vm1, %v13638_v5 }
 0x295   : > { %11227 = vmatmul.mubr.msk.f32.gmra.mrb[184].mxu0 %vm171_vm1, %v13644_v54 }
 0x296   : > { %11229 = vmatprep.mubr.msk.f32.mxu0 %vm171_vm1, %v13650_v11 }
 0x297   : > { %11171 = vmatmul.mubr.msk.f32.gmra.mrb[148].mxu1 %vm171_vm1, %v13646_v19 }
 0x298   : > { %11173 = vmatprep.mubr.msk.f32.mxu1 %vm171_vm1, %v13654_v32 }
 0x299   : > { %11230 = vmatmul.mubr.msk.f32.gmra.mrb[186].mxu0 %vm171_vm1, %v13660_v9 }
 0x29a   : > { %11232 = vmatprep.mubr.msk.f32.mxu0 %vm171_vm1, %v13666_v39 }
 0x29b   : > { %11174 = vmatmul.mubr.msk.f32.gmra.mrb[150].mxu1 %vm171_vm1, %v13662_v38 }
 0x29c   : > { %11176 = vmatprep.mubr.msk.f32.mxu1 %vm171_vm1, %v13670_v28 }
 0x29d   : > { %11233 = vmatmul.mubr.msk.f32.gmra.mrb[188].mxu0 %vm171_vm1, %v13676_v18 }
 0x29e   : > { %11235 = vmatprep.mubr.msk.f32.mxu0 %vm171_vm1, %v13682_v50 }
 0x29f   : > { %11177 = vmatmul.mubr.msk.f32.gmra.mrb[152].mxu1 %vm171_vm1, %v13678_v26 }
 0x2a0   : > { %11179 = vmatprep.mubr.msk.f32.mxu1 %vm171_vm1, %v13687_v37 }
 0x2a1   : > { %11236 = vmatmul.mubr.msk.f32.gmra.mrb[190].mxu0 %vm171_vm1, %v13693_v17 }
 0x2a2   : > { %11290 = vmatprep.mubr.msk.f32.mxu0 %vm171_vm1, %v13454_v25  ;;  %v4689_v25 = vld [vmem:[#allocation3 + $0x1a7] sm:$0x1] }
 0x2a3   : > { %11180 = vmatmul.mubr.msk.f32.gmra.mrb[154].mxu1 %vm171_vm1, %v13695_v30  ;;  %4707 = vst.msk [vmem:[#allocation3 + $0x1a9] sm:$0x1] %vm4653_vm2, %v4689_v25  ;;  %v13828_v25 = vld [vmem:[#allocation3 + $0xb2] sm:$0xff] }
 0x2a4   : > { %11182 = vmatprep.mubr.msk.f32.mxu1 %vm171_vm1, %v13701_v59 }
 0x2a5   : > { %11291 = vmatmul.mubr.msk.f32.vlgmr.msra.gmra.mrb[192].mxu0 %vm171_vm1, %v13469_v2  ;;  %v13729_v2 = vld [vmem:[#allocation3 + $0x170] sm:$0xff] }
 0x2a6   : > { %11293 = vmatprep.mubr.msk.f32.mxu0 %vm171_vm1, %v13478_v60  ;;  %11389 = vmatpush3.msk.msra.mxu0 %vm365_vm0, %v13603_v7  ;;  %v5647_v60 = vld [vmem:[#allocation3 + $0x2] sm:$0xff]  ;;  %v5648_v7 = vld [vmem:[#allocation3 + $0xa] sm:$0xff] }
 0x2a7   : > { %11183 = vmatmul.mubr.msk.f32.gmra.mrb[156].mxu1 %vm171_vm1, %v13707_v61  ;;  %11488 = vmatprep.subr.msk.mxu0 %vm365_vm0, %v13714_v10 }
 0x2a8   : > { %11185 = vmatprep.mubr.msk.f32.mxu1 %vm171_vm1, %v13718_v14 }
 0x2a9   : > { %11294 = vmatmul.mubr.msk.f32.gmra.mrb[194].mxu0 %vm171_vm1, %v13488_v63  ;;  %v13746_v63 = vld [vmem:[#allocation3 + $0x1a] sm:$0xff] }
 0x2aa   : > { %11296 = vmatprep.mubr.msk.f32.mxu0 %vm171_vm1, %v13496_v31  ;;  %v13756_v31 = vld [vmem:[#allocation3 + $0x22] sm:$0xff] }
 0x2ab   : > { %11186 = vmatmul.mubr.msk.f32.gmra.mrb[158].mxu1 %vm171_vm1, %v13729_v2 }
 0x2ac   : > { %11240 = vmatprep.mubr.msk.f32.mxu1 %vm171_vm1, %v5647_v60  ;;  %v13840_v60 = vld [vmem:[#allocation3 + $0xca] sm:$0xff] }
 0x2ad   : > { %11297 = vmatmul.mubr.msk.f32.gmra.mrb[196].mxu0 %vm171_vm1, %v13506_v29  ;;  %v13762_v29 = vld [vmem:[#allocation3 + $0x32] sm:$0xff] }
 0x2ae   : > { %11299 = vmatprep.mubr.msk.f32.mxu0 %vm171_vm1, %v13515_v51  ;;  %v13774_v51 = vld [vmem:[#allocation3 + $0x4a] sm:$0xff] }
 0x2af   : > { %11241 = vmatmul.mubr.msk.f32.vlgmr.msra.gmra.mrb[160].mxu1 %vm171_vm1, %v5648_v7  ;;  %v13852_v7 = vld [vmem:[#allocation3 + $0xe2] sm:$0xff] }
 0x2b0   : > { %11339 = vmatpush3.msk.msra.mxu1 %vm365_vm0, %v13451_v23  ;;  %11243 = vmatprep.mubr.msk.f32.mxu1 %vm171_vm1, %v13746_v63  ;;  %v13768_v23 = vld [vmem:[#allocation3 + $0x3a] sm:$0xff] }
 0x2b1   : > { %11438 = vmatprep.subr.msk.mxu1 %vm365_vm0, %v13743_v1  ;;  %11300 = vmatmul.mubr.msk.f32.gmra.mrb[198].mxu0 %vm171_vm1, %v13525_v27  ;;  %v13780_v27 = vld [vmem:[#allocation3 + $0x52] sm:$0xff] }
 0x2b2   : > { %11302 = vmatprep.mubr.msk.f32.mxu0 %vm171_vm1, %v13534_v47  ;;  %v13786_v47 = vld [vmem:[#allocation3 + $0x62] sm:$0xff] }
 0x2b3   : > { %11244 = vmatmul.mubr.msk.f32.gmra.mrb[162].mxu1 %vm171_vm1, %v13756_v31 }
 0x2b4   : > { %11246 = vmatprep.mubr.msk.f32.mxu1 %vm171_vm1, %v13762_v29 }
 0x2b5   : > { %11303 = vmatmul.mubr.msk.f32.gmra.mrb[200].mxu0 %vm171_vm1, %v13546_v3  ;;  %v13792_v3 = vld [vmem:[#allocation3 + $0x6a] sm:$0xff] }
 0x2b6   : > { %11305 = vmatprep.mubr.msk.f32.mxu0 %vm171_vm1, %v13555_v58  ;;  %v13798_v58 = vld [vmem:[#allocation3 + $0x7a] sm:$0xff] }
 0x2b7   : > { %11247 = vmatmul.mubr.msk.f32.gmra.mrb[164].mxu1 %vm171_vm1, %v13768_v23 }
 0x2b8   : > { %11249 = vmatprep.mubr.msk.f32.mxu1 %vm171_vm1, %v13774_v51 }
 0x2b9   : > { %11306 = vmatmul.mubr.msk.f32.gmra.mrb[202].mxu0 %vm171_vm1, %v13566_v15  ;;  %v13804_v15 = vld [vmem:[#allocation3 + $0x82] sm:$0xff] }
 0x2ba   : > { %11308 = vmatprep.mubr.msk.f32.mxu0 %vm171_vm1, %v13575_v56 }
 0x2bb   : > { %11250 = vmatmul.mubr.msk.f32.gmra.mrb[166].mxu1 %vm171_vm1, %v13780_v27 }
 0x2bc   : > { %11252 = vmatprep.mubr.msk.f32.mxu1 %vm171_vm1, %v13786_v47 }
 0x2bd   : > { %11309 = vmatmul.mubr.msk.f32.gmra.mrb[204].mxu0 %vm171_vm1, %v13586_v8  ;;  %v13810_v8 = vld [vmem:[#allocation3 + $0x92] sm:$0xff] }
 0x2be   : > { %11311 = vmatprep.mubr.msk.f32.mxu0 %vm171_vm1, %v13595_v52 }
 0x2bf   : > { %11253 = vmatmul.mubr.msk.f32.gmra.mrb[168].mxu1 %vm171_vm1, %v13792_v3 }
 0x2c0   : > { %11255 = vmatprep.mubr.msk.f32.mxu1 %vm171_vm1, %v13798_v58 }
 0x2c1   : > { %11312 = vmatmul.mubr.msk.f32.gmra.mrb[206].mxu0 %vm171_vm1, %v13612_v48  ;;  %v13822_v48 = vld [vmem:[#allocation3 + $0xaa] sm:$0xff] }
 0x2c2   : > { %11314 = vmatprep.mubr.msk.f32.mxu0 %vm171_vm1, %v13621_v36  ;;  %v5676_v36 = vld [vmem:[#allocation3 + $0x15a] sm:$0xff] }
 0x2c3   : > { %11256 = vmatmul.mubr.msk.f32.gmra.mrb[170].mxu1 %vm171_vm1, %v13804_v15 }
 0x2c4   : > { %11258 = vmatprep.mubr.msk.f32.mxu1 %vm171_vm1, %v13810_v8 }
 0x2c5   : > { %11315 = vmatmul.mubr.msk.f32.gmra.mrb[208].mxu0 %vm171_vm1, %v13630_v57  ;;  %v13834_v57 = vld [vmem:[#allocation3 + $0xc2] sm:$0xff] }
 0x2c6   : > { %11317 = vmatprep.mubr.msk.f32.mxu0 %vm171_vm1, %v13638_v5  ;;  %v5674_v5 = vld [vmem:[#allocation3 + $0x142] sm:$0xff] }
 0x2c7   : > { %11259 = vmatmul.mubr.msk.f32.gmra.mrb[172].mxu1 %vm171_vm1, %v13816_v0 }
 0x2c8   : > { %11261 = vmatprep.mubr.msk.f32.mxu1 %vm171_vm1, %v13822_v48 }
 0x2c9   : > { %11318 = vmatmul.mubr.msk.f32.gmra.mrb[210].mxu0 %vm171_vm1, %v13646_v19  ;;  %v13846_v19 = vld [vmem:[#allocation3 + $0xda] sm:$0xff] }
 0x2ca   : > { %11320 = vmatprep.mubr.msk.f32.mxu0 %vm171_vm1, %v13654_v32  ;;  %v13892_v32 = vld [vmem:[#allocation3 + $0x180] sm:$0xff] }
 0x2cb   : > { %11262 = vmatmul.mubr.msk.f32.gmra.mrb[174].mxu1 %vm171_vm1, %v13828_v25  ;;  %15405 = vst [vmem:[#allocation8_spill] sm:$0xff] %v13892_v32 }
 0x2cc   : > { %11264 = vmatprep.mubr.msk.f32.mxu1 %vm171_vm1, %v13834_v57 }
 0x2cd   : > { %11321 = vmatmul.mubr.msk.f32.gmra.mrb[212].mxu0 %vm171_vm1, %v13662_v38  ;;  %v13858_v38 = vld [vmem:[#allocation3 + $0xf2] sm:$0xff] }
 0x2ce   : > { %11323 = vmatprep.mubr.msk.f32.mxu0 %vm171_vm1, %v13670_v28  ;;  %v13864_v28 = vld [vmem:[#allocation3 + $0xfa] sm:$0xff] }
 0x2cf   : > { %11265 = vmatmul.mubr.msk.f32.gmra.mrb[176].mxu1 %vm171_vm1, %v13840_v60 }
 0x2d0   : > { %11267 = vmatprep.mubr.msk.f32.mxu1 %vm171_vm1, %v13846_v19 }
 0x2d1   : > { %11324 = vmatmul.mubr.msk.f32.gmra.mrb[214].mxu0 %vm171_vm1, %v13678_v26  ;;  %v13870_v26 = vld [vmem:[#allocation3 + $0x10a] sm:$0xff] }
 0x2d2   : > { %11326 = vmatprep.mubr.msk.f32.mxu0 %vm171_vm1, %v13687_v37  ;;  %v13876_v37 = vld [vmem:[#allocation3 + $0x112] sm:$0xff] }
 0x2d3   : > { %11268 = vmatmul.mubr.msk.f32.gmra.mrb[178].mxu1 %vm171_vm1, %v13852_v7 }
 0x2d4   : > { %11270 = vmatprep.mubr.msk.f32.mxu1 %vm171_vm1, %v13858_v38 }
 0x2d5   : > { %11327 = vmatmul.mubr.msk.f32.gmra.mrb[216].mxu0 %vm171_vm1, %v13695_v30  ;;  %v13882_v30 = vld [vmem:[#allocation3 + $0x122] sm:$0xff] }
 0x2d6   : > { %11329 = vmatprep.mubr.msk.f32.mxu0 %vm171_vm1, %v13701_v59  ;;  %v13888_v59 = vld [vmem:[#allocation3 + $0x12a] sm:$0xff] }
 0x2d7   : > { %11271 = vmatmul.mubr.msk.f32.gmra.mrb[180].mxu1 %vm171_vm1, %v13864_v28 }
 0x2d8   : > { %11273 = vmatprep.mubr.msk.f32.mxu1 %vm171_vm1, %v13870_v26 }
 0x2d9   : > { %11330 = vmatmul.mubr.msk.f32.gmra.mrb[218].mxu0 %vm171_vm1, %v13707_v61  ;;  %v13896_v61 = vld [vmem:[#allocation3 + $0x13a] sm:$0xff] }
 0x2da   : > { %11332 = vmatprep.mubr.msk.f32.mxu0 %vm171_vm1, %v13718_v14  ;;  %v13902_v14 = vld [vmem:[#allocation3 + $0x188] sm:$0xff] }
 0x2db   : > { %11274 = vmatmul.mubr.msk.f32.gmra.mrb[182].mxu1 %vm171_vm1, %v13876_v37  ;;  %15406 = vst [vmem:[#allocation9_spill] sm:$0xff] %v13902_v14 }
 0x2dc   : > { %11276 = vmatprep.mubr.msk.f32.mxu1 %vm171_vm1, %v13882_v30 }
 0x2dd   : > { %11333 = vmatmul.mubr.msk.f32.gmra.mrb[220].mxu0 %vm171_vm1, %v13729_v2  ;;  %v5675_v2 = vld [vmem:[#allocation3 + $0x152] sm:$0xff] }
 0x2de   : > { %11335 = vmatprep.mubr.msk.f32.mxu0 %vm171_vm1, %v13892_v32  ;;  %v5677_v32 = vld [vmem:[#allocation3 + $0x16a] sm:$0xff] }
 0x2df   : > { %11277 = vmatmul.mubr.msk.f32.gmra.mrb[184].mxu1 %vm171_vm1, %v13888_v59 }
 0x2e0   : > { %11279 = vmatprep.mubr.msk.f32.mxu1 %vm171_vm1, %v13896_v61 }
 0x2e1   : > { %11336 = vmatmul.mubr.msk.f32.gmra.mrb[222].mxu0 %vm171_vm1, %v13902_v14  ;;  %v5678_v14 = vld [vmem:[#allocation3 + $0x172] sm:$0xff] }
 0x2e2   : > { %11390 = vmatprep.mubr.msk.f32.mxu0 %vm171_vm1, %v13746_v63  ;;  %v13930_v63 = vld [vmem:[%s15305_s2 + $0x20] sm:$0xf] }
 0x2e3   : > { %11280 = vmatmul.mubr.msk.f32.gmra.mrb[186].mxu1 %vm171_vm1, %v5674_v5 }
 0x2e4   : > { %11282 = vmatprep.mubr.msk.f32.mxu1 %vm171_vm1, %v5675_v2 }
 0x2e5   : > { %11391 = vmatmul.mubr.msk.f32.vlgmr.msra.gmra.mrb[224].mxu0 %vm171_vm1, %v13756_v31  ;;  %v7929_v31 = vld [vmem:[#allocation3 + $0xb1] sm:$0xff] }
 0x2e6   : > { %11393 = vmatprep.mubr.msk.f32.mxu0 %vm171_vm1, %v13762_v29  ;;  %11489 = vmatpush3.msk.msra.mxu0 %vm365_vm0, %v13714_v10  ;;  %v7928_v10 = vld [vmem:[#allocation3 + $0xa9] sm:$0xff] }
 0x2e7   : > { %11283 = vmatmul.mubr.msk.f32.gmra.mrb[188].mxu1 %vm171_vm1, %v5676_v36 }
 0x2e8   : > { %11285 = vmatprep.mubr.msk.f32.mxu1 %vm171_vm1, %v5677_v32 }
 0x2e9   : > { %11394 = vmatmul.mubr.msk.f32.gmra.mrb[226].mxu0 %vm171_vm1, %v13768_v23  ;;  %v7471_v23 = vld [vmem:[#allocation3 + $0x80] sm:$0xff] }
 0x2ea   : > { %11396 = vmatprep.mubr.msk.f32.mxu0 %vm171_vm1, %v13774_v51  ;;  %v7472_v51 = vld [vmem:[#allocation3 + $0x90] sm:$0xff] }
 0x2eb   : > { %11286 = vmatmul.mubr.msk.f32.gmra.mrb[190].mxu1 %vm171_vm1, %v5678_v14 }
 0x2ec   : > { %11340 = vmatprep.mubr.msk.f32.mxu1 %vm171_vm1, %v13390_v24  ;;  %v7039_v24 = vld [vmem:[#allocation3 + $0x182] sm:$0xff] }
 0x2ed   : > { %11397 = vmatmul.mubr.msk.f32.gmra.mrb[228].mxu0 %vm171_vm1, %v13780_v27 }
 0x2ee   : > { %11399 = vmatprep.mubr.msk.f32.mxu0 %vm171_vm1, %v13786_v47 }
 0x2ef   : > { %11341 = vmatmul.mubr.msk.f32.vlgmr.msra.gmra.mrb[192].mxu1 %vm171_vm1, %v13419_v4  ;;  %v7040_v4 = vld [vmem:[#allocation3 + $0x18a] sm:$0xff] }
 0x2f0   : > { %11439 = vmatpush3.msk.msra.mxu1 %vm365_vm0, %v13743_v1  ;;  %11343 = vmatprep.mubr.msk.f32.mxu1 %vm171_vm1, %v13427_v62  ;;  %v7918_v62 = vld [vmem:[#allocation3 + $0x31] sm:$0xff] }
 0x2f1   : > { %11538 = vmatprep.subr.msk.mxu1 %vm365_vm0, %v13930_v63  ;;  %11400 = vmatmul.mubr.msk.f32.gmra.mrb[230].mxu0 %vm171_vm1, %v13792_v3  ;;  %v7473_v3 = vld [vmem:[#allocation3 + $0x98] sm:$0xff] }
 0x2f2   : > { %11402 = vmatprep.mubr.msk.f32.mxu0 %vm171_vm1, %v13798_v58  ;;  %v4773_v58 = vld [vmem:[#allocation2 + $0x8] sm:$0xff] }
 0x2f3   : > { %11344 = vmatmul.mubr.msk.f32.gmra.mrb[194].mxu1 %vm171_vm1, %v13439_v13  ;;  %v7919_v13 = vld [vmem:[#allocation3 + $0x39] sm:$0xff] }
 0x2f4   : > { %11346 = vmatprep.mubr.msk.f32.mxu1 %vm171_vm1, %v13445_v21  ;;  %v7920_v21 = vld [vmem:[#allocation3 + $0x49] sm:$0xff] }
 0x2f5   : > { %11403 = vmatmul.mubr.msk.f32.gmra.mrb[232].mxu0 %vm171_vm1, %v13804_v15  ;;  %v4772_v15 = vld [vmem:[#allocation2] sm:$0xff] }
 0x2f6   : > { %11405 = vmatprep.mubr.msk.f32.mxu0 %vm171_vm1, %v13810_v8 }
 0x2f7   : > { %11347 = vmatmul.mubr.msk.f32.gmra.mrb[196].mxu1 %vm171_vm1, %v13465_v44  ;;  %v14041_v44 = vld [vmem:[#allocation3 + $0x181] sm:$0xff] }
 0x2f8   : > { %11349 = vmatprep.mubr.msk.f32.mxu1 %vm171_vm1, %v13473_v53  ;;  %v7921_v53 = vld [vmem:[#allocation3 + $0x51] sm:$0xff] }
 0x2f9   : > { %11406 = vmatmul.mubr.msk.f32.gmra.mrb[234].mxu0 %vm171_vm1, %v13816_v0 }
 0x2fa   : > { %11408 = vmatprep.mubr.msk.f32.mxu0 %vm171_vm1, %v13822_v48  ;;  %v7475_v48 = vld [vmem:[#allocation3 + $0xb0] sm:$0xff] }
 0x2fb   : > { %11350 = vmatmul.mubr.msk.f32.gmra.mrb[198].mxu1 %vm171_vm1, %v13485_v55  ;;  %v14046_v55 = vld [vmem:[#allocation3 + $0x189] sm:$0xff] }
 0x2fc   : > { %11352 = vmatprep.mubr.msk.f32.mxu1 %vm171_vm1, %v13492_v40  ;;  %v7922_v40 = vld [vmem:[#allocation3 + $0x61] sm:$0xff] }
 0x2fd   : > { %11409 = vmatmul.mubr.msk.f32.gmra.mrb[236].mxu0 %vm171_vm1, %v13828_v25 }
 0x2fe   : > { %11411 = vmatprep.mubr.msk.f32.mxu0 %vm171_vm1, %v13834_v57 }
 0x2ff   : > { %11353 = vmatmul.mubr.msk.f32.gmra.mrb[200].mxu1 %vm171_vm1, %v13503_v45  ;;  %v7464_v45 = vld [vmem:[#allocation3 + $0x30] sm:$0xff] }
 0x300   : > { %11355 = vmatprep.mubr.msk.f32.mxu1 %vm171_vm1, %v13510_v20  ;;  %v7923_v20 = vld [vmem:[#allocation3 + $0x69] sm:$0xff] }
 0x301   : > { %11412 = vmatmul.mubr.msk.f32.gmra.mrb[238].mxu0 %vm171_vm1, %v13840_v60  ;;  %v4774_v60 = vld [vmem:[#allocation2 + $0x10] sm:$0xff] }
 0x302   : > { %11414 = vmatprep.mubr.msk.f32.mxu0 %vm171_vm1, %v13846_v19 }
 0x303   : > { %11356 = vmatmul.mubr.msk.f32.gmra.mrb[202].mxu1 %vm171_vm1, %v13522_v12  ;;  %v7465_v12 = vld [vmem:[#allocation3 + $0x38] sm:$0xff] }
 0x304   : > { %11358 = vmatprep.mubr.msk.f32.mxu1 %vm171_vm1, %v13529_v34  ;;  %v7924_v34 = vld [vmem:[#allocation3 + $0x79] sm:$0xff] }
 0x305   : > { %11415 = vmatmul.mubr.msk.f32.gmra.mrb[240].mxu0 %vm171_vm1, %v13852_v7  ;;  %v7477_v7 = vld [vmem:[#allocation3 + $0xc8] sm:$0xff] }
 0x306   : > { %11417 = vmatprep.mubr.msk.f32.mxu0 %vm171_vm1, %v13858_v38 }
 0x307   : > { %11359 = vmatmul.mubr.msk.f32.gmra.mrb[204].mxu1 %vm171_vm1, %v13543_v6  ;;  %v7466_v6 = vld [vmem:[#allocation3 + $0x48] sm:$0xff] }
 0x308   : > { %11361 = vmatprep.mubr.msk.f32.mxu1 %vm171_vm1, %v13550_v42 }
 0x309   : > { %11418 = vmatmul.mubr.msk.f32.gmra.mrb[242].mxu0 %vm171_vm1, %v13864_v28  ;;  %v7468_v28 = vld [vmem:[#allocation3 + $0x60] sm:$0xff] }
 0x30a   : > { %11420 = vmatprep.mubr.msk.f32.mxu0 %vm171_vm1, %v13870_v26  ;;  %v15407_v26 = vld [vmem:[#allocation27_spill] sm:$0xff] }
 0x30b   : > { %11362 = vmatmul.mubr.msk.f32.gmra.mrb[206].mxu1 %vm171_vm1, %v13563_v35 }
 0x30c   : > { %11364 = vmatprep.mubr.msk.f32.mxu1 %vm171_vm1, %v13570_v33 }
 0x30d   : > { %11421 = vmatmul.mubr.msk.f32.gmra.mrb[244].mxu0 %vm171_vm1, %v13876_v37  ;;  %v7927_v37 = vld [vmem:[#allocation3 + $0x99] sm:$0xff] }
 0x30e   : > { %11423 = vmatprep.mubr.msk.f32.mxu0 %vm171_vm1, %v13882_v30  ;;  %v4777_v30 = vld [vmem:[#allocation2 + $0x28] sm:$0xff] }
 0x30f   : > { %11365 = vmatmul.mubr.msk.f32.gmra.mrb[208].mxu1 %vm171_vm1, %v13583_v43 }
 0x310   : > { %11367 = vmatprep.mubr.msk.f32.mxu1 %vm171_vm1, %v13590_v41 }
 0x311   : > { %11424 = vmatmul.mubr.msk.f32.gmra.mrb[246].mxu0 %vm171_vm1, %v13888_v59  ;;  %v7469_v59 = vld [vmem:[#allocation3 + $0x68] sm:$0xff] }
 0x312   : > { %11426 = vmatprep.mubr.msk.f32.mxu0 %vm171_vm1, %v13896_v61 }
 0x313   : > { %11368 = vmatmul.mubr.msk.f32.gmra.mrb[210].mxu1 %vm171_vm1, %v13609_v46 }
 0x314   : > { %11370 = vmatprep.mubr.msk.f32.mxu1 %vm171_vm1, %v13616_v16 }
 0x315   : > { %11427 = vmatmul.mubr.msk.f32.gmra.mrb[248].mxu0 %vm171_vm1, %v5674_v5  ;;  %v7467_v5 = vld [vmem:[#allocation3 + $0x50] sm:$0xff] }
 0x316   : > { %11429 = vmatprep.mubr.msk.f32.mxu0 %vm171_vm1, %v5675_v2  ;;  %v4776_v2 = vld [vmem:[#allocation2 + $0x20] sm:$0xff] }
 0x317   : > { %11371 = vmatmul.mubr.msk.f32.gmra.mrb[212].mxu1 %vm171_vm1, %v13628_v22 }
 0x318   : > { %11373 = vmatprep.mubr.msk.f32.mxu1 %vm171_vm1, %v13634_v49 }
 0x319   : > { %11430 = vmatmul.mubr.msk.f32.gmra.mrb[250].mxu0 %vm171_vm1, %v5676_v36  ;;  %v7925_v36 = vld [vmem:[#allocation3 + $0x81] sm:$0xff] }
 0x31a   : > { %11432 = vmatprep.mubr.msk.f32.mxu0 %vm171_vm1, %v5677_v32  ;;  %v7926_v32 = vld [vmem:[#allocation3 + $0x91] sm:$0xff] }
 0x31b   : > { %11374 = vmatmul.mubr.msk.f32.gmra.mrb[214].mxu1 %vm171_vm1, %v13644_v54 }
 0x31c   : > { %11376 = vmatprep.mubr.msk.f32.mxu1 %vm171_vm1, %v13650_v11 }
 0x31d   : > { %11433 = vmatmul.mubr.msk.f32.gmra.mrb[252].mxu0 %vm171_vm1, %v5678_v14  ;;  %v7470_v14 = vld [vmem:[#allocation3 + $0x78] sm:$0xff] }
 0x31e   : > { %11435 = vmatprep.mubr.msk.f32.mxu0 %vm171_vm1, %v7039_v24  ;;  %v7479_v24 = vld [vmem:[#allocation3 + $0xe0] sm:$0xff] }
 0x31f   : > { %11377 = vmatmul.mubr.msk.f32.gmra.mrb[216].mxu1 %vm171_vm1, %v13660_v9 }
 0x320   : > { %11379 = vmatprep.mubr.msk.f32.mxu1 %vm171_vm1, %v13666_v39 }
 0x321   : > { %11436 = vmatmul.mubr.msk.f32.gmra.mrb[254].mxu0 %vm171_vm1, %v7040_v4 }
 0x322   : > { %11490 = vmatprep.mubr.msk.f32.mxu0 %vm171_vm1, %v7918_v62 }
 0x323   : > { %11380 = vmatmul.mubr.msk.f32.gmra.mrb[218].mxu1 %vm171_vm1, %v13676_v18 }
 0x324   : > { %11382 = vmatprep.mubr.msk.f32.mxu1 %vm171_vm1, %v13682_v50 }
 0x325   : > { %11491 = vmatmul.mubr.msk.f32.vlgmr.msra.gmra.mrb[0].mxu0 %vm171_vm1, %v7919_v13  ;;  %v15408_v13 = vld [vmem:[#allocation28_spill] sm:$0xff] }
 0x326   : > { %11493 = vmatprep.mubr.msk.f32.mxu0 %vm171_vm1, %v7920_v21  ;;  %v4779_v21 = vld [vmem:[#allocation2 + $0x38] sm:$0xff] }
 0x327   : > { %11383 = vmatmul.mubr.msk.f32.gmra.mrb[220].mxu1 %vm171_vm1, %v13693_v17 }
 0x328   : > { %11385 = vmatprep.mubr.msk.f32.mxu1 %vm171_vm1, %v14041_v44 }
 0x329   : > { %11494 = vmatmul.mubr.msk.f32.gmra.mrb[2].mxu0 %vm171_vm1, %v7921_v53 }
 0x32a   : > { %11496 = vmatprep.mubr.msk.f32.mxu0 %vm171_vm1, %v7922_v40 }
 0x32b   : > { %11386 = vmatmul.mubr.msk.f32.gmra.mrb[222].mxu1 %vm171_vm1, %v14046_v55 }
 0x32c   : > { %11440 = vmatprep.mubr.msk.f32.mxu1 %vm171_vm1, %v7464_v45  ;;  %v4778_v45 = vld [vmem:[#allocation2 + $0x30] sm:$0xff] }
 0x32d   : > { %11497 = vmatmul.mubr.msk.f32.gmra.mrb[4].mxu0 %vm171_vm1, %v7923_v20 }
 0x32e   : > { %11499 = vmatprep.mubr.msk.f32.mxu0 %vm171_vm1, %v7924_v34 }
 0x32f   : > { %11441 = vmatmul.mubr.msk.f32.vlgmr.msra.gmra.mrb[224].mxu1 %vm171_vm1, %v7465_v12 }
 0x330   : > { %11539 = vmatpush3.msk.msra.mxu1 %vm365_vm0, %v13930_v63  ;;  %11443 = vmatprep.mubr.msk.f32.mxu1 %vm171_vm1, %v7466_v6 }
 0x331   : > { %11500 = vmatmul.mubr.msk.f32.gmra.mrb[6].mxu0 %vm171_vm1, %v7925_v36 }
 0x332   : > { %11502 = vmatprep.mubr.msk.f32.mxu0 %vm171_vm1, %v7926_v32 }
 0x333   : > { %11444 = vmatmul.mubr.msk.f32.gmra.mrb[226].mxu1 %vm171_vm1, %v7467_v5 }
 0x334   : > { %11446 = vmatprep.mubr.msk.f32.mxu1 %vm171_vm1, %v7468_v28  ;;  %v15409_v28 = vld [vmem:[#allocation29_spill] sm:$0xff] }
 0x335   : > { %11503 = vmatmul.mubr.msk.f32.gmra.mrb[8].mxu0 %vm171_vm1, %v7927_v37  ;;  %v4781_v37 = vld [vmem:[#allocation2 + $0x48] sm:$0xff] }
 0x336   : > { %11505 = vmatprep.mubr.msk.f32.mxu0 %vm171_vm1, %v7928_v10  ;;  %v4780_v10 = vld [vmem:[#allocation2 + $0x40] sm:$0xff] }
 0x337   : > { %11447 = vmatmul.mubr.msk.f32.gmra.mrb[228].mxu1 %vm171_vm1, %v7469_v59  ;;  %v14067_v1 = vpop.f32.mrb[160].mxu0 }
 0x338   : > { %11449 = vmatprep.mubr.msk.f32.mxu1 %vm171_vm1, %v7470_v14  ;;  %v14069_v29 = vpop.f32.mrb[161].mxu0 }
 0x339   : > { %11506 = vmatmul.mubr.msk.f32.gmra.mrb[10].mxu0 %vm171_vm1, %v7929_v31 }
 0x33a   : > { %11508 = vmatprep.mubr.msk.f32.mxu0 %vm171_vm1, %v13550_v42 }
 0x33b   : > { %11450 = vmatmul.mubr.msk.f32.gmra.mrb[230].mxu1 %vm171_vm1, %v7471_v23  ;;  %v14076_v27 = vpop.f32.mrb[162].mxu0 }
 0x33c   : > { %11452 = vmatprep.mubr.msk.f32.mxu1 %vm171_vm1, %v7472_v51  ;;  %v14078_v47 = vpop.f32.mrb[163].mxu0 }
 0x33d   : > { %11509 = vmatmul.mubr.msk.f32.gmra.mrb[12].mxu0 %vm171_vm1, %v13563_v35 }
 0x33e   : > { %11511 = vmatprep.mubr.msk.f32.mxu0 %vm171_vm1, %v13570_v33 }
 0x33f   : > { %11453 = vmatmul.mubr.msk.f32.gmra.mrb[232].mxu1 %vm171_vm1, %v7473_v3  ;;  %v14087_v42 = vpop.f32.mrb[164].mxu0 }
 0x340   : > { %11455 = vmatprep.mubr.msk.f32.mxu1 %vm171_vm1, %v13575_v56  ;;  %v14089_v0 = vpop.f32.mrb[165].mxu0  ;;  %v4775_v56 = vld [vmem:[#allocation2 + $0x18] sm:$0xff] }
 0x341   : > { %11512 = vmatmul.mubr.msk.f32.gmra.mrb[14].mxu0 %vm171_vm1, %v13583_v43 }
 0x342   : > { %v11142_v8 = vpop.f32.mrb[128].mxu1  ;;  %11514 = vmatprep.mubr.msk.f32.mxu0 %vm171_vm1, %v13590_v41 }
 0x343   : > { %v5130_v35 = vadd.f32 %v11142_v8, %v4773_v58  ;;  %v4970_v25 = vpop.f32.mrb[129].mxu1  ;;  %11456 = vmatmul.mubr.msk.f32.gmra.mrb[234].mxu1 %vm171_vm1, %v7475_v48  ;;  %v15410_v58 = vld [vmem:[#allocation4_spill] sm:$0xff] }
 0x344   : > { %v5129_v33 = vadd.f32 %v4970_v25, %v4772_v15  ;;  %11458 = vmatprep.mubr.msk.f32.mxu1 %vm171_vm1, %v13595_v52  ;;  %v14099_v57 = vpop.f32.mrb[166].mxu0  ;;  %v4783_v15 = vld [vmem:[#allocation2 + $0x58] sm:$0xff] }
 0x345   : > { %5162 = vst.msk [vmem:[#allocation2 + $0x8] sm:$0xff] %vm171_vm1, %v5130_v35  ;;  %v14102_v19 = vpop.f32.mrb[167].mxu0  ;;  %11515 = vmatmul.mubr.msk.f32.gmra.mrb[16].mxu0 %vm171_vm1, %v13609_v46 }
 0x346   : > { %5161 = vst.msk [vmem:[#allocation2] sm:$0xff] %vm171_vm1, %v5129_v33  ;;  %v11145_v43 = vpop.f32.mrb[130].mxu1  ;;  %11517 = vmatprep.mubr.msk.f32.mxu0 %vm171_vm1, %v13616_v16  ;;  %v7485_v33 = vld [vmem:[#allocation3 + $0x128] sm:$0xff] }
 0x347   : > { %v5132_v41 = vadd.f32 %v11145_v43, %v4775_v56  ;;  %v4980_v38 = vpop.f32.mrb[131].mxu1  ;;  %11459 = vmatmul.mubr.msk.f32.gmra.mrb[236].mxu1 %vm171_vm1, %v7477_v7  ;;  %v15411_v7 = vld [vmem:[#allocation5_spill] sm:$0xff] }
 0x348   : > { %v5131_v52 = vadd.f32 %v4980_v38, %v4774_v60  ;;  %11461 = vmatprep.mubr.msk.f32.mxu1 %vm171_vm1, %v15407_v26  ;;  %v14112_v61 = vpop.f32.mrb[168].mxu0 }
 0x349   : > { %5164 = vst.msk [vmem:[#allocation2 + $0x18] sm:$0xff] %vm171_vm1, %v5132_v41  ;;  %v14115_v63 = vpop.f32.mrb[169].mxu0  ;;  %11518 = vmatmul.mubr.msk.f32.gmra.mrb[18].mxu0 %vm171_vm1, %v13628_v22  ;;  %v4785_v41 = vld [vmem:[#allocation2 + $0x68] sm:$0xff] }
 0x34a   : > { %5163 = vst.msk [vmem:[#allocation2 + $0x10] sm:$0xff] %vm171_vm1, %v5131_v52  ;;  %v11148_v46 = vpop.f32.mrb[132].mxu1  ;;  %11520 = vmatprep.mubr.msk.f32.mxu0 %vm171_vm1, %v13634_v49  ;;  %v7481_v49 = vld [vmem:[#allocation3 + $0xf8] sm:$0xff] }
 0x34b   : > { %v5134_v16 = vadd.f32 %v11148_v46, %v4777_v30  ;;  %v4990_v4 = vpop.f32.mrb[133].mxu1  ;;  %11462 = vmatmul.mubr.msk.f32.gmra.mrb[238].mxu1 %vm171_vm1, %v7479_v24 }
 0x34c   : > { %v5133_v62 = vadd.f32 %v4990_v4, %v4776_v2  ;;  %11464 = vmatprep.mubr.msk.f32.mxu1 %vm171_vm1, %v15408_v13  ;;  %v5226_v53 = vld [vmem:[#allocation2 + $0x8] sm:$0xff]  ;;  %v14125_v40 = vpop.f32.mrb[170].mxu0  ;;  %v7487_v2 = vld [vmem:[#allocation3 + $0x140] sm:$0xff] }
 0x34d   : > { %5166 = vst.msk [vmem:[#allocation2 + $0x28] sm:$0xff] %vm171_vm1, %v5134_v16  ;;  %v5584_v22 = vadd.f32 %v14067_v1, %v5226_v53  ;;  %v5225_v20 = vld [vmem:[#allocation2] sm:$0xff]  ;;  %v14129_v34 = vpop.f32.mrb[171].mxu0  ;;  %11521 = vmatmul.mubr.msk.f32.gmra.mrb[20].mxu0 %vm171_vm1, %v13644_v54 }
 0x34e   : > { %5165 = vst.msk [vmem:[#allocation2 + $0x20] sm:$0xff] %vm171_vm1, %v5133_v62  ;;  %v11151_v12 = vpop.f32.mrb[134].mxu1  ;;  %v5583_v6 = vadd.f32 %v14069_v29, %v5225_v20  ;;  %11523 = vmatprep.mubr.msk.f32.mxu0 %vm171_vm1, %v13650_v11  ;;  %v7483_v29 = vld [vmem:[#allocation3 + $0x110] sm:$0xff]  ;;  %v15412_v4 = vld [vmem:[#allocation6_spill] sm:$0xff]  ;;  %v4787_v62 = vld [vmem:[#allocation2 + $0x78] sm:$0xff] }
 0x34f   : > { %v5136_v36 = vadd.f32 %v11151_v12, %v4779_v21  ;;  %v5000_v5 = vpop.f32.mrb[135].mxu1  ;;  %11465 = vmatmul.mubr.msk.f32.gmra.mrb[240].mxu1 %vm171_vm1, %v7481_v49  ;;  %5616 = vst.msk [vmem:[#allocation2 + $0x8] sm:$0xff] %vm171_vm1, %v5584_v22  ;;  %v7489_v22 = vld [vmem:[#allocation3 + $0x158] sm:$0xff] }
 0x350   : > { %v5135_v32 = vadd.f32 %v5000_v5, %v4778_v45  ;;  %11467 = vmatprep.mubr.msk.f32.mxu1 %vm171_vm1, %v15409_v28  ;;  %5615 = vst.msk [vmem:[#allocation2] sm:$0xff] %vm171_vm1, %v5583_v6  ;;  %v5228_v59 = vld [vmem:[#allocation2 + $0x18] sm:$0xff]  ;;  %v14142_v54 = vpop.f32.mrb[172].mxu0  ;;  %v4789_v5 = vld [vmem:[#allocation2 + $0x88] sm:$0xff] }
 0x351   : > { %5168 = vst.msk [vmem:[#allocation2 + $0x38] sm:$0xff] %vm171_vm1, %v5136_v36  ;;  %v5586_v14 = vadd.f32 %v14076_v27, %v5228_v59  ;;  %v5227_v1 = vld [vmem:[#allocation2 + $0x10] sm:$0xff]  ;;  %v14146_v31 = vpop.f32.mrb[173].mxu0  ;;  %11524 = vmatmul.mubr.msk.f32.gmra.mrb[22].mxu0 %vm171_vm1, %v13660_v9  ;;  %v7948_v20 = vld [vmem:[#allocation3 + $0x199] sm:$0xff]  ;;  %v15413_v36 = vld [vmem:[#allocation7_spill] sm:$0xff] }
 0x352   : > { %5167 = vst.msk [vmem:[#allocation2 + $0x30] sm:$0xff] %vm171_vm1, %v5135_v32  ;;  %v11154_v11 = vpop.f32.mrb[136].mxu1  ;;  %v5585_v23 = vadd.f32 %v14078_v47, %v5227_v1  ;;  %11526 = vmatprep.mubr.msk.f32.mxu0 %vm171_vm1, %v13666_v39  ;;  %v4782_v47 = vld [vmem:[#allocation2 + $0x50] sm:$0xff]  ;;  %v7949_v28 = vld [vmem:[#allocation3 + $0x1a1] sm:$0xff] }
 0x353   : > { %v5138_v51 = vadd.f32 %v11154_v11, %v4781_v37  ;;  %v5010_v3 = vpop.f32.mrb[137].mxu1  ;;  %11468 = vmatmul.mubr.msk.f32.gmra.mrb[242].mxu1 %vm171_vm1, %v7483_v29  ;;  %5618 = vst.msk [vmem:[#allocation2 + $0x18] sm:$0xff] %vm171_vm1, %v5586_v14  ;;  %v7491_v1 = vld [vmem:[#allocation3 + $0x170] sm:$0xff] }
 0x354   : > { %v5137_v27 = vadd.f32 %v5010_v3, %v4780_v10  ;;  %11470 = vmatprep.mubr.msk.f32.mxu1 %vm171_vm1, %v15410_v58  ;;  %5617 = vst.msk [vmem:[#allocation2 + $0x10] sm:$0xff] %vm171_vm1, %v5585_v23  ;;  %v5230_v8 = vld [vmem:[#allocation2 + $0x28] sm:$0xff]  ;;  %v14159_v9 = vpop.f32.mrb[174].mxu0  ;;  %v15414_v3 = vld [vmem:[#allocation8_spill] sm:$0xff] }
 0x355   : > { %5170 = vst.msk [vmem:[#allocation2 + $0x48] sm:$0xff] %vm171_vm1, %v5138_v51  ;;  %v5588_v48 = vadd.f32 %v14087_v42, %v5230_v8  ;;  %v5229_v35 = vld [vmem:[#allocation2 + $0x20] sm:$0xff]  ;;  %v14163_v25 = vpop.f32.mrb[175].mxu0  ;;  %11527 = vmatmul.mubr.msk.f32.gmra.mrb[24].mxu0 %vm171_vm1, %v13676_v18 }
 0x356   : > { %5169 = vst.msk [vmem:[#allocation2 + $0x40] sm:$0xff] %vm171_vm1, %v5137_v27  ;;  %v11157_v39 = vpop.f32.mrb[138].mxu1  ;;  %v5587_v56 = vadd.f32 %v14089_v0, %v5229_v35  ;;  %11529 = vmatprep.mubr.msk.f32.mxu0 %vm171_vm1, %v13682_v50  ;;  %v4784_v0 = vld [vmem:[#allocation2 + $0x60] sm:$0xff] }
 0x357   : > { %v5140_v60 = vadd.f32 %v11157_v39, %v4783_v15  ;;  %v5020_v43 = vpop.f32.mrb[139].mxu1  ;;  %11471 = vmatmul.mubr.msk.f32.gmra.mrb[244].mxu1 %vm171_vm1, %v7485_v33  ;;  %5620 = vst.msk [vmem:[#allocation2 + $0x28] sm:$0xff] %vm171_vm1, %v5588_v48  ;;  %v4790_v15 = vld [vmem:[#allocation2 + $0x90] sm:$0xff] }
 0x358   : > { %v5139_v42 = vadd.f32 %v5020_v43, %v4782_v47  ;;  %11473 = vmatprep.mubr.msk.f32.mxu1 %vm171_vm1, %v15411_v7  ;;  %5619 = vst.msk [vmem:[#allocation2 + $0x20] sm:$0xff] %vm171_vm1, %v5587_v56  ;;  %v5232_v38 = vld [vmem:[#allocation2 + $0x38] sm:$0xff]  ;;  %v14176_v18 = vpop.f32.mrb[176].mxu0 }
 0x359   : > { %5172 = vst.msk [vmem:[#allocation2 + $0x58] sm:$0xff] %vm171_vm1, %v5140_v60  ;;  %v5590_v52 = vadd.f32 %v14099_v57, %v5232_v38  ;;  %v5231_v26 = vld [vmem:[#allocation2 + $0x30] sm:$0xff]  ;;  %v14180_v30 = vpop.f32.mrb[177].mxu0  ;;  %11530 = vmatmul.mubr.msk.f32.gmra.mrb[26].mxu0 %vm171_vm1, %v13693_v17  ;;  %v15415_v56 = vld [vmem:[#allocation9_spill] sm:$0xff] }
 0x35a   : > { %5171 = vst.msk [vmem:[#allocation2 + $0x50] sm:$0xff] %vm171_vm1, %v5139_v42  ;;  %v11160_v50 = vpop.f32.mrb[140].mxu1  ;;  %v5589_v46 = vadd.f32 %v14102_v19, %v5231_v26  ;;  %11532 = vmatprep.mubr.msk.f32.mxu0 %vm171_vm1, %v14041_v44  ;;  %v4786_v19 = vld [vmem:[#allocation2 + $0x70] sm:$0xff]  ;;  %v7494_v60 = vld [vmem:[#allocation3 + $0x198] sm:$0xff]  ;;  %v7495_v26 = vld [vmem:[#allocation3 + $0x1a0] sm:$0xff] }
 0x35b   : > { %v5142_v24 = vadd.f32 %v11160_v50, %v4785_v41  ;;  %v5030_v16 = vpop.f32.mrb[141].mxu1  ;;  %11474 = vmatmul.mubr.msk.f32.gmra.mrb[246].mxu1 %vm171_vm1, %v7487_v2  ;;  %5622 = vst.msk [vmem:[#allocation2 + $0x38] sm:$0xff] %vm171_vm1, %v5590_v52 }
 0x35c   : > { %v5141_v57 = vadd.f32 %v5030_v16, %v4784_v0  ;;  %11476 = vmatprep.mubr.msk.f32.mxu1 %vm171_vm1, %v15412_v4  ;;  %5621 = vst.msk [vmem:[#allocation2 + $0x30] sm:$0xff] %vm171_vm1, %v5589_v46  ;;  %v5234_v13 = vld [vmem:[#allocation2 + $0x48] sm:$0xff]  ;;  %v14193_v17 = vpop.f32.mrb[178].mxu0 }
 0x35d   : > { %5174 = vst.msk [vmem:[#allocation2 + $0x68] sm:$0xff] %vm171_vm1, %v5142_v24  ;;  %v5592_v21 = vadd.f32 %v14112_v61, %v5234_v13  ;;  %v5233_v53 = vld [vmem:[#allocation2 + $0x40] sm:$0xff]  ;;  %v14197_v45 = vpop.f32.mrb[179].mxu0  ;;  %11533 = vmatmul.mubr.msk.f32.gmra.mrb[28].mxu0 %vm171_vm1, %v14046_v55  ;;  %v8372_v24 = vld [vmem:[#allocation3 + $0x32] sm:$0xff] }
 0x35e   : > { %5173 = vst.msk [vmem:[#allocation2 + $0x60] sm:$0xff] %vm171_vm1, %v5141_v57  ;;  %v11163_v44 = vpop.f32.mrb[142].mxu1  ;;  %v5591_v12 = vadd.f32 %v14115_v63, %v5233_v53  ;;  %11535 = vmatprep.mubr.msk.f32.mxu0 %vm171_vm1, %v7948_v20  ;;  %v4788_v63 = vld [vmem:[#allocation2 + $0x80] sm:$0xff] }
 0x35f   : > { %v5144_v49 = vadd.f32 %v11163_v44, %v4787_v62  ;;  %v5040_v6 = vpop.f32.mrb[143].mxu1  ;;  %11477 = vmatmul.mubr.msk.f32.gmra.mrb[248].mxu1 %vm171_vm1, %v7489_v22  ;;  %5624 = vst.msk [vmem:[#allocation2 + $0x48] sm:$0xff] %vm171_vm1, %v5592_v21  ;;  %v4794_v62 = vld [vmem:[#allocation2 + $0xb0] sm:$0xff]  ;;  %v8373_v53 = vld [vmem:[#allocation3 + $0x3a] sm:$0xff] }
 0x360   : > { %v5143_v61 = vadd.f32 %v5040_v6, %v4786_v19  ;;  %11479 = vmatprep.mubr.msk.f32.mxu1 %vm171_vm1, %v15413_v36  ;;  %5623 = vst.msk [vmem:[#allocation2 + $0x40] sm:$0xff] %vm171_vm1, %v5591_v12  ;;  %v5236_v32 = vld [vmem:[#allocation2 + $0x58] sm:$0xff]  ;;  %v14209_v55 = vpop.f32.mrb[180].mxu0  ;;  %v8374_v12 = vld [vmem:[#allocation3 + $0x4a] sm:$0xff]  ;;  %v4796_v36 = vld [vmem:[#allocation2 + $0xc0] sm:$0xff] }
 0x361   : > { %5176 = vst.msk [vmem:[#allocation2 + $0x78] sm:$0xff] %vm171_vm1, %v5144_v49  ;;  %v5594_v37 = vadd.f32 %v14125_v40, %v5236_v32  ;;  %v5235_v59 = vld [vmem:[#allocation2 + $0x50] sm:$0xff]  ;;  %v14213_v14 = vpop.f32.mrb[181].mxu0  ;;  %11536 = vmatmul.mubr.msk.f32.gmra.mrb[30].mxu0 %vm171_vm1, %v7949_v28  ;;  %v4791_v40 = vld [vmem:[#allocation2 + $0x98] sm:$0xff] }
 0x362   : > { %5175 = vst.msk [vmem:[#allocation2 + $0x70] sm:$0xff] %vm171_vm1, %v5143_v61  ;;  %v11166_v10 = vpop.f32.mrb[144].mxu1  ;;  %v5593_v11 = vadd.f32 %v14129_v34, %v5235_v59  ;;  %v8375_v28 = vld [vmem:[#allocation3 + $0x52] sm:$0xff] }
 0x363   : > { %v5146_v29 = vadd.f32 %v11166_v10, %v4789_v5  ;;  %v5050_v23 = vpop.f32.mrb[145].mxu1  ;;  %11480 = vmatmul.mubr.msk.f32.gmra.mrb[250].mxu1 %vm171_vm1, %v7491_v1  ;;  %5626 = vst.msk [vmem:[#allocation2 + $0x58] sm:$0xff] %vm171_vm1, %v5594_v37  ;;  %v8376_v1 = vld [vmem:[#allocation3 + $0x62] sm:$0xff] }
 0x364   : > { %v5145_v51 = vadd.f32 %v5050_v23, %v4788_v63  ;;  %11482 = vmatprep.mubr.msk.f32.mxu1 %vm171_vm1, %v15414_v3  ;;  %5625 = vst.msk [vmem:[#allocation2 + $0x50] sm:$0xff] %vm171_vm1, %v5593_v11  ;;  %v5238_v27 = vld [vmem:[#allocation2 + $0x68] sm:$0xff]  ;;  %v14223_v58 = vpop.f32.mrb[182].mxu0 }
 0x365   : > { %5178 = vst.msk [vmem:[#allocation2 + $0x88] sm:$0xff] %vm171_vm1, %v5146_v29  ;;  %v5596_v34 = vadd.f32 %v14142_v54, %v5238_v27  ;;  %v5237_v8 = vld [vmem:[#allocation2 + $0x60] sm:$0xff]  ;;  %v14227_v48 = vpop.f32.mrb[183].mxu0  ;;  %v4793_v54 = vld [vmem:[#allocation2 + $0xa8] sm:$0xff] }
 0x366   : > { %5177 = vst.msk [vmem:[#allocation2 + $0x80] sm:$0xff] %vm171_vm1, %v5145_v51  ;;  %v11169_v47 = vpop.f32.mrb[146].mxu1  ;;  %v5595_v35 = vadd.f32 %v14146_v31, %v5237_v8  ;;  %v4792_v31 = vld [vmem:[#allocation2 + $0xa0] sm:$0xff]  ;;  %v4798_v51 = vld [vmem:[#allocation2 + $0xd0] sm:$0xff] }
 0x367   : > { %v5148_v39 = vadd.f32 %v11169_v47, %v4791_v40  ;;  %v5060_v33 = vpop.f32.mrb[147].mxu1  ;;  %11483 = vmatmul.mubr.msk.f32.gmra.mrb[252].mxu1 %vm171_vm1, %v15415_v56  ;;  %5628 = vst.msk [vmem:[#allocation2 + $0x68] sm:$0xff] %vm171_vm1, %v5596_v34 }
 0x368   : > { %v5147_v43 = vadd.f32 %v5060_v33, %v4790_v15  ;;  %11485 = vmatprep.mubr.msk.f32.mxu1 %vm171_vm1, %v7494_v60  ;;  %5627 = vst.msk [vmem:[#allocation2 + $0x60] sm:$0xff] %vm171_vm1, %v5595_v35  ;;  %v5240_v42 = vld [vmem:[#allocation2 + $0x78] sm:$0xff]  ;;  %v14236_v7 = vpop.f32.mrb[184].mxu0  ;;  %v8377_v15 = vld [vmem:[#allocation3 + $0x6a] sm:$0xff]  ;;  %v4800_v60 = vld [vmem:[#allocation2 + $0xe0] sm:$0xff] }
 0x369   : > { %5180 = vst.msk [vmem:[#allocation2 + $0x98] sm:$0xff] %vm171_vm1, %v5148_v39  ;;  %v5598_v41 = vadd.f32 %v14159_v9, %v5240_v42  ;;  %v5239_v38 = vld [vmem:[#allocation2 + $0x70] sm:$0xff]  ;;  %v14240_v52 = vpop.f32.mrb[185].mxu0  ;;  %v4795_v9 = vld [vmem:[#allocation2 + $0xb8] sm:$0xff] }
 0x36a   : > { %5179 = vst.msk [vmem:[#allocation2 + $0x90] sm:$0xff] %vm171_vm1, %v5147_v43  ;;  %v11172_v0 = vpop.f32.mrb[148].mxu1  ;;  %v5597_v50 = vadd.f32 %v14163_v25, %v5239_v38  ;;  %v8378_v35 = vld [vmem:[#allocation3 + $0x7a] sm:$0xff] }
 0x36b   : > { %v5150_v2 = vadd.f32 %v11172_v0, %v4793_v54  ;;  %v5070_v46 = vpop.f32.mrb[149].mxu1  ;;  %11486 = vmatmul.mubr.msk.f32.gmra.mrb[254].mxu1 %vm171_vm1, %v7495_v26  ;;  %5630 = vst.msk [vmem:[#allocation2 + $0x78] sm:$0xff] %vm171_vm1, %v5598_v41  ;;  %v8380_v26 = vld [vmem:[#allocation3 + $0x92] sm:$0xff] }
 0x36c   : > { %v5149_v16 = vadd.f32 %v5070_v46, %v4792_v31  ;;  %11540 = vmatprep.mubr.msk.f32.mxu1 %vm171_vm1, %v8372_v24  ;;  %5629 = vst.msk [vmem:[#allocation2 + $0x70] sm:$0xff] %vm171_vm1, %v5597_v50  ;;  %v5242_v57 = vld [vmem:[#allocation2 + $0x88] sm:$0xff]  ;;  %v14248_v4 = vpop.f32.mrb[186].mxu0  ;;  %v4802_v24 = vld [vmem:[#allocation2 + $0xf0] sm:$0xff] }
 0x36d   : > { %5182 = vst.msk [vmem:[#allocation2 + $0xa8] sm:$0xff] %vm171_vm1, %v5150_v2  ;;  %v5600_v25 = vadd.f32 %v14176_v18, %v5242_v57  ;;  %v5241_v13 = vld [vmem:[#allocation2 + $0x80] sm:$0xff]  ;;  %v14252_v21 = vpop.f32.mrb[187].mxu0  ;;  %v4797_v18 = vld [vmem:[#allocation2 + $0xc8] sm:$0xff] }
 0x36e   : > { %5181 = vst.msk [vmem:[#allocation2 + $0xa0] sm:$0xff] %vm171_vm1, %v5149_v16  ;;  %v11175_v19 = vpop.f32.mrb[150].mxu1  ;;  %v5599_v44 = vadd.f32 %v14180_v30, %v5241_v13  ;;  %v8379_v31 = vld [vmem:[#allocation3 + $0x82] sm:$0xff] }
 0x36f   : > { %v5152_v22 = vadd.f32 %v11175_v19, %v4795_v9  ;;  %v5080_v20 = vpop.f32.mrb[151].mxu1  ;;  %11541 = vmatmul.mubr.msk.f32.vlgmr.msra.gmra.mrb[0].mxu1 %vm171_vm1, %v8373_v53  ;;  %5632 = vst.msk [vmem:[#allocation2 + $0x88] sm:$0xff] %vm171_vm1, %v5600_v25  ;;  %v8382_v53 = vld [vmem:[#allocation3 + $0xaa] sm:$0xff] }
 0x370   : > { %v5151_v49 = vadd.f32 %v5080_v20, %v4794_v62  ;;  %11543 = vmatprep.mubr.msk.f32.mxu1 %vm171_vm1, %v8374_v12  ;;  %5631 = vst.msk [vmem:[#allocation2 + $0x80] sm:$0xff] %vm171_vm1, %v5599_v44  ;;  %v5244_v6 = vld [vmem:[#allocation2 + $0x98] sm:$0xff]  ;;  %v14260_v61 = vpop.f32.mrb[188].mxu0  ;;  %v5680_v12 = vld [vmem:[#allocation2 + $0x8] sm:$0xff] }
 0x371   : > { %5184 = vst.msk [vmem:[#allocation2 + $0xb8] sm:$0xff] %vm171_vm1, %v5152_v22  ;;  %v5602_v30 = vadd.f32 %v14193_v17, %v5244_v6  ;;  %v5243_v5 = vld [vmem:[#allocation2 + $0x90] sm:$0xff]  ;;  %v14264_v63 = vpop.f32.mrb[189].mxu0  ;;  %v4799_v17 = vld [vmem:[#allocation2 + $0xd8] sm:$0xff] }
 0x372   : > { %5183 = vst.msk [vmem:[#allocation2 + $0xb0] sm:$0xff] %vm171_vm1, %v5151_v49  ;;  %v11178_v32 = vpop.f32.mrb[152].mxu1  ;;  %v5601_v37 = vadd.f32 %v14197_v45, %v5243_v5  ;;  %v8381_v62 = vld [vmem:[#allocation3 + $0x9a] sm:$0xff]  ;;  %v8383_v6 = vld [vmem:[#allocation3 + $0xb2] sm:$0xff] }
 0x373   : > { %v5154_v59 = vadd.f32 %v11178_v32, %v4797_v18  ;;  %v5090_v10 = vpop.f32.mrb[153].mxu1  ;;  %11544 = vmatmul.mubr.msk.f32.gmra.mrb[2].mxu1 %vm171_vm1, %v8375_v28  ;;  %5634 = vst.msk [vmem:[#allocation2 + $0x98] sm:$0xff] %vm171_vm1, %v5602_v30  ;;  %v5679_v5 = vld [vmem:[#allocation2] sm:$0xff] }
 0x374   : > { %v5153_v11 = vadd.f32 %v5090_v10, %v4796_v36  ;;  %11546 = vmatprep.mubr.msk.f32.mxu1 %vm171_vm1, %v8376_v1  ;;  %5633 = vst.msk [vmem:[#allocation2 + $0x90] sm:$0xff] %vm171_vm1, %v5601_v37  ;;  %v5246_v29 = vld [vmem:[#allocation2 + $0xa8] sm:$0xff]  ;;  %v14272_v23 = vpop.f32.mrb[190].mxu0  ;;  %v5682_v1 = vld [vmem:[#allocation2 + $0x18] sm:$0xff] }
 0x375   : > { %5186 = vst.msk [vmem:[#allocation2 + $0xc8] sm:$0xff] %vm171_vm1, %v5154_v59  ;;  %v5604_v45 = vadd.f32 %v14209_v55, %v5246_v29  ;;  %v5245_v3 = vld [vmem:[#allocation2 + $0xa0] sm:$0xff]  ;;  %v14276_v27 = vpop.f32.mrb[191].mxu0  ;;  %v4801_v55 = vld [vmem:[#allocation2 + $0xe8] sm:$0xff] }
 0x376   : > { %5185 = vst.msk [vmem:[#allocation2 + $0xc0] sm:$0xff] %vm171_vm1, %v5153_v11  ;;  %v11181_v40 = vpop.f32.mrb[154].mxu1  ;;  %v5603_v34 = vadd.f32 %v14213_v14, %v5245_v3  ;;  %v8384_v28 = vld [vmem:[#allocation3 + $0xc2] sm:$0xff]  ;;  %v8385_v29 = vld [vmem:[#allocation3 + $0xca] sm:$0xff] }
 0x377   : > { %v5156_v8 = vadd.f32 %v11181_v40, %v4799_v17  ;;  %v5100_v47 = vpop.f32.mrb[155].mxu1  ;;  %11547 = vmatmul.mubr.msk.f32.gmra.mrb[4].mxu1 %vm171_vm1, %v8377_v15  ;;  %5636 = vst.msk [vmem:[#allocation2 + $0xa8] sm:$0xff] %vm171_vm1, %v5604_v45  ;;  %v5681_v3 = vld [vmem:[#allocation2 + $0x10] sm:$0xff]  ;;  %v8386_v15 = vld [vmem:[#allocation3 + $0xda] sm:$0xff] }
 0x378   : > { %v5155_v39 = vadd.f32 %v5100_v47, %v4798_v51  ;;  %11549 = vmatprep.mubr.msk.f32.mxu1 %vm171_vm1, %v8378_v35  ;;  %5635 = vst.msk [vmem:[#allocation2 + $0xa0] sm:$0xff] %vm171_vm1, %v5603_v34  ;;  %v5248_v33 = vld [vmem:[#allocation2 + $0xb8] sm:$0xff]  ;;  %v14284_v56 = vpop.f32.mrb[192].mxu0  ;;  %v5684_v35 = vld [vmem:[#allocation2 + $0x28] sm:$0xff] }
 0x379   : > { %5188 = vst.msk [vmem:[#allocation2 + $0xd8] sm:$0xff] %vm171_vm1, %v5156_v8  ;;  %v5606_v14 = vadd.f32 %v14223_v58, %v5248_v33  ;;  %v5247_v43 = vld [vmem:[#allocation2 + $0xb0] sm:$0xff]  ;;  %v14288_v42 = vpop.f32.mrb[193].mxu0  ;;  %v4803_v58 = vld [vmem:[#allocation2 + $0xf8] sm:$0xff]  ;;  %v8387_v33 = vld [vmem:[#allocation3 + $0xe2] sm:$0xff] }
 0x37a   : > { %5187 = vst.msk [vmem:[#allocation2 + $0xd0] sm:$0xff] %vm171_vm1, %v5155_v39  ;;  %v11184_v54 = vpop.f32.mrb[156].mxu1  ;;  %v5605_v41 = vadd.f32 %v14227_v48, %v5247_v43  ;;  %v5683_v43 = vld [vmem:[#allocation2 + $0x20] sm:$0xff] }
 0x37b   : > { %v5158_v38 = vadd.f32 %v11184_v54, %v4801_v55  ;;  %v5110_v0 = vpop.f32.mrb[157].mxu1  ;;  %11550 = vmatmul.mubr.msk.f32.gmra.mrb[6].mxu1 %vm171_vm1, %v8379_v31  ;;  %5638 = vst.msk [vmem:[#allocation2 + $0xb8] sm:$0xff] %vm171_vm1, %v5606_v14  ;;  %v8388_v31 = vld [vmem:[#allocation3 + $0xf2] sm:$0xff] }
 0x37c   : > { %v5157_v50 = vadd.f32 %v5110_v0, %v4800_v60  ;;  %11552 = vmatprep.mubr.msk.f32.mxu1 %vm171_vm1, %v8380_v26  ;;  %5637 = vst.msk [vmem:[#allocation2 + $0xb0] sm:$0xff] %vm171_vm1, %v5605_v41  ;;  %v5250_v2 = vld [vmem:[#allocation2 + $0xc8] sm:$0xff]  ;;  %v14296_v46 = vpop.f32.mrb[194].mxu0  ;;  %v5686_v26 = vld [vmem:[#allocation2 + $0x38] sm:$0xff] }
 0x37d   : > { %5190 = vst.msk [vmem:[#allocation2 + $0xe8] sm:$0xff] %vm171_vm1, %v5158_v38  ;;  %v5608_v48 = vadd.f32 %v14236_v7, %v5250_v2  ;;  %v5249_v16 = vld [vmem:[#allocation2 + $0xc0] sm:$0xff]  ;;  %v14300_v57 = vpop.f32.mrb[195].mxu0 }
 0x37e   : > { %5189 = vst.msk [vmem:[#allocation2 + $0xe0] sm:$0xff] %vm171_vm1, %v5157_v50  ;;  %v11187_v9 = vpop.f32.mrb[158].mxu1  ;;  %v5607_v25 = vadd.f32 %v14240_v52, %v5249_v16  ;;  %v8389_v2 = vld [vmem:[#allocation3 + $0xfa] sm:$0xff]  ;;  %v5685_v16 = vld [vmem:[#allocation2 + $0x30] sm:$0xff] }
 0x37f   : > { %v5160_v13 = vadd.f32 %v11187_v9, %v4803_v58  ;;  %v5120_v19 = vpop.f32.mrb[159].mxu1  ;;  %11553 = vmatmul.mubr.msk.f32.gmra.mrb[8].mxu1 %vm171_vm1, %v8381_v62  ;;  %5640 = vst.msk [vmem:[#allocation2 + $0xc8] sm:$0xff] %vm171_vm1, %v5608_v48  ;;  %v8390_v62 = vld [vmem:[#allocation3 + $0x10a] sm:$0xff] }
 0x380   : > { %v5159_v44 = vadd.f32 %v5120_v19, %v4802_v24  ;;  %11555 = vmatprep.mubr.msk.f32.mxu1 %vm171_vm1, %v8382_v53  ;;  %5639 = vst.msk [vmem:[#allocation2 + $0xc0] sm:$0xff] %vm171_vm1, %v5607_v25  ;;  %v5252_v7 = vld [vmem:[#allocation2 + $0xd8] sm:$0xff]  ;;  %v14308_v22 = vpop.f32.mrb[196].mxu0  ;;  %v5688_v53 = vld [vmem:[#allocation2 + $0x48] sm:$0xff] }
 0x381   : > { %5192 = vst.msk [vmem:[#allocation2 + $0xf8] sm:$0xff] %vm171_vm1, %v5160_v13  ;;  %v5610_v20 = vadd.f32 %v14248_v4, %v5252_v7  ;;  %v5251_v52 = vld [vmem:[#allocation2 + $0xd0] sm:$0xff]  ;;  %v14312_v18 = vpop.f32.mrb[197].mxu0 }
 0x382   : > { %5191 = vst.msk [vmem:[#allocation2 + $0xf0] sm:$0xff] %vm171_vm1, %v5159_v44  ;;  %v11242_v49 = vpop.f32.mrb[160].mxu1  ;;  %v5609_v36 = vadd.f32 %v14252_v21, %v5251_v52 }
 0x383   : > { %v6038_v30 = vadd.f32 %v11242_v49, %v5680_v12  ;;  %v5878_v32 = vpop.f32.mrb[161].mxu1  ;;  %11556 = vmatmul.mubr.msk.f32.gmra.mrb[10].mxu1 %vm171_vm1, %v8383_v6  ;;  %5642 = vst.msk [vmem:[#allocation2 + $0xd8] sm:$0xff] %vm171_vm1, %v5610_v20  ;;  %v8391_v20 = vld [vmem:[#allocation3 + $0x112] sm:$0xff]  ;;  %v5687_v49 = vld [vmem:[#allocation2 + $0x40] sm:$0xff] }
 0x384   : > { %v6037_v37 = vadd.f32 %v5878_v32, %v5679_v5  ;;  %11558 = vmatprep.mubr.msk.f32.mxu1 %vm171_vm1, %v8384_v28  ;;  %5641 = vst.msk [vmem:[#allocation2 + $0xd0] sm:$0xff] %vm171_vm1, %v5609_v36  ;;  %v5254_v4 = vld [vmem:[#allocation2 + $0xe8] sm:$0xff]  ;;  %v14320_v59 = vpop.f32.mrb[198].mxu0  ;;  %v5690_v28 = vld [vmem:[#allocation2 + $0x58] sm:$0xff] }
 0x385   : > { %6070 = vst.msk [vmem:[#allocation2 + $0x8] sm:$0xff] %vm171_vm1, %v6038_v30  ;;  %v5612_v21 = vadd.f32 %v14260_v61, %v5254_v4  ;;  %v5253_v10 = vld [vmem:[#allocation2 + $0xe0] sm:$0xff]  ;;  %v14324_v17 = vpop.f32.mrb[199].mxu0 }
 0x386   : > { %6069 = vst.msk [vmem:[#allocation2] sm:$0xff] %vm171_vm1, %v6037_v37  ;;  %v11245_v11 = vpop.f32.mrb[162].mxu1  ;;  %v5611_v51 = vadd.f32 %v14264_v63, %v5253_v10  ;;  %v8392_v36 = vld [vmem:[#allocation3 + $0x122] sm:$0xff] }
 0x387   : > { %v6040_v45 = vadd.f32 %v11245_v11, %v5682_v1  ;;  %v5888_v40 = vpop.f32.mrb[163].mxu1  ;;  %11559 = vmatmul.mubr.msk.f32.gmra.mrb[12].mxu1 %vm171_vm1, %v8385_v29  ;;  %5644 = vst.msk [vmem:[#allocation2 + $0xe8] sm:$0xff] %vm171_vm1, %v5612_v21  ;;  %v8393_v21 = vld [vmem:[#allocation3 + $0x12a] sm:$0xff] }
 0x388   : > { %v6039_v34 = vadd.f32 %v5888_v40, %v5681_v3  ;;  %11561 = vmatprep.mubr.msk.f32.mxu1 %vm171_vm1, %v8386_v15  ;;  %5643 = vst.msk [vmem:[#allocation2 + $0xe0] sm:$0xff] %vm171_vm1, %v5611_v51  ;;  %v5256_v61 = vld [vmem:[#allocation2 + $0xf8] sm:$0xff]  ;;  %v14332_v8 = vpop.f32.mrb[200].mxu0  ;;  %v5689_v11 = vld [vmem:[#allocation2 + $0x50] sm:$0xff]  ;;  %v5692_v15 = vld [vmem:[#allocation2 + $0x68] sm:$0xff] }
 0x389   : > { %6072 = vst.msk [vmem:[#allocation2 + $0x18] sm:$0xff] %vm171_vm1, %v6040_v45  ;;  %v5614_v63 = vadd.f32 %v14272_v23, %v5256_v61  ;;  %v5255_v47 = vld [vmem:[#allocation2 + $0xf0] sm:$0xff]  ;;  %v14336_v55 = vpop.f32.mrb[201].mxu0  ;;  %v8394_v51 = vld [vmem:[#allocation3 + $0x13a] sm:$0xff] }
 0x38a   : > { %6071 = vst.msk [vmem:[#allocation2 + $0x10] sm:$0xff] %vm171_vm1, %v6039_v34  ;;  %v11248_v39 = vpop.f32.mrb[164].mxu1  ;;  %v5613_v60 = vadd.f32 %v14276_v27, %v5255_v47 }
 0x38b   : > { %v6042_v14 = vadd.f32 %v11248_v39, %v5684_v35  ;;  %v5898_v54 = vpop.f32.mrb[165].mxu1  ;;  %11562 = vmatmul.mubr.msk.f32.gmra.mrb[14].mxu1 %vm171_vm1, %v8387_v33  ;;  %5646 = vst.msk [vmem:[#allocation2 + $0xf8] sm:$0xff] %vm171_vm1, %v5614_v63  ;;  %v8395_v63 = vld [vmem:[#allocation3 + $0x142] sm:$0xff] }
 0x38c   : > { %v6041_v41 = vadd.f32 %v5898_v54, %v5683_v43  ;;  %11564 = vmatprep.mubr.msk.f32.mxu1 %vm171_vm1, %v8388_v31  ;;  %5645 = vst.msk [vmem:[#allocation2 + $0xf0] sm:$0xff] %vm171_vm1, %v5613_v60  ;;  %v6134_v23 = vld [vmem:[#allocation2 + $0x8] sm:$0xff]  ;;  %v14344_v38 = vpop.f32.mrb[202].mxu0  ;;  %v5691_v39 = vld [vmem:[#allocation2 + $0x60] sm:$0xff]  ;;  %v8396_v60 = vld [vmem:[#allocation3 + $0x152] sm:$0xff] }
 0x38d   : > { %6074 = vst.msk [vmem:[#allocation2 + $0x28] sm:$0xff] %vm171_vm1, %v6042_v14  ;;  %v6492_v27 = vadd.f32 %v14284_v56, %v6134_v23  ;;  %v6133_v0 = vld [vmem:[#allocation2] sm:$0xff]  ;;  %v14348_v58 = vpop.f32.mrb[203].mxu0  ;;  %v5694_v31 = vld [vmem:[#allocation2 + $0x78] sm:$0xff] }
 0x38e   : > { %6073 = vst.msk [vmem:[#allocation2 + $0x20] sm:$0xff] %vm171_vm1, %v6041_v41  ;;  %v11251_v50 = vpop.f32.mrb[166].mxu1  ;;  %v6491_v24 = vadd.f32 %v14288_v42, %v6133_v0 }
 0x38f   : > { %v6044_v48 = vadd.f32 %v11251_v50, %v5686_v26  ;;  %v5908_v9 = vpop.f32.mrb[167].mxu1  ;;  %11565 = vmatmul.mubr.msk.f32.gmra.mrb[16].mxu1 %vm171_vm1, %v8389_v2  ;;  %6524 = vst.msk [vmem:[#allocation2 + $0x8] sm:$0xff] %vm171_vm1, %v6492_v27  ;;  %v8397_v27 = vld [vmem:[#allocation3 + $0x15a] sm:$0xff]  ;;  %v5693_v50 = vld [vmem:[#allocation2 + $0x70] sm:$0xff] }
 0x390   : > { %v6043_v25 = vadd.f32 %v5908_v9, %v5685_v16  ;;  %11567 = vmatprep.mubr.msk.f32.mxu1 %vm171_vm1, %v8390_v62  ;;  %6523 = vst.msk [vmem:[#allocation2] sm:$0xff] %vm171_vm1, %v6491_v24  ;;  %v6136_v56 = vld [vmem:[#allocation2 + $0x18] sm:$0xff]  ;;  %v14356_v13 = vpop.f32.mrb[204].mxu0  ;;  %v8398_v24 = vld [vmem:[#allocation3 + $0x16a] sm:$0xff] }
 0x391   : > { %6076 = vst.msk [vmem:[#allocation2 + $0x38] sm:$0xff] %vm171_vm1, %v6044_v48  ;;  %v6494_v42 = vadd.f32 %v14296_v46, %v6136_v56  ;;  %v6135_v19 = vld [vmem:[#allocation2 + $0x10] sm:$0xff]  ;;  %v14360_v7 = vpop.f32.mrb[205].mxu0  ;;  %v5696_v62 = vld [vmem:[#allocation2 + $0x88] sm:$0xff] }
 0x392   : > { %6075 = vst.msk [vmem:[#allocation2 + $0x30] sm:$0xff] %vm171_vm1, %v6043_v25  ;;  %v11254_v44 = vpop.f32.mrb[168].mxu1  ;;  %v6493_v52 = vadd.f32 %v14300_v57, %v6135_v19 }
 0x393   : > { %v6046_v12 = vadd.f32 %v11254_v44, %v5688_v53  ;;  %v5918_v6 = vpop.f32.mrb[169].mxu1  ;;  %11568 = vmatmul.mubr.msk.f32.gmra.mrb[18].mxu1 %vm171_vm1, %v8391_v20  ;;  %6526 = vst.msk [vmem:[#allocation2 + $0x18] sm:$0xff] %vm171_vm1, %v6494_v42  ;;  %v8399_v42 = vld [vmem:[#allocation3 + $0x172] sm:$0xff]  ;;  %v5695_v44 = vld [vmem:[#allocation2 + $0x80] sm:$0xff] }
 0x394   : > { %v6045_v30 = vadd.f32 %v5918_v6, %v5687_v49  ;;  %11570 = vmatprep.mubr.msk.f32.mxu1 %vm171_vm1, %v8392_v36  ;;  %6525 = vst.msk [vmem:[#allocation2 + $0x10] sm:$0xff] %vm171_vm1, %v6493_v52  ;;  %v6138_v46 = vld [vmem:[#allocation2 + $0x28] sm:$0xff]  ;;  %v14368_v5 = vpop.f32.mrb[206].mxu0  ;;  %v5698_v36 = vld [vmem:[#allocation2 + $0x98] sm:$0xff] }
 0x395   : > { %6078 = vst.msk [vmem:[#allocation2 + $0x48] sm:$0xff] %vm171_vm1, %v6046_v12  ;;  %v6496_v57 = vadd.f32 %v14308_v22, %v6138_v46  ;;  %v6137_v32 = vld [vmem:[#allocation2 + $0x20] sm:$0xff]  ;;  %v14372_v4 = vpop.f32.mrb[207].mxu0 }
 0x396   : > { %6077 = vst.msk [vmem:[#allocation2 + $0x40] sm:$0xff] %vm171_vm1, %v6045_v30  ;;  %v11257_v37 = vpop.f32.mrb[170].mxu1  ;;  %v6495_v10 = vadd.f32 %v14312_v18, %v6137_v32  ;;  %v8400_v52 = vld [vmem:[#allocation3 + $0x182] sm:$0xff] }
 0x397   : > { %v6048_v1 = vadd.f32 %v11257_v37, %v5690_v28  ;;  %v5928_v29 = vpop.f32.mrb[171].mxu1  ;;  %11571 = vmatmul.mubr.msk.f32.gmra.mrb[20].mxu1 %vm171_vm1, %v8393_v21  ;;  %6528 = vst.msk [vmem:[#allocation2 + $0x28] sm:$0xff] %vm171_vm1, %v6496_v57  ;;  %v8401_v57 = vld [vmem:[#allocation3 + $0x18a] sm:$0xff] }
 0x398   : > { %v6047_v45 = vadd.f32 %v5928_v29, %v5689_v11  ;;  %11573 = vmatprep.mubr.msk.f32.mxu1 %vm171_vm1, %v8394_v51  ;;  %6527 = vst.msk [vmem:[#allocation2 + $0x20] sm:$0xff] %vm171_vm1, %v6495_v10  ;;  %v6140_v22 = vld [vmem:[#allocation2 + $0x38] sm:$0xff]  ;;  %v14380_v3 = vpop.f32.mrb[208].mxu0  ;;  %v5697_v37 = vld [vmem:[#allocation2 + $0x90] sm:$0xff]  ;;  %v5700_v51 = vld [vmem:[#allocation2 + $0xa8] sm:$0xff] }
 0x399   : > { %6080 = vst.msk [vmem:[#allocation2 + $0x58] sm:$0xff] %vm171_vm1, %v6048_v1  ;;  %v6498_v18 = vadd.f32 %v14320_v59, %v6140_v22  ;;  %v6139_v40 = vld [vmem:[#allocation2 + $0x30] sm:$0xff]  ;;  %v14384_v61 = vpop.f32.mrb[209].mxu0  ;;  %v8402_v10 = vld [vmem:[#allocation3 + $0x19a] sm:$0xff] }
 0x39a   : > { %6079 = vst.msk [vmem:[#allocation2 + $0x50] sm:$0xff] %vm171_vm1, %v6047_v45  ;;  %v11260_v34 = vpop.f32.mrb[172].mxu1  ;;  %v6497_v47 = vadd.f32 %v14324_v17, %v6139_v40 }
 0x39b   : > { %v6050_v35 = vadd.f32 %v11260_v34, %v5692_v15  ;;  %v5938_v33 = vpop.f32.mrb[173].mxu1  ;;  %11574 = vmatmul.mubr.msk.f32.gmra.mrb[22].mxu1 %vm171_vm1, %v8395_v63  ;;  %6530 = vst.msk [vmem:[#allocation2 + $0x38] sm:$0xff] %vm171_vm1, %v6498_v18  ;;  %v8403_v18 = vld [vmem:[#allocation3 + $0x1a2] sm:$0xff] }
 0x39c   : > { %v6049_v14 = vadd.f32 %v5938_v33, %v5691_v39  ;;  %11576 = vmatprep.mubr.msk.f32.mxu1 %vm171_vm1, %v8396_v60  ;;  %6529 = vst.msk [vmem:[#allocation2 + $0x30] sm:$0xff] %vm171_vm1, %v6497_v47  ;;  %v6142_v59 = vld [vmem:[#allocation2 + $0x48] sm:$0xff]  ;;  %v14392_v43 = vpop.f32.mrb[210].mxu0  ;;  %v5699_v34 = vld [vmem:[#allocation2 + $0xa0] sm:$0xff] }
 0x39d   : > { %6082 = vst.msk [vmem:[#allocation2 + $0x68] sm:$0xff] %vm171_vm1, %v6050_v35  ;;  %v6500_v17 = vadd.f32 %v14332_v8, %v6142_v59  ;;  %v6141_v54 = vld [vmem:[#allocation2 + $0x40] sm:$0xff]  ;;  %v14396_v23 = vpop.f32.mrb[211].mxu0 }
 0x39e   : > { %6081 = vst.msk [vmem:[#allocation2 + $0x60] sm:$0xff] %vm171_vm1, %v6049_v14  ;;  %v11263_v41 = vpop.f32.mrb[174].mxu1  ;;  %v6499_v0 = vadd.f32 %v14336_v55, %v6141_v54  ;;  %v5701_v54 = vld [vmem:[#allocation2 + $0xb0] sm:$0xff] }
 0x39f   : > { %v6052_v26 = vadd.f32 %v11263_v41, %v5694_v31  ;;  %v5948_v2 = vpop.f32.mrb[175].mxu1  ;;  %11577 = vmatmul.mubr.msk.f32.gmra.mrb[24].mxu1 %vm171_vm1, %v8397_v27  ;;  %6532 = vst.msk [vmem:[#allocation2 + $0x48] sm:$0xff] %vm171_vm1, %v6500_v17 }
 0x3a0   : > { %v6051_v48 = vadd.f32 %v5948_v2, %v5693_v50  ;;  %11579 = vmatprep.mubr.msk.f32.mxu1 %vm171_vm1, %v8398_v24  ;;  %6531 = vst.msk [vmem:[#allocation2 + $0x40] sm:$0xff] %vm171_vm1, %v6499_v0  ;;  %v6144_v8 = vld [vmem:[#allocation2 + $0x58] sm:$0xff]  ;;  %v14404_v16 = vpop.f32.mrb[212].mxu0  ;;  %v5704_v50 = vld [vmem:[#allocation2 + $0xc8] sm:$0xff] }
 0x3a1   : > { %6084 = vst.msk [vmem:[#allocation2 + $0x78] sm:$0xff] %vm171_vm1, %v6052_v26  ;;  %v6502_v55 = vadd.f32 %v14344_v38, %v6144_v8  ;;  %v6143_v9 = vld [vmem:[#allocation2 + $0x50] sm:$0xff]  ;;  %v14408_v56 = vpop.f32.mrb[213].mxu0  ;;  %v5703_v8 = vld [vmem:[#allocation2 + $0xc0] sm:$0xff] }
 0x3a2   : > { %6083 = vst.msk [vmem:[#allocation2 + $0x70] sm:$0xff] %vm171_vm1, %v6051_v48  ;;  %v11266_v25 = vpop.f32.mrb[176].mxu1  ;;  %v6501_v19 = vadd.f32 %v14348_v58, %v6143_v9 }
 0x3a3   : > { %v6054_v53 = vadd.f32 %v11266_v25, %v5696_v62  ;;  %v5958_v20 = vpop.f32.mrb[177].mxu1  ;;  %11580 = vmatmul.mubr.msk.f32.gmra.mrb[26].mxu1 %vm171_vm1, %v8399_v42  ;;  %6534 = vst.msk [vmem:[#allocation2 + $0x58] sm:$0xff] %vm171_vm1, %v6502_v55 }
 0x3a4   : > { %v6053_v12 = vadd.f32 %v5958_v20, %v5695_v44  ;;  %11582 = vmatprep.mubr.msk.f32.mxu1 %vm171_vm1, %v8400_v52  ;;  %6533 = vst.msk [vmem:[#allocation2 + $0x50] sm:$0xff] %vm171_vm1, %v6501_v19  ;;  %v6146_v38 = vld [vmem:[#allocation2 + $0x68] sm:$0xff]  ;;  %v14416_v49 = vpop.f32.mrb[214].mxu0  ;;  %v5706_v19 = vld [vmem:[#allocation2 + $0xd8] sm:$0xff]  ;;  %v5705_v52 = vld [vmem:[#allocation2 + $0xd0] sm:$0xff] }
 0x3a5   : > { %6086 = vst.msk [vmem:[#allocation2 + $0x88] sm:$0xff] %vm171_vm1, %v6054_v53  ;;  %v6504_v58 = vadd.f32 %v14356_v13, %v6146_v38  ;;  %v6145_v6 = vld [vmem:[#allocation2 + $0x60] sm:$0xff]  ;;  %v14420_v46 = vpop.f32.mrb[215].mxu0 }
 0x3a6   : > { %6085 = vst.msk [vmem:[#allocation2 + $0x80] sm:$0xff] %vm171_vm1, %v6053_v12  ;;  %v11269_v30 = vpop.f32.mrb[178].mxu1  ;;  %v6503_v32 = vadd.f32 %v14360_v7, %v6145_v6 }
 0x3a7   : > { %v6056_v28 = vadd.f32 %v11269_v30, %v5698_v36  ;;  %v5968_v21 = vpop.f32.mrb[179].mxu1  ;;  %11583 = vmatmul.mubr.msk.f32.gmra.mrb[28].mxu1 %vm171_vm1, %v8401_v57  ;;  %6536 = vst.msk [vmem:[#allocation2 + $0x68] sm:$0xff] %vm171_vm1, %v6504_v58  ;;  %v5708_v30 = vld [vmem:[#allocation2 + $0xe8] sm:$0xff] }
 0x3a8   : > { %v6055_v1 = vadd.f32 %v5968_v21, %v5697_v37  ;;  %11585 = vmatprep.mubr.msk.f32.mxu1 %vm171_vm1, %v8402_v10  ;;  %6535 = vst.msk [vmem:[#allocation2 + $0x60] sm:$0xff] %vm171_vm1, %v6503_v32  ;;  %v6148_v13 = vld [vmem:[#allocation2 + $0x78] sm:$0xff]  ;;  %v14428_v11 = vpop.f32.mrb[216].mxu0  ;;  %v5707_v37 = vld [vmem:[#allocation2 + $0xe0] sm:$0xff] }
 0x3a9   : > { %6088 = vst.msk [vmem:[#allocation2 + $0x98] sm:$0xff] %vm171_vm1, %v6056_v28  ;;  %v6506_v7 = vadd.f32 %v14368_v5, %v6148_v13  ;;  %v6147_v29 = vld [vmem:[#allocation2 + $0x70] sm:$0xff]  ;;  %v14432_v22 = vpop.f32.mrb[217].mxu0 }
 0x3aa   : > { %6087 = vst.msk [vmem:[#allocation2 + $0x90] sm:$0xff] %vm171_vm1, %v6055_v1  ;;  %v11272_v45 = vpop.f32.mrb[180].mxu1  ;;  %v6505_v40 = vadd.f32 %v14372_v4, %v6147_v29  ;;  %v5702_v4 = vld [vmem:[#allocation2 + $0xb8] sm:$0xff] }
 0x3ab   : > { %v6058_v15 = vadd.f32 %v11272_v45, %v5700_v51  ;;  %v5978_v63 = vpop.f32.mrb[181].mxu1  ;;  %11586 = vmatmul.mubr.msk.f32.gmra.mrb[30].mxu1 %vm171_vm1, %v8403_v18  ;;  %6538 = vst.msk [vmem:[#allocation2 + $0x78] sm:$0xff] %vm171_vm1, %v6506_v7  ;;  %v5710_v29 = vld [vmem:[#allocation2 + $0xf8] sm:$0xff] }
 0x3ac   : > { %v6057_v47 = vadd.f32 %v5978_v63, %v5699_v34  ;;  %6537 = vst.msk [vmem:[#allocation2 + $0x70] sm:$0xff] %vm171_vm1, %v6505_v40  ;;  %v6150_v5 = vld [vmem:[#allocation2 + $0x88] sm:$0xff]  ;;  %v14439_v35 = vpop.f32.mrb[218].mxu0  ;;  %v5709_v40 = vld [vmem:[#allocation2 + $0xf0] sm:$0xff] }
 0x3ad   : > { %6090 = vst.msk [vmem:[#allocation2 + $0xa8] sm:$0xff] %vm171_vm1, %v6058_v15  ;;  %v6508_v39 = vadd.f32 %v14380_v3, %v6150_v5  ;;  %v6149_v33 = vld [vmem:[#allocation2 + $0x80] sm:$0xff]  ;;  %v14443_v14 = vpop.f32.mrb[219].mxu0 }
 0x3ae   : > { %6089 = vst.msk [vmem:[#allocation2 + $0xa0] sm:$0xff] %vm171_vm1, %v6057_v47  ;;  %v11275_v60 = vpop.f32.mrb[182].mxu1  ;;  %v6507_v59 = vadd.f32 %v14384_v61, %v6149_v33 }
 0x3af   : > { %v6060_v17 = vadd.f32 %v11275_v60, %v5702_v4  ;;  %v5988_v31 = vpop.f32.mrb[183].mxu1  ;;  %6540 = vst.msk [vmem:[#allocation2 + $0x88] sm:$0xff] %vm171_vm1, %v6508_v39  ;;  %v6588_v39 = vld [vmem:[#allocation2 + $0x8] sm:$0xff] }
 0x3b0   : > { %v6059_v41 = vadd.f32 %v5988_v31, %v5701_v54  ;;  %6539 = vst.msk [vmem:[#allocation2 + $0x80] sm:$0xff] %vm171_vm1, %v6507_v59  ;;  %v6152_v27 = vld [vmem:[#allocation2 + $0x98] sm:$0xff]  ;;  %v14449_v3 = vpop.f32.mrb[220].mxu0  ;;  %v6587_v59 = vld [vmem:[#allocation2] sm:$0xff] }
 0x3b1   : > { %6092 = vst.msk [vmem:[#allocation2 + $0xb8] sm:$0xff] %vm171_vm1, %v6060_v17  ;;  %v6510_v0 = vadd.f32 %v14392_v43, %v6152_v27  ;;  %v6151_v26 = vld [vmem:[#allocation2 + $0x90] sm:$0xff]  ;;  %v14453_v2 = vpop.f32.mrb[221].mxu0 }
 0x3b2   : > { %6091 = vst.msk [vmem:[#allocation2 + $0xb0] sm:$0xff] %vm171_vm1, %v6059_v41  ;;  %v11278_v61 = vpop.f32.mrb[184].mxu1  ;;  %v6509_v24 = vadd.f32 %v14396_v23, %v6151_v26 }
 0x3b3   : > { %v6062_v48 = vadd.f32 %v11278_v61, %v5704_v50  ;;  %v5998_v55 = vpop.f32.mrb[185].mxu1  ;;  %6542 = vst.msk [vmem:[#allocation2 + $0x98] sm:$0xff] %vm171_vm1, %v6510_v0  ;;  %v6590_v0 = vld [vmem:[#allocation2 + $0x18] sm:$0xff] }
 0x3b4   : > { %v6061_v9 = vadd.f32 %v5998_v55, %v5703_v8  ;;  %6541 = vst.msk [vmem:[#allocation2 + $0x90] sm:$0xff] %vm171_vm1, %v6509_v24  ;;  %v6154_v62 = vld [vmem:[#allocation2 + $0xa8] sm:$0xff]  ;;  %v14459_v43 = vpop.f32.mrb[222].mxu0  ;;  %v6589_v24 = vld [vmem:[#allocation2 + $0x10] sm:$0xff] }
 0x3b5   : > { %6094 = vst.msk [vmem:[#allocation2 + $0xc8] sm:$0xff] %vm171_vm1, %v6062_v48  ;;  %v6512_v25 = vadd.f32 %v14404_v16, %v6154_v62  ;;  %v6153_v42 = vld [vmem:[#allocation2 + $0xa0] sm:$0xff]  ;;  %v14463_v53 = vpop.f32.mrb[223].mxu0 }
 0x3b6   : > { %6093 = vst.msk [vmem:[#allocation2 + $0xc0] sm:$0xff] %vm171_vm1, %v6061_v9  ;;  %v11281_v23 = vpop.f32.mrb[186].mxu1  ;;  %v6511_v44 = vadd.f32 %v14408_v56, %v6153_v42 }
 0x3b7   : > { %v6064_v20 = vadd.f32 %v11281_v23, %v5706_v19  ;;  %v6008_v12 = vpop.f32.mrb[187].mxu1  ;;  %6544 = vst.msk [vmem:[#allocation2 + $0xa8] sm:$0xff] %vm171_vm1, %v6512_v25  ;;  %v6592_v25 = vld [vmem:[#allocation2 + $0x28] sm:$0xff] }
 0x3b8   : > { %v6063_v38 = vadd.f32 %v6008_v12, %v5705_v52  ;;  %6543 = vst.msk [vmem:[#allocation2 + $0xa0] sm:$0xff] %vm171_vm1, %v6511_v44  ;;  %v6156_v58 = vld [vmem:[#allocation2 + $0xb8] sm:$0xff]  ;;  %v14469_v16 = vpop.f32.mrb[224].mxu0  ;;  %v6591_v44 = vld [vmem:[#allocation2 + $0x20] sm:$0xff] }
 0x3b9   : > { %6096 = vst.msk [vmem:[#allocation2 + $0xd8] sm:$0xff] %vm171_vm1, %v6064_v20  ;;  %v6514_v6 = vadd.f32 %v14416_v49, %v6156_v58  ;;  %v6155_v36 = vld [vmem:[#allocation2 + $0xb0] sm:$0xff]  ;;  %v14473_v57 = vpop.f32.mrb[225].mxu0 }
 0x3ba   : > { %6095 = vst.msk [vmem:[#allocation2 + $0xd0] sm:$0xff] %vm171_vm1, %v6063_v38  ;;  %v11284_v56 = vpop.f32.mrb[188].mxu1  ;;  %v6513_v32 = vadd.f32 %v14420_v46, %v6155_v36 }
 0x3bb   : > { %v6066_v28 = vadd.f32 %v11284_v56, %v5708_v30  ;;  %v6018_v21 = vpop.f32.mrb[189].mxu1  ;;  %6546 = vst.msk [vmem:[#allocation2 + $0xb8] sm:$0xff] %vm171_vm1, %v6514_v6  ;;  %v6594_v6 = vld [vmem:[#allocation2 + $0x38] sm:$0xff] }
 0x3bc   : > { %v6065_v10 = vadd.f32 %v6018_v21, %v5707_v37  ;;  %6545 = vst.msk [vmem:[#allocation2 + $0xb0] sm:$0xff] %vm171_vm1, %v6513_v32  ;;  %v6158_v1 = vld [vmem:[#allocation2 + $0xc8] sm:$0xff]  ;;  %v14479_v49 = vpop.f32.mrb[226].mxu0  ;;  %v6593_v32 = vld [vmem:[#allocation2 + $0x30] sm:$0xff] }
 0x3bd   : > { %6098 = vst.msk [vmem:[#allocation2 + $0xe8] sm:$0xff] %vm171_vm1, %v6066_v28  ;;  %v6516_v13 = vadd.f32 %v14428_v11, %v6158_v1  ;;  %v6157_v7 = vld [vmem:[#allocation2 + $0xc0] sm:$0xff]  ;;  %v14483_v51 = vpop.f32.mrb[227].mxu0 }
 0x3be   : > { %6097 = vst.msk [vmem:[#allocation2 + $0xe0] sm:$0xff] %vm171_vm1, %v6065_v10  ;;  %v11287_v46 = vpop.f32.mrb[190].mxu1  ;;  %v6515_v45 = vadd.f32 %v14432_v22, %v6157_v7 }
 0x3bf   : > { %v6068_v18 = vadd.f32 %v11287_v46, %v5710_v29  ;;  %v6028_v15 = vpop.f32.mrb[191].mxu1  ;;  %6548 = vst.msk [vmem:[#allocation2 + $0xc8] sm:$0xff] %vm171_vm1, %v6516_v13  ;;  %v6596_v13 = vld [vmem:[#allocation2 + $0x48] sm:$0xff] }
 0x3c0   : > { %v6067_v34 = vadd.f32 %v6028_v15, %v5709_v40  ;;  %6547 = vst.msk [vmem:[#allocation2 + $0xc0] sm:$0xff] %vm171_vm1, %v6515_v45  ;;  %v6160_v63 = vld [vmem:[#allocation2 + $0xd8] sm:$0xff]  ;;  %v14489_v11 = vpop.f32.mrb[228].mxu0  ;;  %v6595_v45 = vld [vmem:[#allocation2 + $0x40] sm:$0xff] }
 0x3c1   : > { %6100 = vst.msk [vmem:[#allocation2 + $0xf8] sm:$0xff] %vm171_vm1, %v6068_v18  ;;  %v6518_v47 = vadd.f32 %v14439_v35, %v6160_v63  ;;  %v6159_v5 = vld [vmem:[#allocation2 + $0xd0] sm:$0xff]  ;;  %v14493_v33 = vpop.f32.mrb[229].mxu0 }
 0x3c2   : > { %6099 = vst.msk [vmem:[#allocation2 + $0xf0] sm:$0xff] %vm171_vm1, %v6067_v34  ;;  %v11342_v22 = vpop.f32.mrb[192].mxu1  ;;  %v6517_v4 = vadd.f32 %v14443_v14, %v6159_v5 }
 0x3c3   : > { %v6946_v60 = vadd.f32 %v11342_v22, %v6588_v39  ;;  %v6786_v17 = vpop.f32.mrb[193].mxu1  ;;  %6550 = vst.msk [vmem:[#allocation2 + $0xd8] sm:$0xff] %vm171_vm1, %v6518_v47  ;;  %v6598_v47 = vld [vmem:[#allocation2 + $0x58] sm:$0xff] }
 0x3c4   : > { %v6945_v54 = vadd.f32 %v6786_v17, %v6587_v59  ;;  %6549 = vst.msk [vmem:[#allocation2 + $0xd0] sm:$0xff] %vm171_vm1, %v6517_v4  ;;  %v6162_v31 = vld [vmem:[#allocation2 + $0xe8] sm:$0xff]  ;;  %v14499_v35 = vpop.f32.mrb[230].mxu0  ;;  %v6597_v4 = vld [vmem:[#allocation2 + $0x50] sm:$0xff] }
 0x3c5   : > { %6978 = vst.msk [vmem:[#allocation2 + $0x8] sm:$0xff] %vm171_vm1, %v6946_v60  ;;  %v6520_v41 = vadd.f32 %v14449_v3, %v6162_v31  ;;  %v6161_v27 = vld [vmem:[#allocation2 + $0xe0] sm:$0xff]  ;;  %v14503_v26 = vpop.f32.mrb[231].mxu0 }
 0x3c6   : > { %6977 = vst.msk [vmem:[#allocation2] sm:$0xff] %vm171_vm1, %v6945_v54  ;;  %v11345_v14 = vpop.f32.mrb[194].mxu1  ;;  %v6519_v50 = vadd.f32 %v14453_v2, %v6161_v27 }
 0x3c7   : > { %v6948_v61 = vadd.f32 %v11345_v14, %v6590_v0  ;;  %v6796_v48 = vpop.f32.mrb[195].mxu1  ;;  %6552 = vst.msk [vmem:[#allocation2 + $0xe8] sm:$0xff] %vm171_vm1, %v6520_v41  ;;  %v6600_v41 = vld [vmem:[#allocation2 + $0x68] sm:$0xff] }
 0x3c8   : > { %v6947_v8 = vadd.f32 %v6796_v48, %v6589_v24  ;;  %6551 = vst.msk [vmem:[#allocation2 + $0xe0] sm:$0xff] %vm171_vm1, %v6519_v50  ;;  %v6164_v55 = vld [vmem:[#allocation2 + $0xf8] sm:$0xff]  ;;  %v14509_v3 = vpop.f32.mrb[232].mxu0  ;;  %v6599_v50 = vld [vmem:[#allocation2 + $0x60] sm:$0xff] }
 0x3c9   : > { %6980 = vst.msk [vmem:[#allocation2 + $0x18] sm:$0xff] %vm171_vm1, %v6948_v61  ;;  %v6522_v9 = vadd.f32 %v14459_v43, %v6164_v55  ;;  %v6163_v62 = vld [vmem:[#allocation2 + $0xf0] sm:$0xff]  ;;  %v14513_v42 = vpop.f32.mrb[233].mxu0 }
 0x3ca   : > { %6979 = vst.msk [vmem:[#allocation2 + $0x10] sm:$0xff] %vm171_vm1, %v6947_v8  ;;  %v11348_v2 = vpop.f32.mrb[196].mxu1  ;;  %v6521_v19 = vadd.f32 %v14463_v53, %v6163_v62 }
 0x3cb   : > { %v6950_v23 = vadd.f32 %v11348_v2, %v6592_v25  ;;  %v6806_v20 = vpop.f32.mrb[197].mxu1  ;;  %6554 = vst.msk [vmem:[#allocation2 + $0xf8] sm:$0xff] %vm171_vm1, %v6522_v9  ;;  %v6602_v9 = vld [vmem:[#allocation2 + $0x78] sm:$0xff] }
 0x3cc   : > { %v6949_v52 = vadd.f32 %v6806_v20, %v6591_v44  ;;  %6553 = vst.msk [vmem:[#allocation2 + $0xf0] sm:$0xff] %vm171_vm1, %v6521_v19  ;;  %v7042_v12 = vld [vmem:[#allocation2 + $0x8] sm:$0xff]  ;;  %v14519_v43 = vpop.f32.mrb[234].mxu0  ;;  %v6601_v19 = vld [vmem:[#allocation2 + $0x70] sm:$0xff] }
 0x3cd   : > { %6982 = vst.msk [vmem:[#allocation2 + $0x28] sm:$0xff] %vm171_vm1, %v6950_v23  ;;  %v7400_v38 = vadd.f32 %v14469_v16, %v7042_v12  ;;  %v7041_v58 = vld [vmem:[#allocation2] sm:$0xff]  ;;  %v14523_v36 = vpop.f32.mrb[235].mxu0 }
 0x3ce   : > { %6981 = vst.msk [vmem:[#allocation2 + $0x20] sm:$0xff] %vm171_vm1, %v6949_v52  ;;  %v11351_v53 = vpop.f32.mrb[198].mxu1  ;;  %v7399_v30 = vadd.f32 %v14473_v57, %v7041_v58 }
 0x3cf   : > { %v6952_v56 = vadd.f32 %v11351_v53, %v6594_v6  ;;  %v6816_v28 = vpop.f32.mrb[199].mxu1  ;;  %7432 = vst.msk [vmem:[#allocation2 + $0x8] sm:$0xff] %vm171_vm1, %v7400_v38  ;;  %v6604_v38 = vld [vmem:[#allocation2 + $0x88] sm:$0xff] }
 0x3d0   : > { %v6951_v37 = vadd.f32 %v6816_v28, %v6593_v32  ;;  %7431 = vst.msk [vmem:[#allocation2] sm:$0xff] %vm171_vm1, %v7399_v30  ;;  %v7044_v21 = vld [vmem:[#allocation2 + $0x18] sm:$0xff]  ;;  %v14529_v16 = vpop.f32.mrb[236].mxu0  ;;  %v6603_v30 = vld [vmem:[#allocation2 + $0x80] sm:$0xff] }
 0x3d1   : > { %6984 = vst.msk [vmem:[#allocation2 + $0x38] sm:$0xff] %vm171_vm1, %v6952_v56  ;;  %v7402_v10 = vadd.f32 %v14479_v49, %v7044_v21  ;;  %v7043_v1 = vld [vmem:[#allocation2 + $0x10] sm:$0xff]  ;;  %v14533_v7 = vpop.f32.mrb[237].mxu0 }
 0x3d2   : > { %6983 = vst.msk [vmem:[#allocation2 + $0x30] sm:$0xff] %vm171_vm1, %v6951_v37  ;;  %v11354_v57 = vpop.f32.mrb[200].mxu1  ;;  %v7401_v29 = vadd.f32 %v14483_v51, %v7043_v1 }
 0x3d3   : > { %v6954_v46 = vadd.f32 %v11354_v57, %v6596_v13  ;;  %v6826_v18 = vpop.f32.mrb[201].mxu1  ;;  %7434 = vst.msk [vmem:[#allocation2 + $0x18] sm:$0xff] %vm171_vm1, %v7402_v10  ;;  %v6606_v10 = vld [vmem:[#allocation2 + $0x98] sm:$0xff] }
 0x3d4   : > { %v6953_v40 = vadd.f32 %v6826_v18, %v6595_v45  ;;  %7433 = vst.msk [vmem:[#allocation2 + $0x10] sm:$0xff] %vm171_vm1, %v7401_v29  ;;  %v7046_v15 = vld [vmem:[#allocation2 + $0x28] sm:$0xff]  ;;  %v14539_v49 = vpop.f32.mrb[238].mxu0  ;;  %v6605_v29 = vld [vmem:[#allocation2 + $0x90] sm:$0xff] }
 0x3d5   : > { %6986 = vst.msk [vmem:[#allocation2 + $0x48] sm:$0xff] %vm171_vm1, %v6954_v46  ;;  %v7404_v34 = vadd.f32 %v14489_v11, %v7046_v15  ;;  %v7045_v63 = vld [vmem:[#allocation2 + $0x20] sm:$0xff]  ;;  %v14543_v5 = vpop.f32.mrb[239].mxu0 }
 0x3d6   : > { %6985 = vst.msk [vmem:[#allocation2 + $0x40] sm:$0xff] %vm171_vm1, %v6953_v40  ;;  %v11357_v51 = vpop.f32.mrb[202].mxu1  ;;  %v7403_v39 = vadd.f32 %v14493_v33, %v7045_v63 }
 0x3d7   : > { %v6956_v22 = vadd.f32 %v11357_v51, %v6598_v47  ;;  %v6836_v60 = vpop.f32.mrb[203].mxu1  ;;  %7436 = vst.msk [vmem:[#allocation2 + $0x28] sm:$0xff] %vm171_vm1, %v7404_v34  ;;  %v6608_v34 = vld [vmem:[#allocation2 + $0xa8] sm:$0xff] }
 0x3d8   : > { %v6955_v59 = vadd.f32 %v6836_v60, %v6597_v4  ;;  %7435 = vst.msk [vmem:[#allocation2 + $0x20] sm:$0xff] %vm171_vm1, %v7403_v39  ;;  %v7048_v17 = vld [vmem:[#allocation2 + $0x38] sm:$0xff]  ;;  %v14549_v11 = vpop.f32.mrb[240].mxu0  ;;  %v6607_v39 = vld [vmem:[#allocation2 + $0xa0] sm:$0xff] }
 0x3d9   : > { %6988 = vst.msk [vmem:[#allocation2 + $0x58] sm:$0xff] %vm171_vm1, %v6956_v22  ;;  %v7406_v54 = vadd.f32 %v14499_v35, %v7048_v17  ;;  %v7047_v31 = vld [vmem:[#allocation2 + $0x30] sm:$0xff]  ;;  %v14553_v27 = vpop.f32.mrb[241].mxu0 }
 0x3da   : > { %6987 = vst.msk [vmem:[#allocation2 + $0x50] sm:$0xff] %vm171_vm1, %v6955_v59  ;;  %v11360_v33 = vpop.f32.mrb[204].mxu1  ;;  %v7405_v0 = vadd.f32 %v14503_v26, %v7047_v31 }
 0x3db   : > { %v6958_v14 = vadd.f32 %v11360_v33, %v6600_v41  ;;  %v6846_v61 = vpop.f32.mrb[205].mxu1  ;;  %7438 = vst.msk [vmem:[#allocation2 + $0x38] sm:$0xff] %vm171_vm1, %v7406_v54  ;;  %v6610_v54 = vld [vmem:[#allocation2 + $0xb8] sm:$0xff] }
 0x3dc   : > { %v6957_v24 = vadd.f32 %v6846_v61, %v6599_v50  ;;  %7437 = vst.msk [vmem:[#allocation2 + $0x30] sm:$0xff] %vm171_vm1, %v7405_v0  ;;  %v7050_v48 = vld [vmem:[#allocation2 + $0x48] sm:$0xff]  ;;  %v14559_v35 = vpop.f32.mrb[242].mxu0  ;;  %v6609_v0 = vld [vmem:[#allocation2 + $0xb0] sm:$0xff] }
 0x3dd   : > { %6990 = vst.msk [vmem:[#allocation2 + $0x68] sm:$0xff] %vm171_vm1, %v6958_v14  ;;  %v7408_v8 = vadd.f32 %v14509_v3, %v7050_v48  ;;  %v7049_v55 = vld [vmem:[#allocation2 + $0x40] sm:$0xff]  ;;  %v14563_v62 = vpop.f32.mrb[243].mxu0 }
 0x3de   : > { %6989 = vst.msk [vmem:[#allocation2 + $0x60] sm:$0xff] %vm171_vm1, %v6957_v24  ;;  %v11363_v26 = vpop.f32.mrb[206].mxu1  ;;  %v7407_v25 = vadd.f32 %v14513_v42, %v7049_v55 }
 0x3df   : > { %v6960_v2 = vadd.f32 %v11363_v26, %v6602_v9  ;;  %v6856_v23 = vpop.f32.mrb[207].mxu1  ;;  %7440 = vst.msk [vmem:[#allocation2 + $0x48] sm:$0xff] %vm171_vm1, %v7408_v8  ;;  %v6612_v8 = vld [vmem:[#allocation2 + $0xc8] sm:$0xff] }
 0x3e0   : > { %v6959_v44 = vadd.f32 %v6856_v23, %v6601_v19  ;;  %7439 = vst.msk [vmem:[#allocation2 + $0x40] sm:$0xff] %vm171_vm1, %v7407_v25  ;;  %v7052_v20 = vld [vmem:[#allocation2 + $0x58] sm:$0xff]  ;;  %v14569_v3 = vpop.f32.mrb[244].mxu0  ;;  %v6611_v25 = vld [vmem:[#allocation2 + $0xc0] sm:$0xff] }
 0x3e1   : > { %6992 = vst.msk [vmem:[#allocation2 + $0x78] sm:$0xff] %vm171_vm1, %v6960_v2  ;;  %v7410_v52 = vadd.f32 %v14519_v43, %v7052_v20  ;;  %v7051_v12 = vld [vmem:[#allocation2 + $0x50] sm:$0xff]  ;;  %v14573_v58 = vpop.f32.mrb[245].mxu0 }
 0x3e2   : > { %6991 = vst.msk [vmem:[#allocation2 + $0x70] sm:$0xff] %vm171_vm1, %v6959_v44  ;;  %v11366_v42 = vpop.f32.mrb[208].mxu1  ;;  %v7409_v6 = vadd.f32 %v14523_v36, %v7051_v12 }
 0x3e3   : > { %v6962_v53 = vadd.f32 %v11366_v42, %v6604_v38  ;;  %v6866_v56 = vpop.f32.mrb[209].mxu1  ;;  %7442 = vst.msk [vmem:[#allocation2 + $0x58] sm:$0xff] %vm171_vm1, %v7410_v52  ;;  %v6614_v52 = vld [vmem:[#allocation2 + $0xd8] sm:$0xff] }
 0x3e4   : > { %v6961_v32 = vadd.f32 %v6866_v56, %v6603_v30  ;;  %7441 = vst.msk [vmem:[#allocation2 + $0x50] sm:$0xff] %vm171_vm1, %v7409_v6  ;;  %v7054_v28 = vld [vmem:[#allocation2 + $0x68] sm:$0xff]  ;;  %v14579_v43 = vpop.f32.mrb[246].mxu0  ;;  %v6613_v6 = vld [vmem:[#allocation2 + $0xd0] sm:$0xff] }
 0x3e5   : > { %6994 = vst.msk [vmem:[#allocation2 + $0x88] sm:$0xff] %vm171_vm1, %v6962_v53  ;;  %v7412_v37 = vadd.f32 %v14529_v16, %v7054_v28  ;;  %v7053_v21 = vld [vmem:[#allocation2 + $0x60] sm:$0xff]  ;;  %v14583_v1 = vpop.f32.mrb[247].mxu0 }
 0x3e6   : > { %6993 = vst.msk [vmem:[#allocation2 + $0x80] sm:$0xff] %vm171_vm1, %v6961_v32  ;;  %v11369_v36 = vpop.f32.mrb[210].mxu1  ;;  %v7411_v13 = vadd.f32 %v14533_v7, %v7053_v21 }
 0x3e7   : > { %v6964_v57 = vadd.f32 %v11369_v36, %v6606_v10  ;;  %v6876_v46 = vpop.f32.mrb[211].mxu1  ;;  %7444 = vst.msk [vmem:[#allocation2 + $0x68] sm:$0xff] %vm171_vm1, %v7412_v37  ;;  %v6616_v37 = vld [vmem:[#allocation2 + $0xe8] sm:$0xff] }
 0x3e8   : > { %v6963_v45 = vadd.f32 %v6876_v46, %v6605_v29  ;;  %7443 = vst.msk [vmem:[#allocation2 + $0x60] sm:$0xff] %vm171_vm1, %v7411_v13  ;;  %v7056_v18 = vld [vmem:[#allocation2 + $0x78] sm:$0xff]  ;;  %v14589_v16 = vpop.f32.mrb[248].mxu0  ;;  %v6615_v13 = vld [vmem:[#allocation2 + $0xe0] sm:$0xff] }
 0x3e9   : > { %6996 = vst.msk [vmem:[#allocation2 + $0x98] sm:$0xff] %vm171_vm1, %v6964_v57  ;;  %v7414_v40 = vadd.f32 %v14539_v49, %v7056_v18  ;;  %v7055_v15 = vld [vmem:[#allocation2 + $0x70] sm:$0xff]  ;;  %v14593_v63 = vpop.f32.mrb[249].mxu0 }
 0x3ea   : > { %6995 = vst.msk [vmem:[#allocation2 + $0x90] sm:$0xff] %vm171_vm1, %v6963_v45  ;;  %v11372_v7 = vpop.f32.mrb[212].mxu1  ;;  %v7413_v47 = vadd.f32 %v14543_v5, %v7055_v15 }
 0x3eb   : > { %v6966_v51 = vadd.f32 %v11372_v7, %v6608_v34  ;;  %v6886_v22 = vpop.f32.mrb[213].mxu1  ;;  %7446 = vst.msk [vmem:[#allocation2 + $0x78] sm:$0xff] %vm171_vm1, %v7414_v40  ;;  %v6618_v40 = vld [vmem:[#allocation2 + $0xf8] sm:$0xff] }
 0x3ec   : > { %v6965_v4 = vadd.f32 %v6886_v22, %v6607_v39  ;;  %7445 = vst.msk [vmem:[#allocation2 + $0x70] sm:$0xff] %vm171_vm1, %v7413_v47  ;;  %v7058_v60 = vld [vmem:[#allocation2 + $0x88] sm:$0xff]  ;;  %v14599_v49 = vpop.f32.mrb[250].mxu0  ;;  %v6617_v47 = vld [vmem:[#allocation2 + $0xf0] sm:$0xff] }
 0x3ed   : > { %6998 = vst.msk [vmem:[#allocation2 + $0xa8] sm:$0xff] %vm171_vm1, %v6966_v51  ;;  %v7416_v59 = vadd.f32 %v14549_v11, %v7058_v60  ;;  %v7057_v17 = vld [vmem:[#allocation2 + $0x80] sm:$0xff]  ;;  %v14603_v31 = vpop.f32.mrb[251].mxu0 }
 0x3ee   : > { %6997 = vst.msk [vmem:[#allocation2 + $0xa0] sm:$0xff] %vm171_vm1, %v6965_v4  ;;  %v11375_v5 = vpop.f32.mrb[214].mxu1  ;;  %v7415_v41 = vadd.f32 %v14553_v27, %v7057_v17 }
 0x3ef   : > { %v6968_v33 = vadd.f32 %v11375_v5, %v6610_v54  ;;  %v6896_v14 = vpop.f32.mrb[215].mxu1  ;;  %7448 = vst.msk [vmem:[#allocation2 + $0x88] sm:$0xff] %vm171_vm1, %v7416_v59  ;;  %v7497_v59 = vld [vmem:[#allocation2 + $0x8] sm:$0xff] }
 0x3f0   : > { %v6967_v50 = vadd.f32 %v6896_v14, %v6609_v0  ;;  %7447 = vst.msk [vmem:[#allocation2 + $0x80] sm:$0xff] %vm171_vm1, %v7415_v41  ;;  %v7060_v61 = vld [vmem:[#allocation2 + $0x98] sm:$0xff]  ;;  %v14609_v11 = vpop.f32.mrb[252].mxu0  ;;  %v7496_v41 = vld [vmem:[#allocation2] sm:$0xff] }
 0x3f1   : > { %7000 = vst.msk [vmem:[#allocation2 + $0xb8] sm:$0xff] %vm171_vm1, %v6968_v33  ;;  %v7418_v24 = vadd.f32 %v14559_v35, %v7060_v61  ;;  %v7059_v48 = vld [vmem:[#allocation2 + $0x90] sm:$0xff]  ;;  %v14613_v55 = vpop.f32.mrb[253].mxu0 }
 0x3f2   : > { %6999 = vst.msk [vmem:[#allocation2 + $0xb0] sm:$0xff] %vm171_vm1, %v6967_v50  ;;  %v11378_v27 = vpop.f32.mrb[216].mxu1  ;;  %v7417_v9 = vadd.f32 %v14563_v62, %v7059_v48 }
 0x3f3   : > { %v6970_v26 = vadd.f32 %v11378_v27, %v6612_v8  ;;  %v6906_v2 = vpop.f32.mrb[217].mxu1  ;;  %7450 = vst.msk [vmem:[#allocation2 + $0x98] sm:$0xff] %vm171_vm1, %v7418_v24  ;;  %v7499_v24 = vld [vmem:[#allocation2 + $0x18] sm:$0xff] }
 0x3f4   : > { %v6969_v19 = vadd.f32 %v6906_v2, %v6611_v25  ;;  %7449 = vst.msk [vmem:[#allocation2 + $0x90] sm:$0xff] %vm171_vm1, %v7417_v9  ;;  %v7062_v23 = vld [vmem:[#allocation2 + $0xa8] sm:$0xff]  ;;  %v14619_v35 = vpop.f32.mrb[254].mxu0  ;;  %v7498_v9 = vld [vmem:[#allocation2 + $0x10] sm:$0xff] }
 0x3f5   : > { %7002 = vst.msk [vmem:[#allocation2 + $0xc8] sm:$0xff] %vm171_vm1, %v6970_v26  ;;  %v7420_v44 = vadd.f32 %v14569_v3, %v7062_v23  ;;  %v7061_v20 = vld [vmem:[#allocation2 + $0xa0] sm:$0xff]  ;;  %v14623_v12 = vpop.f32.mrb[255].mxu0 }
 0x3f6   : > { %7001 = vst.msk [vmem:[#allocation2 + $0xc0] sm:$0xff] %vm171_vm1, %v6969_v19  ;;  %v11381_v62 = vpop.f32.mrb[218].mxu1  ;;  %v7419_v38 = vadd.f32 %v14573_v58, %v7061_v20 }
 0x3f7   : > { %v6972_v42 = vadd.f32 %v11381_v62, %v6614_v52  ;;  %v6916_v53 = vpop.f32.mrb[219].mxu1  ;;  %7452 = vst.msk [vmem:[#allocation2 + $0xa8] sm:$0xff] %vm171_vm1, %v7420_v44  ;;  %v7501_v44 = vld [vmem:[#allocation2 + $0x28] sm:$0xff] }
 0x3f8   : > { %v6971_v30 = vadd.f32 %v6916_v53, %v6613_v6  ;;  %7451 = vst.msk [vmem:[#allocation2 + $0xa0] sm:$0xff] %vm171_vm1, %v7419_v38  ;;  %v7064_v56 = vld [vmem:[#allocation2 + $0xb8] sm:$0xff]  ;;  %v14629_v3 = vpop.f32.mrb[0].mxu0  ;;  %v7500_v38 = vld [vmem:[#allocation2 + $0x20] sm:$0xff] }
 0x3f9   : > { %7004 = vst.msk [vmem:[#allocation2 + $0xd8] sm:$0xff] %vm171_vm1, %v6972_v42  ;;  %v7422_v32 = vadd.f32 %v14579_v43, %v7064_v56  ;;  %v7063_v28 = vld [vmem:[#allocation2 + $0xb0] sm:$0xff]  ;;  %v14633_v21 = vpop.f32.mrb[1].mxu0 }
 0x3fa   : > { %7003 = vst.msk [vmem:[#allocation2 + $0xd0] sm:$0xff] %vm171_vm1, %v6971_v30  ;;  %v11384_v58 = vpop.f32.mrb[220].mxu1  ;;  %v7421_v10 = vadd.f32 %v14583_v1, %v7063_v28 }
 0x3fb   : > { %v6974_v36 = vadd.f32 %v11384_v58, %v6616_v37  ;;  %v6926_v57 = vpop.f32.mrb[221].mxu1  ;;  %7454 = vst.msk [vmem:[#allocation2 + $0xb8] sm:$0xff] %vm171_vm1, %v7422_v32  ;;  %v7503_v32 = vld [vmem:[#allocation2 + $0x38] sm:$0xff] }
 0x3fc   : > { %v6973_v29 = vadd.f32 %v6926_v57, %v6615_v13  ;;  %7453 = vst.msk [vmem:[#allocation2 + $0xb0] sm:$0xff] %vm171_vm1, %v7421_v10  ;;  %v7066_v46 = vld [vmem:[#allocation2 + $0xc8] sm:$0xff]  ;;  %v14639_v43 = vpop.f32.mrb[2].mxu0  ;;  %v7502_v10 = vld [vmem:[#allocation2 + $0x30] sm:$0xff] }
 0x3fd   : > { %7006 = vst.msk [vmem:[#allocation2 + $0xe8] sm:$0xff] %vm171_vm1, %v6974_v36  ;;  %v7424_v45 = vadd.f32 %v14589_v16, %v7066_v46  ;;  %v7065_v18 = vld [vmem:[#allocation2 + $0xc0] sm:$0xff]  ;;  %v14643_v15 = vpop.f32.mrb[3].mxu0 }
 0x3fe   : > { %7005 = vst.msk [vmem:[#allocation2 + $0xe0] sm:$0xff] %vm171_vm1, %v6973_v29  ;;  %v11387_v1 = vpop.f32.mrb[222].mxu1  ;;  %v7423_v34 = vadd.f32 %v14593_v63, %v7065_v18 }
 0x3ff   : > { %v6976_v7 = vadd.f32 %v11387_v1, %v6618_v40  ;;  %v6936_v51 = vpop.f32.mrb[223].mxu1  ;;  %7456 = vst.msk [vmem:[#allocation2 + $0xc8] sm:$0xff] %vm171_vm1, %v7424_v45  ;;  %v7505_v45 = vld [vmem:[#allocation2 + $0x48] sm:$0xff] }
 0x400   : > { %v6975_v39 = vadd.f32 %v6936_v51, %v6617_v47  ;;  %7455 = vst.msk [vmem:[#allocation2 + $0xc0] sm:$0xff] %vm171_vm1, %v7423_v34  ;;  %v7068_v22 = vld [vmem:[#allocation2 + $0xd8] sm:$0xff]  ;;  %v14649_v16 = vpop.f32.mrb[4].mxu0  ;;  %v7504_v34 = vld [vmem:[#allocation2 + $0x40] sm:$0xff] }
 0x401   : > { %7008 = vst.msk [vmem:[#allocation2 + $0xf8] sm:$0xff] %vm171_vm1, %v6976_v7  ;;  %v7426_v4 = vadd.f32 %v14599_v49, %v7068_v22  ;;  %v7067_v60 = vld [vmem:[#allocation2 + $0xd0] sm:$0xff]  ;;  %v14653_v17 = vpop.f32.mrb[5].mxu0 }
 0x402   : > { %7007 = vst.msk [vmem:[#allocation2 + $0xf0] sm:$0xff] %vm171_vm1, %v6975_v39  ;;  %v11442_v63 = vpop.f32.mrb[224].mxu1  ;;  %v7425_v54 = vadd.f32 %v14603_v31, %v7067_v60 }
 0x403   : > { %v7855_v5 = vadd.f32 %v11442_v63, %v7497_v59  ;;  %v7695_v33 = vpop.f32.mrb[225].mxu1  ;;  %7458 = vst.msk [vmem:[#allocation2 + $0xd8] sm:$0xff] %vm171_vm1, %v7426_v4  ;;  %v7507_v4 = vld [vmem:[#allocation2 + $0x58] sm:$0xff] }
 0x404   : > { %v7854_v0 = vadd.f32 %v7695_v33, %v7496_v41  ;;  %7457 = vst.msk [vmem:[#allocation2 + $0xd0] sm:$0xff] %vm171_vm1, %v7425_v54  ;;  %v7070_v14 = vld [vmem:[#allocation2 + $0xe8] sm:$0xff]  ;;  %v14659_v49 = vpop.f32.mrb[6].mxu0  ;;  %v7506_v54 = vld [vmem:[#allocation2 + $0x50] sm:$0xff] }
 0x405   : > { %7887 = vst.msk [vmem:[#allocation2 + $0x8] sm:$0xff] %vm171_vm1, %v7855_v5  ;;  %v7428_v50 = vadd.f32 %v14609_v11, %v7070_v14  ;;  %v7069_v61 = vld [vmem:[#allocation2 + $0xe0] sm:$0xff]  ;;  %v14663_v48 = vpop.f32.mrb[7].mxu0 }
 0x406   : > { %7886 = vst.msk [vmem:[#allocation2] sm:$0xff] %vm171_vm1, %v7854_v0  ;;  %v11445_v31 = vpop.f32.mrb[226].mxu1  ;;  %v7427_v8 = vadd.f32 %v14613_v55, %v7069_v61 }
 0x407   : > { %v7857_v27 = vadd.f32 %v11445_v31, %v7499_v24  ;;  %v7705_v26 = vpop.f32.mrb[227].mxu1  ;;  %7460 = vst.msk [vmem:[#allocation2 + $0xe8] sm:$0xff] %vm171_vm1, %v7428_v50  ;;  %v7509_v50 = vld [vmem:[#allocation2 + $0x68] sm:$0xff] }
 0x408   : > { %v7856_v25 = vadd.f32 %v7705_v26, %v7498_v9  ;;  %7459 = vst.msk [vmem:[#allocation2 + $0xe0] sm:$0xff] %vm171_vm1, %v7427_v8  ;;  %v7072_v2 = vld [vmem:[#allocation2 + $0xf8] sm:$0xff]  ;;  %v14669_v11 = vpop.f32.mrb[8].mxu0  ;;  %v7508_v8 = vld [vmem:[#allocation2 + $0x60] sm:$0xff] }
 0x409   : > { %7889 = vst.msk [vmem:[#allocation2 + $0x18] sm:$0xff] %vm171_vm1, %v7857_v27  ;;  %v7430_v19 = vadd.f32 %v14619_v35, %v7072_v2  ;;  %v7071_v23 = vld [vmem:[#allocation2 + $0xf0] sm:$0xff]  ;;  %v14673_v20 = vpop.f32.mrb[9].mxu0 }
 0x40a   : > { %7888 = vst.msk [vmem:[#allocation2 + $0x10] sm:$0xff] %vm171_vm1, %v7856_v25  ;;  %v11448_v55 = vpop.f32.mrb[228].mxu1  ;;  %v7429_v52 = vadd.f32 %v14623_v12, %v7071_v23 }
 0x40b   : > { %v7859_v62 = vadd.f32 %v11448_v55, %v7501_v44  ;;  %v7715_v42 = vpop.f32.mrb[229].mxu1  ;;  %7462 = vst.msk [vmem:[#allocation2 + $0xf8] sm:$0xff] %vm171_vm1, %v7430_v19  ;;  %v7511_v19 = vld [vmem:[#allocation2 + $0x78] sm:$0xff] }
 0x40c   : > { %v7858_v6 = vadd.f32 %v7715_v42, %v7500_v38  ;;  %7461 = vst.msk [vmem:[#allocation2 + $0xf0] sm:$0xff] %vm171_vm1, %v7429_v52  ;;  %v7951_v53 = vld [vmem:[#allocation2 + $0x8] sm:$0xff]  ;;  %v14679_v35 = vpop.f32.mrb[10].mxu0  ;;  %v7510_v52 = vld [vmem:[#allocation2 + $0x70] sm:$0xff] }
 0x40d   : > { %7891 = vst.msk [vmem:[#allocation2 + $0x28] sm:$0xff] %vm171_vm1, %v7859_v62  ;;  %v8309_v30 = vadd.f32 %v14629_v3, %v7951_v53  ;;  %v7950_v56 = vld [vmem:[#allocation2] sm:$0xff]  ;;  %v14683_v28 = vpop.f32.mrb[11].mxu0 }
 0x40e   : > { %7890 = vst.msk [vmem:[#allocation2 + $0x20] sm:$0xff] %vm171_vm1, %v7858_v6  ;;  %v11451_v12 = vpop.f32.mrb[230].mxu1  ;;  %v8308_v37 = vadd.f32 %v14633_v21, %v7950_v56 }
 0x40f   : > { %v7861_v58 = vadd.f32 %v11451_v12, %v7503_v32  ;;  %v7725_v36 = vpop.f32.mrb[231].mxu1  ;;  %8341 = vst.msk [vmem:[#allocation2 + $0x8] sm:$0xff] %vm171_vm1, %v8309_v30  ;;  %v7513_v30 = vld [vmem:[#allocation2 + $0x88] sm:$0xff] }
 0x410   : > { %v7860_v13 = vadd.f32 %v7725_v36, %v7502_v10  ;;  %8340 = vst.msk [vmem:[#allocation2] sm:$0xff] %vm171_vm1, %v8308_v37  ;;  %v7953_v57 = vld [vmem:[#allocation2 + $0x18] sm:$0xff]  ;;  %v14689_v3 = vpop.f32.mrb[12].mxu0  ;;  %v7512_v37 = vld [vmem:[#allocation2 + $0x80] sm:$0xff] }
 0x411   : > { %7893 = vst.msk [vmem:[#allocation2 + $0x38] sm:$0xff] %vm171_vm1, %v7861_v58  ;;  %v8311_v29 = vadd.f32 %v14639_v43, %v7953_v57  ;;  %v7952_v46 = vld [vmem:[#allocation2 + $0x10] sm:$0xff]  ;;  %v14693_v18 = vpop.f32.mrb[13].mxu0 }
 0x412   : > { %7892 = vst.msk [vmem:[#allocation2 + $0x30] sm:$0xff] %vm171_vm1, %v7860_v13  ;;  %v11454_v21 = vpop.f32.mrb[232].mxu1  ;;  %v8310_v40 = vadd.f32 %v14643_v15, %v7952_v46 }
 0x413   : > { %v7863_v1 = vadd.f32 %v11454_v21, %v7505_v45  ;;  %v7735_v7 = vpop.f32.mrb[233].mxu1  ;;  %8343 = vst.msk [vmem:[#allocation2 + $0x18] sm:$0xff] %vm171_vm1, %v8311_v29  ;;  %v7515_v29 = vld [vmem:[#allocation2 + $0x98] sm:$0xff] }
 0x414   : > { %v7862_v47 = vadd.f32 %v7735_v7, %v7504_v34  ;;  %8342 = vst.msk [vmem:[#allocation2 + $0x10] sm:$0xff] %vm171_vm1, %v8310_v40  ;;  %v7955_v51 = vld [vmem:[#allocation2 + $0x28] sm:$0xff]  ;;  %v14699_v43 = vpop.f32.mrb[14].mxu0  ;;  %v7514_v40 = vld [vmem:[#allocation2 + $0x90] sm:$0xff] }
 0x415   : > { %7895 = vst.msk [vmem:[#allocation2 + $0x48] sm:$0xff] %vm171_vm1, %v7863_v1  ;;  %v8313_v39 = vadd.f32 %v14649_v16, %v7955_v51  ;;  %v7954_v22 = vld [vmem:[#allocation2 + $0x20] sm:$0xff]  ;;  %v14703_v60 = vpop.f32.mrb[15].mxu0 }
 0x416   : > { %7894 = vst.msk [vmem:[#allocation2 + $0x40] sm:$0xff] %vm171_vm1, %v7862_v47  ;;  %v11457_v15 = vpop.f32.mrb[234].mxu1  ;;  %v8312_v59 = vadd.f32 %v14653_v17, %v7954_v22 }
 0x417   : > { %v7865_v63 = vadd.f32 %v11457_v15, %v7507_v4  ;;  %v7745_v5 = vpop.f32.mrb[235].mxu1  ;;  %8345 = vst.msk [vmem:[#allocation2 + $0x28] sm:$0xff] %vm171_vm1, %v8313_v39  ;;  %v7517_v39 = vld [vmem:[#allocation2 + $0xa8] sm:$0xff] }
 0x418   : > { %v7864_v41 = vadd.f32 %v7745_v5, %v7506_v54  ;;  %8344 = vst.msk [vmem:[#allocation2 + $0x20] sm:$0xff] %vm171_vm1, %v8312_v59  ;;  %v7957_v33 = vld [vmem:[#allocation2 + $0x38] sm:$0xff]  ;;  %v14709_v16 = vpop.f32.mrb[16].mxu0  ;;  %v7516_v59 = vld [vmem:[#allocation2 + $0xa0] sm:$0xff] }
 0x419   : > { %7897 = vst.msk [vmem:[#allocation2 + $0x58] sm:$0xff] %vm171_vm1, %v7865_v63  ;;  %v8315_v0 = vadd.f32 %v14659_v49, %v7957_v33  ;;  %v7956_v14 = vld [vmem:[#allocation2 + $0x30] sm:$0xff]  ;;  %v14713_v61 = vpop.f32.mrb[17].mxu0 }
 0x41a   : > { %7896 = vst.msk [vmem:[#allocation2 + $0x50] sm:$0xff] %vm171_vm1, %v7864_v41  ;;  %v11460_v17 = vpop.f32.mrb[236].mxu1  ;;  %v8314_v24 = vadd.f32 %v14663_v48, %v7956_v14 }
 0x41b   : > { %v7867_v31 = vadd.f32 %v11460_v17, %v7509_v50  ;;  %v7755_v27 = vpop.f32.mrb[237].mxu1  ;;  %8347 = vst.msk [vmem:[#allocation2 + $0x38] sm:$0xff] %vm171_vm1, %v8315_v0  ;;  %v7519_v0 = vld [vmem:[#allocation2 + $0xb8] sm:$0xff] }
 0x41c   : > { %v7866_v9 = vadd.f32 %v7755_v27, %v7508_v8  ;;  %8346 = vst.msk [vmem:[#allocation2 + $0x30] sm:$0xff] %vm171_vm1, %v8314_v24  ;;  %v7959_v26 = vld [vmem:[#allocation2 + $0x48] sm:$0xff]  ;;  %v14719_v49 = vpop.f32.mrb[18].mxu0  ;;  %v7518_v24 = vld [vmem:[#allocation2 + $0xb0] sm:$0xff] }
 0x41d   : > { %7899 = vst.msk [vmem:[#allocation2 + $0x68] sm:$0xff] %vm171_vm1, %v7867_v31  ;;  %v8317_v25 = vadd.f32 %v14669_v11, %v7959_v26  ;;  %v7958_v2 = vld [vmem:[#allocation2 + $0x40] sm:$0xff]  ;;  %v14723_v23 = vpop.f32.mrb[19].mxu0 }
 0x41e   : > { %7898 = vst.msk [vmem:[#allocation2 + $0x60] sm:$0xff] %vm171_vm1, %v7866_v9  ;;  %v11463_v48 = vpop.f32.mrb[238].mxu1  ;;  %v8316_v44 = vadd.f32 %v14673_v20, %v7958_v2 }
 0x41f   : > { %v7869_v55 = vadd.f32 %v11463_v48, %v7511_v19  ;;  %v7765_v62 = vpop.f32.mrb[239].mxu1  ;;  %8349 = vst.msk [vmem:[#allocation2 + $0x48] sm:$0xff] %vm171_vm1, %v8317_v25  ;;  %v7521_v25 = vld [vmem:[#allocation2 + $0xc8] sm:$0xff] }
 0x420   : > { %v7868_v38 = vadd.f32 %v7765_v62, %v7510_v52  ;;  %8348 = vst.msk [vmem:[#allocation2 + $0x40] sm:$0xff] %vm171_vm1, %v8316_v44  ;;  %v7961_v42 = vld [vmem:[#allocation2 + $0x58] sm:$0xff]  ;;  %v14729_v11 = vpop.f32.mrb[20].mxu0  ;;  %v7520_v44 = vld [vmem:[#allocation2 + $0xc0] sm:$0xff] }
 0x421   : > { %7901 = vst.msk [vmem:[#allocation2 + $0x78] sm:$0xff] %vm171_vm1, %v7869_v55  ;;  %v8319_v6 = vadd.f32 %v14679_v35, %v7961_v42  ;;  %v7960_v53 = vld [vmem:[#allocation2 + $0x50] sm:$0xff]  ;;  %v14733_v56 = vpop.f32.mrb[21].mxu0 }
 0x422   : > { %7900 = vst.msk [vmem:[#allocation2 + $0x70] sm:$0xff] %vm171_vm1, %v7868_v38  ;;  %v11466_v20 = vpop.f32.mrb[240].mxu1  ;;  %v8318_v32 = vadd.f32 %v14683_v28, %v7960_v53 }
 0x423   : > { %v7871_v12 = vadd.f32 %v11466_v20, %v7513_v30  ;;  %v7775_v58 = vpop.f32.mrb[241].mxu1  ;;  %8351 = vst.msk [vmem:[#allocation2 + $0x58] sm:$0xff] %vm171_vm1, %v8319_v6  ;;  %v7523_v6 = vld [vmem:[#allocation2 + $0xd8] sm:$0xff] }
 0x424   : > { %v7870_v10 = vadd.f32 %v7775_v58, %v7512_v37  ;;  %8350 = vst.msk [vmem:[#allocation2 + $0x50] sm:$0xff] %vm171_vm1, %v8318_v32  ;;  %v7963_v36 = vld [vmem:[#allocation2 + $0x68] sm:$0xff]  ;;  %v14739_v35 = vpop.f32.mrb[22].mxu0  ;;  %v7522_v32 = vld [vmem:[#allocation2 + $0xd0] sm:$0xff] }
 0x425   : > { %7903 = vst.msk [vmem:[#allocation2 + $0x88] sm:$0xff] %vm171_vm1, %v7871_v12  ;;  %v8321_v13 = vadd.f32 %v14689_v3, %v7963_v36  ;;  %v7962_v57 = vld [vmem:[#allocation2 + $0x60] sm:$0xff]  ;;  %v14743_v46 = vpop.f32.mrb[23].mxu0  ;;  %v7525_v36 = vld [vmem:[#allocation2 + $0xe8] sm:$0xff] }
 0x426   : > { %7902 = vst.msk [vmem:[#allocation2 + $0x80] sm:$0xff] %vm171_vm1, %v7870_v10  ;;  %v11469_v28 = vpop.f32.mrb[242].mxu1  ;;  %v8320_v45 = vadd.f32 %v14693_v18, %v7962_v57 }
 0x427   : > { %v7873_v21 = vadd.f32 %v11469_v28, %v7515_v29  ;;  %v7785_v1 = vpop.f32.mrb[243].mxu1  ;;  %8353 = vst.msk [vmem:[#allocation2 + $0x68] sm:$0xff] %vm171_vm1, %v8321_v13  ;;  %v7524_v29 = vld [vmem:[#allocation2 + $0xe0] sm:$0xff] }
 0x428   : > { %v7872_v34 = vadd.f32 %v7785_v1, %v7514_v40  ;;  %8352 = vst.msk [vmem:[#allocation2 + $0x60] sm:$0xff] %vm171_vm1, %v8320_v45  ;;  %v7965_v7 = vld [vmem:[#allocation2 + $0x78] sm:$0xff]  ;;  %v14749_v3 = vpop.f32.mrb[24].mxu0 }
 0x429   : > { %7905 = vst.msk [vmem:[#allocation2 + $0x98] sm:$0xff] %vm171_vm1, %v7873_v21  ;;  %v8323_v47 = vadd.f32 %v14699_v43, %v7965_v7  ;;  %v7964_v51 = vld [vmem:[#allocation2 + $0x70] sm:$0xff]  ;;  %v14753_v22 = vpop.f32.mrb[25].mxu0  ;;  %v7527_v1 = vld [vmem:[#allocation2 + $0xf8] sm:$0xff] }
 0x42a   : > { %7904 = vst.msk [vmem:[#allocation2 + $0x90] sm:$0xff] %vm171_vm1, %v7872_v34  ;;  %v11472_v18 = vpop.f32.mrb[244].mxu1  ;;  %v8322_v4 = vadd.f32 %v14703_v60, %v7964_v51 }
 0x42b   : > { %v7875_v15 = vadd.f32 %v11472_v18, %v7517_v39  ;;  %v7795_v63 = vpop.f32.mrb[245].mxu1  ;;  %8355 = vst.msk [vmem:[#allocation2 + $0x78] sm:$0xff] %vm171_vm1, %v8323_v47  ;;  %v7526_v47 = vld [vmem:[#allocation2 + $0xf0] sm:$0xff] }
 0x42c   : > { %v7874_v54 = vadd.f32 %v7795_v63, %v7516_v59  ;;  %8354 = vst.msk [vmem:[#allocation2 + $0x70] sm:$0xff] %vm171_vm1, %v8322_v4  ;;  %v7967_v5 = vld [vmem:[#allocation2 + $0x88] sm:$0xff]  ;;  %v14759_v43 = vpop.f32.mrb[26].mxu0 }
 0x42d   : > { %7907 = vst.msk [vmem:[#allocation2 + $0xa8] sm:$0xff] %vm171_vm1, %v7875_v15  ;;  %v8325_v41 = vadd.f32 %v14709_v16, %v7967_v5  ;;  %v7966_v33 = vld [vmem:[#allocation2 + $0x80] sm:$0xff]  ;;  %v14763_v14 = vpop.f32.mrb[27].mxu0  ;;  %v8405_v15 = vld [vmem:[#allocation2 + $0x8] sm:$0xff] }
 0x42e   : > { %7906 = vst.msk [vmem:[#allocation2 + $0xa0] sm:$0xff] %vm171_vm1, %v7874_v54  ;;  %v11475_v60 = vpop.f32.mrb[246].mxu1  ;;  %v8324_v50 = vadd.f32 %v14713_v61, %v7966_v33  ;;  %v8404_v54 = vld [vmem:[#allocation2] sm:$0xff] }
 0x42f   : > { %v7877_v17 = vadd.f32 %v11475_v60, %v7519_v0  ;;  %v7805_v31 = vpop.f32.mrb[247].mxu1  ;;  %8357 = vst.msk [vmem:[#allocation2 + $0x88] sm:$0xff] %vm171_vm1, %v8325_v41  ;;  %v8407_v60 = vld [vmem:[#allocation2 + $0x18] sm:$0xff] }
 0x430   : > { %v7876_v8 = vadd.f32 %v7805_v31, %v7518_v24  ;;  %8356 = vst.msk [vmem:[#allocation2 + $0x80] sm:$0xff] %vm171_vm1, %v8324_v50  ;;  %v7969_v27 = vld [vmem:[#allocation2 + $0x98] sm:$0xff]  ;;  %v14769_v16 = vpop.f32.mrb[28].mxu0  ;;  %v8406_v24 = vld [vmem:[#allocation2 + $0x10] sm:$0xff] }
 0x431   : > { %7909 = vst.msk [vmem:[#allocation2 + $0xb8] sm:$0xff] %vm171_vm1, %v7877_v17  ;;  %v8327_v9 = vadd.f32 %v14719_v49, %v7969_v27  ;;  %v7968_v26 = vld [vmem:[#allocation2 + $0x90] sm:$0xff]  ;;  %v14773_v2 = vpop.f32.mrb[29].mxu0 }
 0x432   : > { %7908 = vst.msk [vmem:[#allocation2 + $0xb0] sm:$0xff] %vm171_vm1, %v7876_v8  ;;  %v11478_v61 = vpop.f32.mrb[248].mxu1  ;;  %v8326_v19 = vadd.f32 %v14723_v23, %v7968_v26  ;;  %v8409_v26 = vld [vmem:[#allocation2 + $0x28] sm:$0xff] }
 0x433   : > { %v7879_v48 = vadd.f32 %v11478_v61, %v7521_v25  ;;  %v7815_v55 = vpop.f32.mrb[249].mxu1  ;;  %8359 = vst.msk [vmem:[#allocation2 + $0x98] sm:$0xff] %vm171_vm1, %v8327_v9 }
 0x434   : > { %v7878_v52 = vadd.f32 %v7815_v55, %v7520_v44  ;;  %8358 = vst.msk [vmem:[#allocation2 + $0x90] sm:$0xff] %vm171_vm1, %v8326_v19  ;;  %v7971_v62 = vld [vmem:[#allocation2 + $0xa8] sm:$0xff]  ;;  %v14779_v49 = vpop.f32.mrb[30].mxu0  ;;  %v8408_v19 = vld [vmem:[#allocation2 + $0x20] sm:$0xff] }
 0x435   : > { %7911 = vst.msk [vmem:[#allocation2 + $0xc8] sm:$0xff] %vm171_vm1, %v7879_v48  ;;  %v8329_v38 = vadd.f32 %v14729_v11, %v7971_v62  ;;  %v7970_v42 = vld [vmem:[#allocation2 + $0xa0] sm:$0xff]  ;;  %v14783_v53 = vpop.f32.mrb[31].mxu0 }
 0x436   : > { %7910 = vst.msk [vmem:[#allocation2 + $0xc0] sm:$0xff] %vm171_vm1, %v7878_v52  ;;  %v11481_v23 = vpop.f32.mrb[250].mxu1  ;;  %v8328_v30 = vadd.f32 %v14733_v56, %v7970_v42 }
 0x437   : > { %v7881_v20 = vadd.f32 %v11481_v23, %v7523_v6  ;;  %v7825_v12 = vpop.f32.mrb[251].mxu1  ;;  %8361 = vst.msk [vmem:[#allocation2 + $0xa8] sm:$0xff] %vm171_vm1, %v8329_v38  ;;  %v8411_v6 = vld [vmem:[#allocation2 + $0x38] sm:$0xff] }
 0x438   : > { %v7880_v37 = vadd.f32 %v7825_v12, %v7522_v32  ;;  %8360 = vst.msk [vmem:[#allocation2 + $0xa0] sm:$0xff] %vm171_vm1, %v8328_v30  ;;  %v7973_v58 = vld [vmem:[#allocation2 + $0xb8] sm:$0xff]  ;;  %v8410_v30 = vld [vmem:[#allocation2 + $0x30] sm:$0xff] }
 0x439   : > { %7913 = vst.msk [vmem:[#allocation2 + $0xd8] sm:$0xff] %vm171_vm1, %v7881_v20  ;;  %v8331_v11 = vadd.f32 %v14739_v35, %v7973_v58  ;;  %v7972_v10 = vld [vmem:[#allocation2 + $0xb0] sm:$0xff] }
 0x43a   : > { %7912 = vst.msk [vmem:[#allocation2 + $0xd0] sm:$0xff] %vm171_vm1, %v7880_v37  ;;  %v11484_v13 = vpop.f32.mrb[252].mxu1  ;;  %v8330_v56 = vadd.f32 %v14743_v46, %v7972_v10 }
 0x43b   : > { %v7883_v57 = vadd.f32 %v11484_v13, %v7525_v36  ;;  %v7835_v28 = vpop.f32.mrb[253].mxu1  ;;  %8363 = vst.msk [vmem:[#allocation2 + $0xb8] sm:$0xff] %vm171_vm1, %v8331_v11 }
 0x43c   : > { %v7882_v45 = vadd.f32 %v7835_v28, %v7524_v29  ;;  %8362 = vst.msk [vmem:[#allocation2 + $0xb0] sm:$0xff] %vm171_vm1, %v8330_v56  ;;  %v7975_v21 = vld [vmem:[#allocation2 + $0xc8] sm:$0xff] }
 0x43d   : > { %7915 = vst.msk [vmem:[#allocation2 + $0xe8] sm:$0xff] %vm171_vm1, %v7883_v57  ;;  %v8333_v35 = vadd.f32 %v14749_v3, %v7975_v21  ;;  %v7974_v40 = vld [vmem:[#allocation2 + $0xc0] sm:$0xff]  ;;  %v8413_v57 = vld [vmem:[#allocation2 + $0x48] sm:$0xff] }
 0x43e   : > { %7914 = vst.msk [vmem:[#allocation2 + $0xe0] sm:$0xff] %vm171_vm1, %v7882_v45  ;;  %v11487_v34 = vpop.f32.mrb[254].mxu1  ;;  %v8332_v46 = vadd.f32 %v14753_v22, %v7974_v40 }
 0x43f   : > { %v7885_v7 = vadd.f32 %v11487_v34, %v7527_v1  ;;  %v7845_v51 = vpop.f32.mrb[255].mxu1  ;;  %8365 = vst.msk [vmem:[#allocation2 + $0xc8] sm:$0xff] %vm171_vm1, %v8333_v35  ;;  %v8412_v35 = vld [vmem:[#allocation2 + $0x40] sm:$0xff] }
 0x440   : > { %v7884_v39 = vadd.f32 %v7845_v51, %v7526_v47  ;;  %8364 = vst.msk [vmem:[#allocation2 + $0xc0] sm:$0xff] %vm171_vm1, %v8332_v46  ;;  %v7977_v18 = vld [vmem:[#allocation2 + $0xd8] sm:$0xff] }
 0x441   : > { %7917 = vst.msk [vmem:[#allocation2 + $0xf8] sm:$0xff] %vm171_vm1, %v7885_v7  ;;  %v8335_v3 = vadd.f32 %v14759_v43, %v7977_v18  ;;  %v7976_v4 = vld [vmem:[#allocation2 + $0xd0] sm:$0xff] }
 0x442   : > { %7916 = vst.msk [vmem:[#allocation2 + $0xf0] sm:$0xff] %vm171_vm1, %v7884_v39  ;;  %v11542_v59 = vpop.f32.mrb[0].mxu1  ;;  %v8334_v22 = vadd.f32 %v14763_v14, %v7976_v4 }
 0x443   : > { %v8763_v63 = vadd.f32 %v11542_v59, %v8405_v15  ;;  %v8603_v5 = vpop.f32.mrb[1].mxu1  ;;  %8367 = vst.msk [vmem:[#allocation2 + $0xd8] sm:$0xff] %vm171_vm1, %v8335_v3  ;;  %v8415_v59 = vld [vmem:[#allocation2 + $0x58] sm:$0xff] }
 0x444   : > { %v8762_v41 = vadd.f32 %v8603_v5, %v8404_v54  ;;  %8366 = vst.msk [vmem:[#allocation2 + $0xd0] sm:$0xff] %vm171_vm1, %v8334_v22  ;;  %v7979_v33 = vld [vmem:[#allocation2 + $0xe8] sm:$0xff] }
 0x445   : > { %8795 = vst.msk [vmem:[#allocation2 + $0x8] sm:$0xff] %vm171_vm1, %v8763_v63  ;;  %v8337_v43 = vadd.f32 %v14769_v16, %v7979_v33  ;;  %v7978_v0 = vld [vmem:[#allocation2 + $0xe0] sm:$0xff] }
 0x446   : > { %8794 = vst.msk [vmem:[#allocation2] sm:$0xff] %vm171_vm1, %v8762_v41  ;;  %v11545_v50 = vpop.f32.mrb[2].mxu1  ;;  %v8336_v14 = vadd.f32 %v14773_v2, %v7978_v0  ;;  %v8414_v41 = vld [vmem:[#allocation2 + $0x50] sm:$0xff] }
 0x447   : > { %v8765_v17 = vadd.f32 %v11545_v50, %v8407_v60  ;;  %v8613_v31 = vpop.f32.mrb[3].mxu1  ;;  %8369 = vst.msk [vmem:[#allocation2 + $0xe8] sm:$0xff] %vm171_vm1, %v8337_v43 }
 0x448   : > { %v8764_v8 = vadd.f32 %v8613_v31, %v8406_v24  ;;  %8368 = vst.msk [vmem:[#allocation2 + $0xe0] sm:$0xff] %vm171_vm1, %v8336_v14  ;;  %v7981_v27 = vld [vmem:[#allocation2 + $0xf8] sm:$0xff] }
 0x449   : > { %8797 = vst.msk [vmem:[#allocation2 + $0x18] sm:$0xff] %vm171_vm1, %v8765_v17  ;;  %v8339_v16 = vadd.f32 %v14779_v49, %v7981_v27  ;;  %v7980_v9 = vld [vmem:[#allocation2 + $0xf0] sm:$0xff] }
 0x44a   : > { %8796 = vst.msk [vmem:[#allocation2 + $0x10] sm:$0xff] %vm171_vm1, %v8764_v8  ;;  %v11548_v25 = vpop.f32.mrb[4].mxu1  ;;  %v8338_v61 = vadd.f32 %v14783_v53, %v7980_v9  ;;  %v8417_v9 = vld [vmem:[#allocation2 + $0x68] sm:$0xff] }
 0x44b   : > { %v8767_v2 = vadd.f32 %v11548_v25, %v8409_v26  ;;  %v8623_v48 = vpop.f32.mrb[5].mxu1  ;;  %8371 = vst.msk [vmem:[#allocation2 + $0xf8] sm:$0xff] %vm171_vm1, %v8339_v16 }
 0x44c   : > { %v14817_v44 = vld [vmem:[#allocation2 + $0x8] sm:$0xff]  ;;  %v8766_v55 = vadd.f32 %v8623_v48, %v8408_v19  ;;  %8370 = vst.msk [vmem:[#allocation2 + $0xf0] sm:$0xff] %vm171_vm1, %v8338_v61  ;;  %v8416_v19 = vld [vmem:[#allocation2 + $0x60] sm:$0xff] }
 0x44d   : > { %v8929_v52 = vmul.f32 %v14817_v44, %v14817_v44  ;;  %v14822_v62 = vld [vmem:[#allocation2] sm:$0xff]  ;;  %8799 = vst.msk [vmem:[#allocation2 + $0x28] sm:$0xff] %vm171_vm1, %v8767_v2  ;;  %v8859_v49 = vsel %vm171_vm1, %v14817_v44, 0.0 }
 0x44e   : > { %v8858_v38 = vsel %vm171_vm1, %v14822_v62, 0.0  ;;  %v8928_v42 = vmul.f32 %v14822_v62, %v14822_v62  ;;  %8798 = vst.msk [vmem:[#allocation2 + $0x20] sm:$0xff] %vm171_vm1, %v8766_v55  ;;  %v11551_v23 = vpop.f32.mrb[6].mxu1 }
 0x44f   : > { %v8769_v53 = vadd.f32 %v11551_v23, %v8411_v6  ;;  %v8633_v20 = vpop.f32.mrb[7].mxu1  ;;  %v8961_v32 = vsel %vm171_vm1, %v8929_v52, 0.0  ;;  %v8860_v11 = vadd.f32 %v8859_v49, %v8858_v38 }
 0x450   : > { %v8960_v12 = vsel %vm171_vm1, %v8928_v42, 0.0  ;;  %v14834_v37 = vld [vmem:[#allocation2 + $0x18] sm:$0xff]  ;;  %v8768_v58 = vadd.f32 %v8633_v20, %v8410_v30 }
 0x451   : > { %v14836_v10 = vld [vmem:[#allocation2 + $0x10] sm:$0xff]  ;;  %8801 = vst.msk [vmem:[#allocation2 + $0x38] sm:$0xff] %vm171_vm1, %v8769_v53  ;;  %v8931_v36 = vmul.f32 %v14834_v37, %v14834_v37  ;;  %v8962_v28 = vadd.f32 %v8961_v32, %v8960_v12  ;;  %v8863_v1 = vsel %vm171_vm1, %v14834_v37, 0.0  ;;  %v8419_v12 = vld [vmem:[#allocation2 + $0x78] sm:$0xff] }
 0x452   : > { %v8861_v13 = vsel %vm171_vm1, %v14836_v10, 0.0  ;;  %v8930_v56 = vmul.f32 %v14836_v10, %v14836_v10  ;;  %8800 = vst.msk [vmem:[#allocation2 + $0x30] sm:$0xff] %vm171_vm1, %v8768_v58  ;;  %v11554_v29 = vpop.f32.mrb[8].mxu1 }
 0x453   : > { %v8862_v45 = vadd.f32 %v8861_v13, %v8860_v11  ;;  %v8771_v21 = vadd.f32 %v11554_v29, %v8413_v57  ;;  %v8643_v40 = vpop.f32.mrb[9].mxu1  ;;  %v8965_v18 = vsel %vm171_vm1, %v8931_v36, 0.0 }
 0x454   : > { %v8963_v34 = vsel %vm171_vm1, %v8930_v56, 0.0  ;;  %v14849_v46 = vld [vmem:[#allocation2 + $0x28] sm:$0xff]  ;;  %v8770_v7 = vadd.f32 %v8643_v40, %v8412_v35  ;;  %v8418_v56 = vld [vmem:[#allocation2 + $0x70] sm:$0xff] }
 0x455   : > { %v8964_v47 = vadd.f32 %v8963_v34, %v8962_v28  ;;  %v14851_v51 = vld [vmem:[#allocation2 + $0x20] sm:$0xff]  ;;  %v8864_v39 = vadd.f32 %v8863_v1, %v8862_v45  ;;  %8803 = vst.msk [vmem:[#allocation2 + $0x48] sm:$0xff] %vm171_vm1, %v8771_v21  ;;  %v8933_v3 = vmul.f32 %v14849_v46, %v14849_v46  ;;  %v8867_v43 = vsel %vm171_vm1, %v14849_v46, 0.0 }
 0x456   : > { %v8865_v4 = vsel %vm171_vm1, %v14851_v51, 0.0  ;;  %v8932_v15 = vmul.f32 %v14851_v51, %v14851_v51  ;;  %8802 = vst.msk [vmem:[#allocation2 + $0x40] sm:$0xff] %vm171_vm1, %v8770_v7  ;;  %v11557_v22 = vpop.f32.mrb[10].mxu1 }
 0x457   : > { %v8866_v63 = vadd.f32 %v8865_v4, %v8864_v39  ;;  %v8966_v54 = vadd.f32 %v8965_v18, %v8964_v47  ;;  %v8773_v5 = vadd.f32 %v11557_v22, %v8415_v59  ;;  %v8653_v33 = vpop.f32.mrb[11].mxu1  ;;  %v8969_v31 = vsel %vm171_vm1, %v8933_v3, 0.0  ;;  %v8421_v18 = vld [vmem:[#allocation2 + $0x88] sm:$0xff]  ;;  %v8420_v22 = vld [vmem:[#allocation2 + $0x80] sm:$0xff] }
 0x458   : > { %v8967_v0 = vsel %vm171_vm1, %v8932_v15, 0.0  ;;  %v14865_v60 = vld [vmem:[#allocation2 + $0x38] sm:$0xff]  ;;  %v8772_v50 = vadd.f32 %v8653_v33, %v8414_v41 }
 0x459   : > { %v8968_v14 = vadd.f32 %v8967_v0, %v8966_v54  ;;  %v14867_v17 = vld [vmem:[#allocation2 + $0x30] sm:$0xff]  ;;  %v8868_v24 = vadd.f32 %v8867_v43, %v8866_v63  ;;  %8805 = vst.msk [vmem:[#allocation2 + $0x58] sm:$0xff] %vm171_vm1, %v8773_v5  ;;  %v8935_v8 = vmul.f32 %v14865_v60, %v14865_v60  ;;  %v8871_v55 = vsel %vm171_vm1, %v14865_v60, 0.0 }
 0x45a   : > { %v8869_v27 = vsel %vm171_vm1, %v14867_v17, 0.0  ;;  %v8934_v16 = vmul.f32 %v14867_v17, %v14867_v17  ;;  %8804 = vst.msk [vmem:[#allocation2 + $0x50] sm:$0xff] %vm171_vm1, %v8772_v50  ;;  %v11560_v26 = vpop.f32.mrb[12].mxu1 }
 0x45b   : > { %v8870_v25 = vadd.f32 %v8869_v27, %v8868_v24  ;;  %v8970_v61 = vadd.f32 %v8969_v31, %v8968_v14  ;;  %v8775_v2 = vadd.f32 %v11560_v26, %v8417_v9  ;;  %v8663_v48 = vpop.f32.mrb[13].mxu1  ;;  %v8973_v53 = vsel %vm171_vm1, %v8935_v8, 0.0  ;;  %v8423_v27 = vld [vmem:[#allocation2 + $0x98] sm:$0xff] }
 0x45c   : > { %v8971_v52 = vsel %vm171_vm1, %v8934_v16, 0.0  ;;  %v14881_v49 = vld [vmem:[#allocation2 + $0x48] sm:$0xff]  ;;  %v8774_v38 = vadd.f32 %v8663_v48, %v8416_v19 }
 0x45d   : > { %v8972_v42 = vadd.f32 %v8971_v52, %v8970_v61  ;;  %v14883_v6 = vld [vmem:[#allocation2 + $0x40] sm:$0xff]  ;;  %v8872_v23 = vadd.f32 %v8871_v55, %v8870_v25  ;;  %8807 = vst.msk [vmem:[#allocation2 + $0x68] sm:$0xff] %vm171_vm1, %v8775_v2  ;;  %v8937_v30 = vmul.f32 %v14881_v49, %v14881_v49  ;;  %v8875_v29 = vsel %vm171_vm1, %v14881_v49, 0.0  ;;  %v8422_v61 = vld [vmem:[#allocation2 + $0x90] sm:$0xff] }
 0x45e   : > { %v8873_v20 = vsel %vm171_vm1, %v14883_v6, 0.0  ;;  %v8936_v32 = vmul.f32 %v14883_v6, %v14883_v6  ;;  %8806 = vst.msk [vmem:[#allocation2 + $0x60] sm:$0xff] %vm171_vm1, %v8774_v38  ;;  %v11563_v58 = vpop.f32.mrb[14].mxu1 }
 0x45f   : > { %v8874_v11 = vadd.f32 %v8873_v20, %v8872_v23  ;;  %v8974_v36 = vadd.f32 %v8973_v53, %v8972_v42  ;;  %v8777_v13 = vadd.f32 %v11563_v58, %v8419_v12  ;;  %v8673_v57 = vpop.f32.mrb[15].mxu1  ;;  %v8977_v34 = vsel %vm171_vm1, %v8937_v30, 0.0  ;;  %v8425_v12 = vld [vmem:[#allocation2 + $0xa8] sm:$0xff] }
 0x460   : > { %v8975_v28 = vsel %vm171_vm1, %v8936_v32, 0.0  ;;  %v14897_v45 = vld [vmem:[#allocation2 + $0x58] sm:$0xff]  ;;  %v8776_v21 = vadd.f32 %v8673_v57, %v8418_v56  ;;  %v8424_v56 = vld [vmem:[#allocation2 + $0xa0] sm:$0xff] }
 0x461   : > { %v8976_v35 = vadd.f32 %v8975_v28, %v8974_v36  ;;  %v14899_v40 = vld [vmem:[#allocation2 + $0x50] sm:$0xff]  ;;  %v8876_v1 = vadd.f32 %v8875_v29, %v8874_v11  ;;  %8809 = vst.msk [vmem:[#allocation2 + $0x78] sm:$0xff] %vm171_vm1, %v8777_v13  ;;  %v8939_v7 = vmul.f32 %v14897_v45, %v14897_v45  ;;  %v8879_v54 = vsel %vm171_vm1, %v14897_v45, 0.0 }
 0x462   : > { %v8877_v47 = vsel %vm171_vm1, %v14899_v40, 0.0  ;;  %v8938_v39 = vmul.f32 %v14899_v40, %v14899_v40  ;;  %8808 = vst.msk [vmem:[#allocation2 + $0x70] sm:$0xff] %vm171_vm1, %v8776_v21  ;;  %v11566_v3 = vpop.f32.mrb[16].mxu1 }
 0x463   : > { %v8878_v4 = vadd.f32 %v8877_v47, %v8876_v1  ;;  %v8978_v15 = vadd.f32 %v8977_v34, %v8976_v35  ;;  %v8779_v59 = vadd.f32 %v11566_v3, %v8421_v18  ;;  %v8683_v63 = vpop.f32.mrb[17].mxu1  ;;  %v8981_v14 = vsel %vm171_vm1, %v8939_v7, 0.0 }
 0x464   : > { %v8979_v5 = vsel %vm171_vm1, %v8938_v39, 0.0  ;;  %v14913_v41 = vld [vmem:[#allocation2 + $0x68] sm:$0xff]  ;;  %v8778_v33 = vadd.f32 %v8683_v63, %v8420_v22 }
 0x465   : > { %v8980_v43 = vadd.f32 %v8979_v5, %v8978_v15  ;;  %v14915_v0 = vld [vmem:[#allocation2 + $0x60] sm:$0xff]  ;;  %v8880_v50 = vadd.f32 %v8879_v54, %v8878_v4  ;;  %8811 = vst.msk [vmem:[#allocation2 + $0x88] sm:$0xff] %vm171_vm1, %v8779_v59  ;;  %v8941_v24 = vmul.f32 %v14913_v41, %v14913_v41  ;;  %v8883_v19 = vsel %vm171_vm1, %v14913_v41, 0.0  ;;  %v8427_v4 = vld [vmem:[#allocation2 + $0xb8] sm:$0xff]  ;;  %v8426_v54 = vld [vmem:[#allocation2 + $0xb0] sm:$0xff] }
 0x466   : > { %v8881_v31 = vsel %vm171_vm1, %v14915_v0, 0.0  ;;  %v8940_v8 = vmul.f32 %v14915_v0, %v14915_v0  ;;  %8810 = vst.msk [vmem:[#allocation2 + $0x80] sm:$0xff] %vm171_vm1, %v8778_v33  ;;  %v11569_v16 = vpop.f32.mrb[18].mxu1 }
 0x467   : > { %v8882_v9 = vadd.f32 %v8881_v31, %v8880_v50  ;;  %v8982_v26 = vadd.f32 %v8981_v14, %v8980_v43  ;;  %v8781_v25 = vadd.f32 %v11569_v16, %v8423_v27  ;;  %v8693_v2 = vpop.f32.mrb[19].mxu1  ;;  %v8985_v53 = vsel %vm171_vm1, %v8941_v24, 0.0 }
 0x468   : > { %v8983_v48 = vsel %vm171_vm1, %v8940_v8, 0.0  ;;  %v14929_v55 = vld [vmem:[#allocation2 + $0x78] sm:$0xff]  ;;  %v8780_v52 = vadd.f32 %v8693_v2, %v8422_v61 }
 0x469   : > { %v8984_v38 = vadd.f32 %v8983_v48, %v8982_v26  ;;  %v14931_v42 = vld [vmem:[#allocation2 + $0x70] sm:$0xff]  ;;  %v8884_v23 = vadd.f32 %v8883_v19, %v8882_v9  ;;  %8813 = vst.msk [vmem:[#allocation2 + $0x98] sm:$0xff] %vm171_vm1, %v8781_v25  ;;  %v8943_v30 = vmul.f32 %v14929_v55, %v14929_v55  ;;  %v8887_v29 = vsel %vm171_vm1, %v14929_v55, 0.0  ;;  %v8429_v25 = vld [vmem:[#allocation2 + $0xc8] sm:$0xff] }
 0x46a   : > { %v8885_v20 = vsel %vm171_vm1, %v14931_v42, 0.0  ;;  %v8942_v32 = vmul.f32 %v14931_v42, %v14931_v42  ;;  %8812 = vst.msk [vmem:[#allocation2 + $0x90] sm:$0xff] %vm171_vm1, %v8780_v52  ;;  %v11572_v58 = vpop.f32.mrb[20].mxu1  ;;  %v8428_v52 = vld [vmem:[#allocation2 + $0xc0] sm:$0xff] }
 0x46b   : > { %v8886_v11 = vadd.f32 %v8885_v20, %v8884_v23  ;;  %v8986_v36 = vadd.f32 %v8985_v53, %v8984_v38  ;;  %v8783_v13 = vadd.f32 %v11572_v58, %v8425_v12  ;;  %v8703_v57 = vpop.f32.mrb[21].mxu1  ;;  %v8989_v47 = vsel %vm171_vm1, %v8943_v30, 0.0 }
 0x46c   : > { %v8987_v28 = vsel %vm171_vm1, %v8942_v32, 0.0  ;;  %v14945_v21 = vld [vmem:[#allocation2 + $0x88] sm:$0xff]  ;;  %v8782_v35 = vadd.f32 %v8703_v57, %v8424_v56  ;;  %v8431_v57 = vld [vmem:[#allocation2 + $0xd8] sm:$0xff] }
 0x46d   : > { %v8988_v1 = vadd.f32 %v8987_v28, %v8986_v36  ;;  %v14947_v34 = vld [vmem:[#allocation2 + $0x80] sm:$0xff]  ;;  %v8888_v7 = vadd.f32 %v8887_v29, %v8886_v11  ;;  %8815 = vst.msk [vmem:[#allocation2 + $0xa8] sm:$0xff] %vm171_vm1, %v8783_v13  ;;  %v8945_v39 = vmul.f32 %v14945_v21, %v14945_v21  ;;  %v8891_v33 = vsel %vm171_vm1, %v14945_v21, 0.0 }
 0x46e   : > { %v8889_v18 = vsel %vm171_vm1, %v14947_v34, 0.0  ;;  %v8944_v3 = vmul.f32 %v14947_v34, %v14947_v34  ;;  %8814 = vst.msk [vmem:[#allocation2 + $0xa0] sm:$0xff] %vm171_vm1, %v8782_v35  ;;  %v11575_v15 = vpop.f32.mrb[22].mxu1 }
 0x46f   : > { %v8890_v59 = vadd.f32 %v8889_v18, %v8888_v7  ;;  %v8990_v22 = vadd.f32 %v8989_v47, %v8988_v1  ;;  %v8785_v63 = vadd.f32 %v11575_v15, %v8427_v4  ;;  %v8713_v5 = vpop.f32.mrb[23].mxu1  ;;  %v8993_v27 = vsel %vm171_vm1, %v8945_v39, 0.0  ;;  %v8430_v7 = vld [vmem:[#allocation2 + $0xd0] sm:$0xff] }
 0x470   : > { %v8991_v43 = vsel %vm171_vm1, %v8944_v3, 0.0  ;;  %v14961_v50 = vld [vmem:[#allocation2 + $0x98] sm:$0xff]  ;;  %v8784_v14 = vadd.f32 %v8713_v5, %v8426_v54 }
 0x471   : > { %v8992_v24 = vadd.f32 %v8991_v43, %v8990_v22  ;;  %v14963_v31 = vld [vmem:[#allocation2 + $0x90] sm:$0xff]  ;;  %v8892_v8 = vadd.f32 %v8891_v33, %v8890_v59  ;;  %8817 = vst.msk [vmem:[#allocation2 + $0xb8] sm:$0xff] %vm171_vm1, %v8785_v63  ;;  %v8947_v16 = vmul.f32 %v14961_v50, %v14961_v50  ;;  %v8895_v23 = vsel %vm171_vm1, %v14961_v50, 0.0  ;;  %v8433_v43 = vld [vmem:[#allocation2 + $0xe8] sm:$0xff] }
 0x472   : > { %v8893_v9 = vsel %vm171_vm1, %v14963_v31, 0.0  ;;  %v8946_v26 = vmul.f32 %v14963_v31, %v14963_v31  ;;  %8816 = vst.msk [vmem:[#allocation2 + $0xb0] sm:$0xff] %vm171_vm1, %v8784_v14  ;;  %v11578_v61 = vpop.f32.mrb[24].mxu1 }
 0x473   : > { %v8894_v2 = vadd.f32 %v8893_v9, %v8892_v8  ;;  %v8994_v19 = vadd.f32 %v8993_v27, %v8992_v24  ;;  %v8787_v48 = vadd.f32 %v11578_v61, %v8429_v25  ;;  %v8723_v38 = vpop.f32.mrb[25].mxu1  ;;  %v8997_v11 = vsel %vm171_vm1, %v8947_v16, 0.0  ;;  %v8432_v16 = vld [vmem:[#allocation2 + $0xe0] sm:$0xff] }
 0x474   : > { %v8995_v53 = vsel %vm171_vm1, %v8946_v26, 0.0  ;;  %v14977_v30 = vld [vmem:[#allocation2 + $0xa8] sm:$0xff]  ;;  %v8786_v20 = vadd.f32 %v8723_v38, %v8428_v52 }
 0x475   : > { %v8996_v32 = vadd.f32 %v8995_v53, %v8994_v19  ;;  %v14979_v12 = vld [vmem:[#allocation2 + $0xa0] sm:$0xff]  ;;  %v8896_v58 = vadd.f32 %v8895_v23, %v8894_v2  ;;  %8819 = vst.msk [vmem:[#allocation2 + $0xc8] sm:$0xff] %vm171_vm1, %v8787_v48  ;;  %v8949_v36 = vmul.f32 %v14977_v30, %v14977_v30  ;;  %v8899_v39 = vsel %vm171_vm1, %v14977_v30, 0.0 }
 0x476   : > { %v8897_v13 = vsel %vm171_vm1, %v14979_v12, 0.0  ;;  %v8948_v56 = vmul.f32 %v14979_v12, %v14979_v12  ;;  %8818 = vst.msk [vmem:[#allocation2 + $0xc0] sm:$0xff] %vm171_vm1, %v8786_v20  ;;  %v11581_v29 = vpop.f32.mrb[26].mxu1 }
 0x477   : > { %v8898_v28 = vadd.f32 %v8897_v13, %v8896_v58  ;;  %v8998_v35 = vadd.f32 %v8997_v11, %v8996_v32  ;;  %v8789_v1 = vadd.f32 %v11581_v29, %v8431_v57  ;;  %v8733_v47 = vpop.f32.mrb[27].mxu1  ;;  %v9001_v63 = vsel %vm171_vm1, %v8949_v36, 0.0  ;;  %v8435_v32 = vld [vmem:[#allocation2 + $0xf8] sm:$0xff] }
 0x478   : > { %v8999_v18 = vsel %vm171_vm1, %v8948_v56, 0.0  ;;  %v14993_v3 = vld [vmem:[#allocation2 + $0xb8] sm:$0xff]  ;;  %v8788_v4 = vadd.f32 %v8733_v47, %v8430_v7  ;;  %v8434_v56 = vld [vmem:[#allocation2 + $0xf0] sm:$0xff] }
 0x479   : > { %v9000_v15 = vadd.f32 %v8999_v18, %v8998_v35  ;;  %v14995_v59 = vld [vmem:[#allocation2 + $0xb0] sm:$0xff]  ;;  %v8900_v22 = vadd.f32 %v8899_v39, %v8898_v28  ;;  %8821 = vst.msk [vmem:[#allocation2 + $0xd8] sm:$0xff] %vm171_vm1, %v8789_v1  ;;  %v8951_v54 = vmul.f32 %v14993_v3, %v14993_v3  ;;  %v8903_v26 = vsel %vm171_vm1, %v14993_v3, 0.0 }
 0x47a   : > { %v8901_v5 = vsel %vm171_vm1, %v14995_v59, 0.0  ;;  %v8950_v33 = vmul.f32 %v14995_v59, %v14995_v59  ;;  %8820 = vst.msk [vmem:[#allocation2 + $0xd0] sm:$0xff] %vm171_vm1, %v8788_v4  ;;  %v11584_v14 = vpop.f32.mrb[28].mxu1 }
 0x47b   : > { %v8902_v24 = vadd.f32 %v8901_v5, %v8900_v22  ;;  %v9002_v8 = vadd.f32 %v9001_v63, %v9000_v15  ;;  %v8791_v27 = vadd.f32 %v11584_v14, %v8433_v43  ;;  %v8743_v9 = vpop.f32.mrb[29].mxu1  ;;  %v9005_v38 = vsel %vm171_vm1, %v8951_v54, 0.0 }
 0x47c   : > { %v9003_v25 = vsel %vm171_vm1, %v8950_v33, 0.0  ;;  %v15009_v61 = vld [vmem:[#allocation2 + $0xc8] sm:$0xff]  ;;  %v8790_v2 = vadd.f32 %v8743_v9, %v8432_v16 }
 0x47d   : > { %v9004_v19 = vadd.f32 %v9003_v25, %v9002_v8  ;;  %v15011_v48 = vld [vmem:[#allocation2 + $0xc0] sm:$0xff]  ;;  %v8904_v52 = vadd.f32 %v8903_v26, %v8902_v24  ;;  %8823 = vst.msk [vmem:[#allocation2 + $0xe8] sm:$0xff] %vm171_vm1, %v8791_v27  ;;  %v8953_v23 = vmul.f32 %v15009_v61, %v15009_v61  ;;  %v8907_v29 = vsel %vm171_vm1, %v15009_v61, 0.0 }
 0x47e   : > { %v8905_v53 = vsel %vm171_vm1, %v15011_v48, 0.0  ;;  %v8952_v20 = vmul.f32 %v15011_v48, %v15011_v48  ;;  %8822 = vst.msk [vmem:[#allocation2 + $0xe0] sm:$0xff] %vm171_vm1, %v8790_v2  ;;  %v11587_v58 = vpop.f32.mrb[30].mxu1 }
 0x47f   : > { %v8906_v11 = vadd.f32 %v8905_v53, %v8904_v52  ;;  %v9006_v36 = vadd.f32 %v9005_v38, %v9004_v19  ;;  %v8793_v13 = vadd.f32 %v11587_v58, %v8435_v32  ;;  %v8753_v57 = vpop.f32.mrb[31].mxu1  ;;  %v9009_v18 = vsel %vm171_vm1, %v8953_v23, 0.0 }
 0x480   : > { %v9007_v28 = vsel %vm171_vm1, %v8952_v20, 0.0  ;;  %v15025_v35 = vld [vmem:[#allocation2 + $0xd8] sm:$0xff]  ;;  %v8792_v1 = vadd.f32 %v8753_v57, %v8434_v56 }
 0x481   : > { %v9008_v7 = vadd.f32 %v9007_v28, %v9006_v36  ;;  %v15027_v47 = vld [vmem:[#allocation2 + $0xd0] sm:$0xff]  ;;  %v8908_v39 = vadd.f32 %v8907_v29, %v8906_v11  ;;  %8825 = vst.msk [vmem:[#allocation2 + $0xf8] sm:$0xff] %vm171_vm1, %v8793_v13  ;;  %v8955_v4 = vmul.f32 %v15025_v35, %v15025_v35  ;;  %v8911_v5 = vsel %vm171_vm1, %v15025_v35, 0.0 }
 0x482   : > { %v8909_v15 = vsel %vm171_vm1, %v15027_v47, 0.0  ;;  %v8954_v22 = vmul.f32 %v15027_v47, %v15027_v47  ;;  %8824 = vst.msk [vmem:[#allocation2 + $0xf0] sm:$0xff] %vm171_vm1, %v8792_v1 }
 0x483   : > { %v8910_v63 = vadd.f32 %v8909_v15, %v8908_v39  ;;  %v9010_v54 = vadd.f32 %v9009_v18, %v9008_v7  ;;  %v9013_v27 = vsel %vm171_vm1, %v8955_v4, 0.0 }
 0x484   : > { %v9011_v33 = vsel %vm171_vm1, %v8954_v22, 0.0  ;;  %v15041_v43 = vld [vmem:[#allocation2 + $0xe8] sm:$0xff] }
 0x485   : > { %v9012_v14 = vadd.f32 %v9011_v33, %v9010_v54  ;;  %v15043_v24 = vld [vmem:[#allocation2 + $0xe0] sm:$0xff]  ;;  %v8912_v8 = vadd.f32 %v8911_v5, %v8910_v63  ;;  %v8957_v16 = vmul.f32 %v15041_v43, %v15041_v43  ;;  %v8915_v19 = vsel %vm171_vm1, %v15041_v43, 0.0 }
 0x486   : > { %v8913_v9 = vsel %vm171_vm1, %v15043_v24, 0.0  ;;  %v8956_v26 = vmul.f32 %v15043_v24, %v15043_v24 }
 0x487   : > { %v8914_v25 = vadd.f32 %v8913_v9, %v8912_v8  ;;  %v9014_v2 = vadd.f32 %v9013_v27, %v9012_v14  ;;  %v9017_v32 = vsel %vm171_vm1, %v8957_v16, 0.0 }
 0x488   : > { %v9015_v52 = vsel %vm171_vm1, %v8956_v26, 0.0  ;;  %v15055_v38 = vld [vmem:[#allocation2 + $0xf8] sm:$0xff] }
 0x489   : > { %v9016_v23 = vadd.f32 %v9015_v52, %v9014_v2  ;;  %v15057_v53 = vld [vmem:[#allocation2 + $0xf0] sm:$0xff]  ;;  %v8916_v20 = vadd.f32 %v8915_v19, %v8914_v25  ;;  %v8959_v58 = vmul.f32 %v15055_v38, %v15055_v38  ;;  %v8919_v57 = vsel %vm171_vm1, %v15055_v38, 0.0 }
 0x48a   : > { %v8917_v11 = vsel %vm171_vm1, %v15057_v53, 0.0  ;;  %v8958_v36 = vmul.f32 %v15057_v53, %v15057_v53 }
 0x48b   : > { %v8918_v13 = vadd.f32 %v8917_v11, %v8916_v20  ;;  %v9018_v56 = vadd.f32 %v9017_v32, %v9016_v23  ;;  %v9021_v7 = vsel %vm171_vm1, %v8959_v58, 0.0 }
 0x48c   : > { %v9019_v29 = vsel %vm171_vm1, %v8958_v36, 0.0 }
 0x48d   : > { %v8920_v28 = vadd.f32 %v8919_v57, %v8918_v13  ;;  %v9020_v1 = vadd.f32 %v9019_v29, %v9018_v56 }
 0x48f   : > { %v8921_v39 = vrot.slane %v8920_v28, 4  ;;  %v9022_v18 = vadd.f32 %v9021_v7, %v9020_v1 }
 0x491   : > { %v8922_v4 = vadd.f32 %v8921_v39, %v8920_v28  ;;  %v9023_v15 = vrot.slane %v9022_v18, 4 }
 0x493   : > { %v8923_v22 = vrot.slane %v8922_v4, 2  ;;  %v9024_v63 = vadd.f32 %v9023_v15, %v9022_v18  ;;  %v10059_v15 = vld [vmem:[%s11664_s25 + $0x19] sm:$0xff] }
 0x495   : > { %v8924_v54 = vadd.f32 %v8923_v22, %v8922_v4  ;;  %v9025_v5 = vrot.slane %v9024_v63, 2  ;;  %v10060_v22 = vld [vmem:[%s11664_s25 + $0x21] sm:$0xff] }
 0x497   : > { %v8925_v33 = vrot.slane %v8924_v54, 1  ;;  %v9026_v14 = vadd.f32 %v9025_v5, %v9024_v63  ;;  %v10061_v63 = vld [vmem:[%s11664_s25 + $0x31] sm:$0xff] }
 0x499   : > { %v8926_v8 = vadd.f32 %v8925_v33, %v8924_v54  ;;  %v9027_v27 = vrot.slane %v9026_v14, 1  ;;  %v10062_v54 = vld [vmem:[%s11664_s25 + $0x39] sm:$0xff] }
 0x49b   : > { %v15070_v16 = vmul.f32 0.00390625, %v8926_v8  ;;  %v9028_v9 = vadd.f32 %v9027_v27, %v9026_v14  ;;  %v10063_v27 = vld [vmem:[%s11664_s25 + $0x49] sm:$0xff] }
 0x49d   : > { %v9029_v26 = vmul.f32 0.00390625, %v9028_v9  ;;  %v9030_v25 = vmul.f32 %v15070_v16, %v15070_v16  ;;  %v9032_v52 = vsub.f32 %v14822_v62, %v15070_v16  ;;  %v9033_v23 = vsub.f32 %v14817_v44, %v15070_v16  ;;  %v10065_v9 = vld [vmem:[%s11664_s25 + $0x61] sm:$0xff] }
 0x49e   : > { %v9034_v20 = vsub.f32 %v14836_v10, %v15070_v16  ;;  %v9035_v32 = vsub.f32 %v14834_v37, %v15070_v16  ;;  %v9036_v58 = vsub.f32 %v14851_v51, %v15070_v16  ;;  %v9037_v11 = vsub.f32 %v14849_v46, %v15070_v16 }
 0x49f   : > { %v9031_v2 = vsub.f32 %v9029_v26, %v9030_v25  ;;  %v9038_v36 = vsub.f32 %v14867_v17, %v15070_v16  ;;  %v9039_v62 = vsub.f32 %v14865_v60, %v15070_v16  ;;  %v9040_v44 = vsub.f32 %v14883_v6, %v15070_v16  ;;  %v10066_v26 = vld [vmem:[%s11664_s25 + $0x69] sm:$0xff] }
 0x4a0   : > { %v9041_v10 = vsub.f32 %v14881_v49, %v15070_v16  ;;  %v9042_v37 = vsub.f32 %v14899_v40, %v15070_v16  ;;  %v9043_v51 = vsub.f32 %v14897_v45, %v15070_v16  ;;  %v9044_v46 = vsub.f32 %v14915_v0, %v15070_v16 }
 0x4a1   : > { %v9064_v19 = vadd.f32 1e-05, %v9031_v2  ;;  %v9045_v17 = vsub.f32 %v14913_v41, %v15070_v16  ;;  %v9046_v60 = vsub.f32 %v14931_v42, %v15070_v16  ;;  %v9047_v6 = vsub.f32 %v14929_v55, %v15070_v16 }
 0x4a2   : > { %v9048_v49 = vsub.f32 %v14947_v34, %v15070_v16  ;;  %v9049_v40 = vsub.f32 %v14945_v21, %v15070_v16  ;;  %v9050_v45 = vsub.f32 %v14963_v31, %v15070_v16  ;;  %v9051_v0 = vsub.f32 %v14961_v50, %v15070_v16 }
 0x4a3   : > { %11600 = vrsqrt.f32 %v9064_v19  ;;  %v9052_v41 = vsub.f32 %v14979_v12, %v15070_v16  ;;  %v9053_v42 = vsub.f32 %v14977_v30, %v15070_v16  ;;  %v9054_v55 = vsub.f32 %v14995_v59, %v15070_v16 }
 0x4a4   : > { %v9055_v34 = vsub.f32 %v14993_v3, %v15070_v16  ;;  %v9056_v21 = vsub.f32 %v15011_v48, %v15070_v16  ;;  %v9057_v31 = vsub.f32 %v15009_v61, %v15070_v16  ;;  %v9058_v50 = vsub.f32 %v15027_v47, %v15070_v16 }
 0x4a5   : > { %v9059_v12 = vsub.f32 %v15025_v35, %v15070_v16  ;;  %v9060_v30 = vsub.f32 %v15043_v24, %v15070_v16  ;;  %v9061_v59 = vsub.f32 %v15041_v43, %v15070_v16  ;;  %v9062_v3 = vsub.f32 %v15057_v53, %v15070_v16 }
 0x4a6   : > { %v9063_v48 = vsub.f32 %v15055_v38, %v15070_v16  ;;  %v10064_v16 = vld [vmem:[%s11664_s25 + $0x51] sm:$0xff] }
 0x4ad   : > { %v11601_v13 = vpop.eup %11600 }
 0x4ae   : > { %v9066_v61 = vmul.f32 %v11601_v13, %v9032_v52  ;;  %v9067_v56 = vmul.f32 %v11601_v13, %v9033_v23  ;;  %v9068_v47 = vmul.f32 %v11601_v13, %v9034_v20  ;;  %v9069_v35 = vmul.f32 %v11601_v13, %v9035_v32  ;;  %v10067_v23 = vld [vmem:[%s11664_s25 + $0x79] sm:$0xff]  ;;  %v10068_v20 = vld [vmem:[%s11664_s25 + $0x81] sm:$0xff]  ;;  %v10069_v32 = vld [vmem:[%s11664_s25 + $0x91] sm:$0xff] }
 0x4af   : > { %v9070_v57 = vmul.f32 %v11601_v13, %v9036_v58  ;;  %v9071_v24 = vmul.f32 %v11601_v13, %v9037_v11  ;;  %v9072_v29 = vmul.f32 %v11601_v13, %v9038_v36  ;;  %v9073_v28 = vmul.f32 %v11601_v13, %v9039_v62 }
 0x4b0   : > { %v9074_v43 = vmul.f32 %v11601_v13, %v9040_v44  ;;  %v9075_v1 = vmul.f32 %v11601_v13, %v9041_v10  ;;  %v9076_v53 = vmul.f32 %v11601_v13, %v9042_v37  ;;  %v9077_v7 = vmul.f32 %v11601_v13, %v9043_v51  ;;  %v10070_v44 = vld [vmem:[%s11664_s25 + $0x99] sm:$0xff]  ;;  %v10071_v10 = vld [vmem:[%s11664_s25 + $0xa9] sm:$0xff]  ;;  %v10072_v37 = vld [vmem:[%s11664_s25 + $0xb1] sm:$0xff] }
 0x4b1   : > { %v15138_v38 = vmul.f32 %v11601_v13, %v9044_v46  ;;  %v15140_v39 = vmul.f32 %v11601_v13, %v9045_v17  ;;  %v15142_v18 = vmul.f32 %v11601_v13, %v9046_v60  ;;  %v15144_v4 = vmul.f32 %v11601_v13, %v9047_v6  ;;  %v10073_v6 = vld [vmem:[%s11664_s25 + $0xc1] sm:$0xff] }
 0x4b2   : > { %v15151_v5 = vmul.f32 %v11601_v13, %v9048_v49  ;;  %v15153_v33 = vmul.f32 %v11601_v13, %v9049_v40  ;;  %v15155_v14 = vmul.f32 %v11601_v13, %v9050_v45  ;;  %v15157_v8 = vmul.f32 %v11601_v13, %v9051_v0  ;;  %v10074_v49 = vld [vmem:[%s11664_s25 + $0xc9] sm:$0xff]  ;;  %v10075_v40 = vld [vmem:[%s11664_s25 + $0xd9] sm:$0xff]  ;;  %v10076_v45 = vld [vmem:[%s11664_s25 + $0xe1] sm:$0xff] }
 0x4b3   : > { %v15163_v25 = vmul.f32 %v11601_v13, %v9052_v41  ;;  %v15165_v2 = vmul.f32 %v11601_v13, %v9053_v42  ;;  %v15167_v19 = vmul.f32 %v11601_v13, %v9054_v55  ;;  %v15169_v52 = vmul.f32 %v11601_v13, %v9055_v34  ;;  %v10077_v0 = vld [vmem:[%s11664_s25 + $0xf1] sm:$0xff]  ;;  %v10078_v41 = vld [vmem:[%s11664_s25 + $0xf9] sm:$0xff] }
 0x4b4   : > { %v15174_v58 = vmul.f32 %v11601_v13, %v9056_v21  ;;  %v15176_v11 = vmul.f32 %v11601_v13, %v9057_v31  ;;  %v15178_v36 = vmul.f32 %v11601_v13, %v9058_v50  ;;  %v15180_v62 = vmul.f32 %v11601_v13, %v9059_v12  ;;  %v10079_v31 = vld [vmem:[%s11664_s25 + $0x109] sm:$0xff]  ;;  %v10080_v50 = vld [vmem:[%s11664_s25 + $0x111] sm:$0xff]  ;;  %v10081_v12 = vld [vmem:[%s11664_s25 + $0x121] sm:$0xff] }
 0x4b5   : > { %v15190_v51 = vmul.f32 %v11601_v13, %v9060_v30  ;;  %v15192_v46 = vmul.f32 %v11601_v13, %v9061_v59  ;;  %v15194_v17 = vmul.f32 %v11601_v13, %v9062_v3  ;;  %v15196_v60 = vmul.f32 %v11601_v13, %v9063_v48  ;;  %v10082_v48 = vld [vmem:[%s11664_s25 + $0x129] sm:$0xff] }
 0x4b6   : > { %v9130_v42 = vadd.f32 %v10059_v15, %v9066_v61  ;;  %v9131_v55 = vadd.f32 %v10060_v22, %v9067_v56  ;;  %v9132_v34 = vadd.f32 %v10061_v63, %v9068_v47  ;;  %v9133_v21 = vadd.f32 %v10062_v54, %v9069_v35  ;;  %v10084_v61 = vld [vmem:[%s11664_s25 + $0x141] sm:$0xff] }
 0x4b7   : > { %15416 = vst [vmem:[#allocation10_spill] sm:$0xff] %v15196_v60  ;;  %v9134_v13 = vadd.f32 %v10063_v27, %v9070_v57  ;;  %v9135_v30 = vadd.f32 %v10064_v16, %v9071_v24  ;;  %v9136_v59 = vadd.f32 %v10065_v9, %v9072_v29  ;;  %v9137_v3 = vadd.f32 %v10066_v26, %v9073_v28  ;;  %v10083_v60 = vld [vmem:[%s11664_s25 + $0x139] sm:$0xff]  ;;  %v10085_v57 = vld [vmem:[%s11664_s25 + $0x151] sm:$0xff]  ;;  %v10087_v29 = vld [vmem:[%s11664_s25 + $0x169] sm:$0xff] }
 0x4b8   : > { %v9138_v56 = vadd.f32 %v10067_v23, %v9074_v43  ;;  %v9139_v47 = vadd.f32 %v10068_v20, %v9075_v1  ;;  %v9140_v35 = vadd.f32 %v10069_v32, %v9076_v53  ;;  %v9141_v15 = vadd.f32 %v10070_v44, %v9077_v7  ;;  %9162 = vst.msk [vmem:[%s15188_s7] sm:$0xff] %vm171_vm1, %v9130_v42  ;;  %v10086_v24 = vld [vmem:[%s11664_s25 + $0x159] sm:$0xff]  ;;  %v10088_v7 = vld [vmem:[%s11664_s25 + $0x171] sm:$0xff] }
 0x4b9   : > { %9163 = vst.msk [vmem:[%s15188_s7 + $0x8] sm:$0xff] %vm171_vm1, %v9131_v55  ;;  %9164 = vst.msk [vmem:[%s15188_s7 + $0x10] sm:$0xff] %vm171_vm1, %v9132_v34  ;;  %v9142_v28 = vadd.f32 %v10071_v10, %v15138_v38  ;;  %v9143_v43 = vadd.f32 %v10072_v37, %v15140_v39  ;;  %v9144_v1 = vadd.f32 %v10073_v6, %v15142_v18  ;;  %v10089_v38 = vld [vmem:[%s11664_s25 + $0x181] sm:$0xff]  ;;  %v10090_v39 = vld [vmem:[%s11664_s25 + $0x189] sm:$0xff] }
 0x4ba   : > { %9165 = vst.msk [vmem:[%s15188_s7 + $0x18] sm:$0xff] %vm171_vm1, %v9133_v21  ;;  %v9145_v53 = vadd.f32 %v10074_v49, %v15144_v4  ;;  %9166 = vst.msk [vmem:[%s15188_s7 + $0x20] sm:$0xff] %vm171_vm1, %v9134_v13  ;;  %v9146_v18 = vadd.f32 %v10075_v40, %v15151_v5  ;;  %v9147_v22 = vadd.f32 %v10076_v45, %v15153_v33 }
 0x4bb   : > { %9167 = vst.msk [vmem:[%s15188_s7 + $0x28] sm:$0xff] %vm171_vm1, %v9135_v30  ;;  %9168 = vst.msk [vmem:[%s15188_s7 + $0x30] sm:$0xff] %vm171_vm1, %v9136_v59  ;;  %v9148_v4 = vadd.f32 %v10077_v0, %v15155_v14  ;;  %v9149_v63 = vadd.f32 %v10078_v41, %v15157_v8  ;;  %v9150_v54 = vadd.f32 %v10079_v31, %v15163_v25 }
 0x4bc   : > { %9169 = vst.msk [vmem:[%s15188_s7 + $0x38] sm:$0xff] %vm171_vm1, %v9137_v3  ;;  %9170 = vst.msk [vmem:[%s15188_s7 + $0x40] sm:$0xff] %vm171_vm1, %v9138_v56  ;;  %v9151_v5 = vadd.f32 %v10080_v50, %v15165_v2  ;;  %v9152_v33 = vadd.f32 %v10081_v12, %v15167_v19  ;;  %v9153_v14 = vadd.f32 %v10082_v48, %v15169_v52 }
 0x4bd   : > { %9171 = vst.msk [vmem:[%s15188_s7 + $0x48] sm:$0xff] %vm171_vm1, %v9139_v47  ;;  %9172 = vst.msk [vmem:[%s15188_s7 + $0x50] sm:$0xff] %vm171_vm1, %v9140_v35  ;;  %v9154_v8 = vadd.f32 %v10083_v60, %v15174_v58  ;;  %v9155_v27 = vadd.f32 %v10084_v61, %v15176_v11  ;;  %v9156_v16 = vadd.f32 %v10085_v57, %v15178_v36 }
 0x4be   : > { %9173 = vst.msk [vmem:[%s15188_s7 + $0x58] sm:$0xff] %vm171_vm1, %v9141_v15  ;;  %9174 = vst.msk [vmem:[%s15188_s7 + $0x60] sm:$0xff] %vm171_vm1, %v9142_v28  ;;  %v9157_v9 = vadd.f32 %v10086_v24, %v15180_v62  ;;  %v9158_v26 = vadd.f32 %v10087_v29, %v15190_v51  ;;  %v9159_v25 = vadd.f32 %v10088_v7, %v15192_v46  ;;  %v15417_v19 = vld [vmem:[#allocation10_spill] sm:$0xff] }
 0x4bf   : > { %9175 = vst.msk [vmem:[%s15188_s7 + $0x68] sm:$0xff] %vm171_vm1, %v9143_v43  ;;  %9176 = vst.msk [vmem:[%s15188_s7 + $0x70] sm:$0xff] %vm171_vm1, %v9144_v1  ;;  %v9160_v2 = vadd.f32 %v10089_v38, %v15194_v17  ;;  %v9161_v52 = vadd.f32 %v10090_v39, %v15417_v19 }
 0x4c0   : > { %9177 = vst.msk [vmem:[%s15188_s7 + $0x78] sm:$0xff] %vm171_vm1, %v9145_v53  ;;  %9178 = vst.msk [vmem:[%s15188_s7 + $0x80] sm:$0xff] %vm171_vm1, %v9146_v18 }
 0x4c1   : > { %9179 = vst.msk [vmem:[%s15188_s7 + $0x88] sm:$0xff] %vm171_vm1, %v9147_v22  ;;  %9180 = vst.msk [vmem:[%s15188_s7 + $0x90] sm:$0xff] %vm171_vm1, %v9148_v4 }
 0x4c2   : > { %9181 = vst.msk [vmem:[%s15188_s7 + $0x98] sm:$0xff] %vm171_vm1, %v9149_v63  ;;  %9182 = vst.msk [vmem:[%s15188_s7 + $0xa0] sm:$0xff] %vm171_vm1, %v9150_v54 }
 0x4c3   : > { %9183 = vst.msk [vmem:[%s15188_s7 + $0xa8] sm:$0xff] %vm171_vm1, %v9151_v5  ;;  %9184 = vst.msk [vmem:[%s15188_s7 + $0xb0] sm:$0xff] %vm171_vm1, %v9152_v33 }
 0x4c4   : > { %9185 = vst.msk [vmem:[%s15188_s7 + $0xb8] sm:$0xff] %vm171_vm1, %v9153_v14  ;;  %9186 = vst.msk [vmem:[%s15188_s7 + $0xc0] sm:$0xff] %vm171_vm1, %v9154_v8 }
 0x4c5   : > { %9187 = vst.msk [vmem:[%s15188_s7 + $0xc8] sm:$0xff] %vm171_vm1, %v9155_v27  ;;  %9188 = vst.msk [vmem:[%s15188_s7 + $0xd0] sm:$0xff] %vm171_vm1, %v9156_v16 }
 0x4c6   : > { %9189 = vst.msk [vmem:[%s15188_s7 + $0xd8] sm:$0xff] %vm171_vm1, %v9157_v9  ;;  %9190 = vst.msk [vmem:[%s15188_s7 + $0xe0] sm:$0xff] %vm171_vm1, %v9158_v26 }
 0x4c7   : > { %9191 = vst.msk [vmem:[%s15188_s7 + $0xe8] sm:$0xff] %vm171_vm1, %v9159_v25  ;;  %9192 = vst.msk [vmem:[%s15188_s7 + $0xf0] sm:$0xff] %vm171_vm1, %v9160_v2 }
 0x4c8   : > { %9193 = vst.msk [vmem:[%s15188_s7 + $0xf8] sm:$0xff] %vm171_vm1, %v9161_v52 }
 0x4c9 PF: > { %s13_s12 = sadd.s32 1, %s11609_s12  }
 0x4ca   : > { %p10_p4 = scmp.ge.s32.totalorder %s13_s12, 4  }
 0x4cc   :  { %12 = sbr.rel (!%p10_p4) target bundleno = 1 (0x1), region = 83 }

</bundles_post_ra>
